<compile_context>
chip_gen: v7x
topology: tpu7x:2x2x1
jax: 0.10.0
libtpu: 0.0.40
codegen_flags: <defaults>
</compile_context>

<pallas_src>
import jax
import jax.numpy as jnp
from jax.experimental import pallas as pl
from jax.experimental.pallas import tpu as pltpu

D_MODEL = 512
N_HEAD = 8
HEAD_DIM = D_MODEL // N_HEAD
DIM_FF = 512
N_LAYERS = 3
N_CLASSES = 5
EPS = 1e-5
N_SLAB = 10          # rows in the per-layer small-operand slab


def _layer_norm(z, g, b):
    mu = jnp.mean(z, axis=-1, keepdims=True)
    var = jnp.mean((z - mu) ** 2, axis=-1, keepdims=True)
    return (z - mu) * jax.lax.rsqrt(var + EPS) * g + b


def _softmax_last_approx(z):
    zmax = jnp.max(z, axis=-1, keepdims=True)
    e = jnp.exp(z - zmax)
    return e * pl.reciprocal(jnp.sum(e, axis=-1, keepdims=True), approx=True)


# slab row layout (per layer):
#   0: bq (pre-scaled by 1/sqrt(hd))   1: bk      2: bv      3: b_out
#   4: b_ff1                           5: b_ff2
#   6: ln1_g   7: ln1_b   8: ln2_g   9: ln2_b
# const slab rows: 0: bn_scale   1: bn_shift   2: b_lin (padded to 512)
def salience_kernel(x_ref, m_ref, wqkv_ref, wo_ref, wff1_ref, wff2_ref,
                    slab_ref, cslab_ref, wlin_ref,
                    out_ref, h_ref, ctx_ref):
    layer = pl.program_id(1)
    Bb, T, D = x_ref.shape
    N = Bb * T

    @pl.when(layer == 0)
    def _():
        h_ref[...] = x_ref[...].astype(jnp.float32).reshape(N, D)

    h = h_ref[...]                                    # (N, D) f32 carried state
    hb = h.astype(jnp.bfloat16)

    # ---- fused, lane-dense QKV projection: one (N,512)@(512,1536) MXU pass ----
    qkv = jnp.dot(hb, wqkv_ref[...], preferred_element_type=jnp.float32)
    q = qkv[:, 0 * D:1 * D] + slab_ref[0:1, :]        # scale folded into Wq/bq
    k = qkv[:, 1 * D:2 * D] + slab_ref[1:2, :]
    v = qkv[:, 2 * D:3 * D] + slab_ref[2:3, :]

    # ---- per-head attention; ctx assembled full-width in a VMEM scratch ----
    for hh in range(N_HEAD):
        lo, hi = hh * HEAD_DIM, (hh + 1) * HEAD_DIM
        qh = q[:, lo:hi].reshape(Bb, T, HEAD_DIM).astype(jnp.bfloat16)
        kh = k[:, lo:hi].reshape(Bb, T, HEAD_DIM).astype(jnp.bfloat16)
        vh = v[:, lo:hi].reshape(Bb, T, HEAD_DIM).astype(jnp.bfloat16)
        s = jnp.einsum("btd,bsd->bts", qh, kh,
                       preferred_element_type=jnp.float32)
        p = _softmax_last_approx(s)
        ctxh = jnp.einsum("bts,bsd->btd", p.astype(jnp.bfloat16), vh,
                          preferred_element_type=jnp.float32)
        ctx_ref[:, lo:hi] = ctxh.reshape(N, HEAD_DIM)

    # ---- single full-width output projection: (N,512)@(512,512) ----
    attn = jnp.dot(ctx_ref[...].astype(jnp.bfloat16), wo_ref[...],
                   preferred_element_type=jnp.float32) + slab_ref[3:4, :]
    h = _layer_norm(h + attn, slab_ref[6:7, :], slab_ref[7:8, :])

    # ---- feed-forward (ReLU), post-norm ----
    ff = jnp.dot(h.astype(jnp.bfloat16), wff1_ref[...],
                 preferred_element_type=jnp.float32) + slab_ref[4:5, :]
    ff = jnp.maximum(ff, 0.0)
    ff = jnp.dot(ff.astype(jnp.bfloat16), wff2_ref[...],
                 preferred_element_type=jnp.float32) + slab_ref[5:6, :]
    h = _layer_norm(h + ff, slab_ref[8:9, :], slab_ref[9:10, :])
    h_ref[...] = h

    # ---- last layer only: folded BatchNorm, mask + mean pool, classifier ----
    @pl.when(layer == pl.num_programs(1) - 1)
    def _():
        hn = h * cslab_ref[0:1, :] + cslab_ref[1:2, :]          # BN pre-folded
        h3 = hn.reshape(Bb, T, D) * m_ref[...]                  # mask (Bb,T,1)
        pooled = jnp.sum(h3, axis=1) * (1.0 / float(T))         # (Bb, D)
        logits = (jnp.dot(pooled.astype(jnp.bfloat16), wlin_ref[...],
                          preferred_element_type=jnp.float32)
                  + cslab_ref[2:3, 0:N_CLASSES])
        # exact softmax on the tiny (Bb, 5) output so probabilities sum to 1
        zmax = jnp.max(logits, axis=-1, keepdims=True)
        e = jnp.exp(logits - zmax)
        out_ref[...] = e / jnp.sum(e, axis=-1, keepdims=True)


def salience_predictor(params, x_nct, m_n1t, *, batch_blocks=1,
                       vmem_limit_bytes=48 * 1024 * 1024):
    """x_nct: (B, 512, T) f32, m_n1t: (B, 1, T) f32 -> (B, 5) probabilities.

    batch_blocks=1 for v5e/v6e (single TC).  On v7x set batch_blocks=2 only
    when Bb*T is large enough to be MXU-bound (each batch block re-streams the
    layer weights).  On v5e/v6e you may raise vmem_limit_bytes (128 MiB VMEM)
    and grow Bb to amortize the weight stream further.
    """
    B, C, T = x_nct.shape
    assert C == D_MODEL and B % batch_blocks == 0 and T % 8 == 0
    Bb = B // batch_blocks
    L, D, F = N_LAYERS, D_MODEL, DIM_FF
    scale = 1.0 / float(HEAD_DIM) ** 0.5

    x = jnp.transpose(x_nct, (0, 2, 1)).astype(jnp.bfloat16)   # (B, T, D) bf16
    m = jnp.transpose(m_n1t, (0, 2, 1))                        # (B, T, 1) f32

    # ---------------- host-side weight prep (pure prep, zero kernel cost) ----
    col_scale = jnp.concatenate(
        [jnp.full((D,), scale, jnp.float32), jnp.ones((2 * D,), jnp.float32)])
    w_qkv = (params["w_qkv"] * col_scale).astype(jnp.bfloat16)   # (L, D, 3D)
    w_out = params["w_out"].astype(jnp.bfloat16)                 # (L, D, D)
    w_ff1 = params["w_ff1"].astype(jnp.bfloat16)                 # (L, D, F)
    w_ff2 = params["w_ff2"].astype(jnp.bfloat16)                 # (L, F, D)
    w_lin = params["w_lin"].astype(jnp.bfloat16)                 # (D, 5)

    b_qkv = params["b_qkv"][:, 0, :]                             # (L, 3D)
    slab = jnp.stack(
        [b_qkv[:, :D] * scale, b_qkv[:, D:2 * D], b_qkv[:, 2 * D:],
         params["b_out"][:, 0, :], params["b_ff1"][:, 0, :],
         params["b_ff2"][:, 0, :],
         params["ln1_g"][:, 0, :], params["ln1_b"][:, 0, :],
         params["ln2_g"][:, 0, :], params["ln2_b"][:, 0, :]],
        axis=1)                                                  # (L, 10, D) f32

    bn_scale = params["bn_g"] / jnp.sqrt(params["bn_var"] + EPS)        # (1, D)
    bn_shift = params["bn_b"] - params["bn_mean"] * bn_scale            # (1, D)
    b_lin_row = jnp.zeros((1, D), jnp.float32).at[:, :N_CLASSES].set(
        params["b_lin"])
    cslab = jnp.concatenate([bn_scale, bn_shift, b_lin_row], axis=0)    # (3, D)

    def layer_w(*tail):          # per-layer weight block, streamed over l
        return pl.BlockSpec((None, *tail),
                            lambda b, l: (l,) + (0,) * len(tail))

    in_specs = [
        pl.BlockSpec((Bb, T, D), lambda b, l: (b, 0, 0)),        # x (bf16)
        pl.BlockSpec((Bb, T, 1), lambda b, l: (b, 0, 0)),        # mask
        layer_w(D, 3 * D),                                       # fused W_qkv
        layer_w(D, D),                                           # W_out
        layer_w(D, F),                                           # W_ff1
        layer_w(F, D),                                           # W_ff2
        layer_w(N_SLAB, D),                                      # per-layer slab
        pl.BlockSpec((3, D), lambda b, l: (0, 0)),               # const slab
        pl.BlockSpec((D, N_CLASSES), lambda b, l: (0, 0)),       # W_lin
    ]

    return pl.pallas_call(
        salience_kernel,
        out_shape=jax.ShapeDtypeStruct((B, N_CLASSES), jnp.float32),
        grid=(batch_blocks, L),
        in_specs=in_specs,
        out_specs=pl.BlockSpec((Bb, N_CLASSES), lambda b, l: (b, 0)),
        scratch_shapes=[pltpu.VMEM((Bb * T, D), jnp.float32),    # carried h
                        pltpu.VMEM((Bb * T, D), jnp.float32)],   # ctx assembly
        compiler_params=pltpu.CompilerParams(
            dimension_semantics=("parallel", "arbitrary"),
            vmem_limit_bytes=vmem_limit_bytes),
    )(x, m, w_qkv, w_out, w_ff1, w_ff2, slab, cslab, w_lin)


def init_params(key):
    ks = jax.random.split(key, 14)

    def nrm(k, shape, scale=0.02):
        return jax.random.normal(k, shape, jnp.float32) * scale

    L, D, F = N_LAYERS, D_MODEL, DIM_FF
    return dict(
        w_qkv=nrm(ks[0], (L, D, 3 * D)),
        b_qkv=nrm(ks[1], (L, 1, 3 * D)),
        w_out=nrm(ks[2], (L, D, D)),
        b_out=nrm(ks[3], (L, 1, D)),
        w_ff1=nrm(ks[4], (L, D, F)),
        b_ff1=nrm(ks[5], (L, 1, F)),
        w_ff2=nrm(ks[6], (L, F, D)),
        b_ff2=nrm(ks[7], (L, 1, D)),
        ln1_g=jnp.ones((L, 1, D), jnp.float32),
        ln1_b=jnp.zeros((L, 1, D), jnp.float32),
        ln2_g=jnp.ones((L, 1, D), jnp.float32),
        ln2_b=jnp.zeros((L, 1, D), jnp.float32),
        bn_g=1.0 + nrm(ks[8], (1, D), 0.05),
        bn_b=nrm(ks[9], (1, D), 0.05),
        bn_mean=nrm(ks[10], (1, D), 0.1),
        bn_var=1.0 + jnp.abs(nrm(ks[11], (1, D), 0.1)),
        w_lin=nrm(ks[12], (D, N_CLASSES), 0.1),
        b_lin=nrm(ks[13], (1, N_CLASSES), 0.1),
    )


def reference_forward(params, x_nct, m_n1t):
    """Plain-JAX f32 (highest-precision) reference with eval-mode semantics."""
    HI = jax.lax.Precision.HIGHEST
    B, C, T = x_nct.shape
    D, H, hd = C, N_HEAD, HEAD_DIM
    h = jnp.transpose(x_nct, (0, 2, 1)).reshape(B * T, D)

    def ln(z, g, b):
        mu = jnp.mean(z, -1, keepdims=True)
        var = jnp.mean((z - mu) ** 2, -1, keepdims=True)
        return (z - mu) / jnp.sqrt(var + EPS) * g + b

    for l in range(N_LAYERS):
        qkv = jnp.dot(h, params["w_qkv"][l], precision=HI) + params["b_qkv"][l]
        q, k, v = jnp.split(qkv, 3, axis=-1)
        q = q.reshape(B, T, H, hd).transpose(0, 2, 1, 3)
        k = k.reshape(B, T, H, hd).transpose(0, 2, 1, 3)
        v = v.reshape(B, T, H, hd).transpose(0, 2, 1, 3)
        s = jnp.einsum("bhtd,bhsd->bhts", q, k, precision=HI) / jnp.sqrt(float(hd))
        p = jax.nn.softmax(s, axis=-1)
        ctx = jnp.einsum("bhts,bhsd->bhtd", p, v,
                         precision=HI).transpose(0, 2, 1, 3).reshape(B * T, D)
        h = ln(h + jnp.dot(ctx, params["w_out"][l], precision=HI) + params["b_out"][l],
               params["ln1_g"][l], params["ln1_b"][l])
        ff = jax.nn.relu(jnp.dot(h, params["w_ff1"][l], precision=HI)
                         + params["b_ff1"][l])
        ff = jnp.dot(ff, params["w_ff2"][l], precision=HI) + params["b_ff2"][l]
        h = ln(h + ff, params["ln2_g"][l], params["ln2_b"][l])

    h = (h - params["bn_mean"]) / jnp.sqrt(params["bn_var"] + EPS) \
        * params["bn_g"] + params["bn_b"]
    h3 = h.reshape(B, T, D) * jnp.transpose(m_n1t, (0, 2, 1))
    pooled = jnp.mean(h3, axis=1)
    logits = jnp.dot(pooled, params["w_lin"], precision=HI) + params["b_lin"]
    return jax.nn.softmax(logits, axis=-1)


if __name__ == "__main__":
    # TODO(synk): dropout (p=0.1) and training-mode BatchNorm batch statistics
    # are not implemented (kernel is inference/eval mode).
    # TODO(synk): no attention key-padding mask (matches the original module,
    # which does not pass src_key_padding_mask).
    # TODO(synk): for production-sized T, tile attention flash-style (online
    # softmax over key blocks) and tile the (B*T) rows over the grid.
    key = jax.random.PRNGKey(0)
    kp, kx, km = jax.random.split(key, 3)

    B, T = 2, 8
    params = init_params(kp)
    x = jax.random.normal(kx, (B, D_MODEL, T), jnp.float32)            # (N, C, T)
    m = (jax.random.uniform(km, (B, 1, T)) > 0.3).astype(jnp.float32)  # mask

    out = salience_predictor(params, x, m)
    out = jax.block_until_ready(out)

    ref = reference_forward(params, x, m)
    assert out.shape == (B, N_CLASSES)
    assert float(jnp.max(jnp.abs(out - ref))) < 1e-2

    print("KERNEL_OK")
</pallas_src>

<mosaic_0001>
module attributes {stable_mosaic.version = 11 : i64} {
  func.func @salience_kernel(%arg0: i32, %arg1: i32, %arg2: memref<2x8x512xbf16, #tpu.memory_space<vmem>>, %arg3: memref<2x8x1xf32, #tpu.memory_space<vmem>>, %arg4: memref<1x512x1536xbf16, #tpu.memory_space<vmem>>, %arg5: memref<1x512x512xbf16, #tpu.memory_space<vmem>>, %arg6: memref<1x512x512xbf16, #tpu.memory_space<vmem>>, %arg7: memref<1x512x512xbf16, #tpu.memory_space<vmem>>, %arg8: memref<1x10x512xf32, #tpu.memory_space<vmem>>, %arg9: memref<3x512xf32, #tpu.memory_space<vmem>>, %arg10: memref<512x5xbf16, #tpu.memory_space<vmem>>, %arg11: memref<2x5xf32, #tpu.memory_space<vmem>>, %arg12: memref<16x512xf32, #tpu.memory_space<vmem>>, %arg13: memref<16x512xf32, #tpu.memory_space<vmem>>) attributes {dimension_semantics = [#tpu.dimension_semantics<parallel>, #tpu.dimension_semantics<arbitrary>], iteration_bounds = array<i64: 1, 3>, scalar_prefetch = 0 : i64, scratch_operands = 2 : i64, tpu.core_type = #tpu.core_type<tc>, window_params = [{transform_indices = @transform_0, window_bounds = array<i64: 2, 8, 512>}, {transform_indices = @transform_1, window_bounds = array<i64: 2, 8, 1>}, {transform_indices = @transform_2, window_bounds = array<i64: 1, 512, 1536>}, {transform_indices = @transform_3, window_bounds = array<i64: 1, 512, 512>}, {transform_indices = @transform_4, window_bounds = array<i64: 1, 512, 512>}, {transform_indices = @transform_5, window_bounds = array<i64: 1, 512, 512>}, {transform_indices = @transform_6, window_bounds = array<i64: 1, 10, 512>}, {pipeline_mode = #tpu.pipeline_mode<synchronous>, transform_indices = @transform_7, window_bounds = array<i64: 3, 512>}, {pipeline_mode = #tpu.pipeline_mode<synchronous>, transform_indices = @transform_8, window_bounds = array<i64: 512, 5>}, {transform_indices = @transform_9, window_bounds = array<i64: 2, 5>}]} {
    %c0_i32 = arith.constant 0 : i32
    %0 = arith.cmpi eq, %arg1, %c0_i32 : i32
    %1 = arith.extui %0 : i1 to i32
    %c0_i32_0 = arith.constant 0 : i32
    %2 = arith.cmpi ne, %1, %c0_i32_0 : i32
    scf.if %2 {
      %c0_95 = arith.constant 0 : index
      %c0_96 = arith.constant 0 : index
      %c0_97 = arith.constant 0 : index
      %300 = vector.load %arg2[%c0_95, %c0_96, %c0_97] : memref<2x8x512xbf16, #tpu.memory_space<vmem>>, vector<2x8x512xbf16>
      %301 = arith.extf %300 : vector<2x8x512xbf16> to vector<2x8x512xf32>
      %302 = vector.shape_cast %301 : vector<2x8x512xf32> to vector<16x512xf32>
      %c0_98 = arith.constant 0 : index
      %c0_99 = arith.constant 0 : index
      %303 = vector.load %arg12[%c0_98, %c0_99] : memref<16x512xf32, #tpu.memory_space<vmem>>, vector<16x512xf32>
      tpu.vector_store %arg12[%c0_98, %c0_99], %302 {strides = array<i32>} : memref<16x512xf32, #tpu.memory_space<vmem>>, vector<16x512xf32>,
    } else {
    }
    %c0 = arith.constant 0 : index
    %c0_1 = arith.constant 0 : index
    %3 = vector.load %arg12[%c0, %c0_1] : memref<16x512xf32, #tpu.memory_space<vmem>>, vector<16x512xf32>
    %4 = arith.truncf %3 : vector<16x512xf32> to vector<16x512xbf16>
    %c0_2 = arith.constant 0 : index
    %c0_3 = arith.constant 0 : index
    %c0_4 = arith.constant 0 : index
    %5 = vector.load %arg4[%c0_2, %c0_3, %c0_4] : memref<1x512x1536xbf16, #tpu.memory_space<vmem>>, vector<1x512x1536xbf16>
    %6 = vector.shape_cast %5 : vector<1x512x1536xbf16> to vector<512x1536xbf16>
    %cst = arith.constant dense<0.000000e+00> : vector<16x1536xf32>
    %7 = tpu.matmul %4, %6, %cst {dimension_numbers = #tpu.dot_dimension_numbers<[1], [0], [0], [1], [0, 0, 1, 1], [], []>} : vector<16x512xbf16>, vector<512x1536xbf16>, vector<16x1536xf32> -> vector<16x1536xf32>
    %8 = vector.extract_strided_slice %7 {offsets = [0, 0], sizes = [16, 512], strides = [1, 1]} : vector<16x1536xf32> to vector<16x512xf32>
    %c0_5 = arith.constant 0 : index
    %c0_6 = arith.constant 0 : index
    %c0_7 = arith.constant 0 : index
    %9 = vector.load %arg8[%c0_5, %c0_6, %c0_7] : memref<1x10x512xf32, #tpu.memory_space<vmem>>, vector<1x1x512xf32>
    %10 = vector.shape_cast %9 : vector<1x1x512xf32> to vector<1x512xf32>
    %11 = vector.broadcast %10 : vector<1x512xf32> to vector<16x512xf32>
    %12 = arith.addf %8, %11 : vector<16x512xf32>
    %13 = vector.extract_strided_slice %7 {offsets = [0, 512], sizes = [16, 512], strides = [1, 1]} : vector<16x1536xf32> to vector<16x512xf32>
    %c0_8 = arith.constant 0 : index
    %c1 = arith.constant 1 : index
    %c0_9 = arith.constant 0 : index
    %14 = vector.load %arg8[%c0_8, %c1, %c0_9] : memref<1x10x512xf32, #tpu.memory_space<vmem>>, vector<1x1x512xf32>
    %15 = vector.shape_cast %14 : vector<1x1x512xf32> to vector<1x512xf32>
    %16 = vector.broadcast %15 : vector<1x512xf32> to vector<16x512xf32>
    %17 = arith.addf %13, %16 : vector<16x512xf32>
    %18 = vector.extract_strided_slice %7 {offsets = [0, 1024], sizes = [16, 512], strides = [1, 1]} : vector<16x1536xf32> to vector<16x512xf32>
    %c0_10 = arith.constant 0 : index
    %c2 = arith.constant 2 : index
    %c0_11 = arith.constant 0 : index
    %19 = vector.load %arg8[%c0_10, %c2, %c0_11] : memref<1x10x512xf32, #tpu.memory_space<vmem>>, vector<1x1x512xf32>
    %20 = vector.shape_cast %19 : vector<1x1x512xf32> to vector<1x512xf32>
    %21 = vector.broadcast %20 : vector<1x512xf32> to vector<16x512xf32>
    %22 = arith.addf %18, %21 : vector<16x512xf32>
    %23 = vector.extract_strided_slice %12 {offsets = [0, 0], sizes = [16, 64], strides = [1, 1]} : vector<16x512xf32> to vector<16x64xf32>
    %24 = vector.shape_cast %23 : vector<16x64xf32> to vector<2x8x64xf32>
    %25 = arith.truncf %24 : vector<2x8x64xf32> to vector<2x8x64xbf16>
    %26 = vector.extract_strided_slice %17 {offsets = [0, 0], sizes = [16, 64], strides = [1, 1]} : vector<16x512xf32> to vector<16x64xf32>
    %27 = vector.shape_cast %26 : vector<16x64xf32> to vector<2x8x64xf32>
    %28 = arith.truncf %27 : vector<2x8x64xf32> to vector<2x8x64xbf16>
    %29 = vector.extract_strided_slice %22 {offsets = [0, 0], sizes = [16, 64], strides = [1, 1]} : vector<16x512xf32> to vector<16x64xf32>
    %30 = vector.shape_cast %29 : vector<16x64xf32> to vector<2x8x64xf32>
    %31 = arith.truncf %30 : vector<2x8x64xf32> to vector<2x8x64xbf16>
    "tpu.trace_start"() <{level = 10 : i32, message = "btd,bsd->bts"}> : () -> ()
    %cst_12 = arith.constant dense<0.000000e+00> : vector<2x8x8xf32>
    %32 = tpu.matmul %25, %28, %cst_12 {dimension_numbers = #tpu.dot_dimension_numbers<[2], [2], [1], [1], [0, 0, 0, 1, 1, 1], [0], [0]>} : vector<2x8x64xbf16>, vector<2x8x64xbf16>, vector<2x8x8xf32> -> vector<2x8x8xf32>
    "tpu.trace_stop"() : () -> ()
    %cst_13 = arith.constant dense<0xFF800000> : vector<2x8xf32>
    %33 = vector.multi_reduction <maximumf>, %32, %cst_13 [2] : vector<2x8x8xf32> to vector<2x8xf32>
    %34 = vector.shape_cast %33 : vector<2x8xf32> to vector<2x8x1xf32>
    %35 = vector.broadcast %34 : vector<2x8x1xf32> to vector<2x8x8xf32>
    %36 = arith.subf %32, %35 : vector<2x8x8xf32>
    %37 = math.exp %36 : vector<2x8x8xf32>
    %cst_14 = arith.constant dense<0.000000e+00> : vector<2x8xf32>
    %38 = vector.multi_reduction <add>, %37, %cst_14 [2] : vector<2x8x8xf32> to vector<2x8xf32>
    %39 = vector.shape_cast %38 : vector<2x8xf32> to vector<2x8x1xf32>
    %40 = tpu.reciprocal %39 {approx = true} : vector<2x8x1xf32> -> vector<2x8x1xf32>
    %41 = vector.broadcast %40 : vector<2x8x1xf32> to vector<2x8x8xf32>
    %42 = arith.mulf %37, %41 : vector<2x8x8xf32>
    %43 = arith.truncf %42 : vector<2x8x8xf32> to vector<2x8x8xbf16>
    "tpu.trace_start"() <{level = 10 : i32, message = "bts,bsd->btd"}> : () -> ()
    %cst_15 = arith.constant dense<0.000000e+00> : vector<2x8x64xf32>
    %44 = tpu.matmul %43, %31, %cst_15 {dimension_numbers = #tpu.dot_dimension_numbers<[2], [1], [1], [2], [0, 0, 0, 1, 1, 2], [0], [0]>} : vector<2x8x8xbf16>, vector<2x8x64xbf16>, vector<2x8x64xf32> -> vector<2x8x64xf32>
    "tpu.trace_stop"() : () -> ()
    %45 = vector.shape_cast %44 : vector<2x8x64xf32> to vector<16x64xf32>
    %c0_16 = arith.constant 0 : index
    %c0_17 = arith.constant 0 : index
    %46 = vector.load %arg13[%c0_16, %c0_17] : memref<16x512xf32, #tpu.memory_space<vmem>>, vector<16x64xf32>
    tpu.vector_store %arg13[%c0_16, %c0_17], %45 {strides = array<i32>} : memref<16x512xf32, #tpu.memory_space<vmem>>, vector<16x64xf32>,
    %47 = vector.extract_strided_slice %12 {offsets = [0, 64], sizes = [16, 64], strides = [1, 1]} : vector<16x512xf32> to vector<16x64xf32>
    %48 = vector.shape_cast %47 : vector<16x64xf32> to vector<2x8x64xf32>
    %49 = arith.truncf %48 : vector<2x8x64xf32> to vector<2x8x64xbf16>
    %50 = vector.extract_strided_slice %17 {offsets = [0, 64], sizes = [16, 64], strides = [1, 1]} : vector<16x512xf32> to vector<16x64xf32>
    %51 = vector.shape_cast %50 : vector<16x64xf32> to vector<2x8x64xf32>
    %52 = arith.truncf %51 : vector<2x8x64xf32> to vector<2x8x64xbf16>
    %53 = vector.extract_strided_slice %22 {offsets = [0, 64], sizes = [16, 64], strides = [1, 1]} : vector<16x512xf32> to vector<16x64xf32>
    %54 = vector.shape_cast %53 : vector<16x64xf32> to vector<2x8x64xf32>
    %55 = arith.truncf %54 : vector<2x8x64xf32> to vector<2x8x64xbf16>
    "tpu.trace_start"() <{level = 10 : i32, message = "btd,bsd->bts"}> : () -> ()
    %cst_18 = arith.constant dense<0.000000e+00> : vector<2x8x8xf32>
    %56 = tpu.matmul %49, %52, %cst_18 {dimension_numbers = #tpu.dot_dimension_numbers<[2], [2], [1], [1], [0, 0, 0, 1, 1, 1], [0], [0]>} : vector<2x8x64xbf16>, vector<2x8x64xbf16>, vector<2x8x8xf32> -> vector<2x8x8xf32>
    "tpu.trace_stop"() : () -> ()
    %cst_19 = arith.constant dense<0xFF800000> : vector<2x8xf32>
    %57 = vector.multi_reduction <maximumf>, %56, %cst_19 [2] : vector<2x8x8xf32> to vector<2x8xf32>
    %58 = vector.shape_cast %57 : vector<2x8xf32> to vector<2x8x1xf32>
    %59 = vector.broadcast %58 : vector<2x8x1xf32> to vector<2x8x8xf32>
    %60 = arith.subf %56, %59 : vector<2x8x8xf32>
    %61 = math.exp %60 : vector<2x8x8xf32>
    %cst_20 = arith.constant dense<0.000000e+00> : vector<2x8xf32>
    %62 = vector.multi_reduction <add>, %61, %cst_20 [2] : vector<2x8x8xf32> to vector<2x8xf32>
    %63 = vector.shape_cast %62 : vector<2x8xf32> to vector<2x8x1xf32>
    %64 = tpu.reciprocal %63 {approx = true} : vector<2x8x1xf32> -> vector<2x8x1xf32>
    %65 = vector.broadcast %64 : vector<2x8x1xf32> to vector<2x8x8xf32>
    %66 = arith.mulf %61, %65 : vector<2x8x8xf32>
    %67 = arith.truncf %66 : vector<2x8x8xf32> to vector<2x8x8xbf16>
    "tpu.trace_start"() <{level = 10 : i32, message = "bts,bsd->btd"}> : () -> ()
    %cst_21 = arith.constant dense<0.000000e+00> : vector<2x8x64xf32>
    %68 = tpu.matmul %67, %55, %cst_21 {dimension_numbers = #tpu.dot_dimension_numbers<[2], [1], [1], [2], [0, 0, 0, 1, 1, 2], [0], [0]>} : vector<2x8x8xbf16>, vector<2x8x64xbf16>, vector<2x8x64xf32> -> vector<2x8x64xf32>
    "tpu.trace_stop"() : () -> ()
    %69 = vector.shape_cast %68 : vector<2x8x64xf32> to vector<16x64xf32>
    %c0_22 = arith.constant 0 : index
    %c64 = arith.constant 64 : index
    %70 = vector.load %arg13[%c0_22, %c64] : memref<16x512xf32, #tpu.memory_space<vmem>>, vector<16x64xf32>
    tpu.vector_store %arg13[%c0_22, %c64], %69 {strides = array<i32>} : memref<16x512xf32, #tpu.memory_space<vmem>>, vector<16x64xf32>,
    %71 = vector.extract_strided_slice %12 {offsets = [0, 128], sizes = [16, 64], strides = [1, 1]} : vector<16x512xf32> to vector<16x64xf32>
    %72 = vector.shape_cast %71 : vector<16x64xf32> to vector<2x8x64xf32>
    %73 = arith.truncf %72 : vector<2x8x64xf32> to vector<2x8x64xbf16>
    %74 = vector.extract_strided_slice %17 {offsets = [0, 128], sizes = [16, 64], strides = [1, 1]} : vector<16x512xf32> to vector<16x64xf32>
    %75 = vector.shape_cast %74 : vector<16x64xf32> to vector<2x8x64xf32>
    %76 = arith.truncf %75 : vector<2x8x64xf32> to vector<2x8x64xbf16>
    %77 = vector.extract_strided_slice %22 {offsets = [0, 128], sizes = [16, 64], strides = [1, 1]} : vector<16x512xf32> to vector<16x64xf32>
    %78 = vector.shape_cast %77 : vector<16x64xf32> to vector<2x8x64xf32>
    %79 = arith.truncf %78 : vector<2x8x64xf32> to vector<2x8x64xbf16>
    "tpu.trace_start"() <{level = 10 : i32, message = "btd,bsd->bts"}> : () -> ()
    %cst_23 = arith.constant dense<0.000000e+00> : vector<2x8x8xf32>
    %80 = tpu.matmul %73, %76, %cst_23 {dimension_numbers = #tpu.dot_dimension_numbers<[2], [2], [1], [1], [0, 0, 0, 1, 1, 1], [0], [0]>} : vector<2x8x64xbf16>, vector<2x8x64xbf16>, vector<2x8x8xf32> -> vector<2x8x8xf32>
    "tpu.trace_stop"() : () -> ()
    %cst_24 = arith.constant dense<0xFF800000> : vector<2x8xf32>
    %81 = vector.multi_reduction <maximumf>, %80, %cst_24 [2] : vector<2x8x8xf32> to vector<2x8xf32>
    %82 = vector.shape_cast %81 : vector<2x8xf32> to vector<2x8x1xf32>
    %83 = vector.broadcast %82 : vector<2x8x1xf32> to vector<2x8x8xf32>
    %84 = arith.subf %80, %83 : vector<2x8x8xf32>
    %85 = math.exp %84 : vector<2x8x8xf32>
    %cst_25 = arith.constant dense<0.000000e+00> : vector<2x8xf32>
    %86 = vector.multi_reduction <add>, %85, %cst_25 [2] : vector<2x8x8xf32> to vector<2x8xf32>
    %87 = vector.shape_cast %86 : vector<2x8xf32> to vector<2x8x1xf32>
    %88 = tpu.reciprocal %87 {approx = true} : vector<2x8x1xf32> -> vector<2x8x1xf32>
    %89 = vector.broadcast %88 : vector<2x8x1xf32> to vector<2x8x8xf32>
    %90 = arith.mulf %85, %89 : vector<2x8x8xf32>
    %91 = arith.truncf %90 : vector<2x8x8xf32> to vector<2x8x8xbf16>
    "tpu.trace_start"() <{level = 10 : i32, message = "bts,bsd->btd"}> : () -> ()
    %cst_26 = arith.constant dense<0.000000e+00> : vector<2x8x64xf32>
    %92 = tpu.matmul %91, %79, %cst_26 {dimension_numbers = #tpu.dot_dimension_numbers<[2], [1], [1], [2], [0, 0, 0, 1, 1, 2], [0], [0]>} : vector<2x8x8xbf16>, vector<2x8x64xbf16>, vector<2x8x64xf32> -> vector<2x8x64xf32>
    "tpu.trace_stop"() : () -> ()
    %93 = vector.shape_cast %92 : vector<2x8x64xf32> to vector<16x64xf32>
    %c0_27 = arith.constant 0 : index
    %c128 = arith.constant 128 : index
    %94 = vector.load %arg13[%c0_27, %c128] : memref<16x512xf32, #tpu.memory_space<vmem>>, vector<16x64xf32>
    tpu.vector_store %arg13[%c0_27, %c128], %93 {strides = array<i32>} : memref<16x512xf32, #tpu.memory_space<vmem>>, vector<16x64xf32>,
    %95 = vector.extract_strided_slice %12 {offsets = [0, 192], sizes = [16, 64], strides = [1, 1]} : vector<16x512xf32> to vector<16x64xf32>
    %96 = vector.shape_cast %95 : vector<16x64xf32> to vector<2x8x64xf32>
    %97 = arith.truncf %96 : vector<2x8x64xf32> to vector<2x8x64xbf16>
    %98 = vector.extract_strided_slice %17 {offsets = [0, 192], sizes = [16, 64], strides = [1, 1]} : vector<16x512xf32> to vector<16x64xf32>
    %99 = vector.shape_cast %98 : vector<16x64xf32> to vector<2x8x64xf32>
    %100 = arith.truncf %99 : vector<2x8x64xf32> to vector<2x8x64xbf16>
    %101 = vector.extract_strided_slice %22 {offsets = [0, 192], sizes = [16, 64], strides = [1, 1]} : vector<16x512xf32> to vector<16x64xf32>
    %102 = vector.shape_cast %101 : vector<16x64xf32> to vector<2x8x64xf32>
    %103 = arith.truncf %102 : vector<2x8x64xf32> to vector<2x8x64xbf16>
    "tpu.trace_start"() <{level = 10 : i32, message = "btd,bsd->bts"}> : () -> ()
    %cst_28 = arith.constant dense<0.000000e+00> : vector<2x8x8xf32>
    %104 = tpu.matmul %97, %100, %cst_28 {dimension_numbers = #tpu.dot_dimension_numbers<[2], [2], [1], [1], [0, 0, 0, 1, 1, 1], [0], [0]>} : vector<2x8x64xbf16>, vector<2x8x64xbf16>, vector<2x8x8xf32> -> vector<2x8x8xf32>
    "tpu.trace_stop"() : () -> ()
    %cst_29 = arith.constant dense<0xFF800000> : vector<2x8xf32>
    %105 = vector.multi_reduction <maximumf>, %104, %cst_29 [2] : vector<2x8x8xf32> to vector<2x8xf32>
    %106 = vector.shape_cast %105 : vector<2x8xf32> to vector<2x8x1xf32>
    %107 = vector.broadcast %106 : vector<2x8x1xf32> to vector<2x8x8xf32>
    %108 = arith.subf %104, %107 : vector<2x8x8xf32>
    %109 = math.exp %108 : vector<2x8x8xf32>
    %cst_30 = arith.constant dense<0.000000e+00> : vector<2x8xf32>
    %110 = vector.multi_reduction <add>, %109, %cst_30 [2] : vector<2x8x8xf32> to vector<2x8xf32>
    %111 = vector.shape_cast %110 : vector<2x8xf32> to vector<2x8x1xf32>
    %112 = tpu.reciprocal %111 {approx = true} : vector<2x8x1xf32> -> vector<2x8x1xf32>
    %113 = vector.broadcast %112 : vector<2x8x1xf32> to vector<2x8x8xf32>
    %114 = arith.mulf %109, %113 : vector<2x8x8xf32>
    %115 = arith.truncf %114 : vector<2x8x8xf32> to vector<2x8x8xbf16>
    "tpu.trace_start"() <{level = 10 : i32, message = "bts,bsd->btd"}> : () -> ()
    %cst_31 = arith.constant dense<0.000000e+00> : vector<2x8x64xf32>
    %116 = tpu.matmul %115, %103, %cst_31 {dimension_numbers = #tpu.dot_dimension_numbers<[2], [1], [1], [2], [0, 0, 0, 1, 1, 2], [0], [0]>} : vector<2x8x8xbf16>, vector<2x8x64xbf16>, vector<2x8x64xf32> -> vector<2x8x64xf32>
    "tpu.trace_stop"() : () -> ()
    %117 = vector.shape_cast %116 : vector<2x8x64xf32> to vector<16x64xf32>
    %c0_32 = arith.constant 0 : index
    %c192 = arith.constant 192 : index
    %118 = vector.load %arg13[%c0_32, %c192] : memref<16x512xf32, #tpu.memory_space<vmem>>, vector<16x64xf32>
    tpu.vector_store %arg13[%c0_32, %c192], %117 {strides = array<i32>} : memref<16x512xf32, #tpu.memory_space<vmem>>, vector<16x64xf32>,
    %119 = vector.extract_strided_slice %12 {offsets = [0, 256], sizes = [16, 64], strides = [1, 1]} : vector<16x512xf32> to vector<16x64xf32>
    %120 = vector.shape_cast %119 : vector<16x64xf32> to vector<2x8x64xf32>
    %121 = arith.truncf %120 : vector<2x8x64xf32> to vector<2x8x64xbf16>
    %122 = vector.extract_strided_slice %17 {offsets = [0, 256], sizes = [16, 64], strides = [1, 1]} : vector<16x512xf32> to vector<16x64xf32>
    %123 = vector.shape_cast %122 : vector<16x64xf32> to vector<2x8x64xf32>
    %124 = arith.truncf %123 : vector<2x8x64xf32> to vector<2x8x64xbf16>
    %125 = vector.extract_strided_slice %22 {offsets = [0, 256], sizes = [16, 64], strides = [1, 1]} : vector<16x512xf32> to vector<16x64xf32>
    %126 = vector.shape_cast %125 : vector<16x64xf32> to vector<2x8x64xf32>
    %127 = arith.truncf %126 : vector<2x8x64xf32> to vector<2x8x64xbf16>
    "tpu.trace_start"() <{level = 10 : i32, message = "btd,bsd->bts"}> : () -> ()
    %cst_33 = arith.constant dense<0.000000e+00> : vector<2x8x8xf32>
    %128 = tpu.matmul %121, %124, %cst_33 {dimension_numbers = #tpu.dot_dimension_numbers<[2], [2], [1], [1], [0, 0, 0, 1, 1, 1], [0], [0]>} : vector<2x8x64xbf16>, vector<2x8x64xbf16>, vector<2x8x8xf32> -> vector<2x8x8xf32>
    "tpu.trace_stop"() : () -> ()
    %cst_34 = arith.constant dense<0xFF800000> : vector<2x8xf32>
    %129 = vector.multi_reduction <maximumf>, %128, %cst_34 [2] : vector<2x8x8xf32> to vector<2x8xf32>
    %130 = vector.shape_cast %129 : vector<2x8xf32> to vector<2x8x1xf32>
    %131 = vector.broadcast %130 : vector<2x8x1xf32> to vector<2x8x8xf32>
    %132 = arith.subf %128, %131 : vector<2x8x8xf32>
    %133 = math.exp %132 : vector<2x8x8xf32>
    %cst_35 = arith.constant dense<0.000000e+00> : vector<2x8xf32>
    %134 = vector.multi_reduction <add>, %133, %cst_35 [2] : vector<2x8x8xf32> to vector<2x8xf32>
    %135 = vector.shape_cast %134 : vector<2x8xf32> to vector<2x8x1xf32>
    %136 = tpu.reciprocal %135 {approx = true} : vector<2x8x1xf32> -> vector<2x8x1xf32>
    %137 = vector.broadcast %136 : vector<2x8x1xf32> to vector<2x8x8xf32>
    %138 = arith.mulf %133, %137 : vector<2x8x8xf32>
    %139 = arith.truncf %138 : vector<2x8x8xf32> to vector<2x8x8xbf16>
    "tpu.trace_start"() <{level = 10 : i32, message = "bts,bsd->btd"}> : () -> ()
    %cst_36 = arith.constant dense<0.000000e+00> : vector<2x8x64xf32>
    %140 = tpu.matmul %139, %127, %cst_36 {dimension_numbers = #tpu.dot_dimension_numbers<[2], [1], [1], [2], [0, 0, 0, 1, 1, 2], [0], [0]>} : vector<2x8x8xbf16>, vector<2x8x64xbf16>, vector<2x8x64xf32> -> vector<2x8x64xf32>
    "tpu.trace_stop"() : () -> ()
    %141 = vector.shape_cast %140 : vector<2x8x64xf32> to vector<16x64xf32>
    %c0_37 = arith.constant 0 : index
    %c256 = arith.constant 256 : index
    %142 = vector.load %arg13[%c0_37, %c256] : memref<16x512xf32, #tpu.memory_space<vmem>>, vector<16x64xf32>
    tpu.vector_store %arg13[%c0_37, %c256], %141 {strides = array<i32>} : memref<16x512xf32, #tpu.memory_space<vmem>>, vector<16x64xf32>,
    %143 = vector.extract_strided_slice %12 {offsets = [0, 320], sizes = [16, 64], strides = [1, 1]} : vector<16x512xf32> to vector<16x64xf32>
    %144 = vector.shape_cast %143 : vector<16x64xf32> to vector<2x8x64xf32>
    %145 = arith.truncf %144 : vector<2x8x64xf32> to vector<2x8x64xbf16>
    %146 = vector.extract_strided_slice %17 {offsets = [0, 320], sizes = [16, 64], strides = [1, 1]} : vector<16x512xf32> to vector<16x64xf32>
    %147 = vector.shape_cast %146 : vector<16x64xf32> to vector<2x8x64xf32>
    %148 = arith.truncf %147 : vector<2x8x64xf32> to vector<2x8x64xbf16>
    %149 = vector.extract_strided_slice %22 {offsets = [0, 320], sizes = [16, 64], strides = [1, 1]} : vector<16x512xf32> to vector<16x64xf32>
    %150 = vector.shape_cast %149 : vector<16x64xf32> to vector<2x8x64xf32>
    %151 = arith.truncf %150 : vector<2x8x64xf32> to vector<2x8x64xbf16>
    "tpu.trace_start"() <{level = 10 : i32, message = "btd,bsd->bts"}> : () -> ()
    %cst_38 = arith.constant dense<0.000000e+00> : vector<2x8x8xf32>
    %152 = tpu.matmul %145, %148, %cst_38 {dimension_numbers = #tpu.dot_dimension_numbers<[2], [2], [1], [1], [0, 0, 0, 1, 1, 1], [0], [0]>} : vector<2x8x64xbf16>, vector<2x8x64xbf16>, vector<2x8x8xf32> -> vector<2x8x8xf32>
    "tpu.trace_stop"() : () -> ()
    %cst_39 = arith.constant dense<0xFF800000> : vector<2x8xf32>
    %153 = vector.multi_reduction <maximumf>, %152, %cst_39 [2] : vector<2x8x8xf32> to vector<2x8xf32>
    %154 = vector.shape_cast %153 : vector<2x8xf32> to vector<2x8x1xf32>
    %155 = vector.broadcast %154 : vector<2x8x1xf32> to vector<2x8x8xf32>
    %156 = arith.subf %152, %155 : vector<2x8x8xf32>
    %157 = math.exp %156 : vector<2x8x8xf32>
    %cst_40 = arith.constant dense<0.000000e+00> : vector<2x8xf32>
    %158 = vector.multi_reduction <add>, %157, %cst_40 [2] : vector<2x8x8xf32> to vector<2x8xf32>
    %159 = vector.shape_cast %158 : vector<2x8xf32> to vector<2x8x1xf32>
    %160 = tpu.reciprocal %159 {approx = true} : vector<2x8x1xf32> -> vector<2x8x1xf32>
    %161 = vector.broadcast %160 : vector<2x8x1xf32> to vector<2x8x8xf32>
    %162 = arith.mulf %157, %161 : vector<2x8x8xf32>
    %163 = arith.truncf %162 : vector<2x8x8xf32> to vector<2x8x8xbf16>
    "tpu.trace_start"() <{level = 10 : i32, message = "bts,bsd->btd"}> : () -> ()
    %cst_41 = arith.constant dense<0.000000e+00> : vector<2x8x64xf32>
    %164 = tpu.matmul %163, %151, %cst_41 {dimension_numbers = #tpu.dot_dimension_numbers<[2], [1], [1], [2], [0, 0, 0, 1, 1, 2], [0], [0]>} : vector<2x8x8xbf16>, vector<2x8x64xbf16>, vector<2x8x64xf32> -> vector<2x8x64xf32>
    "tpu.trace_stop"() : () -> ()
    %165 = vector.shape_cast %164 : vector<2x8x64xf32> to vector<16x64xf32>
    %c0_42 = arith.constant 0 : index
    %c320 = arith.constant 320 : index
    %166 = vector.load %arg13[%c0_42, %c320] : memref<16x512xf32, #tpu.memory_space<vmem>>, vector<16x64xf32>
    tpu.vector_store %arg13[%c0_42, %c320], %165 {strides = array<i32>} : memref<16x512xf32, #tpu.memory_space<vmem>>, vector<16x64xf32>,
    %167 = vector.extract_strided_slice %12 {offsets = [0, 384], sizes = [16, 64], strides = [1, 1]} : vector<16x512xf32> to vector<16x64xf32>
    %168 = vector.shape_cast %167 : vector<16x64xf32> to vector<2x8x64xf32>
    %169 = arith.truncf %168 : vector<2x8x64xf32> to vector<2x8x64xbf16>
    %170 = vector.extract_strided_slice %17 {offsets = [0, 384], sizes = [16, 64], strides = [1, 1]} : vector<16x512xf32> to vector<16x64xf32>
    %171 = vector.shape_cast %170 : vector<16x64xf32> to vector<2x8x64xf32>
    %172 = arith.truncf %171 : vector<2x8x64xf32> to vector<2x8x64xbf16>
    %173 = vector.extract_strided_slice %22 {offsets = [0, 384], sizes = [16, 64], strides = [1, 1]} : vector<16x512xf32> to vector<16x64xf32>
    %174 = vector.shape_cast %173 : vector<16x64xf32> to vector<2x8x64xf32>
    %175 = arith.truncf %174 : vector<2x8x64xf32> to vector<2x8x64xbf16>
    "tpu.trace_start"() <{level = 10 : i32, message = "btd,bsd->bts"}> : () -> ()
    %cst_43 = arith.constant dense<0.000000e+00> : vector<2x8x8xf32>
    %176 = tpu.matmul %169, %172, %cst_43 {dimension_numbers = #tpu.dot_dimension_numbers<[2], [2], [1], [1], [0, 0, 0, 1, 1, 1], [0], [0]>} : vector<2x8x64xbf16>, vector<2x8x64xbf16>, vector<2x8x8xf32> -> vector<2x8x8xf32>
    "tpu.trace_stop"() : () -> ()
    %cst_44 = arith.constant dense<0xFF800000> : vector<2x8xf32>
    %177 = vector.multi_reduction <maximumf>, %176, %cst_44 [2] : vector<2x8x8xf32> to vector<2x8xf32>
    %178 = vector.shape_cast %177 : vector<2x8xf32> to vector<2x8x1xf32>
    %179 = vector.broadcast %178 : vector<2x8x1xf32> to vector<2x8x8xf32>
    %180 = arith.subf %176, %179 : vector<2x8x8xf32>
    %181 = math.exp %180 : vector<2x8x8xf32>
    %cst_45 = arith.constant dense<0.000000e+00> : vector<2x8xf32>
    %182 = vector.multi_reduction <add>, %181, %cst_45 [2] : vector<2x8x8xf32> to vector<2x8xf32>
    %183 = vector.shape_cast %182 : vector<2x8xf32> to vector<2x8x1xf32>
    %184 = tpu.reciprocal %183 {approx = true} : vector<2x8x1xf32> -> vector<2x8x1xf32>
    %185 = vector.broadcast %184 : vector<2x8x1xf32> to vector<2x8x8xf32>
    %186 = arith.mulf %181, %185 : vector<2x8x8xf32>
    %187 = arith.truncf %186 : vector<2x8x8xf32> to vector<2x8x8xbf16>
    "tpu.trace_start"() <{level = 10 : i32, message = "bts,bsd->btd"}> : () -> ()
    %cst_46 = arith.constant dense<0.000000e+00> : vector<2x8x64xf32>
    %188 = tpu.matmul %187, %175, %cst_46 {dimension_numbers = #tpu.dot_dimension_numbers<[2], [1], [1], [2], [0, 0, 0, 1, 1, 2], [0], [0]>} : vector<2x8x8xbf16>, vector<2x8x64xbf16>, vector<2x8x64xf32> -> vector<2x8x64xf32>
    "tpu.trace_stop"() : () -> ()
    %189 = vector.shape_cast %188 : vector<2x8x64xf32> to vector<16x64xf32>
    %c0_47 = arith.constant 0 : index
    %c384 = arith.constant 384 : index
    %190 = vector.load %arg13[%c0_47, %c384] : memref<16x512xf32, #tpu.memory_space<vmem>>, vector<16x64xf32>
    tpu.vector_store %arg13[%c0_47, %c384], %189 {strides = array<i32>} : memref<16x512xf32, #tpu.memory_space<vmem>>, vector<16x64xf32>,
    %191 = vector.extract_strided_slice %12 {offsets = [0, 448], sizes = [16, 64], strides = [1, 1]} : vector<16x512xf32> to vector<16x64xf32>
    %192 = vector.shape_cast %191 : vector<16x64xf32> to vector<2x8x64xf32>
    %193 = arith.truncf %192 : vector<2x8x64xf32> to vector<2x8x64xbf16>
    %194 = vector.extract_strided_slice %17 {offsets = [0, 448], sizes = [16, 64], strides = [1, 1]} : vector<16x512xf32> to vector<16x64xf32>
    %195 = vector.shape_cast %194 : vector<16x64xf32> to vector<2x8x64xf32>
    %196 = arith.truncf %195 : vector<2x8x64xf32> to vector<2x8x64xbf16>
    %197 = vector.extract_strided_slice %22 {offsets = [0, 448], sizes = [16, 64], strides = [1, 1]} : vector<16x512xf32> to vector<16x64xf32>
    %198 = vector.shape_cast %197 : vector<16x64xf32> to vector<2x8x64xf32>
    %199 = arith.truncf %198 : vector<2x8x64xf32> to vector<2x8x64xbf16>
    "tpu.trace_start"() <{level = 10 : i32, message = "btd,bsd->bts"}> : () -> ()
    %cst_48 = arith.constant dense<0.000000e+00> : vector<2x8x8xf32>
    %200 = tpu.matmul %193, %196, %cst_48 {dimension_numbers = #tpu.dot_dimension_numbers<[2], [2], [1], [1], [0, 0, 0, 1, 1, 1], [0], [0]>} : vector<2x8x64xbf16>, vector<2x8x64xbf16>, vector<2x8x8xf32> -> vector<2x8x8xf32>
    "tpu.trace_stop"() : () -> ()
    %cst_49 = arith.constant dense<0xFF800000> : vector<2x8xf32>
    %201 = vector.multi_reduction <maximumf>, %200, %cst_49 [2] : vector<2x8x8xf32> to vector<2x8xf32>
    %202 = vector.shape_cast %201 : vector<2x8xf32> to vector<2x8x1xf32>
    %203 = vector.broadcast %202 : vector<2x8x1xf32> to vector<2x8x8xf32>
    %204 = arith.subf %200, %203 : vector<2x8x8xf32>
    %205 = math.exp %204 : vector<2x8x8xf32>
    %cst_50 = arith.constant dense<0.000000e+00> : vector<2x8xf32>
    %206 = vector.multi_reduction <add>, %205, %cst_50 [2] : vector<2x8x8xf32> to vector<2x8xf32>
    %207 = vector.shape_cast %206 : vector<2x8xf32> to vector<2x8x1xf32>
    %208 = tpu.reciprocal %207 {approx = true} : vector<2x8x1xf32> -> vector<2x8x1xf32>
    %209 = vector.broadcast %208 : vector<2x8x1xf32> to vector<2x8x8xf32>
    %210 = arith.mulf %205, %209 : vector<2x8x8xf32>
    %211 = arith.truncf %210 : vector<2x8x8xf32> to vector<2x8x8xbf16>
    "tpu.trace_start"() <{level = 10 : i32, message = "bts,bsd->btd"}> : () -> ()
    %cst_51 = arith.constant dense<0.000000e+00> : vector<2x8x64xf32>
    %212 = tpu.matmul %211, %199, %cst_51 {dimension_numbers = #tpu.dot_dimension_numbers<[2], [1], [1], [2], [0, 0, 0, 1, 1, 2], [0], [0]>} : vector<2x8x8xbf16>, vector<2x8x64xbf16>, vector<2x8x64xf32> -> vector<2x8x64xf32>
    "tpu.trace_stop"() : () -> ()
    %213 = vector.shape_cast %212 : vector<2x8x64xf32> to vector<16x64xf32>
    %c0_52 = arith.constant 0 : index
    %c448 = arith.constant 448 : index
    %214 = vector.load %arg13[%c0_52, %c448] : memref<16x512xf32, #tpu.memory_space<vmem>>, vector<16x64xf32>
    tpu.vector_store %arg13[%c0_52, %c448], %213 {strides = array<i32>} : memref<16x512xf32, #tpu.memory_space<vmem>>, vector<16x64xf32>,
    %c0_53 = arith.constant 0 : index
    %c0_54 = arith.constant 0 : index
    %215 = vector.load %arg13[%c0_53, %c0_54] : memref<16x512xf32, #tpu.memory_space<vmem>>, vector<16x512xf32>
    %216 = arith.truncf %215 : vector<16x512xf32> to vector<16x512xbf16>
    %c0_55 = arith.constant 0 : index
    %c0_56 = arith.constant 0 : index
    %c0_57 = arith.constant 0 : index
    %217 = vector.load %arg5[%c0_55, %c0_56, %c0_57] : memref<1x512x512xbf16, #tpu.memory_space<vmem>>, vector<1x512x512xbf16>
    %218 = vector.shape_cast %217 : vector<1x512x512xbf16> to vector<512x512xbf16>
    %cst_58 = arith.constant dense<0.000000e+00> : vector<16x512xf32>
    %219 = tpu.matmul %216, %218, %cst_58 {dimension_numbers = #tpu.dot_dimension_numbers<[1], [0], [0], [1], [0, 0, 1, 1], [], []>} : vector<16x512xbf16>, vector<512x512xbf16>, vector<16x512xf32> -> vector<16x512xf32>
    %c0_59 = arith.constant 0 : index
    %c3 = arith.constant 3 : index
    %c0_60 = arith.constant 0 : index
    %220 = vector.load %arg8[%c0_59, %c3, %c0_60] : memref<1x10x512xf32, #tpu.memory_space<vmem>>, vector<1x1x512xf32>
    %221 = vector.shape_cast %220 : vector<1x1x512xf32> to vector<1x512xf32>
    %222 = vector.broadcast %221 : vector<1x512xf32> to vector<16x512xf32>
    %223 = arith.addf %219, %222 : vector<16x512xf32>
    %224 = arith.addf %3, %223 : vector<16x512xf32>
    %c0_61 = arith.constant 0 : index
    %c6 = arith.constant 6 : index
    %c0_62 = arith.constant 0 : index
    %225 = vector.load %arg8[%c0_61, %c6, %c0_62] : memref<1x10x512xf32, #tpu.memory_space<vmem>>, vector<1x1x512xf32>
    %226 = vector.shape_cast %225 : vector<1x1x512xf32> to vector<1x512xf32>
    %c0_63 = arith.constant 0 : index
    %c7 = arith.constant 7 : index
    %c0_64 = arith.constant 0 : index
    %227 = vector.load %arg8[%c0_63, %c7, %c0_64] : memref<1x10x512xf32, #tpu.memory_space<vmem>>, vector<1x1x512xf32>
    %228 = vector.shape_cast %227 : vector<1x1x512xf32> to vector<1x512xf32>
    %cst_65 = arith.constant dense<0.000000e+00> : vector<16xf32>
    %229 = vector.multi_reduction <add>, %224, %cst_65 [1] : vector<16x512xf32> to vector<16xf32>
    %230 = vector.shape_cast %229 : vector<16xf32> to vector<16x1xf32>
    %cst_66 = arith.constant 5.120000e+02 : f32
    %231 = vector.broadcast %cst_66 : f32 to vector<16x1xf32>
    %232 = arith.divf %230, %231 : vector<16x1xf32>
    %233 = vector.broadcast %232 : vector<16x1xf32> to vector<16x512xf32>
    %234 = arith.subf %224, %233 : vector<16x512xf32>
    %235 = arith.mulf %234, %234 : vector<16x512xf32>
    %cst_67 = arith.constant dense<0.000000e+00> : vector<16xf32>
    %236 = vector.multi_reduction <add>, %235, %cst_67 [1] : vector<16x512xf32> to vector<16xf32>
    %237 = vector.shape_cast %236 : vector<16xf32> to vector<16x1xf32>
    %cst_68 = arith.constant 5.120000e+02 : f32
    %238 = vector.broadcast %cst_68 : f32 to vector<16x1xf32>
    %239 = arith.divf %237, %238 : vector<16x1xf32>
    %240 = vector.broadcast %232 : vector<16x1xf32> to vector<16x512xf32>
    %241 = arith.subf %224, %240 : vector<16x512xf32>
    %cst_69 = arith.constant 9.99999974E-6 : f32
    %242 = vector.broadcast %cst_69 : f32 to vector<16x1xf32>
    %243 = arith.addf %239, %242 : vector<16x1xf32>
    %244 = math.rsqrt %243 : vector<16x1xf32>
    %245 = vector.broadcast %244 : vector<16x1xf32> to vector<16x512xf32>
    %246 = arith.mulf %241, %245 : vector<16x512xf32>
    %247 = vector.broadcast %226 : vector<1x512xf32> to vector<16x512xf32>
    %248 = arith.mulf %246, %247 : vector<16x512xf32>
    %249 = vector.broadcast %228 : vector<1x512xf32> to vector<16x512xf32>
    %250 = arith.addf %248, %249 : vector<16x512xf32>
    %251 = arith.truncf %250 : vector<16x512xf32> to vector<16x512xbf16>
    %c0_70 = arith.constant 0 : index
    %c0_71 = arith.constant 0 : index
    %c0_72 = arith.constant 0 : index
    %252 = vector.load %arg6[%c0_70, %c0_71, %c0_72] : memref<1x512x512xbf16, #tpu.memory_space<vmem>>, vector<1x512x512xbf16>
    %253 = vector.shape_cast %252 : vector<1x512x512xbf16> to vector<512x512xbf16>
    %cst_73 = arith.constant dense<0.000000e+00> : vector<16x512xf32>
    %254 = tpu.matmul %251, %253, %cst_73 {dimension_numbers = #tpu.dot_dimension_numbers<[1], [0], [0], [1], [0, 0, 1, 1], [], []>} : vector<16x512xbf16>, vector<512x512xbf16>, vector<16x512xf32> -> vector<16x512xf32>
    %c0_74 = arith.constant 0 : index
    %c4 = arith.constant 4 : index
    %c0_75 = arith.constant 0 : index
    %255 = vector.load %arg8[%c0_74, %c4, %c0_75] : memref<1x10x512xf32, #tpu.memory_space<vmem>>, vector<1x1x512xf32>
    %256 = vector.shape_cast %255 : vector<1x1x512xf32> to vector<1x512xf32>
    %257 = vector.broadcast %256 : vector<1x512xf32> to vector<16x512xf32>
    %258 = arith.addf %254, %257 : vector<16x512xf32>
    %cst_76 = arith.constant 0.000000e+00 : f32
    %259 = vector.broadcast %cst_76 : f32 to vector<16x512xf32>
    %260 = arith.maximumf %258, %259 : vector<16x512xf32>
    %261 = arith.truncf %260 : vector<16x512xf32> to vector<16x512xbf16>
    %c0_77 = arith.constant 0 : index
    %c0_78 = arith.constant 0 : index
    %c0_79 = arith.constant 0 : index
    %262 = vector.load %arg7[%c0_77, %c0_78, %c0_79] : memref<1x512x512xbf16, #tpu.memory_space<vmem>>, vector<1x512x512xbf16>
    %263 = vector.shape_cast %262 : vector<1x512x512xbf16> to vector<512x512xbf16>
    %cst_80 = arith.constant dense<0.000000e+00> : vector<16x512xf32>
    %264 = tpu.matmul %261, %263, %cst_80 {dimension_numbers = #tpu.dot_dimension_numbers<[1], [0], [0], [1], [0, 0, 1, 1], [], []>} : vector<16x512xbf16>, vector<512x512xbf16>, vector<16x512xf32> -> vector<16x512xf32>
    %c0_81 = arith.constant 0 : index
    %c5 = arith.constant 5 : index
    %c0_82 = arith.constant 0 : index
    %265 = vector.load %arg8[%c0_81, %c5, %c0_82] : memref<1x10x512xf32, #tpu.memory_space<vmem>>, vector<1x1x512xf32>
    %266 = vector.shape_cast %265 : vector<1x1x512xf32> to vector<1x512xf32>
    %267 = vector.broadcast %266 : vector<1x512xf32> to vector<16x512xf32>
    %268 = arith.addf %264, %267 : vector<16x512xf32>
    %269 = arith.addf %250, %268 : vector<16x512xf32>
    %c0_83 = arith.constant 0 : index
    %c8 = arith.constant 8 : index
    %c0_84 = arith.constant 0 : index
    %270 = vector.load %arg8[%c0_83, %c8, %c0_84] : memref<1x10x512xf32, #tpu.memory_space<vmem>>, vector<1x1x512xf32>
    %271 = vector.shape_cast %270 : vector<1x1x512xf32> to vector<1x512xf32>
    %c0_85 = arith.constant 0 : index
    %c9 = arith.constant 9 : index
    %c0_86 = arith.constant 0 : index
    %272 = vector.load %arg8[%c0_85, %c9, %c0_86] : memref<1x10x512xf32, #tpu.memory_space<vmem>>, vector<1x1x512xf32>
    %273 = vector.shape_cast %272 : vector<1x1x512xf32> to vector<1x512xf32>
    %cst_87 = arith.constant dense<0.000000e+00> : vector<16xf32>
    %274 = vector.multi_reduction <add>, %269, %cst_87 [1] : vector<16x512xf32> to vector<16xf32>
    %275 = vector.shape_cast %274 : vector<16xf32> to vector<16x1xf32>
    %cst_88 = arith.constant 5.120000e+02 : f32
    %276 = vector.broadcast %cst_88 : f32 to vector<16x1xf32>
    %277 = arith.divf %275, %276 : vector<16x1xf32>
    %278 = vector.broadcast %277 : vector<16x1xf32> to vector<16x512xf32>
    %279 = arith.subf %269, %278 : vector<16x512xf32>
    %280 = arith.mulf %279, %279 : vector<16x512xf32>
    %cst_89 = arith.constant dense<0.000000e+00> : vector<16xf32>
    %281 = vector.multi_reduction <add>, %280, %cst_89 [1] : vector<16x512xf32> to vector<16xf32>
    %282 = vector.shape_cast %281 : vector<16xf32> to vector<16x1xf32>
    %cst_90 = arith.constant 5.120000e+02 : f32
    %283 = vector.broadcast %cst_90 : f32 to vector<16x1xf32>
    %284 = arith.divf %282, %283 : vector<16x1xf32>
    %285 = vector.broadcast %277 : vector<16x1xf32> to vector<16x512xf32>
    %286 = arith.subf %269, %285 : vector<16x512xf32>
    %cst_91 = arith.constant 9.99999974E-6 : f32
    %287 = vector.broadcast %cst_91 : f32 to vector<16x1xf32>
    %288 = arith.addf %284, %287 : vector<16x1xf32>
    %289 = math.rsqrt %288 : vector<16x1xf32>
    %290 = vector.broadcast %289 : vector<16x1xf32> to vector<16x512xf32>
    %291 = arith.mulf %286, %290 : vector<16x512xf32>
    %292 = vector.broadcast %271 : vector<1x512xf32> to vector<16x512xf32>
    %293 = arith.mulf %291, %292 : vector<16x512xf32>
    %294 = vector.broadcast %273 : vector<1x512xf32> to vector<16x512xf32>
    %295 = arith.addf %293, %294 : vector<16x512xf32>
    %c0_92 = arith.constant 0 : index
    %c0_93 = arith.constant 0 : index
    %296 = vector.load %arg12[%c0_92, %c0_93] : memref<16x512xf32, #tpu.memory_space<vmem>>, vector<16x512xf32>
    tpu.vector_store %arg12[%c0_92, %c0_93], %295 {strides = array<i32>} : memref<16x512xf32, #tpu.memory_space<vmem>>, vector<16x512xf32>,
    %c2_i32 = arith.constant 2 : i32
    %297 = arith.cmpi eq, %arg1, %c2_i32 : i32
    %298 = arith.extui %297 : i1 to i32
    %c0_i32_94 = arith.constant 0 : i32
    %299 = arith.cmpi ne, %298, %c0_i32_94 : i32
    scf.if %299 {
      %c0_95 = arith.constant 0 : index
      %c0_96 = arith.constant 0 : index
      %300 = vector.load %arg9[%c0_95, %c0_96] : memref<3x512xf32, #tpu.memory_space<vmem>>, vector<1x512xf32>
      %301 = vector.broadcast %300 : vector<1x512xf32> to vector<16x512xf32>
      %302 = arith.mulf %295, %301 : vector<16x512xf32>
      %c1_97 = arith.constant 1 : index
      %c0_98 = arith.constant 0 : index
      %303 = vector.load %arg9[%c1_97, %c0_98] : memref<3x512xf32, #tpu.memory_space<vmem>>, vector<1x512xf32>
      %304 = vector.broadcast %303 : vector<1x512xf32> to vector<16x512xf32>
      %305 = arith.addf %302, %304 : vector<16x512xf32>
      %306 = vector.shape_cast %305 : vector<16x512xf32> to vector<2x8x512xf32>
      %c0_99 = arith.constant 0 : index
      %c0_100 = arith.constant 0 : index
      %c0_101 = arith.constant 0 : index
      %307 = vector.load %arg3[%c0_99, %c0_100, %c0_101] : memref<2x8x1xf32, #tpu.memory_space<vmem>>, vector<2x8x1xf32>
      %308 = vector.broadcast %307 : vector<2x8x1xf32> to vector<2x8x512xf32>
      %309 = arith.mulf %306, %308 : vector<2x8x512xf32>
      %cst_102 = arith.constant dense<0.000000e+00> : vector<2x512xf32>
      %310 = vector.multi_reduction <add>, %309, %cst_102 [1] : vector<2x8x512xf32> to vector<2x512xf32>
      %cst_103 = arith.constant 1.250000e-01 : f32
      %311 = vector.broadcast %cst_103 : f32 to vector<2x512xf32>
      %312 = arith.mulf %310, %311 : vector<2x512xf32>
      %313 = arith.truncf %312 : vector<2x512xf32> to vector<2x512xbf16>
      %c0_104 = arith.constant 0 : index
      %c0_105 = arith.constant 0 : index
      %314 = vector.load %arg10[%c0_104, %c0_105] : memref<512x5xbf16, #tpu.memory_space<vmem>>, vector<512x5xbf16>
      %cst_106 = arith.constant dense<0.000000e+00> : vector<2x5xf32>
      %315 = tpu.matmul %313, %314, %cst_106 {dimension_numbers = #tpu.dot_dimension_numbers<[1], [0], [0], [1], [0, 0, 1, 1], [], []>} : vector<2x512xbf16>, vector<512x5xbf16>, vector<2x5xf32> -> vector<2x5xf32>
      %c2_107 = arith.constant 2 : index
      %c0_108 = arith.constant 0 : index
      %316 = vector.load %arg9[%c2_107, %c0_108] : memref<3x512xf32, #tpu.memory_space<vmem>>, vector<1x5xf32>
      %317 = vector.broadcast %316 : vector<1x5xf32> to vector<2x5xf32>
      %318 = arith.addf %315, %317 : vector<2x5xf32>
      %cst_109 = arith.constant dense<0xFF800000> : vector<2xf32>
      %319 = vector.multi_reduction <maximumf>, %318, %cst_109 [1] : vector<2x5xf32> to vector<2xf32>
      %320 = vector.shape_cast %319 : vector<2xf32> to vector<2x1xf32>
      %321 = vector.broadcast %320 : vector<2x1xf32> to vector<2x5xf32>
      %322 = arith.subf %318, %321 : vector<2x5xf32>
      %323 = math.exp %322 : vector<2x5xf32>
      %cst_110 = arith.constant dense<0.000000e+00> : vector<2xf32>
      %324 = vector.multi_reduction <add>, %323, %cst_110 [1] : vector<2x5xf32> to vector<2xf32>
      %325 = vector.shape_cast %324 : vector<2xf32> to vector<2x1xf32>
      %326 = vector.broadcast %325 : vector<2x1xf32> to vector<2x5xf32>
      %327 = arith.divf %323, %326 : vector<2x5xf32>
      %c0_111 = arith.constant 0 : index
      %c0_112 = arith.constant 0 : index
      %328 = vector.load %arg11[%c0_111, %c0_112] : memref<2x5xf32, #tpu.memory_space<vmem>>, vector<2x5xf32>
      tpu.vector_store %arg11[%c0_111, %c0_112], %327 {strides = array<i32>} : memref<2x5xf32, #tpu.memory_space<vmem>>, vector<2x5xf32>,
    } else {
    }
    return
  }
  func.func @transform_0(%arg0: i32, %arg1: i32) -> (i32, i32, i32) {
    %c0_i32 = arith.constant 0 : i32
    %c0_i32_0 = arith.constant 0 : i32
    %c0_i32_1 = arith.constant 0 : i32
    return %arg0, %c0_i32, %c0_i32_0 : i32, i32, i32
  }
  func.func @transform_1(%arg0: i32, %arg1: i32) -> (i32, i32, i32) {
    %c0_i32 = arith.constant 0 : i32
    %c0_i32_0 = arith.constant 0 : i32
    %c0_i32_1 = arith.constant 0 : i32
    return %arg0, %c0_i32, %c0_i32_0 : i32, i32, i32
  }
  func.func @transform_2(%arg0: i32, %arg1: i32) -> (i32, i32, i32) {
    %c0_i32 = arith.constant 0 : i32
    %c0_i32_0 = arith.constant 0 : i32
    %c0_i32_1 = arith.constant 0 : i32
    return %arg1, %c0_i32, %c0_i32_0 : i32, i32, i32
  }
  func.func @transform_3(%arg0: i32, %arg1: i32) -> (i32, i32, i32) {
    %c0_i32 = arith.constant 0 : i32
    %c0_i32_0 = arith.constant 0 : i32
    %c0_i32_1 = arith.constant 0 : i32
    return %arg1, %c0_i32, %c0_i32_0 : i32, i32, i32
  }
  func.func @transform_4(%arg0: i32, %arg1: i32) -> (i32, i32, i32) {
    %c0_i32 = arith.constant 0 : i32
    %c0_i32_0 = arith.constant 0 : i32
    %c0_i32_1 = arith.constant 0 : i32
    return %arg1, %c0_i32, %c0_i32_0 : i32, i32, i32
  }
  func.func @transform_5(%arg0: i32, %arg1: i32) -> (i32, i32, i32) {
    %c0_i32 = arith.constant 0 : i32
    %c0_i32_0 = arith.constant 0 : i32
    %c0_i32_1 = arith.constant 0 : i32
    return %arg1, %c0_i32, %c0_i32_0 : i32, i32, i32
  }
  func.func @transform_6(%arg0: i32, %arg1: i32) -> (i32, i32, i32) {
    %c0_i32 = arith.constant 0 : i32
    %c0_i32_0 = arith.constant 0 : i32
    %c0_i32_1 = arith.constant 0 : i32
    return %arg1, %c0_i32, %c0_i32_0 : i32, i32, i32
  }
  func.func @transform_7(%arg0: i32, %arg1: i32) -> (i32, i32) {
    %c0_i32 = arith.constant 0 : i32
    %c0_i32_0 = arith.constant 0 : i32
    %c0_i32_1 = arith.constant 0 : i32
    return %c0_i32, %c0_i32_0 : i32, i32
  }
  func.func @transform_8(%arg0: i32, %arg1: i32) -> (i32, i32) {
    %c0_i32 = arith.constant 0 : i32
    %c0_i32_0 = arith.constant 0 : i32
    %c0_i32_1 = arith.constant 0 : i32
    return %c0_i32, %c0_i32_0 : i32, i32
  }
  func.func @transform_9(%arg0: i32, %arg1: i32) -> (i32, i32) {
    %c0_i32 = arith.constant 0 : i32
    %c0_i32_0 = arith.constant 0 : i32
    return %arg0, %c0_i32 : i32, i32
  }
}

</mosaic_0001>

<bundles_post_ra>
// kernel: tpu_custom_call.1
= control target key start
LH: loop header
LB: loop body
LE: loop exit
PB: predicated region body
PF: predicated region fallthrough
CT: control target
= control target key end

     0   :  { %s14041_s0 = inlined_call_operand.hbm [shape: bf16[2,8,512], index: 0, kind: input, shape index: {}]   ;;  %s14042_s1 = inlined_call_operand.vmem [shape: f32[2,8,1], index: 1, kind: input, shape index: {}]   ;;  %s14043_s2 = inlined_call_operand.hbm [shape: bf16[3,512,1536], index: 2, kind: input, shape index: {}]   ;;  %s14044_s3 = inlined_call_operand.hbm [shape: bf16[3,512,512], index: 3, kind: input, shape index: {}]   ;;  %s14045_s4 = inlined_call_operand.hbm [shape: bf16[3,512,512], index: 4, kind: input, shape index: {}]   ;;  %s14046_s5 = inlined_call_operand.hbm [shape: bf16[3,512,512], index: 5, kind: input, shape index: {}]   ;;  %s14047_s6 = inlined_call_operand.vmem [shape: f32[3,10,512], index: 6, kind: input, shape index: {}]   ;;  %s14048_s7 = inlined_call_operand.hbm [shape: f32[3,512], index: 7, kind: input, shape index: {}]   ;;  %s14049_s8 = inlined_call_operand.vmem [shape: bf16[512,5], index: 8, kind: input, shape index: {}]   ;;  %s14050_s9 = inlined_call_operand.hbm [shape: f32[2,5], index: 9, kind: output, shape index: {}]  }
   0x1   :  { %14066 = sst [smem:[#allocation26_spill]] %s14042_s1 }
   0x2   :  { %14067 = sst [smem:[#allocation27_spill]] %s14043_s2 }
   0x3   :  { %14068 = sst [smem:[#allocation28_spill]] %s14045_s4 }
   0x4   :  { %14069 = sst [smem:[#allocation29_spill]] %s14047_s6 }
   0x5   :  { %14070 = sst [smem:[#allocation30_spill]] %s14049_s8 }
   0x6   :  { %14071 = sst [smem:[#allocation31_spill]] %s14050_s9 }
   0x7   :  { %14 = vsyncpa [#allocation5], 0 }
   0x8   :  { %15 = vsyncpa [#allocation8], 0 }
   0x9   :  { %17 = vsyncpa [#allocation8 + $0x1], 0 }
   0xa   :  { %18 = vsyncpa [#allocation11], 0 }
   0xb   :  { %20 = vsyncpa [#allocation11 + $0x1], 0 }
   0xc   :  { %21 = vsyncpa [#allocation14], 0 }
   0xd   :  { %22 = vsyncpa [#allocation6], 0  ;;  %s12158_s30 = smov 0   ;;  %s12160_s10 = smov 0  }
   0xe   :  { %s12162_s11 = smov 0   ;;  %s12164_s12 = smov 0  }
   0xf   :  { %s12166_s13 = smov 0   ;;  %s12168_s14 = smov 0  }
  0x10 LB: > { %14072 = sst [smem:[#allocation21_spill]] %s12079_s11  ;;  %s37_s15 = sadd.s32 1, %s12087_s13  ;;  %s12091_s14 = sphi %s12168_s14, %s28_s14   ;;  %s12087_s13 = sphi %s12166_s13, %s14101_s13   ;;  %s12083_s12 = sphi %s12164_s12, %s14100_s12   ;;  %s12079_s11 = sphi %s12162_s11, %s14099_s11   ;;  %s12075_s10 = sphi %s12160_s10, %s14103_s10   ;;  %s12071_s30 = sphi %s12158_s30, %s14102_s30  }
  0x11   : > { %14073 = sst [smem:[#allocation22_spill]] %s12087_s13  ;;  %s99_s16 = sadd.s32 1, %s12079_s11 }
  0x12   : > { %14074 = sst [smem:[#allocation23_spill]] %s12091_s14  ;;  %p38_p0 = scmp.ge.s32.totalorder %s37_s15, 3 }
  0x13   : > { %p106_p1 = scmp.ne.s32.totalorder %s12079_s11, %s12075_s10  ;;  %p107_p2 = scmp.eq.s32.totalorder %s12091_s14, 0 }
  0x14   : > { %s14105_s15 = smov (%p38_p0, %s37_s15), 0  ;;  %p10490_p4 = scmp.lt.s32.totalorder %s12091_s14, 3 }
  0x15   : > { %14075 = sst [smem:[#allocation24_spill]] %s14105_s15  ;;  %p108_p3 = por %p107_p2, %p106_p1 }
  0x16   : > { %s96_s17 = ssub.s32 %s12087_s13, %s14105_s15  ;;  %s14051_s18 = sand.u32 1, %s12091_s14  }
  0x17   : > { %p97_p5 = scmp.eq.s32.totalorder %s96_s17, 0  ;;  %s350_s19 = sand.u32 1, %s12079_s11  }
  0x18   : > { %s10446_s20 = smul.u32 49152, %s12087_s13  ;;  %s14077_s2 = sld [smem:[#allocation27_spill]] }
  0x19   : > { %s12202_s21 = scalar_select %p97_p5, %s12079_s11, %s99_s16  }
  0x1a   : > { %s10445_s22 = smul.u32 3072, %s350_s19  ;;  %p12211_p6 = pnand %p10490_p4, %p108_p3 }
  0x1b   : > { %14076 = sst [smem:[#allocation25_spill]] %s12202_s21  ;;  %s12219_s29 = scalar_lea.sflag [#allocation8], %s14051_s18 }
  0x1c   : > { %s352_s27 = scalar_lea.vmem [#allocation7], %s10445_s22  ;;  %p12225_p8 = pneg %p12211_p6 }
  0x1d   : > { %s359_s28 = sshll.u32 %s352_s27, 4  ;;  %s12215_s28 = int_to_ptr.vmem [resolvable:$true] %s359_s28 }
  0x1e   : > { %s12209_s25 = scalar_lea.hbm %s14077_s2, %s10446_s20  ;;  %s11828_s22 = scalar_lea.hbm %s14077_s2, 147456 }
  0x1f   : > { %s11823_s16 = scalar_lea.hbm %s12209_s25, 49152  ;;  %p11829_p11 = scmp.lt.u32.totalorder %s12209_s25, %s14077_s2 }
  0x20   : > { %p11824_p7 = scmp.ne.s32.totalorder %s12209_s25, %s11823_s16  ;;  %p11830_p12 = scmp.lt.u32.totalorder %s11828_s22, %s11823_s16 }
  0x21   : > { %p11832_p0 = scmp.lt.u32.totalorder %s11823_s16, %s12209_s25 }
  0x22   : > { %p11826_p9 = pnand %p12225_p8, %p11824_p7  ;;  %p11831_p13 = por %p11830_p12, %p11829_p11 }
  0x24   : > { %p11827_p10 = pneg %p11826_p9  ;;  %p11833_p1 = por %p11832_p0, %p11831_p13 }
  0x26   : > { %p11834_p2 = pnand %p11833_p1, %p11827_p10 }
  0x28   : > { %11837 = shalt.err (!%p11834_p2)
}
  0x29   : > { %s11838_s18 = scalar_lea.vmem %s12215_s28, 49152  ;;  %s12093_s20 = smov [#allocation7]  }
  0x2a   : > { %p11839_p3 = scmp.ne.s32.totalorder %s12215_s28, %s11838_s18  ;;  %s11843_s23 = sshll.u32 %s12093_s20, 4  ;;  %s11844_s23 = int_to_ptr.vmem [resolvable:$false] %s11843_s23 }
  0x2b   : > { %s11845_s24 = scalar_lea.vmem %s11844_s23, 98304  ;;  %p11846_p7 = scmp.lt.s32.totalorder %s12215_s28, %s11844_s23 }
  0x2c   : > { %p11841_p4 = pnand %p11839_p3, %p12225_p8  ;;  %p11847_p9 = scmp.lt.s32.totalorder %s11845_s24, %s11838_s18 }
  0x2e   : > { %p11842_p5 = pneg %p11841_p4  ;;  %p11848_p11 = por %p11847_p9, %p11846_p7 }
  0x30   : > { %p11849_p12 = pnand %p11848_p11, %p11842_p5 }
  0x32   : > { %11852 = shalt.err (!%p11849_p12)
}
  0x33   : > { %s12094_s16 = smov 768   ;;  %s12095_s22 = smov 48  }
  0x34   : > { %10478 = dma.hbm_to_vmem [thread:$0]  (!%p12211_p6), %s12209_s25, 49152, %s12215_s28, %s12219_s29, %s12094_s16, %s12094_s16, %s12095_s22  }
  0x35   : > { %s12251_s27 = sshll.u32 %s350_s19, 10  ;;  %s12254_s18 = sshll.u32 %s12087_s13, 14 }
  0x36   : > { %s14080_s4 = sld [smem:[#allocation28_spill]]  ;;  %s394_s2 = scalar_lea.vmem [#allocation10], %s12251_s27 }
  0x37   : > { %s401_s15 = sshll.u32 %s394_s2, 4  ;;  %s14081_s25 = sand.u32 1, %s12091_s14   ;;  %s12263_s15 = int_to_ptr.vmem [resolvable:$true] %s401_s15 }
  0x38   : > { %s12267_s19 = scalar_lea.sflag [#allocation11], %s14081_s25 }
  0x3c   : > { %s12260_s24 = scalar_lea.hbm %s14080_s4, %s12254_s18  ;;  %s11858_s20 = scalar_lea.hbm %s14080_s4, 49152 }
  0x3d   : > { %s11853_s28 = scalar_lea.hbm %s12260_s24, 16384  ;;  %p11859_p1 = scmp.lt.u32.totalorder %s12260_s24, %s14080_s4 }
  0x3e   : > { %p11854_p10 = scmp.ne.s32.totalorder %s12260_s24, %s11853_s28  ;;  %p11860_p2 = scmp.lt.u32.totalorder %s11858_s20, %s11853_s28 }
  0x3f   : > { %p11862_p4 = scmp.lt.u32.totalorder %s11853_s28, %s12260_s24 }
  0x40   : > { %p11856_p13 = pnand %p11854_p10, %p12225_p8  ;;  %p11861_p3 = por %p11860_p2, %p11859_p1 }
  0x42   : > { %p11857_p0 = pneg %p11856_p13  ;;  %p11863_p5 = por %p11862_p4, %p11861_p3 }
  0x44   : > { %p11864_p7 = pnand %p11863_p5, %p11857_p0 }
  0x46   : > { %11867 = shalt.err (!%p11864_p7)
}
  0x47   : > { %s11868_s2 = scalar_lea.vmem %s12263_s15, 16384  ;;  %s12096_s25 = smov [#allocation10]  }
  0x48   : > { %p11869_p9 = scmp.ne.s32.totalorder %s12263_s15, %s11868_s2  ;;  %s11873_s16 = sshll.u32 %s12096_s25, 4  ;;  %s11874_s16 = int_to_ptr.vmem [resolvable:$false] %s11873_s16 }
  0x49   : > { %s11875_s13 = scalar_lea.vmem %s11874_s16, 32768  ;;  %p11876_p10 = scmp.lt.s32.totalorder %s12263_s15, %s11874_s16 }
  0x4a   : > { %p11871_p11 = pnand %p11869_p9, %p12225_p8  ;;  %p11877_p13 = scmp.lt.s32.totalorder %s11875_s13, %s11868_s2 }
  0x4c   : > { %p11872_p12 = pneg %p11871_p11  ;;  %p11878_p1 = por %p11877_p13, %p11876_p10 }
  0x4e   : > { %p11879_p2 = pnand %p11878_p1, %p11872_p12 }
  0x50   : > { %11882 = shalt.err (!%p11879_p2)
}
  0x51   : > { %s14054_s28 = smov 256   ;;  %s14056_s22 = smov 16  }
  0x52   : > { %10484 = dma.hbm_to_vmem [thread:$0]  (!%p12211_p6), %s12260_s24, 16384, %s12263_s15, %s12267_s19, %s14054_s28, %s14054_s28, %s14056_s22  }
  0x53   : > { %s12295_s20 = sadd.s32 4294967295, %s12091_s14   ;;  %p112_p0 = scmp.ne.s32.totalorder %s12075_s10, %s12071_s30 }
  0x54   : > { %p14061_p3 = scmp.eq.s32.totalorder %s12295_s20, 0  ;;  %p9198_p4 = scmp.ge.s32.totalorder %s12091_s14, 1 }
  0x55   : > { %p295_p5 = scmp.lt.s32.totalorder %s12091_s14, 4  ;;  %s12099_s15 = smov [#allocation4]  }
  0x56   : > { %p12304_p7 = por %p14061_p3, %p112_p0  ;;  %s311_s24 = sshll.u32 %s12099_s15, 4  ;;  %s12312_s24 = int_to_ptr.vmem [resolvable:$true] %s311_s24 }
  0x57   : > { %p12308_p9 = pnand %p9198_p4, %p295_p5  ;;  %s12100_s30 = smov [#allocation13]  }
  0x58   : > { %s14082_s23 = scalar_select %p12304_p7, 1, 0 }
  0x59   : > { %s14083_s2 = scalar_select %p12308_p9, 1, 0 }
  0x5a   : > { %p10468_p11 = pneg %p12308_p9  ;;  %s334_s25 = sshll.u32 %s12100_s30, 4  ;;  %s12316_s25 = int_to_ptr.vmem [resolvable:$true] %s334_s25 }
  0x5b   : > { %s12328_s22 = scalar_lea.hbm %s14044_s3, %s12254_s18  ;;  %s373_s15 = scalar_lea.vmem [#allocation9], %s12251_s27 }
  0x5c   : > { %p12320_p12 = pnand %p10468_p11, %p14061_p3  ;;  %s380_s4 = sshll.u32 %s373_s15, 4  ;;  %s12331_s4 = int_to_ptr.vmem [resolvable:$true] %s380_s4 }
  0x5d   : > { %s11883_s11 = scalar_lea.hbm %s14041_s0, 512 }
  0x5e   : > { %p11884_p10 = scmp.ne.s32.totalorder %s14041_s0, %s11883_s11  ;;  %p11885_p13 = pneg %p12320_p12 }
  0x5f   : > { %p11890_p0 = scmp.lt.u32.totalorder %s11883_s11, %s14041_s0 }
  0x60   : > { %p11886_p1 = pnand %p11885_p13, %p11884_p10 }
  0x62   : > { %p11887_p2 = pneg %p11886_p1 }
  0x64   : > { %p11892_p4 = pnand %p11890_p0, %p11887_p2 }
  0x66   : > { %11895 = shalt.err (!%p11892_p4)
}
  0x67   : > { %s11896_s21 = scalar_lea.vmem %s12312_s24, 512  ;;  %p11904_p7 = scmp.lt.s32.totalorder %s12312_s24, %s12312_s24 }
  0x68   : > { %p11897_p5 = scmp.ne.s32.totalorder %s12312_s24, %s11896_s21  ;;  %p11905_p10 = scmp.lt.s32.totalorder %s11896_s21, %s11896_s21 }
  0x6a   : > { %p11899_p11 = pnand %p11897_p5, %p11885_p13  ;;  %p11906_p1 = por %p11905_p10, %p11904_p7 }
  0x6c   : > { %p11900_p3 = pneg %p11899_p11 }
  0x6e   : > { %p11907_p9 = pnand %p11906_p1, %p11900_p3 }
  0x70   : > { %11910 = shalt.err (!%p11907_p9)
}
  0x71   : > { %s14085_s9 = smov 16   ;;  %s14086_s11 = smov 256  }
  0x72   : > { %10471 = dma.hbm_to_vmem [thread:$0]  (!%p12320_p12), %s14041_s0, 512, %s12312_s24, [#allocation5], %s14086_s11, %s14086_s11, %s14085_s9  }
  0x73   : > { %s11911_s13 = scalar_lea.hbm %s14048_s7, 256 }
  0x74   : > { %p11912_p3 = scmp.ne.s32.totalorder %s14048_s7, %s11911_s13  ;;  %p11918_p2 = scmp.lt.u32.totalorder %s11911_s13, %s14048_s7 }
  0x76   : > { %p11914_p7 = pnand %p11912_p3, %p11885_p13 }
  0x78   : > { %p11915_p9 = pneg %p11914_p7 }
  0x7a   : > { %p11920_p0 = pnand %p11918_p2, %p11915_p9 }
  0x7c   : > { %11923 = shalt.err (!%p11920_p0)
}
  0x7d   : > { %s11924_s24 = scalar_lea.vmem %s12316_s25, 256  ;;  %p11932_p10 = scmp.lt.s32.totalorder %s12316_s25, %s12316_s25 }
  0x7e   : > { %p11925_p4 = scmp.ne.s32.totalorder %s12316_s25, %s11924_s24  ;;  %p11933_p1 = scmp.lt.s32.totalorder %s11924_s24, %s11924_s24 }
  0x80   : > { %p11927_p5 = pnand %p11925_p4, %p11885_p13  ;;  %p11934_p3 = por %p11933_p1, %p11932_p10 }
  0x82   : > { %p11928_p11 = pneg %p11927_p5 }
  0x84   : > { %p11935_p7 = pnand %p11934_p3, %p11928_p11 }
  0x86   : > { %11938 = shalt.err (!%p11935_p7)
}
  0x87   : > { %10474 = dma.hbm_to_vmem [thread:$0]  (!%p12320_p12), %s14048_s7, 256, %s12316_s25, [#allocation14]  }
  0x88   : > { %s11939_s8 = scalar_lea.hbm %s12328_s22, 16384  ;;  %s11944_s30 = scalar_lea.hbm %s14044_s3, 49152 }
  0x89   : > { %p11940_p13 = scmp.ne.s32.totalorder %s12328_s22, %s11939_s8  ;;  %p11945_p0 = scmp.lt.u32.totalorder %s12328_s22, %s14044_s3 }
  0x8a   : > { %p11946_p4 = scmp.lt.u32.totalorder %s11944_s30, %s11939_s8  ;;  %p11948_p11 = scmp.lt.u32.totalorder %s11939_s8, %s12328_s22 }
  0x8b   : > { %p11942_p9 = pnand %p11940_p13, %p12225_p8 }
  0x8c   : > { %p11947_p5 = por %p11946_p4, %p11945_p0 }
  0x8d   : > { %p11943_p2 = pneg %p11942_p9 }
  0x8e   : > { %p11949_p10 = por %p11948_p11, %p11947_p5 }
  0x90   : > { %p11950_p1 = pnand %p11949_p10, %p11943_p2 }
  0x92   : > { %11953 = shalt.err (!%p11950_p1)
}
  0x93   : > { %s11954_s25 = scalar_lea.vmem %s12331_s4, 16384  ;;  %s12101_s13 = smov [#allocation9]  }
  0x94   : > { %p11955_p12 = scmp.ne.s32.totalorder %s12331_s4, %s11954_s25  ;;  %s11959_s21 = sshll.u32 %s12101_s13, 4  ;;  %s11960_s21 = int_to_ptr.vmem [resolvable:$false] %s11959_s21 }
  0x95   : > { %s11961_s24 = scalar_lea.vmem %s11960_s21, 32768  ;;  %p11962_p13 = scmp.lt.s32.totalorder %s12331_s4, %s11960_s21 }
  0x96   : > { %p11957_p3 = pnand %p11955_p12, %p12225_p8  ;;  %p11963_p9 = scmp.lt.s32.totalorder %s11961_s24, %s11954_s25 }
  0x98   : > { %p11958_p7 = pneg %p11957_p3  ;;  %p11964_p0 = por %p11963_p9, %p11962_p13 }
  0x9a   : > { %p11965_p4 = pnand %p11964_p0, %p11958_p7 }
  0x9c   : > { %11968 = shalt.err (!%p11965_p4)
}
  0x9d   : > { %10481 = dma.hbm_to_vmem [thread:$0]  (!%p12211_p6), %s12328_s22, 16384, %s12331_s4, %s12219_s29, %s14086_s11, %s14086_s11, %s14085_s9  }
  0x9e   : > { %s12417_s8 = scalar_lea.hbm %s14046_s5, %s12254_s18  ;;  %s415_s14 = scalar_lea.vmem [#allocation12], %s12251_s27 }
  0x9f   : > { %s422_s15 = sshll.u32 %s415_s14, 4  ;;  %s11969_s30 = scalar_lea.hbm %s12417_s8, 16384  ;;  %s12420_s15 = int_to_ptr.vmem [resolvable:$true] %s422_s15 }
  0xa0   : > { %p11970_p2 = scmp.ne.s32.totalorder %s12417_s8, %s11969_s30  ;;  %s11974_s29 = scalar_lea.hbm %s14046_s5, 49152 }
  0xa1   : > { %p11975_p10 = scmp.lt.u32.totalorder %s12417_s8, %s14046_s5  ;;  %p11976_p1 = scmp.lt.u32.totalorder %s11974_s29, %s11969_s30 }
  0xa2   : > { %p11972_p5 = pnand %p11970_p2, %p12225_p8  ;;  %p11978_p3 = scmp.lt.u32.totalorder %s11969_s30, %s12417_s8 }
  0xa3   : > { %p11977_p12 = por %p11976_p1, %p11975_p10 }
  0xa4   : > { %p11973_p11 = pneg %p11972_p5 }
  0xa5   : > { %p11979_p7 = por %p11978_p3, %p11977_p12 }
  0xa7   : > { %p11980_p13 = pnand %p11979_p7, %p11973_p11 }
  0xa9   : > { %11983 = shalt.err (!%p11980_p13)
}
  0xaa   : > { %s11984_s27 = scalar_lea.vmem %s12420_s15, 16384  ;;  %s12102_s28 = smov [#allocation12]  }
  0xab   : > { %p11985_p9 = scmp.ne.s32.totalorder %s12420_s15, %s11984_s27  ;;  %s11989_s25 = sshll.u32 %s12102_s28, 4  ;;  %s11990_s25 = int_to_ptr.vmem [resolvable:$false] %s11989_s25 }
  0xac   : > { %s11991_s13 = scalar_lea.vmem %s11990_s25, 32768  ;;  %p11992_p2 = scmp.lt.s32.totalorder %s12420_s15, %s11990_s25 }
  0xad   : > { %p11987_p0 = pnand %p11985_p9, %p12225_p8  ;;  %p11993_p5 = scmp.lt.s32.totalorder %s11991_s13, %s11984_s27 }
  0xaf   : > { %p11988_p4 = pneg %p11987_p0  ;;  %p11994_p10 = por %p11993_p5, %p11992_p2 }
  0xb1   : > { %p11995_p1 = pnand %p11994_p10, %p11988_p4 }
  0xb3   : > { %11998 = shalt.err (!%p11995_p1)
}
  0xb4   : > { %10487 = dma.hbm_to_vmem [thread:$0]  (!%p12211_p6), %s12417_s8, 16384, %s12420_s15, %s12267_s19, %s14086_s11, %s14086_s11, %s14085_s9  }
  0xb5   : > { %p14087_p8 = scmp.ne.s32.totalorder %s14083_s2, 0 }
  0xb6   : > { %p14088_p11 = scmp.eq.s32.totalorder (!%p14087_p8), %s12295_s20, 0 }
  0xb7   : > { %442 = sbr.rel (%p14087_p8) target bundleno = 7485 (0x1d3d), region = 56 }
  0xbe   : > { %12050 = dma.done.wait (%p14088_p11), [#allocation5], 512   ;;  %p14089_p12 = pmov %p14088_p11 }
  0xbf   : > { %s448_s26 = sand.u32 1, %s12295_s20   ;;  %s450_s17 = sand.u32 1, %s12075_s10  }
  0xc0   : > { %12052 = vsyncadd (%p14089_p12), [#allocation5], 4294966784  ;;  %s10447_s21 = smul.u32 3072, %s450_s17  ;;  %s449_s24 = scalar_lea.sflag [#allocation8], %s448_s26 }
  0xc1   : > { %p14090_p3 = scmp.ne.s32.totalorder %s14082_s23, 0 }
  0xc2   : > { %s12455_s1 = scalar_lea.vmem [#allocation7], %s10447_s21 }
  0xc3   : > { %12054 = dma.done.wait (%p14090_p3), %s449_s24, 65536  }
  0xc4   : > { %12056 = vsyncadd (%p14090_p3), %s449_s24, 4294901760  ;;  %s9215_s19 = sshll.u32 %s450_s17, 10  ;;  %s467_s9 = scalar_lea.sflag [#allocation11], %s448_s26 }
  0xc5   : > { %s12461_s2 = scalar_lea.vmem [#allocation9], %s9215_s19  ;;  %s12463_s11 = scalar_lea.vmem [#allocation10], %s9215_s19 }
  0xc6   : > { %12058 = dma.done.wait (%p14090_p3), %s467_s9, 32768  }
  0xc7   : > { %12060 = vsyncadd (%p14090_p3), %s467_s9, 4294934528  ;;  %s12469_s6 = scalar_lea.vmem [#allocation12], %s9215_s19  ;;  %p14091_p6 = pmov %p14088_p11 }
  0xc9   : > { %12062 = dma.done.wait (%p14091_p6), [#allocation14], 256   ;;  %p14092_p7 = pmov %p14091_p6 }
  0xca   : > { %p545_p13 = scmp.lt.s32.totalorder %s12083_s12, 2  ;;  %s14093_s16 = sld [smem:[#allocation29_spill]] }
  0xcb   : > { %12064 = vsyncadd (%p14092_p7), [#allocation14], 4294967040  ;;  %p9221_p9 = scmp.ne.s32.totalorder %s12083_s12, 0 }
  0xcc   : > { %s546_s8 = scalar_select %p545_p13, %s12083_s12, 2 }
  0xcd   : > { %554 = sbr.rel (%p9221_p9) target bundleno = 212 (0xd4), region = 84  ;;  %v555_v0 = vld [vmem:[#allocation4] sm:$0xff] (!%p9221_p9)  ;;  %v556_v1 = vld [vmem:[#allocation4 + $0x8] sm:$0xff] (!%p9221_p9)  ;;  %v557_v2 = vld [vmem:[#allocation4 + $0x10] sm:$0xff] (!%p9221_p9) }
  0xce   : > { %s10072_s14 = sshll.u32 %s546_s8, 6  ;;  %v559_v3 = vunpack.c.l.bf16 (!%p9221_p9), %v555_v0  ;;  %v560_v4 = vunpack.c.h.bf16 (!%p9221_p9), %v555_v0  ;;  %v561_v5 = vunpack.c.l.bf16 (!%p9221_p9), %v556_v1  ;;  %v562_v6 = vunpack.c.h.bf16 (!%p9221_p9), %v556_v1  ;;  %v558_v7 = vld [vmem:[#allocation4 + $0x18] sm:$0xff] (!%p9221_p9) }
  0xcf   : > { %v563_v8 = vunpack.c.l.bf16 (!%p9221_p9), %v557_v2  ;;  %v564_v9 = vunpack.c.h.bf16 (!%p9221_p9), %v557_v2  ;;  %v565_v10 = vunpack.c.l.bf16 (!%p9221_p9), %v558_v7  ;;  %v566_v11 = vunpack.c.h.bf16 (!%p9221_p9), %v558_v7 }
  0xd0   : > { %s12480_s4 = scalar_lea.vmem %s14093_s16, %s10072_s14  ;;  %567 = vst [vmem:[#allocation2] sm:$0xff] (!%p9221_p9), %v559_v3  ;;  %568 = vst [vmem:[#allocation2 + $0x8] sm:$0xff] (!%p9221_p9), %v560_v4 }
  0xd1   : > { %569 = vst [vmem:[#allocation2 + $0x10] sm:$0xff] (!%p9221_p9), %v561_v5  ;;  %570 = vst [vmem:[#allocation2 + $0x18] sm:$0xff] (!%p9221_p9), %v562_v6 }
  0xd2   : > { %571 = vst [vmem:[#allocation2 + $0x20] sm:$0xff] (!%p9221_p9), %v563_v8  ;;  %572 = vst [vmem:[#allocation2 + $0x28] sm:$0xff] (!%p9221_p9), %v564_v9 }
  0xd3   : > { %573 = vst [vmem:[#allocation2 + $0x30] sm:$0xff] (!%p9221_p9), %v565_v10  ;;  %574 = vst [vmem:[#allocation2 + $0x38] sm:$0xff] (!%p9221_p9), %v566_v11 }
  0xd4 PF: > { %v10554_v12 = vld [vmem:[%s12455_s1 + $0x4] ss:$48 sps:$4 sm:$0xff]   ;;  %v10556_v13 = vld [vmem:[%s12455_s1] ss:$48 sps:$4 sm:$0xff]   ;;  %v10572_v19 = vld [vmem:[%s12455_s1 + $0xc] ss:$48 sps:$4 sm:$0xff]  }
  0xd5   : > { %2891 = vmatprep.subr.bf16.mxu0 %v10554_v12  ;;  %v10557_v14 = vld [vmem:[%s12455_s1 + $0x64] ss:$48 sps:$4 sm:$0xff]   ;;  %v10559_v15 = vld [vmem:[%s12455_s1 + $0x60] ss:$48 sps:$4 sm:$0xff]   ;;  %v10574_v20 = vld [vmem:[%s12455_s1 + $0x8] ss:$48 sps:$4 sm:$0xff]   ;;  %2977 = vmatprep.subr.bf16.mxu1 %v10572_v19 }
  0xd6   : > { %2892 = vmatpush1.bf16.msra.mxu0 %v10556_v13  ;;  %v10560_v16 = vld [vmem:[%s12455_s1 + $0xc4] ss:$48 sps:$4 sm:$0xff]   ;;  %v10562_v17 = vld [vmem:[%s12455_s1 + $0xc0] ss:$48 sps:$4 sm:$0xff]   ;;  %2978 = vmatpush1.bf16.msra.mxu1 %v10574_v20  ;;  %v10578_v22 = vld [vmem:[%s12455_s1 + $0x6c] ss:$48 sps:$4 sm:$0xff]  }
  0xd7   : > { %2893 = vmatprep.subr.bf16.mxu0 %v10557_v14  ;;  %v10563_v18 = vld [vmem:[%s12455_s1 + $0x124] ss:$48 sps:$4 sm:$0xff]   ;;  %v10565_v21 = vld [vmem:[%s12455_s1 + $0x120] ss:$48 sps:$4 sm:$0xff]   ;;  %v10580_v23 = vld [vmem:[%s12455_s1 + $0x68] ss:$48 sps:$4 sm:$0xff]   ;;  %2979 = vmatprep.subr.bf16.mxu1 %v10578_v22 }
  0xd8   : > { %v10566_v24 = vld [vmem:[%s12455_s1 + $0x184] ss:$48 sps:$4 sm:$0xff]   ;;  %v10568_v25 = vld [vmem:[%s12455_s1 + $0x180] ss:$48 sps:$4 sm:$0xff]   ;;  %v10584_v26 = vld [vmem:[%s12455_s1 + $0xcc] ss:$48 sps:$4 sm:$0xff]  }
  0xd9   : > { %v10569_v27 = vld [vmem:[%s12455_s1 + $0x1e4] ss:$48 sps:$4 sm:$0xff]   ;;  %v10586_v28 = vld [vmem:[%s12455_s1 + $0xc8] ss:$48 sps:$4 sm:$0xff]   ;;  %v10590_v29 = vld [vmem:[%s12455_s1 + $0x12c] ss:$48 sps:$4 sm:$0xff]  }
  0xda   : > { %2894 = vmatpush1.bf16.msra.mxu0 %v10559_v15  ;;  %2980 = vmatpush1.bf16.msra.mxu1 %v10580_v23  ;;  %v10571_v30 = vld [vmem:[%s12455_s1 + $0x1e0] ss:$48 sps:$4 sm:$0xff]   ;;  %v10575_v31 = vld [vmem:[%s12455_s1 + $0x244] ss:$48 sps:$4 sm:$0xff]   ;;  %v10592_v32 = vld [vmem:[%s12455_s1 + $0x128] ss:$48 sps:$4 sm:$0xff]  }
  0xdb   : > { %2895 = vmatprep.subr.bf16.mxu0 %v10560_v16  ;;  %2981 = vmatprep.subr.bf16.mxu1 %v10584_v26  ;;  %v10596_v33 = vld [vmem:[%s12455_s1 + $0x18c] ss:$48 sps:$4 sm:$0xff]   ;;  %v10577_v34 = vld [vmem:[%s12455_s1 + $0x240] ss:$48 sps:$4 sm:$0xff]   ;;  %v10581_v35 = vld [vmem:[%s12455_s1 + $0x2a4] ss:$48 sps:$4 sm:$0xff]  }
  0xdc   : > { %v10598_v36 = vld [vmem:[%s12455_s1 + $0x188] ss:$48 sps:$4 sm:$0xff]   ;;  %v10602_v37 = vld [vmem:[%s12455_s1 + $0x1ec] ss:$48 sps:$4 sm:$0xff]   ;;  %v10583_v38 = vld [vmem:[%s12455_s1 + $0x2a0] ss:$48 sps:$4 sm:$0xff]  }
  0xdd   : > { %v10587_v39 = vld [vmem:[%s12455_s1 + $0x304] ss:$48 sps:$4 sm:$0xff]   ;;  %v10604_v40 = vld [vmem:[%s12455_s1 + $0x1e8] ss:$48 sps:$4 sm:$0xff]   ;;  %v10608_v41 = vld [vmem:[%s12455_s1 + $0x24c] ss:$48 sps:$4 sm:$0xff]  }
  0xde   : > { %2896 = vmatpush1.bf16.msra.mxu0 %v10562_v17  ;;  %2982 = vmatpush1.bf16.msra.mxu1 %v10586_v28  ;;  %v10589_v42 = vld [vmem:[%s12455_s1 + $0x300] ss:$48 sps:$4 sm:$0xff]   ;;  %v10593_v43 = vld [vmem:[%s12455_s1 + $0x364] ss:$48 sps:$4 sm:$0xff]   ;;  %v10610_v44 = vld [vmem:[%s12455_s1 + $0x248] ss:$48 sps:$4 sm:$0xff]  }
  0xdf   : > { %2897 = vmatprep.subr.bf16.mxu0 %v10563_v18  ;;  %2983 = vmatprep.subr.bf16.mxu1 %v10590_v29  ;;  %v10614_v45 = vld [vmem:[%s12455_s1 + $0x2ac] ss:$48 sps:$4 sm:$0xff]   ;;  %v10595_v46 = vld [vmem:[%s12455_s1 + $0x360] ss:$48 sps:$4 sm:$0xff]   ;;  %v10599_v47 = vld [vmem:[%s12455_s1 + $0x3c4] ss:$48 sps:$4 sm:$0xff]  }
  0xe0   : > { %v10616_v48 = vld [vmem:[%s12455_s1 + $0x2a8] ss:$48 sps:$4 sm:$0xff]   ;;  %v10620_v49 = vld [vmem:[%s12455_s1 + $0x30c] ss:$48 sps:$4 sm:$0xff]   ;;  %v10601_v53 = vld [vmem:[%s12455_s1 + $0x3c0] ss:$48 sps:$4 sm:$0xff]  }
  0xe1   : > { %v576_v50 = vld [vmem:[#allocation2 + $0x8] sm:$0xff]  ;;  %v10605_v54 = vld [vmem:[%s12455_s1 + $0x424] ss:$48 sps:$4 sm:$0xff]   ;;  %v10607_v57 = vld [vmem:[%s12455_s1 + $0x420] ss:$48 sps:$4 sm:$0xff]   ;;  %vm12104_vm0 = vmmov 0  }
  0xe2   : > { %2898 = vmatpush1.bf16.msra.mxu0 %v10565_v21  ;;  %2984 = vmatpush1.bf16.msra.mxu1 %v10592_v32  ;;  %v580_v51 = vld [vmem:[#allocation2 + $0x28] sm:$0xff]  ;;  %v10611_v58 = vld [vmem:[%s12455_s1 + $0x484] ss:$48 sps:$4 sm:$0xff]   ;;  %v10613_v61 = vld [vmem:[%s12455_s1 + $0x480] ss:$48 sps:$4 sm:$0xff]   ;;  %vm3505_vm1 = vcmask 523264  }
  0xe3   : > { %2899 = vmatprep.subr.bf16.mxu0 %v10566_v24  ;;  %2985 = vmatprep.subr.bf16.mxu1 %v10596_v33  ;;  %v12521_v52 = vpack.c.bf16 %v580_v51, %v576_v50  ;;  %v10622_v55 = vld [vmem:[%s12455_s1 + $0x308] ss:$48 sps:$4 sm:$0xff]   ;;  %v10626_v56 = vld [vmem:[%s12455_s1 + $0x36c] ss:$48 sps:$4 sm:$0xff]   ;;  %v10617_v62 = vld [vmem:[%s12455_s1 + $0x4e4] ss:$48 sps:$4 sm:$0xff]  }
  0xe4   : > { %v10628_v59 = vld [vmem:[%s12455_s1 + $0x368] ss:$48 sps:$4 sm:$0xff]   ;;  %v10632_v60 = vld [vmem:[%s12455_s1 + $0x3cc] ss:$48 sps:$4 sm:$0xff]   ;;  %v10619_v1 = vld [vmem:[%s12455_s1 + $0x4e0] ss:$48 sps:$4 sm:$0xff]  }
  0xe5   : > { %2923 = vmatprep.mubr.bf16.mxu0 %v12521_v52  ;;  %3009 = vmatprep.mubr.bf16.mxu1 %v12521_v52  ;;  %v10634_v63 = vld [vmem:[%s12455_s1 + $0x3c8] ss:$48 sps:$4 sm:$0xff]   ;;  %v10638_v0 = vld [vmem:[%s12455_s1 + $0x42c] ss:$48 sps:$4 sm:$0xff]   ;;  %v10623_v2 = vld [vmem:[%s12455_s1 + $0x544] ss:$48 sps:$4 sm:$0xff]  }
  0xe6   : > { %2900 = vmatpush1.bf16.msra.mxu0 %v10568_v25  ;;  %2986 = vmatpush1.bf16.msra.mxu1 %v10598_v36  ;;  %v10640_v3 = vld [vmem:[%s12455_s1 + $0x428] ss:$48 sps:$4 sm:$0xff]   ;;  %v10644_v4 = vld [vmem:[%s12455_s1 + $0x48c] ss:$48 sps:$4 sm:$0xff]   ;;  %v10625_v5 = vld [vmem:[%s12455_s1 + $0x540] ss:$48 sps:$4 sm:$0xff]  }
  0xe7   : > { %2901 = vmatprep.subr.bf16.mxu0 %v10569_v27  ;;  %2987 = vmatprep.subr.bf16.mxu1 %v10602_v37  ;;  %v10629_v6 = vld [vmem:[%s12455_s1 + $0x5a4] ss:$48 sps:$4 sm:$0xff]   ;;  %v10646_v7 = vld [vmem:[%s12455_s1 + $0x488] ss:$48 sps:$4 sm:$0xff]   ;;  %v10650_v8 = vld [vmem:[%s12455_s1 + $0x4ec] ss:$48 sps:$4 sm:$0xff]  }
  0xe8   : > { %v10631_v9 = vld [vmem:[%s12455_s1 + $0x5a0] ss:$48 sps:$4 sm:$0xff]   ;;  %v10637_v10 = vld [vmem:[%s12455_s1 + $0x604] ss:$48 sps:$4 sm:$0xff]   ;;  %v10652_v13 = vld [vmem:[%s12455_s1 + $0x4e8] ss:$48 sps:$4 sm:$0xff]  }
  0xe9   : > { %v575_v11 = vld [vmem:[#allocation2] sm:$0xff]  ;;  %v10656_v14 = vld [vmem:[%s12455_s1 + $0x54c] ss:$48 sps:$4 sm:$0xff]   ;;  %v10658_v18 = vld [vmem:[%s12455_s1 + $0x548] ss:$48 sps:$4 sm:$0xff]   ;;  %s12105_s23 = smov 64  }
  0xea   : > { %2902 = vmatpush1.bf16.msra.mxu0 %v10571_v30  ;;  %2988 = vmatpush1.bf16.msra.mxu1 %v10604_v40  ;;  %v579_v12 = vld [vmem:[#allocation2 + $0x20] sm:$0xff]  ;;  %v10662_v19 = vld [vmem:[%s12455_s1 + $0x5ac] ss:$48 sps:$4 sm:$0xff]   ;;  %v10664_v22 = vld [vmem:[%s12455_s1 + $0x5a8] ss:$48 sps:$4 sm:$0xff]   ;;  %vm3626_vm2 = vcmask 1043456  }
  0xeb   : > { %2903 = vmatprep.subr.bf16.mxu0 %v10575_v31  ;;  %2989 = vmatprep.subr.bf16.mxu1 %v10608_v41  ;;  %v10635_v15 = vld [vmem:[%s12455_s1 + $0x600] ss:$48 sps:$4 sm:$0xff]   ;;  %v12550_v16 = vpack.c.bf16 %v579_v12, %v575_v11  ;;  %v10643_v17 = vld [vmem:[%s12455_s1 + $0x664] ss:$48 sps:$4 sm:$0xff]   ;;  %v10670_v23 = vld [vmem:[%s12455_s1 + $0x60c] ss:$48 sps:$4 sm:$0xff]  }
  0xec   : > { %v10641_v20 = vld [vmem:[%s12455_s1 + $0x660] ss:$48 sps:$4 sm:$0xff]   ;;  %v10649_v21 = vld [vmem:[%s12455_s1 + $0x6c4] ss:$48 sps:$4 sm:$0xff]   ;;  %v10668_v26 = vld [vmem:[%s12455_s1 + $0x608] ss:$48 sps:$4 sm:$0xff]  }
  0xed   : > { %v10647_v24 = vld [vmem:[%s12455_s1 + $0x6c0] ss:$48 sps:$4 sm:$0xff]   ;;  %v10655_v25 = vld [vmem:[%s12455_s1 + $0x724] ss:$48 sps:$4 sm:$0xff]   ;;  %v10676_v27 = vld [vmem:[%s12455_s1 + $0x66c] ss:$48 sps:$4 sm:$0xff]  }
  0xee   : > { %2904 = vmatpush1.bf16.msra.mxu0 %v10577_v34  ;;  %2990 = vmatpush1.bf16.msra.mxu1 %v10610_v44  ;;  %v10653_v28 = vld [vmem:[%s12455_s1 + $0x720] ss:$48 sps:$4 sm:$0xff]   ;;  %v10661_v29 = vld [vmem:[%s12455_s1 + $0x784] ss:$48 sps:$4 sm:$0xff]   ;;  %v10674_v30 = vld [vmem:[%s12455_s1 + $0x668] ss:$48 sps:$4 sm:$0xff]  }
  0xef   : > { %2905 = vmatprep.subr.bf16.mxu0 %v10581_v35  ;;  %2991 = vmatprep.subr.bf16.mxu1 %v10614_v45  ;;  %v10682_v31 = vld [vmem:[%s12455_s1 + $0x6cc] ss:$48 sps:$4 sm:$0xff]   ;;  %v10659_v32 = vld [vmem:[%s12455_s1 + $0x780] ss:$48 sps:$4 sm:$0xff]   ;;  %v10667_v33 = vld [vmem:[%s12455_s1 + $0x7e4] ss:$48 sps:$4 sm:$0xff]  }
  0xf0   : > { %v10680_v34 = vld [vmem:[%s12455_s1 + $0x6c8] ss:$48 sps:$4 sm:$0xff]   ;;  %v10688_v35 = vld [vmem:[%s12455_s1 + $0x72c] ss:$48 sps:$4 sm:$0xff]   ;;  %v10673_v40 = vld [vmem:[%s12455_s1 + $0x844] ss:$48 sps:$4 sm:$0xff]  }
  0xf1   : > { %v578_v36 = vld [vmem:[#allocation2 + $0x18] sm:$0xff]  ;;  %v10679_v44 = vld [vmem:[%s12455_s1 + $0x8a4] ss:$48 sps:$4 sm:$0xff]   ;;  %v10683_v51 = vld [vmem:[%s12455_s1 + $0x900] ss:$48 sps:$4 sm:$0xff]   ;;  %vm3598_vm3 = vcmask 64512  }
  0xf2   : > { %2906 = vmatpush1.bf16.msra.mxu0 %v10583_v38  ;;  %2992 = vmatpush1.bf16.msra.mxu1 %v10616_v48  ;;  %v582_v37 = vld [vmem:[#allocation2 + $0x38] sm:$0xff]  ;;  %v10685_v48 = vld [vmem:[%s12455_s1 + $0x904] ss:$48 sps:$4 sm:$0xff]   ;;  %v10719_v12 = vld [vmem:[%s12455_s1 + $0xb40] ss:$48 sps:$4 sm:$0xff]   ;;  %vm3952_vm4 = vcmask 1048064  }
  0xf3   : > { %2907 = vmatprep.subr.bf16.mxu0 %v10587_v39  ;;  %2993 = vmatprep.subr.bf16.mxu1 %v10620_v49  ;;  %v12573_v38 = vpack.c.bf16 %v582_v37, %v578_v36  ;;  %v10665_v39 = vld [vmem:[%s12455_s1 + $0x7e0] ss:$48 sps:$4 sm:$0xff]   ;;  %v10686_v41 = vld [vmem:[%s12455_s1 + $0x728] ss:$48 sps:$4 sm:$0xff]   ;;  %v10706_v50 = vld [vmem:[%s12455_s1 + $0x84c] ss:$48 sps:$4 sm:$0xff]  }
  0xf4   : > { %v10692_v45 = vld [vmem:[%s12455_s1 + $0x788] ss:$48 sps:$4 sm:$0xff]   ;;  %v10742_v11 = vld [vmem:[%s12455_s1 + $0xa8c] ss:$48 sps:$4 sm:$0xff]   ;;  %v10749_v36 = vld [vmem:[%s12455_s1 + $0x130] ss:$48 sps:$4 sm:$0xff]  }
  0xf5   : > { %v10698_v49 = vld [vmem:[%s12455_s1 + $0x7e8] ss:$48 sps:$4 sm:$0xff]   ;;  %v10757_v37 = vld [vmem:[%s12455_s1 + $0x194] ss:$48 sps:$4 sm:$0xff]   ;;  %p10031_p0 = scmp.ne.s32.totalorder %s12083_s12, 2 }
  0xf6   : > { %2908 = vmatpush1.bf16.msra.mxu0 %v10589_v42  ;;  %2994 = vmatpush1.bf16.msra.mxu1 %v10622_v55  ;;  %v10694_v42 = vld [vmem:[%s12455_s1 + $0x78c] ss:$48 sps:$4 sm:$0xff]   ;;  %s14094_s18 = sld [smem:[#allocation26_spill]] (!%p10031_p0)  ;;  %s14095_s26 = sld [smem:[#allocation30_spill]] (!%p10031_p0)  ;;  %vm8715_vm5 = vcmask (!%p10031_p0), 1041409   ;;  %vm9000_vm6 = vcmask (!%p10031_p0), 33792  }
  0xf7   : > { %2909 = vmatprep.subr.bf16.mxu0 %v10593_v43  ;;  %2995 = vmatprep.subr.bf16.mxu1 %v10626_v56  ;;  %v10671_v43 = vld [vmem:[%s12455_s1 + $0x840] ss:$48 sps:$4 sm:$0xff]   ;;  %v10712_v55 = vld [vmem:[%s12455_s1 + $0x8ac] ss:$48 sps:$4 sm:$0xff]  }
  0xf8   : > { %v10689_v56 = vld [vmem:[%s12455_s1 + $0x960] ss:$48 sps:$4 sm:$0xff]  }
  0xfa   : > { %2910 = vmatpush1.bf16.msra.mxu0 %v10595_v46  ;;  %2996 = vmatpush1.bf16.msra.mxu1 %v10628_v59  ;;  %v10700_v46 = vld [vmem:[%s12455_s1 + $0x7ec] ss:$48 sps:$4 sm:$0xff]  }
  0xfb   : > { %2911 = vmatprep.subr.bf16.mxu0 %v10599_v47  ;;  %2997 = vmatprep.subr.bf16.mxu1 %v10632_v60  ;;  %v10677_v47 = vld [vmem:[%s12455_s1 + $0x8a0] ss:$48 sps:$4 sm:$0xff]   ;;  %v10718_v59 = vld [vmem:[%s12455_s1 + $0x90c] ss:$48 sps:$4 sm:$0xff]  }
  0xfc   : > { %v10695_v60 = vld [vmem:[%s12455_s1 + $0x9c0] ss:$48 sps:$4 sm:$0xff]  }
  0xfe   : > { %2912 = vmatpush1.bf16.msra.mxu0 %v10601_v53  ;;  %2998 = vmatpush1.bf16.msra.mxu1 %v10634_v63  ;;  %v10691_v53 = vld [vmem:[%s12455_s1 + $0x964] ss:$48 sps:$4 sm:$0xff]   ;;  %v10724_v63 = vld [vmem:[%s12455_s1 + $0x96c] ss:$48 sps:$4 sm:$0xff]  }
  0xff   : > { %2913 = vmatprep.subr.bf16.mxu0 %v10605_v54  ;;  %2999 = vmatprep.subr.bf16.mxu1 %v10638_v0  ;;  %v10704_v54 = vld [vmem:[%s12455_s1 + $0x848] ss:$48 sps:$4 sm:$0xff]   ;;  %v10701_v0 = vld [vmem:[%s12455_s1 + $0xa20] ss:$48 sps:$4 sm:$0xff]  }
 0x102   : > { %2914 = vmatpush1.bf16.msra.mxu0 %v10607_v57  ;;  %3000 = vmatpush1.bf16.msra.mxu1 %v10640_v3  ;;  %v10697_v57 = vld [vmem:[%s12455_s1 + $0x9c4] ss:$48 sps:$4 sm:$0xff]   ;;  %v10730_v3 = vld [vmem:[%s12455_s1 + $0x9cc] ss:$48 sps:$4 sm:$0xff]  }
 0x103   : > { %2915 = vmatprep.subr.bf16.mxu0 %v10611_v58  ;;  %3001 = vmatprep.subr.bf16.mxu1 %v10644_v4  ;;  %v10710_v58 = vld [vmem:[%s12455_s1 + $0x8a8] ss:$48 sps:$4 sm:$0xff]   ;;  %v10707_v4 = vld [vmem:[%s12455_s1 + $0xa80] ss:$48 sps:$4 sm:$0xff]  }
 0x106   : > { %2916 = vmatpush1.bf16.msra.mxu0 %v10613_v61  ;;  %3002 = vmatpush1.bf16.msra.mxu1 %v10646_v7  ;;  %v10703_v61 = vld [vmem:[%s12455_s1 + $0xa24] ss:$48 sps:$4 sm:$0xff]   ;;  %v10736_v7 = vld [vmem:[%s12455_s1 + $0xa2c] ss:$48 sps:$4 sm:$0xff]  }
 0x107   : > { %2917 = vmatprep.subr.bf16.mxu0 %v10617_v62  ;;  %3003 = vmatprep.subr.bf16.mxu1 %v10650_v8  ;;  %v10716_v62 = vld [vmem:[%s12455_s1 + $0x908] ss:$48 sps:$4 sm:$0xff]   ;;  %v10713_v8 = vld [vmem:[%s12455_s1 + $0xae0] ss:$48 sps:$4 sm:$0xff]  }
 0x10a   : > { %2918 = vmatpush1.bf16.msra.mxu0 %v10619_v1  ;;  %3004 = vmatpush1.bf16.msra.mxu1 %v10652_v13  ;;  %v10709_v1 = vld [vmem:[%s12455_s1 + $0xa84] ss:$48 sps:$4 sm:$0xff]  }
 0x10b   : > { %2919 = vmatprep.subr.bf16.mxu0 %v10623_v2  ;;  %3005 = vmatprep.subr.bf16.mxu1 %v10656_v14  ;;  %v10722_v2 = vld [vmem:[%s12455_s1 + $0x968] ss:$48 sps:$4 sm:$0xff]   ;;  %v10727_v13 = vld [vmem:[%s12455_s1 + $0xba4] ss:$48 sps:$4 sm:$0xff]  }
 0x10c   : > { %v10740_v14 = vld [vmem:[%s12455_s1 + $0xa88] ss:$48 sps:$4 sm:$0xff]  }
 0x10e   : > { %2920 = vmatpush1.bf16.msra.mxu0 %v10625_v5  ;;  %3006 = vmatpush1.bf16.msra.mxu1 %v10658_v18  ;;  %v10715_v5 = vld [vmem:[%s12455_s1 + $0xae4] ss:$48 sps:$4 sm:$0xff]  }
 0x10f   : > { %2921 = vmatprep.subr.bf16.mxu0 %v10629_v6  ;;  %3007 = vmatprep.subr.bf16.mxu1 %v10662_v19  ;;  %v10728_v6 = vld [vmem:[%s12455_s1 + $0x9c8] ss:$48 sps:$4 sm:$0xff]   ;;  %v577_v18 = vld [vmem:[#allocation2 + $0x10] sm:$0xff] }
 0x110   : > { %v581_v19 = vld [vmem:[#allocation2 + $0x30] sm:$0xff] }
 0x112   : > { %2922 = vmatpush1.bf16.msra.mxu0 %v10631_v9  ;;  %3008 = vmatpush1.bf16.msra.mxu1 %v10664_v22  ;;  %v10721_v9 = vld [vmem:[%s12455_s1 + $0xb44] ss:$48 sps:$4 sm:$0xff]   ;;  %v10754_v22 = vld [vmem:[%s12455_s1 + $0xb4c] ss:$48 sps:$4 sm:$0xff]  }
 0x113   : > { %2934 = vmatprep.subr.bf16.mxu0 %v10637_v10  ;;  %3020 = vmatprep.subr.bf16.mxu1 %v10670_v23  ;;  %v10734_v10 = vld [vmem:[%s12455_s1 + $0xa28] ss:$48 sps:$4 sm:$0xff]   ;;  %v12621_v23 = vpack.c.bf16 %v581_v19, %v577_v18  ;;  %v10838_v18 = vld [vmem:[%s12455_s1 + $0x49c] ss:$48 sps:$4 sm:$0xff]   ;;  %v10815_v19 = vld [vmem:[%s12455_s1 + $0x550] ss:$48 sps:$4 sm:$0xff]  }
 0x115   : > { %2924 = vmatmul.mubr.bf16.vlgmr.msra.gmra.mrb[0].mxu0 %v12550_v16  ;;  %3010 = vmatmul.mubr.bf16.vlgmr.msra.gmra.mrb[0].mxu1 %v12550_v16 }
 0x116   : > { %2935 = vmatpush1.bf16.msra.mxu0 %v10635_v15  ;;  %3021 = vmatpush1.bf16.msra.mxu1 %v10668_v26  ;;  %v10748_v15 = vld [vmem:[%s12455_s1 + $0xaec] ss:$48 sps:$4 sm:$0xff]   ;;  %v10752_v26 = vld [vmem:[%s12455_s1 + $0xb48] ss:$48 sps:$4 sm:$0xff]  }
 0x117   : > { %2936 = vmatprep.subr.bf16.mxu0 %v10643_v17  ;;  %3022 = vmatprep.subr.bf16.mxu1 %v10676_v27  ;;  %v10725_v17 = vld [vmem:[%s12455_s1 + $0xba0] ss:$48 sps:$4 sm:$0xff]   ;;  %v10760_v27 = vld [vmem:[%s12455_s1 + $0xbac] ss:$48 sps:$4 sm:$0xff]  }
 0x118   : > { %2966 = vmatprep.mubr.bf16.mxu0 %v12573_v38  ;;  %3052 = vmatprep.mubr.bf16.mxu1 %v12573_v38 }
 0x11a   : > { %2937 = vmatpush1.bf16.msra.mxu0 %v10641_v20  ;;  %3023 = vmatpush1.bf16.msra.mxu1 %v10674_v30  ;;  %v10733_v20 = vld [vmem:[%s12455_s1 + $0x14] ss:$48 sps:$4 sm:$0xff]   ;;  %v10758_v30 = vld [vmem:[%s12455_s1 + $0xba8] ss:$48 sps:$4 sm:$0xff]  }
 0x11b   : > { %2938 = vmatprep.subr.bf16.mxu0 %v10649_v21  ;;  %3024 = vmatprep.subr.bf16.mxu1 %v10682_v31  ;;  %v10746_v21 = vld [vmem:[%s12455_s1 + $0xae8] ss:$48 sps:$4 sm:$0xff]   ;;  %v10766_v31 = vld [vmem:[%s12455_s1 + $0x1c] ss:$48 sps:$4 sm:$0xff]  }
 0x11e   : > { %2939 = vmatpush1.bf16.msra.mxu0 %v10647_v24  ;;  %3025 = vmatpush1.bf16.msra.mxu1 %v10680_v34  ;;  %v10731_v24 = vld [vmem:[%s12455_s1 + $0x10] ss:$48 sps:$4 sm:$0xff]   ;;  %v10764_v34 = vld [vmem:[%s12455_s1 + $0x18] ss:$48 sps:$4 sm:$0xff]  }
 0x11f   : > { %2940 = vmatprep.subr.bf16.mxu0 %v10655_v25  ;;  %3026 = vmatprep.subr.bf16.mxu1 %v10688_v35  ;;  %v10739_v25 = vld [vmem:[%s12455_s1 + $0x74] ss:$48 sps:$4 sm:$0xff]   ;;  %v10772_v35 = vld [vmem:[%s12455_s1 + $0x7c] ss:$48 sps:$4 sm:$0xff]  }
 0x122   : > { %2941 = vmatpush1.bf16.msra.mxu0 %v10653_v28  ;;  %3027 = vmatpush1.bf16.msra.mxu1 %v10686_v41  ;;  %v10737_v28 = vld [vmem:[%s12455_s1 + $0x70] ss:$48 sps:$4 sm:$0xff]  }
 0x123   : > { %2942 = vmatprep.subr.bf16.mxu0 %v10661_v29  ;;  %3028 = vmatprep.subr.bf16.mxu1 %v10694_v42  ;;  %v10745_v29 = vld [vmem:[%s12455_s1 + $0xd4] ss:$48 sps:$4 sm:$0xff]   ;;  %v10755_v41 = vld [vmem:[%s12455_s1 + $0x190] ss:$48 sps:$4 sm:$0xff]  }
 0x124   : > { %v10763_v42 = vld [vmem:[%s12455_s1 + $0x1f4] ss:$48 sps:$4 sm:$0xff]  }
 0x126   : > { %2943 = vmatpush1.bf16.msra.mxu0 %v10659_v32  ;;  %3029 = vmatpush1.bf16.msra.mxu1 %v10692_v45  ;;  %v10743_v32 = vld [vmem:[%s12455_s1 + $0xd0] ss:$48 sps:$4 sm:$0xff]  }
 0x127   : > { %2944 = vmatprep.subr.bf16.mxu0 %v10667_v33  ;;  %3030 = vmatprep.subr.bf16.mxu1 %v10700_v46  ;;  %v10751_v33 = vld [vmem:[%s12455_s1 + $0x134] ss:$48 sps:$4 sm:$0xff]   ;;  %v10761_v45 = vld [vmem:[%s12455_s1 + $0x1f0] ss:$48 sps:$4 sm:$0xff]  }
 0x128   : > { %v10769_v46 = vld [vmem:[%s12455_s1 + $0x254] ss:$48 sps:$4 sm:$0xff]  }
 0x12a   : > { %2945 = vmatpush1.bf16.msra.mxu0 %v10665_v39  ;;  %3031 = vmatpush1.bf16.msra.mxu1 %v10698_v49  ;;  %v10770_v39 = vld [vmem:[%s12455_s1 + $0x78] ss:$48 sps:$4 sm:$0xff]   ;;  %v10767_v49 = vld [vmem:[%s12455_s1 + $0x250] ss:$48 sps:$4 sm:$0xff]  }
 0x12b   : > { %2946 = vmatprep.subr.bf16.mxu0 %v10673_v40  ;;  %3032 = vmatprep.subr.bf16.mxu1 %v10706_v50  ;;  %v10778_v40 = vld [vmem:[%s12455_s1 + $0xdc] ss:$48 sps:$4 sm:$0xff]   ;;  %v10775_v50 = vld [vmem:[%s12455_s1 + $0x2b4] ss:$48 sps:$4 sm:$0xff]  }
 0x12e   : > { %2947 = vmatpush1.bf16.msra.mxu0 %v10671_v43  ;;  %3033 = vmatpush1.bf16.msra.mxu1 %v10704_v54  ;;  %v10776_v43 = vld [vmem:[%s12455_s1 + $0xd8] ss:$48 sps:$4 sm:$0xff]   ;;  %v10773_v54 = vld [vmem:[%s12455_s1 + $0x2b0] ss:$48 sps:$4 sm:$0xff]  }
 0x12f   : > { %2948 = vmatprep.subr.bf16.mxu0 %v10679_v44  ;;  %3034 = vmatprep.subr.bf16.mxu1 %v10712_v55  ;;  %v10784_v44 = vld [vmem:[%s12455_s1 + $0x13c] ss:$48 sps:$4 sm:$0xff]   ;;  %v10781_v55 = vld [vmem:[%s12455_s1 + $0x314] ss:$48 sps:$4 sm:$0xff]  }
 0x132   : > { %2949 = vmatpush1.bf16.msra.mxu0 %v10677_v47  ;;  %3035 = vmatpush1.bf16.msra.mxu1 %v10710_v58  ;;  %v10782_v47 = vld [vmem:[%s12455_s1 + $0x138] ss:$48 sps:$4 sm:$0xff]   ;;  %v10779_v58 = vld [vmem:[%s12455_s1 + $0x310] ss:$48 sps:$4 sm:$0xff]  }
 0x133   : > { %2950 = vmatprep.subr.bf16.mxu0 %v10685_v48  ;;  %3036 = vmatprep.subr.bf16.mxu1 %v10718_v59  ;;  %v10790_v48 = vld [vmem:[%s12455_s1 + $0x19c] ss:$48 sps:$4 sm:$0xff]   ;;  %v10787_v59 = vld [vmem:[%s12455_s1 + $0x374] ss:$48 sps:$4 sm:$0xff]  }
 0x136   : > { %2951 = vmatpush1.bf16.msra.mxu0 %v10683_v51  ;;  %3037 = vmatpush1.bf16.msra.mxu1 %v10716_v62  ;;  %v10788_v51 = vld [vmem:[%s12455_s1 + $0x198] ss:$48 sps:$4 sm:$0xff]   ;;  %v10785_v62 = vld [vmem:[%s12455_s1 + $0x370] ss:$48 sps:$4 sm:$0xff]  }
 0x137   : > { %2952 = vmatprep.subr.bf16.mxu0 %v10691_v53  ;;  %3038 = vmatprep.subr.bf16.mxu1 %v10724_v63  ;;  %v10796_v53 = vld [vmem:[%s12455_s1 + $0x1fc] ss:$48 sps:$4 sm:$0xff]   ;;  %v10793_v63 = vld [vmem:[%s12455_s1 + $0x3d4] ss:$48 sps:$4 sm:$0xff]  }
 0x13a   : > { %2953 = vmatpush1.bf16.msra.mxu0 %v10689_v56  ;;  %3039 = vmatpush1.bf16.msra.mxu1 %v10722_v2  ;;  %v10794_v56 = vld [vmem:[%s12455_s1 + $0x1f8] ss:$48 sps:$4 sm:$0xff]   ;;  %v10791_v2 = vld [vmem:[%s12455_s1 + $0x3d0] ss:$48 sps:$4 sm:$0xff]  }
 0x13b   : > { %2954 = vmatprep.subr.bf16.mxu0 %v10697_v57  ;;  %3040 = vmatprep.subr.bf16.mxu1 %v10730_v3  ;;  %v10802_v57 = vld [vmem:[%s12455_s1 + $0x25c] ss:$48 sps:$4 sm:$0xff]   ;;  %v10799_v3 = vld [vmem:[%s12455_s1 + $0x434] ss:$48 sps:$4 sm:$0xff]  }
 0x13e   : > { %2955 = vmatpush1.bf16.msra.mxu0 %v10695_v60  ;;  %3041 = vmatpush1.bf16.msra.mxu1 %v10728_v6  ;;  %v10800_v60 = vld [vmem:[%s12455_s1 + $0x258] ss:$48 sps:$4 sm:$0xff]   ;;  %v10797_v6 = vld [vmem:[%s12455_s1 + $0x430] ss:$48 sps:$4 sm:$0xff]  }
 0x13f   : > { %2956 = vmatprep.subr.bf16.mxu0 %v10703_v61  ;;  %3042 = vmatprep.subr.bf16.mxu1 %v10736_v7  ;;  %v10808_v61 = vld [vmem:[%s12455_s1 + $0x2bc] ss:$48 sps:$4 sm:$0xff]   ;;  %v10805_v7 = vld [vmem:[%s12455_s1 + $0x494] ss:$48 sps:$4 sm:$0xff]  }
 0x142   : > { %2957 = vmatpush1.bf16.msra.mxu0 %v10701_v0  ;;  %3043 = vmatpush1.bf16.msra.mxu1 %v10734_v10  ;;  %v10806_v0 = vld [vmem:[%s12455_s1 + $0x2b8] ss:$48 sps:$4 sm:$0xff]   ;;  %v10803_v10 = vld [vmem:[%s12455_s1 + $0x490] ss:$48 sps:$4 sm:$0xff]  }
 0x143   : > { %2958 = vmatprep.subr.bf16.mxu0 %v10709_v1  ;;  %3044 = vmatprep.subr.bf16.mxu1 %v10742_v11  ;;  %v10814_v1 = vld [vmem:[%s12455_s1 + $0x31c] ss:$48 sps:$4 sm:$0xff]   ;;  %v10811_v11 = vld [vmem:[%s12455_s1 + $0x4f4] ss:$48 sps:$4 sm:$0xff]  }
 0x146   : > { %2959 = vmatpush1.bf16.msra.mxu0 %v10707_v4  ;;  %3045 = vmatpush1.bf16.msra.mxu1 %v10740_v14  ;;  %v10812_v4 = vld [vmem:[%s12455_s1 + $0x318] ss:$48 sps:$4 sm:$0xff]   ;;  %v10809_v14 = vld [vmem:[%s12455_s1 + $0x4f0] ss:$48 sps:$4 sm:$0xff]  }
 0x147   : > { %2960 = vmatprep.subr.bf16.mxu0 %v10715_v5  ;;  %3046 = vmatprep.subr.bf16.mxu1 %v10748_v15  ;;  %v10820_v5 = vld [vmem:[%s12455_s1 + $0x37c] ss:$48 sps:$4 sm:$0xff]   ;;  %v10817_v15 = vld [vmem:[%s12455_s1 + $0x554] ss:$48 sps:$4 sm:$0xff]  }
 0x14a   : > { %2961 = vmatpush1.bf16.msra.mxu0 %v10713_v8  ;;  %3047 = vmatpush1.bf16.msra.mxu1 %v10746_v21  ;;  %v10818_v8 = vld [vmem:[%s12455_s1 + $0x378] ss:$48 sps:$4 sm:$0xff]  }
 0x14b   : > { %2962 = vmatprep.subr.bf16.mxu0 %v10721_v9  ;;  %3048 = vmatprep.subr.bf16.mxu1 %v10754_v22  ;;  %v10826_v9 = vld [vmem:[%s12455_s1 + $0x3dc] ss:$48 sps:$4 sm:$0xff]   ;;  %v10836_v21 = vld [vmem:[%s12455_s1 + $0x498] ss:$48 sps:$4 sm:$0xff]  }
 0x14c   : > { %v10844_v22 = vld [vmem:[%s12455_s1 + $0x4fc] ss:$48 sps:$4 sm:$0xff]  }
 0x14e   : > { %2963 = vmatpush1.bf16.msra.mxu0 %v10719_v12  ;;  %3049 = vmatpush1.bf16.msra.mxu1 %v10752_v26  ;;  %v10824_v12 = vld [vmem:[%s12455_s1 + $0x3d8] ss:$48 sps:$4 sm:$0xff]  }
 0x14f   : > { %2964 = vmatprep.subr.bf16.mxu0 %v10727_v13  ;;  %3050 = vmatprep.subr.bf16.mxu1 %v10760_v27  ;;  %v10832_v13 = vld [vmem:[%s12455_s1 + $0x43c] ss:$48 sps:$4 sm:$0xff]   ;;  %v10842_v26 = vld [vmem:[%s12455_s1 + $0x4f8] ss:$48 sps:$4 sm:$0xff]  }
 0x150   : > { %v10850_v27 = vld [vmem:[%s12455_s1 + $0x55c] ss:$48 sps:$4 sm:$0xff]  }
 0x152   : > { %2965 = vmatpush1.bf16.msra.mxu0 %v10725_v17  ;;  %3051 = vmatpush1.bf16.msra.mxu1 %v10758_v30  ;;  %v10830_v17 = vld [vmem:[%s12455_s1 + $0x438] ss:$48 sps:$4 sm:$0xff]  }
 0x153   : > { %3063 = vmatprep.subr.bf16.mxu0 %v10733_v20  ;;  %3149 = vmatprep.subr.bf16.mxu1 %v10766_v31  ;;  %v10823_v20 = vld [vmem:[%s12455_s1 + $0x5b4] ss:$48 sps:$4 sm:$0xff]   ;;  %v10848_v30 = vld [vmem:[%s12455_s1 + $0x558] ss:$48 sps:$4 sm:$0xff]   ;;  %v10856_v31 = vld [vmem:[%s12455_s1 + $0x5bc] ss:$48 sps:$4 sm:$0xff]  }
 0x155   : > { %2967 = vmatmul.mubr.bf16.vlgmr.msra.gmra.mrb[0].mxu0 %v12621_v23  ;;  %3053 = vmatmul.mubr.bf16.vlgmr.msra.gmra.mrb[0].mxu1 %v12621_v23 }
 0x156   : > { %3064 = vmatpush1.bf16.msra.mxu0 %v10731_v24  ;;  %3095 = vmatprep.mubr.bf16.mxu0 %v12521_v52  ;;  %v10821_v24 = vld [vmem:[%s12455_s1 + $0x5b0] ss:$48 sps:$4 sm:$0xff]  }
 0x157   : > { %3065 = vmatprep.subr.bf16.mxu0 %v10739_v25  ;;  %3150 = vmatpush1.bf16.msra.mxu1 %v10764_v34  ;;  %v10829_v25 = vld [vmem:[%s12455_s1 + $0x614] ss:$48 sps:$4 sm:$0xff]   ;;  %v10854_v34 = vld [vmem:[%s12455_s1 + $0x5b8] ss:$48 sps:$4 sm:$0xff]  }
 0x158   : > { %3151 = vmatprep.subr.bf16.mxu1 %v10772_v35  ;;  %3181 = vmatprep.mubr.bf16.mxu1 %v12521_v52  ;;  %v10862_v35 = vld [vmem:[%s12455_s1 + $0x61c] ss:$48 sps:$4 sm:$0xff]  }
 0x15a   : > { %3066 = vmatpush1.bf16.msra.mxu0 %v10737_v28  ;;  %v10827_v28 = vld [vmem:[%s12455_s1 + $0x610] ss:$48 sps:$4 sm:$0xff]  }
 0x15b   : > { %3067 = vmatprep.subr.bf16.mxu0 %v10745_v29  ;;  %3152 = vmatpush1.bf16.msra.mxu1 %v10770_v39  ;;  %v10835_v29 = vld [vmem:[%s12455_s1 + $0x674] ss:$48 sps:$4 sm:$0xff]   ;;  %v10860_v39 = vld [vmem:[%s12455_s1 + $0x618] ss:$48 sps:$4 sm:$0xff]  }
 0x15c   : > { %3153 = vmatprep.subr.bf16.mxu1 %v10778_v40  ;;  %v10868_v40 = vld [vmem:[%s12455_s1 + $0x67c] ss:$48 sps:$4 sm:$0xff]  }
 0x15e   : > { %3068 = vmatpush1.bf16.msra.mxu0 %v10743_v32  ;;  %v10833_v32 = vld [vmem:[%s12455_s1 + $0x670] ss:$48 sps:$4 sm:$0xff]  }
 0x15f   : > { %3069 = vmatprep.subr.bf16.mxu0 %v10751_v33  ;;  %3154 = vmatpush1.bf16.msra.mxu1 %v10776_v43  ;;  %v10841_v33 = vld [vmem:[%s12455_s1 + $0x6d4] ss:$48 sps:$4 sm:$0xff]   ;;  %v10866_v43 = vld [vmem:[%s12455_s1 + $0x678] ss:$48 sps:$4 sm:$0xff]  }
 0x160   : > { %3155 = vmatprep.subr.bf16.mxu1 %v10784_v44  ;;  %v10874_v44 = vld [vmem:[%s12455_s1 + $0x6dc] ss:$48 sps:$4 sm:$0xff]  }
 0x162   : > { %3070 = vmatpush1.bf16.msra.mxu0 %v10749_v36  ;;  %v10839_v36 = vld [vmem:[%s12455_s1 + $0x6d0] ss:$48 sps:$4 sm:$0xff]  }
 0x163   : > { %3071 = vmatprep.subr.bf16.mxu0 %v10757_v37  ;;  %3156 = vmatpush1.bf16.msra.mxu1 %v10782_v47  ;;  %v10847_v37 = vld [vmem:[%s12455_s1 + $0x734] ss:$48 sps:$4 sm:$0xff]   ;;  %v10872_v47 = vld [vmem:[%s12455_s1 + $0x6d8] ss:$48 sps:$4 sm:$0xff]  }
 0x164   : > { %3157 = vmatprep.subr.bf16.mxu1 %v10790_v48  ;;  %v10880_v48 = vld [vmem:[%s12455_s1 + $0x73c] ss:$48 sps:$4 sm:$0xff]  }
 0x166   : > { %3072 = vmatpush1.bf16.msra.mxu0 %v10755_v41  ;;  %v10845_v41 = vld [vmem:[%s12455_s1 + $0x730] ss:$48 sps:$4 sm:$0xff]  }
 0x167   : > { %3073 = vmatprep.subr.bf16.mxu0 %v10763_v42  ;;  %3158 = vmatpush1.bf16.msra.mxu1 %v10788_v51  ;;  %v10853_v42 = vld [vmem:[%s12455_s1 + $0x794] ss:$48 sps:$4 sm:$0xff]   ;;  %v10878_v51 = vld [vmem:[%s12455_s1 + $0x738] ss:$48 sps:$4 sm:$0xff]  }
 0x168   : > { %3159 = vmatprep.subr.bf16.mxu1 %v10796_v53  ;;  %v10886_v53 = vld [vmem:[%s12455_s1 + $0x79c] ss:$48 sps:$4 sm:$0xff]  }
 0x16a   : > { %3074 = vmatpush1.bf16.msra.mxu0 %v10761_v45  ;;  %v10851_v45 = vld [vmem:[%s12455_s1 + $0x790] ss:$48 sps:$4 sm:$0xff]  }
 0x16b   : > { %3075 = vmatprep.subr.bf16.mxu0 %v10769_v46  ;;  %3160 = vmatpush1.bf16.msra.mxu1 %v10794_v56  ;;  %v10859_v46 = vld [vmem:[%s12455_s1 + $0x7f4] ss:$48 sps:$4 sm:$0xff]   ;;  %v10884_v56 = vld [vmem:[%s12455_s1 + $0x798] ss:$48 sps:$4 sm:$0xff]  }
 0x16c   : > { %3161 = vmatprep.subr.bf16.mxu1 %v10802_v57  ;;  %v10892_v57 = vld [vmem:[%s12455_s1 + $0x7fc] ss:$48 sps:$4 sm:$0xff]  }
 0x16e   : > { %3076 = vmatpush1.bf16.msra.mxu0 %v10767_v49  ;;  %v10857_v49 = vld [vmem:[%s12455_s1 + $0x7f0] ss:$48 sps:$4 sm:$0xff]  }
 0x16f   : > { %3077 = vmatprep.subr.bf16.mxu0 %v10775_v50  ;;  %3162 = vmatpush1.bf16.msra.mxu1 %v10800_v60  ;;  %v10865_v50 = vld [vmem:[%s12455_s1 + $0x854] ss:$48 sps:$4 sm:$0xff]   ;;  %v10890_v60 = vld [vmem:[%s12455_s1 + $0x7f8] ss:$48 sps:$4 sm:$0xff]  }
 0x170   : > { %3163 = vmatprep.subr.bf16.mxu1 %v10808_v61  ;;  %v10898_v61 = vld [vmem:[%s12455_s1 + $0x85c] ss:$48 sps:$4 sm:$0xff]  }
 0x172   : > { %3078 = vmatpush1.bf16.msra.mxu0 %v10773_v54  ;;  %v10863_v54 = vld [vmem:[%s12455_s1 + $0x850] ss:$48 sps:$4 sm:$0xff]  }
 0x173   : > { %3079 = vmatprep.subr.bf16.mxu0 %v10781_v55  ;;  %3164 = vmatpush1.bf16.msra.mxu1 %v10806_v0  ;;  %v10871_v55 = vld [vmem:[%s12455_s1 + $0x8b4] ss:$48 sps:$4 sm:$0xff]   ;;  %v10896_v0 = vld [vmem:[%s12455_s1 + $0x858] ss:$48 sps:$4 sm:$0xff]  }
 0x174   : > { %3165 = vmatprep.subr.bf16.mxu1 %v10814_v1  ;;  %v10904_v1 = vld [vmem:[%s12455_s1 + $0x8bc] ss:$48 sps:$4 sm:$0xff]  }
 0x176   : > { %3080 = vmatpush1.bf16.msra.mxu0 %v10779_v58  ;;  %v10869_v58 = vld [vmem:[%s12455_s1 + $0x8b0] ss:$48 sps:$4 sm:$0xff]  }
 0x177   : > { %3081 = vmatprep.subr.bf16.mxu0 %v10787_v59  ;;  %3166 = vmatpush1.bf16.msra.mxu1 %v10812_v4  ;;  %v10877_v59 = vld [vmem:[%s12455_s1 + $0x914] ss:$48 sps:$4 sm:$0xff]   ;;  %v10902_v4 = vld [vmem:[%s12455_s1 + $0x8b8] ss:$48 sps:$4 sm:$0xff]  }
 0x178   : > { %3167 = vmatprep.subr.bf16.mxu1 %v10820_v5  ;;  %v10910_v5 = vld [vmem:[%s12455_s1 + $0x91c] ss:$48 sps:$4 sm:$0xff]  }
 0x17a   : > { %3082 = vmatpush1.bf16.msra.mxu0 %v10785_v62  ;;  %v10875_v62 = vld [vmem:[%s12455_s1 + $0x910] ss:$48 sps:$4 sm:$0xff]  }
 0x17b   : > { %3083 = vmatprep.subr.bf16.mxu0 %v10793_v63  ;;  %3168 = vmatpush1.bf16.msra.mxu1 %v10818_v8  ;;  %v10883_v63 = vld [vmem:[%s12455_s1 + $0x974] ss:$48 sps:$4 sm:$0xff]   ;;  %v10908_v8 = vld [vmem:[%s12455_s1 + $0x918] ss:$48 sps:$4 sm:$0xff]  }
 0x17c   : > { %3169 = vmatprep.subr.bf16.mxu1 %v10826_v9  ;;  %v10916_v9 = vld [vmem:[%s12455_s1 + $0x97c] ss:$48 sps:$4 sm:$0xff]  }
 0x17e   : > { %3084 = vmatpush1.bf16.msra.mxu0 %v10791_v2  ;;  %v10881_v2 = vld [vmem:[%s12455_s1 + $0x970] ss:$48 sps:$4 sm:$0xff]  }
 0x17f   : > { %3085 = vmatprep.subr.bf16.mxu0 %v10799_v3  ;;  %3170 = vmatpush1.bf16.msra.mxu1 %v10824_v12  ;;  %v10889_v3 = vld [vmem:[%s12455_s1 + $0x9d4] ss:$48 sps:$4 sm:$0xff]   ;;  %v10914_v12 = vld [vmem:[%s12455_s1 + $0x978] ss:$48 sps:$4 sm:$0xff]  }
 0x180   : > { %3171 = vmatprep.subr.bf16.mxu1 %v10832_v13  ;;  %v10922_v13 = vld [vmem:[%s12455_s1 + $0x9dc] ss:$48 sps:$4 sm:$0xff]  }
 0x182   : > { %3086 = vmatpush1.bf16.msra.mxu0 %v10797_v6  ;;  %v10887_v6 = vld [vmem:[%s12455_s1 + $0x9d0] ss:$48 sps:$4 sm:$0xff]  }
 0x183   : > { %3087 = vmatprep.subr.bf16.mxu0 %v10805_v7  ;;  %3172 = vmatpush1.bf16.msra.mxu1 %v10830_v17  ;;  %v10895_v7 = vld [vmem:[%s12455_s1 + $0xa34] ss:$48 sps:$4 sm:$0xff]   ;;  %v10920_v17 = vld [vmem:[%s12455_s1 + $0x9d8] ss:$48 sps:$4 sm:$0xff]  }
 0x184   : > { %3173 = vmatprep.subr.bf16.mxu1 %v10838_v18  ;;  %v10925_v18 = vld [vmem:[%s12455_s1 + $0xa3c] ss:$48 sps:$4 sm:$0xff]  }
 0x186   : > { %3088 = vmatpush1.bf16.msra.mxu0 %v10803_v10  ;;  %v10893_v10 = vld [vmem:[%s12455_s1 + $0xa30] ss:$48 sps:$4 sm:$0xff]  }
 0x187   : > { %3089 = vmatprep.subr.bf16.mxu0 %v10811_v11  ;;  %3174 = vmatpush1.bf16.msra.mxu1 %v10836_v21  ;;  %v10901_v11 = vld [vmem:[%s12455_s1 + $0xa94] ss:$48 sps:$4 sm:$0xff]   ;;  %v10923_v21 = vld [vmem:[%s12455_s1 + $0xa38] ss:$48 sps:$4 sm:$0xff]  }
 0x188   : > { %3175 = vmatprep.subr.bf16.mxu1 %v10844_v22  ;;  %v10928_v22 = vld [vmem:[%s12455_s1 + $0xa9c] ss:$48 sps:$4 sm:$0xff]  }
 0x18a   : > { %3090 = vmatpush1.bf16.msra.mxu0 %v10809_v14  ;;  %v10899_v14 = vld [vmem:[%s12455_s1 + $0xa90] ss:$48 sps:$4 sm:$0xff]  }
 0x18b   : > { %3091 = vmatprep.subr.bf16.mxu0 %v10817_v15  ;;  %3176 = vmatpush1.bf16.msra.mxu1 %v10842_v26  ;;  %v10907_v15 = vld [vmem:[%s12455_s1 + $0xaf4] ss:$48 sps:$4 sm:$0xff]   ;;  %v10926_v26 = vld [vmem:[%s12455_s1 + $0xa98] ss:$48 sps:$4 sm:$0xff]  }
 0x18c   : > { %3177 = vmatprep.subr.bf16.mxu1 %v10850_v27  ;;  %v10931_v27 = vld [vmem:[%s12455_s1 + $0xafc] ss:$48 sps:$4 sm:$0xff]  }
 0x18e   : > { %3092 = vmatpush1.bf16.msra.mxu0 %v10815_v19  ;;  %v10905_v19 = vld [vmem:[%s12455_s1 + $0xaf0] ss:$48 sps:$4 sm:$0xff]  }
 0x18f   : > { %3093 = vmatprep.subr.bf16.mxu0 %v10823_v20  ;;  %3178 = vmatpush1.bf16.msra.mxu1 %v10848_v30  ;;  %v10913_v20 = vld [vmem:[%s12455_s1 + $0xb54] ss:$48 sps:$4 sm:$0xff]   ;;  %v10934_v30 = vld [vmem:[%s12455_s1 + $0xb5c] ss:$48 sps:$4 sm:$0xff]  }
 0x190   : > { %3179 = vmatprep.subr.bf16.mxu1 %v10856_v31  ;;  %v10940_v31 = vld [vmem:[%s12455_s1 + $0x24] ss:$48 sps:$4 sm:$0xff]  }
 0x192   : > { %3094 = vmatpush1.bf16.msra.mxu0 %v10821_v24  ;;  %v10911_v24 = vld [vmem:[%s12455_s1 + $0xb50] ss:$48 sps:$4 sm:$0xff]  }
 0x193   : > { %3106 = vmatprep.subr.bf16.mxu0 %v10829_v25  ;;  %3180 = vmatpush1.bf16.msra.mxu1 %v10854_v34  ;;  %v10919_v25 = vld [vmem:[%s12455_s1 + $0xbb4] ss:$48 sps:$4 sm:$0xff]   ;;  %v10938_v34 = vld [vmem:[%s12455_s1 + $0x20] ss:$48 sps:$4 sm:$0xff]  }
 0x194   : > { %3192 = vmatprep.subr.bf16.mxu1 %v10862_v35  ;;  %v10943_v35 = vld [vmem:[%s12455_s1 + $0x84] ss:$48 sps:$4 sm:$0xff]  }
 0x195   : > { %3096 = vmatmul.mubr.bf16.vlgmr.msra.gmra.mrb[4].mxu0 %v12550_v16 }
 0x196   : > { %3107 = vmatpush1.bf16.msra.mxu0 %v10827_v28  ;;  %3138 = vmatprep.mubr.bf16.mxu0 %v12573_v38  ;;  %v10917_v28 = vld [vmem:[%s12455_s1 + $0xbb0] ss:$48 sps:$4 sm:$0xff]  }
 0x197   : > { %3108 = vmatprep.subr.bf16.mxu0 %v10835_v29  ;;  %3182 = vmatmul.mubr.bf16.vlgmr.msra.gmra.mrb[4].mxu1 %v12550_v16  ;;  %v10929_v29 = vld [vmem:[%s12455_s1 + $0xaf8] ss:$48 sps:$4 sm:$0xff]  }
 0x198   : > { %3193 = vmatpush1.bf16.msra.mxu1 %v10860_v39  ;;  %3224 = vmatprep.mubr.bf16.mxu1 %v12573_v38  ;;  %v10946_v39 = vld [vmem:[%s12455_s1 + $0x2c] ss:$48 sps:$4 sm:$0xff]  }
 0x199   : > { %3194 = vmatprep.subr.bf16.mxu1 %v10868_v40  ;;  %v10949_v40 = vld [vmem:[%s12455_s1 + $0xe4] ss:$48 sps:$4 sm:$0xff]  }
 0x19a   : > { %3109 = vmatpush1.bf16.msra.mxu0 %v10833_v32  ;;  %v10932_v32 = vld [vmem:[%s12455_s1 + $0xb58] ss:$48 sps:$4 sm:$0xff]  }
 0x19b   : > { %3110 = vmatprep.subr.bf16.mxu0 %v10841_v33  ;;  %v10937_v33 = vld [vmem:[%s12455_s1 + $0xbbc] ss:$48 sps:$4 sm:$0xff]  }
 0x19c   : > { %3195 = vmatpush1.bf16.msra.mxu1 %v10866_v43  ;;  %v10952_v43 = vld [vmem:[%s12455_s1 + $0x8c] ss:$48 sps:$4 sm:$0xff]  }
 0x19d   : > { %3196 = vmatprep.subr.bf16.mxu1 %v10874_v44  ;;  %v10955_v44 = vld [vmem:[%s12455_s1 + $0x144] ss:$48 sps:$4 sm:$0xff]  }
 0x19e   : > { %3111 = vmatpush1.bf16.msra.mxu0 %v10839_v36  ;;  %v10935_v36 = vld [vmem:[%s12455_s1 + $0xbb8] ss:$48 sps:$4 sm:$0xff]  }
 0x19f   : > { %3112 = vmatprep.subr.bf16.mxu0 %v10847_v37  ;;  %v10941_v37 = vld [vmem:[%s12455_s1 + $0x80] ss:$48 sps:$4 sm:$0xff]  }
 0x1a0   : > { %3197 = vmatpush1.bf16.msra.mxu1 %v10872_v47  ;;  %v10958_v47 = vld [vmem:[%s12455_s1 + $0xec] ss:$48 sps:$4 sm:$0xff]  }
 0x1a1   : > { %3198 = vmatprep.subr.bf16.mxu1 %v10880_v48  ;;  %v10961_v48 = vld [vmem:[%s12455_s1 + $0x1a4] ss:$48 sps:$4 sm:$0xff]  }
 0x1a2   : > { %3113 = vmatpush1.bf16.msra.mxu0 %v10845_v41  ;;  %v10944_v41 = vld [vmem:[%s12455_s1 + $0x28] ss:$48 sps:$4 sm:$0xff]  }
 0x1a3   : > { %3114 = vmatprep.subr.bf16.mxu0 %v10853_v42  ;;  %v10947_v42 = vld [vmem:[%s12455_s1 + $0xe0] ss:$48 sps:$4 sm:$0xff]  }
 0x1a4   : > { %3199 = vmatpush1.bf16.msra.mxu1 %v10878_v51  ;;  %v10964_v51 = vld [vmem:[%s12455_s1 + $0x14c] ss:$48 sps:$4 sm:$0xff]  }
 0x1a5   : > { %3200 = vmatprep.subr.bf16.mxu1 %v10886_v53  ;;  %v10967_v53 = vld [vmem:[%s12455_s1 + $0x204] ss:$48 sps:$4 sm:$0xff]  }
 0x1a6   : > { %3115 = vmatpush1.bf16.msra.mxu0 %v10851_v45  ;;  %v10950_v45 = vld [vmem:[%s12455_s1 + $0x88] ss:$48 sps:$4 sm:$0xff]  }
 0x1a7   : > { %3116 = vmatprep.subr.bf16.mxu0 %v10859_v46  ;;  %v10953_v46 = vld [vmem:[%s12455_s1 + $0x140] ss:$48 sps:$4 sm:$0xff]  }
 0x1a8   : > { %3201 = vmatpush1.bf16.msra.mxu1 %v10884_v56  ;;  %v10970_v56 = vld [vmem:[%s12455_s1 + $0x1ac] ss:$48 sps:$4 sm:$0xff]  }
 0x1a9   : > { %3202 = vmatprep.subr.bf16.mxu1 %v10892_v57  ;;  %v10973_v57 = vld [vmem:[%s12455_s1 + $0x264] ss:$48 sps:$4 sm:$0xff]  }
 0x1aa   : > { %3117 = vmatpush1.bf16.msra.mxu0 %v10857_v49  ;;  %v10956_v49 = vld [vmem:[%s12455_s1 + $0xe8] ss:$48 sps:$4 sm:$0xff]  }
 0x1ab   : > { %3118 = vmatprep.subr.bf16.mxu0 %v10865_v50  ;;  %v10959_v50 = vld [vmem:[%s12455_s1 + $0x1a0] ss:$48 sps:$4 sm:$0xff]  }
 0x1ac   : > { %3203 = vmatpush1.bf16.msra.mxu1 %v10890_v60  ;;  %v10979_v60 = vld [vmem:[%s12455_s1 + $0x2c4] ss:$48 sps:$4 sm:$0xff]  }
 0x1ad   : > { %3204 = vmatprep.subr.bf16.mxu1 %v10898_v61  ;;  %v10974_v61 = vld [vmem:[%s12455_s1 + $0x208] ss:$48 sps:$4 sm:$0xff]  }
 0x1ae   : > { %3119 = vmatpush1.bf16.msra.mxu0 %v10863_v54  ;;  %v10962_v54 = vld [vmem:[%s12455_s1 + $0x148] ss:$48 sps:$4 sm:$0xff]  }
 0x1af   : > { %3120 = vmatprep.subr.bf16.mxu0 %v10871_v55  ;;  %v10965_v55 = vld [vmem:[%s12455_s1 + $0x200] ss:$48 sps:$4 sm:$0xff]  }
 0x1b0   : > { %3205 = vmatpush1.bf16.msra.mxu1 %v10896_v0  ;;  %v10985_v0 = vld [vmem:[%s12455_s1 + $0x324] ss:$48 sps:$4 sm:$0xff]  }
 0x1b1   : > { %3206 = vmatprep.subr.bf16.mxu1 %v10904_v1  ;;  %v10980_v1 = vld [vmem:[%s12455_s1 + $0x268] ss:$48 sps:$4 sm:$0xff]  }
 0x1b2   : > { %3121 = vmatpush1.bf16.msra.mxu0 %v10869_v58  ;;  %v10971_v58 = vld [vmem:[%s12455_s1 + $0x260] ss:$48 sps:$4 sm:$0xff]  }
 0x1b3   : > { %3122 = vmatprep.subr.bf16.mxu0 %v10877_v59  ;;  %v10976_v59 = vld [vmem:[%s12455_s1 + $0x20c] ss:$48 sps:$4 sm:$0xff]  }
 0x1b4   : > { %3207 = vmatpush1.bf16.msra.mxu1 %v10902_v4  ;;  %v10991_v4 = vld [vmem:[%s12455_s1 + $0x384] ss:$48 sps:$4 sm:$0xff]  }
 0x1b5   : > { %3208 = vmatprep.subr.bf16.mxu1 %v10910_v5  ;;  %v10986_v5 = vld [vmem:[%s12455_s1 + $0x2c8] ss:$48 sps:$4 sm:$0xff]  }
 0x1b6   : > { %3123 = vmatpush1.bf16.msra.mxu0 %v10875_v62  ;;  %v10977_v62 = vld [vmem:[%s12455_s1 + $0x2c0] ss:$48 sps:$4 sm:$0xff]  }
 0x1b7   : > { %3124 = vmatprep.subr.bf16.mxu0 %v10883_v63  ;;  %v10982_v63 = vld [vmem:[%s12455_s1 + $0x26c] ss:$48 sps:$4 sm:$0xff]  }
 0x1b8   : > { %3209 = vmatpush1.bf16.msra.mxu1 %v10908_v8  ;;  %v10997_v8 = vld [vmem:[%s12455_s1 + $0x3e4] ss:$48 sps:$4 sm:$0xff]  }
 0x1b9   : > { %3210 = vmatprep.subr.bf16.mxu1 %v10916_v9  ;;  %v10992_v9 = vld [vmem:[%s12455_s1 + $0x328] ss:$48 sps:$4 sm:$0xff]  }
 0x1ba   : > { %3125 = vmatpush1.bf16.msra.mxu0 %v10881_v2  ;;  %v10983_v2 = vld [vmem:[%s12455_s1 + $0x320] ss:$48 sps:$4 sm:$0xff]  }
 0x1bb   : > { %3126 = vmatprep.subr.bf16.mxu0 %v10889_v3  ;;  %v10988_v3 = vld [vmem:[%s12455_s1 + $0x2cc] ss:$48 sps:$4 sm:$0xff]  }
 0x1bc   : > { %3211 = vmatpush1.bf16.msra.mxu1 %v10914_v12  ;;  %v11003_v12 = vld [vmem:[%s12455_s1 + $0x444] ss:$48 sps:$4 sm:$0xff]  }
 0x1bd   : > { %3212 = vmatprep.subr.bf16.mxu1 %v10922_v13  ;;  %v10998_v13 = vld [vmem:[%s12455_s1 + $0x388] ss:$48 sps:$4 sm:$0xff]  }
 0x1be   : > { %3127 = vmatpush1.bf16.msra.mxu0 %v10887_v6  ;;  %v10989_v6 = vld [vmem:[%s12455_s1 + $0x380] ss:$48 sps:$4 sm:$0xff]  }
 0x1bf   : > { %3128 = vmatprep.subr.bf16.mxu0 %v10895_v7  ;;  %v10994_v7 = vld [vmem:[%s12455_s1 + $0x32c] ss:$48 sps:$4 sm:$0xff]  }
 0x1c0   : > { %3213 = vmatpush1.bf16.msra.mxu1 %v10920_v17  ;;  %v11009_v17 = vld [vmem:[%s12455_s1 + $0x4a4] ss:$48 sps:$4 sm:$0xff]  }
 0x1c1   : > { %3214 = vmatprep.subr.bf16.mxu1 %v10925_v18  ;;  %v11004_v18 = vld [vmem:[%s12455_s1 + $0x3e8] ss:$48 sps:$4 sm:$0xff]  }
 0x1c2   : > { %3129 = vmatpush1.bf16.msra.mxu0 %v10893_v10  ;;  %v10995_v10 = vld [vmem:[%s12455_s1 + $0x3e0] ss:$48 sps:$4 sm:$0xff]  }
 0x1c3   : > { %3130 = vmatprep.subr.bf16.mxu0 %v10901_v11  ;;  %v11000_v11 = vld [vmem:[%s12455_s1 + $0x38c] ss:$48 sps:$4 sm:$0xff]  }
 0x1c4   : > { %3215 = vmatpush1.bf16.msra.mxu1 %v10923_v21  ;;  %v11015_v21 = vld [vmem:[%s12455_s1 + $0x504] ss:$48 sps:$4 sm:$0xff]  }
 0x1c5   : > { %3216 = vmatprep.subr.bf16.mxu1 %v10928_v22  ;;  %v11010_v22 = vld [vmem:[%s12455_s1 + $0x448] ss:$48 sps:$4 sm:$0xff]  }
 0x1c6   : > { %3131 = vmatpush1.bf16.msra.mxu0 %v10899_v14  ;;  %v11001_v14 = vld [vmem:[%s12455_s1 + $0x440] ss:$48 sps:$4 sm:$0xff]  }
 0x1c7   : > { %3132 = vmatprep.subr.bf16.mxu0 %v10907_v15  ;;  %v11006_v15 = vld [vmem:[%s12455_s1 + $0x3ec] ss:$48 sps:$4 sm:$0xff]  }
 0x1c8   : > { %3217 = vmatpush1.bf16.msra.mxu1 %v10926_v26  ;;  %v11021_v26 = vld [vmem:[%s12455_s1 + $0x564] ss:$48 sps:$4 sm:$0xff]  }
 0x1c9   : > { %3218 = vmatprep.subr.bf16.mxu1 %v10931_v27  ;;  %v11016_v27 = vld [vmem:[%s12455_s1 + $0x4a8] ss:$48 sps:$4 sm:$0xff]  }
 0x1ca   : > { %3133 = vmatpush1.bf16.msra.mxu0 %v10905_v19  ;;  %v11007_v19 = vld [vmem:[%s12455_s1 + $0x4a0] ss:$48 sps:$4 sm:$0xff]  }
 0x1cb   : > { %3134 = vmatprep.subr.bf16.mxu0 %v10913_v20  ;;  %v11012_v20 = vld [vmem:[%s12455_s1 + $0x44c] ss:$48 sps:$4 sm:$0xff]  }
 0x1cc   : > { %3219 = vmatpush1.bf16.msra.mxu1 %v10929_v29  ;;  %v11024_v29 = vld [vmem:[%s12455_s1 + $0x50c] ss:$48 sps:$4 sm:$0xff]  }
 0x1cd   : > { %3220 = vmatprep.subr.bf16.mxu1 %v10934_v30  ;;  %v11027_v30 = vld [vmem:[%s12455_s1 + $0x5c4] ss:$48 sps:$4 sm:$0xff]  }
 0x1ce   : > { %3135 = vmatpush1.bf16.msra.mxu0 %v10911_v24  ;;  %v11013_v24 = vld [vmem:[%s12455_s1 + $0x500] ss:$48 sps:$4 sm:$0xff]  }
 0x1cf   : > { %3136 = vmatprep.subr.bf16.mxu0 %v10919_v25  ;;  %v11018_v25 = vld [vmem:[%s12455_s1 + $0x4ac] ss:$48 sps:$4 sm:$0xff]  }
 0x1d0   : > { %3221 = vmatpush1.bf16.msra.mxu1 %v10932_v32  ;;  %v11025_v32 = vld [vmem:[%s12455_s1 + $0x5c0] ss:$48 sps:$4 sm:$0xff]  }
 0x1d1   : > { %3222 = vmatprep.subr.bf16.mxu1 %v10937_v33  ;;  %v11030_v33 = vld [vmem:[%s12455_s1 + $0x56c] ss:$48 sps:$4 sm:$0xff]  }
 0x1d2   : > { %3137 = vmatpush1.bf16.msra.mxu0 %v10917_v28  ;;  %v11019_v28 = vld [vmem:[%s12455_s1 + $0x560] ss:$48 sps:$4 sm:$0xff]  }
 0x1d3   : > { %3235 = vmatprep.subr.bf16.mxu0 %v10940_v31  ;;  %v11022_v31 = vld [vmem:[%s12455_s1 + $0x508] ss:$48 sps:$4 sm:$0xff]  }
 0x1d4   : > { %3223 = vmatpush1.bf16.msra.mxu1 %v10935_v36  ;;  %v11031_v36 = vld [vmem:[%s12455_s1 + $0x620] ss:$48 sps:$4 sm:$0xff]  }
 0x1d5   : > { %3139 = vmatmul.mubr.bf16.vlgmr.msra.gmra.mrb[4].mxu0 %v12621_v23  ;;  %3321 = vmatprep.subr.bf16.mxu1 %v10946_v39  ;;  %v11039_v39 = vld [vmem:[%s12455_s1 + $0x684] ss:$48 sps:$4 sm:$0xff]  }
 0x1d6   : > { %3236 = vmatpush1.bf16.msra.mxu0 %v10938_v34  ;;  %3267 = vmatprep.mubr.bf16.mxu0 %v12521_v52  ;;  %v11033_v34 = vld [vmem:[%s12455_s1 + $0x624] ss:$48 sps:$4 sm:$0xff]  }
 0x1d7   : > { %3237 = vmatprep.subr.bf16.mxu0 %v10943_v35  ;;  %3225 = vmatmul.mubr.bf16.vlgmr.msra.gmra.mrb[4].mxu1 %v12621_v23  ;;  %v11028_v35 = vld [vmem:[%s12455_s1 + $0x568] ss:$48 sps:$4 sm:$0xff]  }
 0x1d8   : > { %3322 = vmatpush1.bf16.msra.mxu1 %v10944_v41  ;;  %3353 = vmatprep.mubr.bf16.mxu1 %v12521_v52  ;;  %v10968_v52 = vld [vmem:[%s12455_s1 + $0x1a8] ss:$48 sps:$4 sm:$0xff]   ;;  %v11037_v41 = vld [vmem:[%s12455_s1 + $0x680] ss:$48 sps:$4 sm:$0xff]  }
 0x1d9   : > { %3323 = vmatprep.subr.bf16.mxu1 %v10952_v43  ;;  %v11045_v43 = vld [vmem:[%s12455_s1 + $0x6e4] ss:$48 sps:$4 sm:$0xff]  }
 0x1da   : > { %3238 = vmatpush1.bf16.msra.mxu0 %v10941_v37  ;;  %v11036_v37 = vld [vmem:[%s12455_s1 + $0x5cc] ss:$48 sps:$4 sm:$0xff]  }
 0x1db   : > { %3239 = vmatprep.subr.bf16.mxu0 %v10949_v40  ;;  %v11034_v40 = vld [vmem:[%s12455_s1 + $0x5c8] ss:$48 sps:$4 sm:$0xff]  }
 0x1dc   : > { %3324 = vmatpush1.bf16.msra.mxu1 %v10950_v45  ;;  %v11043_v45 = vld [vmem:[%s12455_s1 + $0x6e0] ss:$48 sps:$4 sm:$0xff]  }
 0x1dd   : > { %3325 = vmatprep.subr.bf16.mxu1 %v10958_v47  ;;  %v11051_v47 = vld [vmem:[%s12455_s1 + $0x744] ss:$48 sps:$4 sm:$0xff]  }
 0x1de   : > { %3240 = vmatpush1.bf16.msra.mxu0 %v10947_v42  ;;  %v11042_v42 = vld [vmem:[%s12455_s1 + $0x62c] ss:$48 sps:$4 sm:$0xff]  }
 0x1df   : > { %3241 = vmatprep.subr.bf16.mxu0 %v10955_v44  ;;  %v11040_v44 = vld [vmem:[%s12455_s1 + $0x628] ss:$48 sps:$4 sm:$0xff]  }
 0x1e0   : > { %3326 = vmatpush1.bf16.msra.mxu1 %v10956_v49  ;;  %v11046_v49 = vld [vmem:[%s12455_s1 + $0x688] ss:$48 sps:$4 sm:$0xff]  }
 0x1e1   : > { %3327 = vmatprep.subr.bf16.mxu1 %v10964_v51  ;;  %v11054_v51 = vld [vmem:[%s12455_s1 + $0x6ec] ss:$48 sps:$4 sm:$0xff]  }
 0x1e2   : > { %3242 = vmatpush1.bf16.msra.mxu0 %v10953_v46  ;;  %v11048_v46 = vld [vmem:[%s12455_s1 + $0x68c] ss:$48 sps:$4 sm:$0xff]  }
 0x1e3   : > { %3243 = vmatprep.subr.bf16.mxu0 %v10961_v48  ;;  %v3409_v48 = vlaneseq }
 0x1e4   : > { %3328 = vmatpush1.bf16.msra.mxu1 %v10962_v54 }
 0x1e5   : > { %3329 = vmatprep.subr.bf16.mxu1 %v10970_v56  ;;  %v12846_v54 = vshrl.u32 %v3409_v48, 7  ;;  %v11055_v56 = vld [vmem:[%s12455_s1 + $0x7a0] ss:$48 sps:$4 sm:$0xff]   ;;  %v11106_v48 = vld [vmem:[%s12455_s1 + $0xa48] ss:$48 sps:$4 sm:$0xff]  }
 0x1e6   : > { %3244 = vmatpush1.bf16.msra.mxu0 %v10959_v50  ;;  %v11049_v50 = vld [vmem:[%s12455_s1 + $0x740] ss:$48 sps:$4 sm:$0xff]  }
 0x1e7   : > { %3245 = vmatprep.subr.bf16.mxu0 %v10967_v53  ;;  %v11057_v53 = vld [vmem:[%s12455_s1 + $0x7a4] ss:$48 sps:$4 sm:$0xff]  }
 0x1e8   : > { %3330 = vmatpush1.bf16.msra.mxu1 %v10968_v52  ;;  %v11060_v52 = vld [vmem:[%s12455_s1 + $0x74c] ss:$48 sps:$4 sm:$0xff]  }
 0x1e9   : > { %3331 = vmatprep.subr.bf16.mxu1 %v10976_v59  ;;  %v11058_v59 = vld [vmem:[%s12455_s1 + $0x748] ss:$48 sps:$4 sm:$0xff]  }
 0x1ea   : > { %3246 = vmatpush1.bf16.msra.mxu0 %v10965_v55  ;;  %v11052_v55 = vld [vmem:[%s12455_s1 + $0x6e8] ss:$48 sps:$4 sm:$0xff]  }
 0x1eb   : > { %3247 = vmatprep.subr.bf16.mxu0 %v10973_v57  ;;  %v12852_v57 = vld [vmem:[%s12480_s4] ss:$8 sm:$0xf] }
 0x1ec   : > { %3332 = vmatpush1.bf16.msra.mxu1 %v10974_v61  ;;  %v11066_v61 = vld [vmem:[%s12455_s1 + $0x7ac] ss:$48 sps:$4 sm:$0xff]  }
 0x1ed   : > { %3333 = vmatprep.subr.bf16.mxu1 %v10982_v63 }
 0x1ee   : > { %3248 = vmatpush1.bf16.msra.mxu0 %v10971_v58  ;;  %v12857_v58 = vsub.s32 1, %v12846_v54 }
 0x1ef   : > { %3249 = vmatprep.subr.bf16.mxu0 %v10979_v60  ;;  %v11061_v60 = vld [vmem:[%s12455_s1 + $0x800] ss:$48 sps:$4 sm:$0xff]  }
 0x1f0   : > { %3334 = vmatpush1.bf16.msra.mxu1 %v10980_v1  ;;  %v11067_v1 = vld [vmem:[%s12455_s1 + $0x860] ss:$48 sps:$4 sm:$0xff]  }
 0x1f1   : > { %3335 = vmatprep.subr.bf16.mxu1 %v10988_v3  ;;  %v12870_v3 = vsub.s32 2, %v12846_v54 }
 0x1f2   : > { %3250 = vmatpush1.bf16.msra.mxu0 %v10977_v62  ;;  %v11069_v62 = vld [vmem:[%s12455_s1 + $0x864] ss:$48 sps:$4 sm:$0xff]  }
 0x1f3   : > { %3251 = vmatprep.subr.bf16.mxu0 %v10985_v0  ;;  %v11064_v0 = vld [vmem:[%s12455_s1 + $0x7a8] ss:$48 sps:$4 sm:$0xff]  }
 0x1f4   : > { %3336 = vmatpush1.bf16.msra.mxu1 %v10986_v5  ;;  %v11075_v5 = vld [vmem:[%s12455_s1 + $0x8c4] ss:$48 sps:$4 sm:$0xff]  }
 0x1f5   : > { %3337 = vmatprep.subr.bf16.mxu1 %v10994_v7 }
 0x1f6   : > { %3252 = vmatpush1.bf16.msra.mxu0 %v10983_v2 }
 0x1f7   : > { %3253 = vmatprep.subr.bf16.mxu0 %v10991_v4  ;;  %v11072_v4 = vld [vmem:[%s12455_s1 + $0x80c] ss:$48 sps:$4 sm:$0xff]  }
 0x1f8   : > { %3338 = vmatpush1.bf16.msra.mxu1 %v10992_v9 }
 0x1f9   : > { %3339 = vmatprep.subr.bf16.mxu1 %v11000_v11  ;;  %v11070_v11 = vld [vmem:[%s12455_s1 + $0x808] ss:$48 sps:$4 sm:$0xff]  }
 0x1fa   : > { %3254 = vmatpush1.bf16.msra.mxu0 %v10989_v6 }
 0x1fb   : > { %3255 = vmatprep.subr.bf16.mxu0 %v10997_v8  ;;  %v12879_v8 = vsub.s32 3, %v12846_v54 }
 0x1fc   : > { %3340 = vmatpush1.bf16.msra.mxu1 %v10998_v13  ;;  %v3420_v13 = vrot.slane %v12852_v57, %v12870_v3 }
 0x1fd   : > { %3341 = vmatprep.subr.bf16.mxu1 %v11006_v15  ;;  %v11081_v15 = vld [vmem:[%s12455_s1 + $0x924] ss:$48 sps:$4 sm:$0xff]  }
 0x1fe   : > { %3256 = vmatpush1.bf16.msra.mxu0 %v10995_v10 }
 0x1ff   : > { %3257 = vmatprep.subr.bf16.mxu0 %v11003_v12  ;;  %v11073_v12 = vld [vmem:[%s12455_s1 + $0x8c0] ss:$48 sps:$4 sm:$0xff]  }
 0x200   : > { %3342 = vmatpush1.bf16.msra.mxu1 %v11004_v18 }
 0x201   : > { %3343 = vmatprep.subr.bf16.mxu1 %v11012_v20  ;;  %v11079_v20 = vld [vmem:[%s12455_s1 + $0x920] ss:$48 sps:$4 sm:$0xff]  }
 0x202   : > { %3258 = vmatpush1.bf16.msra.mxu0 %v11001_v14  ;;  %v11078_v14 = vld [vmem:[%s12455_s1 + $0x86c] ss:$48 sps:$4 sm:$0xff]  }
 0x203   : > { %3259 = vmatprep.subr.bf16.mxu0 %v11009_v17  ;;  %v3424_v17 = vrot.slane %v12852_v57, %v12879_v8 }
 0x204   : > { %3344 = vmatpush1.bf16.msra.mxu1 %v11010_v22 }
 0x205   : > { %3345 = vmatprep.subr.bf16.mxu1 %v11018_v25  ;;  %v11087_v25 = vld [vmem:[%s12455_s1 + $0x984] ss:$48 sps:$4 sm:$0xff]  }
 0x206   : > { %3260 = vmatpush1.bf16.msra.mxu0 %v11007_v19  ;;  %v11076_v19 = vld [vmem:[%s12455_s1 + $0x868] ss:$48 sps:$4 sm:$0xff]  }
 0x207   : > { %3261 = vmatprep.subr.bf16.mxu0 %v11015_v21 }
 0x208   : > { %3346 = vmatpush1.bf16.msra.mxu1 %v11016_v27 }
 0x209   : > { %3347 = vmatprep.subr.bf16.mxu1 %v11024_v29 }
 0x20a   : > { %3262 = vmatpush1.bf16.msra.mxu0 %v11013_v24  ;;  %v11084_v24 = vld [vmem:[%s12455_s1 + $0x8cc] ss:$48 sps:$4 sm:$0xff]  }
 0x20b   : > { %3263 = vmatprep.subr.bf16.mxu0 %v11021_v26 }
 0x20c   : > { %3348 = vmatpush1.bf16.msra.mxu1 %v11022_v31  ;;  %v11082_v31 = vld [vmem:[%s12455_s1 + $0x8c8] ss:$48 sps:$4 sm:$0xff]  }
 0x20d   : > { %3349 = vmatprep.subr.bf16.mxu1 %v11030_v33  ;;  %v11090_v33 = vld [vmem:[%s12455_s1 + $0x92c] ss:$48 sps:$4 sm:$0xff]  }
 0x20e   : > { %3264 = vmatpush1.bf16.msra.mxu0 %v11019_v28 }
 0x20f   : > { %3265 = vmatprep.subr.bf16.mxu0 %v11027_v30 }
 0x210   : > { %3350 = vmatpush1.bf16.msra.mxu1 %v11028_v35  ;;  %v11088_v35 = vld [vmem:[%s12455_s1 + $0x928] ss:$48 sps:$4 sm:$0xff]  }
 0x211   : > { %3351 = vmatprep.subr.bf16.mxu1 %v11036_v37  ;;  %v11096_v37 = vld [vmem:[%s12455_s1 + $0x98c] ss:$48 sps:$4 sm:$0xff]  }
 0x212   : > { %3266 = vmatpush1.bf16.msra.mxu0 %v11025_v32  ;;  %v11085_v32 = vld [vmem:[%s12455_s1 + $0x980] ss:$48 sps:$4 sm:$0xff]  }
 0x213   : > { %3278 = vmatprep.subr.bf16.mxu0 %v11033_v34  ;;  %v11093_v34 = vld [vmem:[%s12455_s1 + $0x9e4] ss:$48 sps:$4 sm:$0xff]  }
 0x214   : > { %3352 = vmatpush1.bf16.msra.mxu1 %v11034_v40  ;;  %v11094_v40 = vld [vmem:[%s12455_s1 + $0x988] ss:$48 sps:$4 sm:$0xff]  }
 0x215   : > { %3268 = vmatmul.mubr.bf16.vlgmr.msra.gmra.mrb[8].mxu0 %v12550_v16  ;;  %3364 = vmatprep.subr.bf16.mxu1 %v11042_v42  ;;  %v11102_v42 = vld [vmem:[%s12455_s1 + $0x9ec] ss:$48 sps:$4 sm:$0xff]  }
 0x216   : > { %3279 = vmatpush1.bf16.msra.mxu0 %v11031_v36  ;;  %3310 = vmatprep.mubr.bf16.mxu0 %v12573_v38  ;;  %v11091_v36 = vld [vmem:[%s12455_s1 + $0x9e0] ss:$48 sps:$4 sm:$0xff]  }
 0x217   : > { %3280 = vmatprep.subr.bf16.mxu0 %v11039_v39  ;;  %3354 = vmatmul.mubr.bf16.vlgmr.msra.gmra.mrb[8].mxu1 %v12550_v16  ;;  %v11063_v16 = vld [vmem:[%s12455_s1 + $0x804] ss:$48 sps:$4 sm:$0xff]  }
 0x218   : > { %3365 = vmatpush1.bf16.msra.mxu1 %v11040_v44  ;;  %3396 = vmatprep.mubr.bf16.mxu1 %v12573_v38  ;;  %v3416_v38 = vrot.slane %v12852_v57, %v12857_v58  ;;  %v11099_v39 = vld [vmem:[%s12455_s1 + $0xa44] ss:$48 sps:$4 sm:$0xff]   ;;  %v11100_v44 = vld [vmem:[%s12455_s1 + $0x9e8] ss:$48 sps:$4 sm:$0xff]  }
 0x219   : > { %3366 = vmatprep.subr.bf16.mxu1 %v11048_v46  ;;  %v11108_v46 = vld [vmem:[%s12455_s1 + $0xa4c] ss:$48 sps:$4 sm:$0xff]  }
 0x21a   : > { %3281 = vmatpush1.bf16.msra.mxu0 %v11037_v41  ;;  %v11097_v41 = vld [vmem:[%s12455_s1 + $0xa40] ss:$48 sps:$4 sm:$0xff]  }
 0x21b   : > { %3282 = vmatprep.subr.bf16.mxu0 %v11045_v43  ;;  %v11105_v43 = vld [vmem:[%s12455_s1 + $0xaa4] ss:$48 sps:$4 sm:$0xff]  }
 0x21c   : > { %3367 = vmatpush1.bf16.msra.mxu1 %v11046_v49  ;;  %v11109_v49 = vld [vmem:[%s12455_s1 + $0xb00] ss:$48 sps:$4 sm:$0xff]  }
 0x21d   : > { %3368 = vmatprep.subr.bf16.mxu1 %v11054_v51  ;;  %v11117_v51 = vld [vmem:[%s12455_s1 + $0xb64] ss:$48 sps:$4 sm:$0xff]  }
 0x21e   : > { %3283 = vmatpush1.bf16.msra.mxu0 %v11043_v45  ;;  %v11103_v45 = vld [vmem:[%s12455_s1 + $0xaa0] ss:$48 sps:$4 sm:$0xff]  }
 0x21f   : > { %3284 = vmatprep.subr.bf16.mxu0 %v11051_v47  ;;  %v11111_v47 = vld [vmem:[%s12455_s1 + $0xb04] ss:$48 sps:$4 sm:$0xff]  }
 0x220   : > { %3369 = vmatpush1.bf16.msra.mxu1 %v11052_v55  ;;  %v11115_v55 = vld [vmem:[%s12455_s1 + $0xb60] ss:$48 sps:$4 sm:$0xff]  }
 0x221   : > { %3370 = vmatprep.subr.bf16.mxu1 %v11060_v52  ;;  %v11123_v52 = vld [vmem:[%s12455_s1 + $0xbc4] ss:$48 sps:$4 sm:$0xff]  }
 0x222   : > { %3285 = vmatpush1.bf16.msra.mxu0 %v11049_v50  ;;  %v11114_v50 = vld [vmem:[%s12455_s1 + $0xaac] ss:$48 sps:$4 sm:$0xff]  }
 0x223   : > { %3286 = vmatprep.subr.bf16.mxu0 %v11057_v53  ;;  %v11112_v53 = vld [vmem:[%s12455_s1 + $0xaa8] ss:$48 sps:$4 sm:$0xff]  }
 0x224   : > { %3371 = vmatpush1.bf16.msra.mxu1 %v11058_v59  ;;  %v11121_v59 = vld [vmem:[%s12455_s1 + $0xbc0] ss:$48 sps:$4 sm:$0xff]  }
 0x225   : > { %3372 = vmatprep.subr.bf16.mxu1 %v11066_v61  ;;  %v11124_v61 = vld [vmem:[%s12455_s1 + $0xb68] ss:$48 sps:$4 sm:$0xff]  }
 0x226   : > { %3287 = vmatpush1.bf16.msra.mxu0 %v11055_v56  ;;  %v11120_v56 = vld [vmem:[%s12455_s1 + $0xb0c] ss:$48 sps:$4 sm:$0xff]  }
 0x227   : > { %3288 = vmatprep.subr.bf16.mxu0 %v11063_v16  ;;  %v11118_v16 = vld [vmem:[%s12455_s1 + $0xb08] ss:$48 sps:$4 sm:$0xff]  }
 0x228   : > { %v12865_v63 = vpop.f32.mrb[0].mxu0  ;;  %3373 = vmatpush1.bf16.msra.mxu1 %v11064_v0  ;;  %v3054_v18 = vpop.f32.mrb[0].mxu1  ;;  %v11127_v0 = vld [vmem:[%s12455_s1 + $0xbc8] ss:$48 sps:$4 sm:$0xff]  }
 0x229   : > { %v2970_v2 = vpop.f32.mrb[1].mxu0  ;;  %3374 = vmatprep.subr.bf16.mxu1 %v11072_v4  ;;  %v12893_v21 = vadd.f32 %v3420_v13, %v3054_v18  ;;  %v3056_v22 = vpop.f32.mrb[1].mxu1 }
 0x22a   : > { %v12874_v6 = vadd.f32 %v3416_v38, %v2970_v2  ;;  %v12876_v7 = vpop.f32.mrb[2].mxu0  ;;  %3289 = vmatpush1.bf16.msra.mxu0 %v11061_v60  ;;  %v12897_v26 = vadd.f32 %v3424_v17, %v3056_v22  ;;  %v3058_v27 = vpop.f32.mrb[2].mxu1  ;;  %v11126_v60 = vld [vmem:[%s12455_s1 + $0xb6c] ss:$48 sps:$4 sm:$0xff]   ;;  %v12943_v2 = vsub.s32 0, %v12846_v54 }
 0x22b   : > { %v2974_v9 = vpop.f32.mrb[3].mxu0  ;;  %3290 = vmatprep.subr.bf16.mxu0 %v11069_v62  ;;  %v12899_v28 = vadd.f32 %v3420_v13, %v3058_v27  ;;  %v3060_v29 = vpop.f32.mrb[3].mxu1  ;;  %v12103_v62 = vmov 0.0  }
 0x22c   : > { %v12881_v10 = vadd.f32 %v3416_v38, %v2974_v9  ;;  %3375 = vmatpush1.bf16.msra.mxu1 %v11070_v11  ;;  %v12901_v30 = vadd.f32 %v3424_v17, %v3060_v29  ;;  %v11129_v38 = vld [vmem:[%s12455_s1 + $0xbcc] ss:$48 sps:$4 sm:$0xff]  }
 0x22d   : > { %3376 = vmatprep.subr.bf16.mxu1 %v11078_v14 }
 0x22e   : > { %3291 = vmatpush1.bf16.msra.mxu0 %v11067_v1  ;;  %v9606_v1 = vld [vmem:[%s12480_s4 + $0x1] ss:$8 sm:$0xf] }
 0x22f   : > { %3292 = vmatprep.subr.bf16.mxu0 %v11075_v5  ;;  %v3443_v4 = vrot.slane %v9606_v1, %v12943_v2  ;;  %v3447_v5 = vrot.slane %v9606_v1, %v12857_v58  ;;  %v3451_v22 = vrot.slane %v9606_v1, %v12870_v3 }
 0x230   : > { %3377 = vmatpush1.bf16.msra.mxu1 %v11076_v19 }
 0x231   : > { %3378 = vmatprep.subr.bf16.mxu1 %v11084_v24  ;;  %v3455_v24 = vrot.slane %v9606_v1, %v12879_v8 }
 0x232   : > { %3293 = vmatpush1.bf16.msra.mxu0 %v11073_v12 }
 0x233   : > { %3294 = vmatprep.subr.bf16.mxu0 %v11081_v15 }
 0x234   : > { %3379 = vmatpush1.bf16.msra.mxu1 %v11082_v31 }
 0x235   : > { %3380 = vmatprep.subr.bf16.mxu1 %v11090_v33 }
 0x236   : > { %3295 = vmatpush1.bf16.msra.mxu0 %v11079_v20 }
 0x237   : > { %3296 = vmatprep.subr.bf16.mxu0 %v11087_v25 }
 0x238   : > { %3381 = vmatpush1.bf16.msra.mxu1 %v11088_v35 }
 0x239   : > { %3382 = vmatprep.subr.bf16.mxu1 %v11096_v37 }
 0x23a   : > { %3297 = vmatpush1.bf16.msra.mxu0 %v11085_v32 }
 0x23b   : > { %3298 = vmatprep.subr.bf16.mxu0 %v11093_v34 }
 0x23c   : > { %3383 = vmatpush1.bf16.msra.mxu1 %v11094_v40 }
 0x23d   : > { %3384 = vmatprep.subr.bf16.mxu1 %v11102_v42 }
 0x23e   : > { %3299 = vmatpush1.bf16.msra.mxu0 %v11091_v36 }
 0x23f   : > { %3300 = vmatprep.subr.bf16.mxu0 %v11099_v39 }
 0x240   : > { %3385 = vmatpush1.bf16.msra.mxu1 %v11100_v44 }
 0x241   : > { %3386 = vmatprep.subr.bf16.mxu1 %v11108_v46 }
 0x242   : > { %3301 = vmatpush1.bf16.msra.mxu0 %v11097_v41 }
 0x243   : > { %3302 = vmatprep.subr.bf16.mxu0 %v11105_v43 }
 0x244   : > { %3387 = vmatpush1.bf16.msra.mxu1 %v11106_v48 }
 0x245   : > { %3388 = vmatprep.subr.bf16.mxu1 %v11114_v50 }
 0x246   : > { %3303 = vmatpush1.bf16.msra.mxu0 %v11103_v45 }
 0x247   : > { %3304 = vmatprep.subr.bf16.mxu0 %v11111_v47 }
 0x248   : > { %3389 = vmatpush1.bf16.msra.mxu1 %v11112_v53 }
 0x249   : > { %3390 = vmatprep.subr.bf16.mxu1 %v11120_v56 }
 0x24a   : > { %3305 = vmatpush1.bf16.msra.mxu0 %v11109_v49 }
 0x24b   : > { %3306 = vmatprep.subr.bf16.mxu0 %v11117_v51 }
 0x24c   : > { %3391 = vmatpush1.bf16.msra.mxu1 %v11118_v16 }
 0x24d   : > { %3392 = vmatprep.subr.bf16.mxu1 %v11126_v60 }
 0x24e   : > { %3307 = vmatpush1.bf16.msra.mxu0 %v11115_v55 }
 0x24f   : > { %3308 = vmatprep.subr.bf16.mxu0 %v11123_v52 }
 0x250   : > { %3393 = vmatpush1.bf16.msra.mxu1 %v11124_v61 }
 0x251   : > { %3394 = vmatprep.subr.bf16.mxu1 %v11129_v38 }
 0x252   : > { %3309 = vmatpush1.bf16.msra.mxu0 %v11121_v59 }
 0x253   : > { %10181 = vmatprep.subr.bf16.mxu0 %v12103_v62 }
 0x254   : > { %3395 = vmatpush1.bf16.msra.mxu1 %v11127_v0 }
 0x255   : > { %3311 = vmatmul.mubr.bf16.vlgmr.msra.gmra.mrb[8].mxu0 %v12621_v23  ;;  %10187 = vmatprep.subr.bf16.mxu1 %v12103_v62 }
 0x256   : > { %10183 = vmatprep.mubr.msk.bf16.mxu0 %vm12104_vm0, %v12103_v62 }
 0x257   : > { %3397 = vmatmul.mubr.bf16.vlgmr.msra.gmra.mrb[8].mxu1 %v12621_v23  ;;  %v3412_v23 = vrot.slane %v12852_v57, %v12943_v2 }
 0x258   : > { %10189 = vmatprep.mubr.msk.bf16.mxu1 %vm12104_vm0, %v12103_v62 }
 0x259   : > { %v3429_v25 = vadd.f32 %v3412_v23, %v12865_v63  ;;  %v3433_v29 = vadd.f32 %v3412_v23, %v12876_v7  ;;  %v9607_v7 = vld [vmem:[%s12480_s4 + $0x2] ss:$8 sm:$0xf] }
 0x25a   : > { %v3474_v40 = vrot.slane %v9607_v7, %v12943_v2  ;;  %v3478_v41 = vrot.slane %v9607_v7, %v12857_v58  ;;  %v3482_v55 = vrot.slane %v9607_v7, %v12870_v3  ;;  %v3486_v56 = vrot.slane %v9607_v7, %v12879_v8 }
 0x25b   : > { %v12969_v34 = vpack.c.bf16 %v3429_v25, %v3429_v25  ;;  %v12975_v39 = vpack.c.bf16 %v3433_v29, %v3433_v29 }
 0x2a8   : > { %v3140_v9 = vpop.f32.mrb[4].mxu0 }
 0x2a9   : > { %v3460_v11 = vadd.f32 %v3443_v4, %v3140_v9  ;;  %v3142_v12 = vpop.f32.mrb[5].mxu0 }
 0x2aa   : > { %v12947_v13 = vadd.f32 %v3447_v5, %v3142_v12  ;;  %v3144_v14 = vpop.f32.mrb[6].mxu0  ;;  %v3226_v57 = vpop.f32.mrb[4].mxu1 }
 0x2ab   : > { %v12951_v15 = vpack.c.bf16 %v3460_v11, %v3460_v11  ;;  %v3464_v17 = vadd.f32 %v3443_v4, %v3144_v14  ;;  %v3146_v18 = vpop.f32.mrb[7].mxu0  ;;  %v12964_v31 = vadd.f32 %v3451_v22, %v3226_v57  ;;  %v3228_v32 = vpop.f32.mrb[5].mxu1 }
 0x2ac   : > { %v12953_v54 = vadd.f32 %v3447_v5, %v3146_v18  ;;  %v12967_v33 = vadd.f32 %v3455_v24, %v3228_v32  ;;  %v3230_v63 = vpop.f32.mrb[6].mxu1 }
 0x2ad   : > { %v3510_v19 = vsel %vm3505_vm1, %v12951_v15, 0  ;;  %v3502_v20 = vpack.c.bf16 %v3464_v17, %v3464_v17  ;;  %v12971_v35 = vadd.f32 %v3451_v22, %v3230_v63  ;;  %v3232_v36 = vpop.f32.mrb[7].mxu1 }
 0x2ae   : > { %10182 = vmatpush3.bf16.xpose.msra.mxu0 %v3510_v19  ;;  %v12973_v37 = vadd.f32 %v3455_v24, %v3232_v36 }
 0x2af   : > { %v3556_v27 = vsel %vm3505_vm1, %v3502_v20, 0  ;;  %3774 = vrot.lane.b32.xlu1 %v3502_v20, %s12105_s23  ;;  %10193 = vmatprep.subr.bf16.mxu0 %v12103_v62 }
 0x2b0   : > { %10188 = vmatpush3.bf16.xpose.msra.mxu1 %v3556_v27 }
 0x2b1   : > { %10199 = vmatprep.subr.bf16.mxu1 %v12103_v62 }
 0x2b5   : > { %10184 = vmatmul.mubr.msk.bf16.vlgmr.msra.gmra.mrb[12].mxu0 %vm3505_vm1, %v12969_v34 }
 0x2b6   : > { %10195 = vmatprep.mubr.msk.bf16.mxu0 %vm12104_vm0, %v12103_v62 }
 0x2b7   : > { %10190 = vmatmul.mubr.msk.bf16.vlgmr.msra.gmra.mrb[12].mxu1 %vm3505_vm1, %v12975_v39 }
 0x2b8   : > { %10201 = vmatprep.mubr.msk.bf16.mxu1 %vm12104_vm0, %v12103_v62 }
 0x328   : > { %v3312_v42 = vpop.f32.mrb[8].mxu0 }
 0x329   : > { %v3491_v43 = vadd.f32 %v3474_v40, %v3312_v42  ;;  %v3314_v44 = vpop.f32.mrb[9].mxu0 }
 0x32a   : > { %v12988_v45 = vadd.f32 %v3478_v41, %v3314_v44  ;;  %v3316_v46 = vpop.f32.mrb[10].mxu0  ;;  %v3398_v16 = vpop.f32.mrb[8].mxu1 }
 0x32b   : > { %v12990_v47 = vpack.c.bf16 %v3491_v43, %v3491_v43  ;;  %v3495_v48 = vadd.f32 %v3474_v40, %v3316_v46  ;;  %v3318_v49 = vpop.f32.mrb[11].mxu0  ;;  %v13003_v59 = vadd.f32 %v3482_v55, %v3398_v16  ;;  %v3400_v60 = vpop.f32.mrb[9].mxu1 }
 0x32c   : > { %v12992_v50 = vadd.f32 %v3478_v41, %v3318_v49  ;;  %v13006_v61 = vadd.f32 %v3486_v56, %v3400_v60  ;;  %v3402_v38 = vpop.f32.mrb[10].mxu1 }
 0x32d   : > { %v3628_v51 = vsel %vm3626_vm2, %v12990_v47, 0  ;;  %v12996_v53 = vpack.c.bf16 %v3495_v48, %v3495_v48  ;;  %v13008_v0 = vadd.f32 %v3482_v55, %v3402_v38  ;;  %v3404_v1 = vpop.f32.mrb[11].mxu1 }
 0x32e   : > { %10194 = vmatpush3.bf16.msra.mxu0 %v3628_v51  ;;  %v13010_v4 = vadd.f32 %v3486_v56, %v3404_v1 }
 0x32f   : > { %v3674_v52 = vsel %vm3626_vm2, %v12996_v53, 0  ;;  %10205 = vmatprep.subr.bf16.mxu0 %v12103_v62 }
 0x330   : > { %10200 = vmatpush3.bf16.msra.mxu1 %v3674_v52 }
 0x331   : > { %10211 = vmatprep.subr.bf16.mxu1 %v12103_v62 }
 0x388   : > { %v3546_v5 = vpop.f32.mrb[12].mxu0 }
 0x389   : > { %v10185_v9 = vpop.f32.mrb[13].mxu0  ;;  %v3599_v11 = vsel %vm3598_vm3, %v3546_v5, -inf }
 0x38a   : > { %v3592_v12 = vpop.f32.mrb[12].mxu1  ;;  %3600 = vmax.xlane.f32.xlu0 %v3599_v11  ;;  %v3549_v14 = vpop.f32.mrb[14].mxu0 }
 0x38b   : > { %v10186_v23 = vpop.f32.mrb[15].mxu0  ;;  %v10191_v17 = vpop.f32.mrb[13].mxu1  ;;  %v3602_v20 = vsel %vm3598_vm3, %v3592_v12, -inf }
 0x38c   : > { %v3595_v18 = vpop.f32.mrb[14].mxu1 }
 0x38d   : > { %v10192_v19 = vpop.f32.mrb[15].mxu1 }
 0x38e   : > { %3603 = vmax.xlane.f32.xlu0 %v3602_v20 }
 0x3a4   : > { %3722 = vrot.lane.b32.xlu0 %v12951_v15, %s12105_s23  ;;  %v3775_v15 = vpop.permute.xlu1 %3774 }
 0x417   : > { %v3601_v22 = vpop.xlane.xlu0 %3600 }
 0x418   : > { %v3605_v24 = vsub.f32 %v3546_v5, %v3601_v22 }
 0x41a   : > { %v3607_v25 = vmul.f32 1.442695, %v3605_v24 }
 0x41b   : > { %v3604_v27 = vpop.xlane.xlu0 %3603 }
 0x41c   : > { %11706 = vpow2.f32 %v3607_v25  ;;  %v3606_v57 = vsub.f32 %v3592_v12, %v3604_v27 }
 0x41e   : > { %v3609_v29 = vmul.f32 1.442695, %v3606_v57 }
 0x41f   : > { %v3723_v44 = vpop.permute.xlu0 %3722 }
 0x420   : > { %11708 = vpow2.f32 %v3609_v29  ;;  %v3728_v49 = vsel %vm3505_vm1, %v3723_v44, 0 }
 0x426   : > { %v11707_v32 = vpop.eup %11706 }
 0x427   : > { %v3611_v63 = vsel %vm3598_vm3, %v11707_v32, 0.0 }
 0x428   : > { %3612 = vadd.xlane.f32.xlu1 %v3611_v63 }
 0x42a   : > { %v11709_v36 = vpop.eup %11708 }
 0x42b   : > { %v3614_v7 = vsel %vm3598_vm3, %v11709_v36, 0.0 }
 0x42c   : > { %3615 = vadd.xlane.f32.xlu1 %v3614_v7 }
 0x43d   : > { %3719 = vrot.lane.b32.xlu1 %v12969_v34, %s12105_s23 }
 0x441   : > { %3771 = vrot.lane.b32.xlu1 %v12975_v39, %s12105_s23  ;;  %v3780_v39 = vsel %vm3505_vm1, %v3775_v15, 0 }
 0x4b5   : > { %v3613_v40 = vpop.xlane.xlu1 %3612 }
 0x4b6   : > { %11710 = vrcp.f32 %v3613_v40 }
 0x4b9   : > { %v3616_v41 = vpop.xlane.xlu1 %3615 }
 0x4ba   : > { %11712 = vrcp.f32 %v3616_v41 }
 0x4bd   : > { %v3720_v55 = vpop.permute.xlu1 %3719 }
 0x4c0   : > { %v11711_v42 = vpop.eup %11710 }
 0x4c1   : > { %v3619_v43 = vmul.f32 %v11711_v42, %v11707_v32  ;;  %v3772_v56 = vpop.permute.xlu1 %3771 }
 0x4c3   : > { %v3621_v46 = vpack.c.bf16 %v3619_v43, %v3619_v43 }
 0x4c4   : > { %v11713_v48 = vpop.eup %11712 }
 0x4c5   : > { %v3620_v51 = vmul.f32 %v11713_v48, %v11709_v36  ;;  %10196 = vmatmul.mubr.msk.bf16.vlgmr.msra.gmra.mrb[16].mxu0 %vm3598_vm3, %v3621_v46 }
 0x4c6   : > { %10206 = vmatpush3.bf16.xpose.msra.mxu0 %v3728_v49  ;;  %10207 = vmatprep.mubr.msk.bf16.mxu0 %vm12104_vm0, %v12103_v62 }
 0x4c7   : > { %v3622_v34 = vpack.c.bf16 %v3620_v51, %v3620_v51  ;;  %10217 = vmatprep.subr.bf16.mxu0 %v12103_v62 }
 0x4c9   : > { %10202 = vmatmul.mubr.msk.bf16.vlgmr.msra.gmra.mrb[16].mxu1 %vm3598_vm3, %v3622_v34  ;;  %v13054_v34 = vpack.c.bf16 %v12947_v13, %v12947_v13  ;;  %v13070_v13 = vpack.c.bf16 %v12988_v45, %v12988_v45 }
 0x4ca   : > { %10212 = vmatpush3.bf16.xpose.msra.mxu1 %v3780_v39  ;;  %10213 = vmatprep.mubr.msk.bf16.mxu1 %vm12104_vm0, %v12103_v62 }
 0x4cb   : > { %10223 = vmatprep.subr.bf16.mxu1 %v12103_v62 }
 0x4cd   : > { %10208 = vmatmul.mubr.msk.bf16.vlgmr.msra.gmra.mrb[20].mxu0 %vm3505_vm1, %v3720_v55 }
 0x4ce   : > { %10219 = vmatprep.mubr.msk.bf16.mxu0 %vm12104_vm0, %v12103_v62 }
 0x4d1   : > { %10214 = vmatmul.mubr.msk.bf16.vlgmr.msra.gmra.mrb[20].mxu1 %vm3505_vm1, %v3772_v56 }
 0x4d2   : > { %10225 = vmatprep.mubr.msk.bf16.mxu1 %vm12104_vm0, %v12103_v62 }
 0x598   : > { %v3664_v52 = vpop.f32.mrb[16].mxu0 }
 0x599   : > { %3716 = vst.msk [vmem:[#allocation3] sm:$0xff] %vm3505_vm1, %v3664_v52  ;;  %v10197_v16 = vpop.f32.mrb[17].mxu0  ;;  %v3965_v52 = vsel %vm3505_vm1, %v13054_v34, 0 }
 0x59a   : > { %v3667_v60 = vpop.f32.mrb[18].mxu0 }
 0x59b   : > { %v10198_v38 = vpop.f32.mrb[19].mxu0 }
 0x59c   : > { %v3710_v1 = vpop.f32.mrb[16].mxu1  ;;  %v13077_v38 = vpack.c.bf16 %v12992_v50, %v12992_v50 }
 0x59d   : > { %3717 = vst.msk [vmem:[#allocation3 + $0x20] sm:$0xff] %vm3505_vm1, %v3710_v1  ;;  %v10203_v5 = vpop.f32.mrb[17].mxu1  ;;  %v3956_v1 = vpack.c.bf16 %v12881_v10, %v12881_v10 }
 0x59e   : > { %v3713_v9 = vpop.f32.mrb[18].mxu1  ;;  %v4081_v5 = vsel %vm3626_vm2, %v13070_v13, 0  ;;  %v4127_v45 = vsel %vm3626_vm2, %v13077_v38, 0 }
 0x59f   : > { %v10204_v11 = vpop.f32.mrb[19].mxu1 }
 0x5a0   : > { %v3764_v12 = vpop.f32.mrb[20].mxu0 }
 0x5a1   : > { %v10209_v14 = vpop.f32.mrb[21].mxu0  ;;  %v3822_v23 = vsel %vm3598_vm3, %v3764_v12, -inf }
 0x5a2   : > { %3823 = vmax.xlane.f32.xlu0 %v3822_v23  ;;  %v3767_v17 = vpop.f32.mrb[22].mxu0 }
 0x5a3   : > { %v10210_v18 = vpop.f32.mrb[23].mxu0 }
 0x5a4   : > { %v3816_v19 = vpop.f32.mrb[20].mxu1 }
 0x5a5   : > { %v10215_v20 = vpop.f32.mrb[21].mxu1  ;;  %v3825_v22 = vsel %vm3598_vm3, %v3816_v19, -inf }
 0x5a6   : > { %3826 = vmax.xlane.f32.xlu1 %v3825_v22  ;;  %v3819_v24 = vpop.f32.mrb[22].mxu1 }
 0x5a7   : > { %v10216_v25 = vpop.f32.mrb[23].mxu1 }
 0x5b7   : > { %3896 = vrot.lane.b32.xlu1 %v12996_v53, %s12105_s23 }
 0x62f   : > { %v3824_v27 = vpop.xlane.xlu0 %3823 }
 0x630   : > { %v3828_v57 = vsub.f32 %v3764_v12, %v3824_v27 }
 0x632   : > { %v3830_v29 = vmul.f32 1.442695, %v3828_v57 }
 0x633   : > { %v3827_v32 = vpop.xlane.xlu1 %3826 }
 0x634   : > { %11714 = vpow2.f32 %v3830_v29  ;;  %v3829_v63 = vsub.f32 %v3816_v19, %v3827_v32 }
 0x636   : > { %v3832_v36 = vmul.f32 1.442695, %v3829_v63 }
 0x637   : > { %v3897_v7 = vpop.permute.xlu1 %3896 }
 0x638   : > { %11716 = vpow2.f32 %v3832_v36  ;;  %v3902_v15 = vsel %vm3626_vm2, %v3897_v7, 0 }
 0x639   : > { %10224 = vmatpush3.bf16.msra.mxu1 %v3902_v15 }
 0x63a   : > { %10235 = vmatprep.subr.bf16.mxu1 %v12103_v62 }
 0x63e   : > { %v11715_v40 = vpop.eup %11714 }
 0x63f   : > { %v3834_v41 = vsel %vm3598_vm3, %v11715_v40, 0.0 }
 0x640   : > { %3835 = vadd.xlane.f32.xlu0 %v3834_v41 }
 0x642   : > { %v11717_v42 = vpop.eup %11716 }
 0x643   : > { %v3837_v53 = vsel %vm3598_vm3, %v11717_v42, 0.0 }
 0x644   : > { %3838 = vadd.xlane.f32.xlu0 %v3837_v53 }
 0x65a   : > { %3847 = vrot.lane.b32.xlu0 %v12990_v47, %s12105_s23  ;;  %v3958_v47 = vpack.c.bf16 %v12953_v54, %v12953_v54  ;;  %v3955_v54 = vpack.c.bf16 %v12874_v6, %v12874_v6 }
 0x65c   : > { %v4011_v60 = vsel %vm3505_vm1, %v3958_v47, 0 }
 0x6cd   : > { %v3836_v43 = vpop.xlane.xlu0 %3835 }
 0x6ce   : > { %11718 = vrcp.f32 %v3836_v43 }
 0x6d1   : > { %v3839_v44 = vpop.xlane.xlu0 %3838 }
 0x6d2   : > { %11720 = vrcp.f32 %v3839_v44 }
 0x6d5   : > { %v3848_v46 = vpop.permute.xlu0 %3847 }
 0x6d6   : > { %v3853_v48 = vsel %vm3626_vm2, %v3848_v46, 0 }
 0x6d7   : > { %10218 = vmatpush3.bf16.msra.mxu0 %v3853_v48 }
 0x6d8   : > { %v11719_v49 = vpop.eup %11718  ;;  %10229 = vmatprep.subr.bf16.mxu0 %v12103_v62 }
 0x6d9   : > { %v3842_v51 = vmul.f32 %v11719_v49, %v11715_v40 }
 0x6db   : > { %v3844_v39 = vpack.c.bf16 %v3842_v51, %v3842_v51 }
 0x6dc   : > { %v11721_v55 = vpop.eup %11720 }
 0x6dd   : > { %v3843_v56 = vmul.f32 %v11721_v55, %v11717_v42  ;;  %10220 = vmatmul.mubr.msk.bf16.vlgmr.msra.gmra.mrb[24].mxu0 %vm3598_vm3, %v3844_v39 }
 0x6de   : > { %10231 = vmatprep.mubr.msk.bf16.mxu0 %vm12104_vm0, %v12103_v62 }
 0x6df   : > { %v3845_v16 = vpack.c.bf16 %v3843_v56, %v3843_v56 }
 0x6e0   : > { %10230 = vmatpush3.bf16.xpose.msra.mxu0 %v3965_v52 }
 0x6e1   : > { %10226 = vmatmul.mubr.msk.bf16.vlgmr.msra.gmra.mrb[24].mxu1 %vm3598_vm3, %v3845_v16  ;;  %10241 = vmatprep.subr.bf16.mxu0 %v12103_v62 }
 0x6e2   : > { %10236 = vmatpush3.bf16.xpose.msra.mxu1 %v4011_v60  ;;  %10237 = vmatprep.mubr.msk.bf16.mxu1 %vm12104_vm0, %v12103_v62 }
 0x6e3   : > { %10247 = vmatprep.subr.bf16.mxu1 %v12103_v62 }
 0x6e7   : > { %10232 = vmatmul.mubr.msk.bf16.vlgmr.msra.gmra.mrb[28].mxu0 %vm3505_vm1, %v3955_v54 }
 0x6e8   : > { %10242 = vmatpush3.bf16.msra.mxu0 %v4081_v5  ;;  %10243 = vmatprep.mubr.msk.bf16.mxu0 %vm12104_vm0, %v12103_v62 }
 0x6e9   : > { %10238 = vmatmul.mubr.msk.bf16.vlgmr.msra.gmra.mrb[28].mxu1 %vm3505_vm1, %v3956_v1  ;;  %10253 = vmatprep.subr.bf16.mxu0 %v12103_v62 }
 0x6ea   : > { %10248 = vmatpush3.bf16.msra.mxu1 %v4127_v45  ;;  %10249 = vmatprep.mubr.msk.bf16.mxu1 %vm12104_vm0, %v12103_v62 }
 0x6eb   : > { %10259 = vmatprep.subr.bf16.mxu1 %v12103_v62 }
 0x7b0   : > { %v13093_v6 = vpop.f32.mrb[24].mxu0 }
 0x7b1   : > { %v10221_v10 = vpop.f32.mrb[25].mxu0 }
 0x7b2   : > { %v3892_v50 = vpop.f32.mrb[26].mxu0 }
 0x7b3   : > { %v10222_v9 = vpop.f32.mrb[27].mxu0 }
 0x7b4   : > { %v13095_v11 = vpop.f32.mrb[24].mxu1 }
 0x7b5   : > { %v10227_v12 = vpop.f32.mrb[25].mxu1 }
 0x7b6   : > { %v3941_v14 = vpop.f32.mrb[26].mxu1 }
 0x7b7   : > { %v10228_v23 = vpop.f32.mrb[27].mxu1 }
 0x7ba   : > { %v4001_v17 = vpop.f32.mrb[28].mxu0 }
 0x7bb   : > { %v10233_v18 = vpop.f32.mrb[29].mxu0  ;;  %v4053_v19 = vsel %vm3598_vm3, %v4001_v17, -inf }
 0x7bc   : > { %v4047_v20 = vpop.f32.mrb[28].mxu1  ;;  %4054 = vmax.xlane.f32.xlu1 %v4053_v19  ;;  %v4004_v22 = vpop.f32.mrb[30].mxu0 }
 0x7bd   : > { %v10234_v24 = vpop.f32.mrb[31].mxu0  ;;  %v10239_v25 = vpop.f32.mrb[29].mxu1  ;;  %v4056_v27 = vsel %vm3598_vm3, %v4047_v20, -inf }
 0x7be   : > { %4057 = vmax.xlane.f32.xlu0 %v4056_v27  ;;  %v4050_v57 = vpop.f32.mrb[30].mxu1 }
 0x7bf   : > { %v10240_v29 = vpop.f32.mrb[31].mxu1 }
 0x7cd   : > { %4227 = vrot.lane.b32.xlu1 %v3958_v47, %s12105_s23 }
 0x849   : > { %v4055_v32 = vpop.xlane.xlu1 %4054 }
 0x84a   : > { %v4059_v63 = vsub.f32 %v4001_v17, %v4055_v32 }
 0x84b   : > { %v4058_v36 = vpop.xlane.xlu0 %4057 }
 0x84c   : > { %v4061_v7 = vmul.f32 1.442695, %v4059_v63  ;;  %v4060_v15 = vsub.f32 %v4047_v20, %v4058_v36 }
 0x84d   : > { %v4228_v44 = vpop.permute.xlu1 %4227 }
 0x84e   : > { %11722 = vpow2.f32 %v4061_v7  ;;  %v4063_v40 = vmul.f32 1.442695, %v4060_v15 }
 0x850   : > { %11724 = vpow2.f32 %v4063_v40 }
 0x858   : > { %v11723_v41 = vpop.eup %11722 }
 0x859   : > { %v4065_v42 = vsel %vm3598_vm3, %v11723_v41, 0.0 }
 0x85a   : > { %v11725_v53 = vpop.eup %11724  ;;  %4066 = vadd.xlane.f32.xlu0 %v4065_v42 }
 0x85b   : > { %v4068_v43 = vsel %vm3598_vm3, %v11725_v53, 0.0 }
 0x85c   : > { %4069 = vadd.xlane.f32.xlu1 %v4068_v43 }
 0x86d   : > { %4172 = vrot.lane.b32.xlu1 %v3955_v54, %s12105_s23 }
 0x870   : > { %4175 = vrot.lane.b32.xlu0 %v13054_v34, %s12105_s23  ;;  %v4233_v34 = vsel %vm3505_vm1, %v4228_v44, 0 }
 0x871   : > { %4224 = vrot.lane.b32.xlu1 %v3956_v1, %s12105_s23 }
 0x8e7   : > { %v4067_v46 = vpop.xlane.xlu0 %4066 }
 0x8e8   : > { %11726 = vrcp.f32 %v4067_v46 }
 0x8e9   : > { %v4070_v48 = vpop.xlane.xlu1 %4069 }
 0x8ea   : > { %11728 = vrcp.f32 %v4070_v48 }
 0x8eb   : > { %v4176_v55 = vpop.permute.xlu0 %4175 }
 0x8ec   : > { %v4181_v52 = vsel %vm3505_vm1, %v4176_v55, 0  ;;  %v13138_v55 = vpack.c.bf16 %v12964_v31, %v12964_v31  ;;  %v13154_v31 = vpack.c.bf16 %v13003_v59, %v13003_v59 }
 0x8ed   : > { %v4173_v60 = vpop.permute.xlu1 %4172 }
 0x8f1   : > { %v4225_v54 = vpop.permute.xlu1 %4224 }
 0x8f2   : > { %v11727_v49 = vpop.eup %11726 }
 0x8f3   : > { %v4073_v51 = vmul.f32 %v11727_v49, %v11723_v41 }
 0x8f4   : > { %v11729_v39 = vpop.eup %11728 }
 0x8f5   : > { %v4074_v47 = vmul.f32 %v11729_v39, %v11725_v53  ;;  %v4075_v56 = vpack.c.bf16 %v4073_v51, %v4073_v51 }
 0x8f7   : > { %10244 = vmatmul.mubr.msk.bf16.vlgmr.msra.gmra.mrb[32].mxu0 %vm3598_vm3, %v4075_v56  ;;  %v4076_v16 = vpack.c.bf16 %v4074_v47, %v4074_v47 }
 0x8f8   : > { %10254 = vmatpush3.bf16.xpose.msra.mxu0 %v4181_v52  ;;  %10255 = vmatprep.mubr.msk.bf16.mxu0 %vm12104_vm0, %v12103_v62 }
 0x8f9   : > { %10250 = vmatmul.mubr.msk.bf16.vlgmr.msra.gmra.mrb[32].mxu1 %vm3598_vm3, %v4076_v16  ;;  %10265 = vmatprep.subr.bf16.mxu0 %v12103_v62  ;;  %v4417_v16 = vsel %vm3505_vm1, %v13138_v55, 0 }
 0x8fa   : > { %10260 = vmatpush3.bf16.xpose.msra.mxu1 %v4233_v34  ;;  %10261 = vmatprep.mubr.msk.bf16.mxu1 %vm12104_vm0, %v12103_v62 }
 0x8fb   : > { %10271 = vmatprep.subr.bf16.mxu1 %v12103_v62 }
 0x8ff   : > { %10256 = vmatmul.mubr.msk.bf16.vlgmr.msra.gmra.mrb[36].mxu0 %vm3505_vm1, %v4173_v60 }
 0x900   : > { %10267 = vmatprep.mubr.msk.bf16.mxu0 %vm12104_vm0, %v12103_v62 }
 0x901   : > { %10262 = vmatmul.mubr.msk.bf16.vlgmr.msra.gmra.mrb[36].mxu1 %vm3505_vm1, %v4225_v54  ;;  %v13161_v54 = vpack.c.bf16 %v13008_v0, %v13008_v0 }
 0x902   : > { %10273 = vmatprep.mubr.msk.bf16.mxu1 %vm12104_vm0, %v12103_v62 }
 0x903   : > { %v4579_v59 = vsel %vm3626_vm2, %v13161_v54, 0 }
 0x9ca   : > { %v4117_v1 = vpop.f32.mrb[32].mxu0 }
 0x9cb   : > { %4169 = vst.msk [vmem:[#allocation3 + $0x8] sm:$0xff] %vm3505_vm1, %v4117_v1  ;;  %v10245_v5 = vpop.f32.mrb[33].mxu0  ;;  %v4408_v1 = vpack.c.bf16 %v12899_v28, %v12899_v28 }
 0x9cc   : > { %v4120_v45 = vpop.f32.mrb[34].mxu0  ;;  %v4163_v10 = vpop.f32.mrb[32].mxu1  ;;  %v4533_v5 = vsel %vm3626_vm2, %v13154_v31, 0 }
 0x9cd   : > { %4170 = vst.msk [vmem:[#allocation3 + $0x28] sm:$0xff] %vm3505_vm1, %v4163_v10  ;;  %v10246_v50 = vpop.f32.mrb[35].mxu0  ;;  %v10251_v9 = vpop.f32.mrb[33].mxu1 }
 0x9ce   : > { %v4166_v12 = vpop.f32.mrb[34].mxu1 }
 0x9cf   : > { %v10252_v14 = vpop.f32.mrb[35].mxu1 }
 0x9d2   : > { %v4217_v23 = vpop.f32.mrb[36].mxu0 }
 0x9d3   : > { %v10257_v17 = vpop.f32.mrb[37].mxu0  ;;  %v4275_v18 = vsel %vm3598_vm3, %v4217_v23, -inf }
 0x9d4   : > { %4276 = vmax.xlane.f32.xlu0 %v4275_v18  ;;  %v4220_v19 = vpop.f32.mrb[38].mxu0  ;;  %v4269_v20 = vpop.f32.mrb[36].mxu1 }
 0x9d5   : > { %v10258_v22 = vpop.f32.mrb[39].mxu0  ;;  %v10263_v24 = vpop.f32.mrb[37].mxu1  ;;  %v4278_v25 = vsel %vm3598_vm3, %v4269_v20, -inf }
 0x9d6   : > { %4279 = vmax.xlane.f32.xlu1 %v4278_v25  ;;  %v4272_v27 = vpop.f32.mrb[38].mxu1 }
 0x9d7   : > { %v10264_v57 = vpop.f32.mrb[39].mxu1 }
 0x9e7   : > { %4349 = vrot.lane.b32.xlu1 %v13077_v38, %s12105_s23 }
 0xa61   : > { %v4277_v29 = vpop.xlane.xlu0 %4276 }
 0xa62   : > { %v4281_v32 = vsub.f32 %v4217_v23, %v4277_v29 }
 0xa63   : > { %v4280_v63 = vpop.xlane.xlu1 %4279 }
 0xa64   : > { %v4283_v36 = vmul.f32 1.442695, %v4281_v32  ;;  %v4282_v7 = vsub.f32 %v4269_v20, %v4280_v63 }
 0xa66   : > { %11730 = vpow2.f32 %v4283_v36  ;;  %v4285_v15 = vmul.f32 1.442695, %v4282_v7 }
 0xa67   : > { %v4350_v40 = vpop.permute.xlu1 %4349 }
 0xa68   : > { %11732 = vpow2.f32 %v4285_v15  ;;  %v4355_v41 = vsel %vm3626_vm2, %v4350_v40, 0 }
 0xa69   : > { %10272 = vmatpush3.bf16.msra.mxu1 %v4355_v41 }
 0xa6a   : > { %10283 = vmatprep.subr.bf16.mxu1 %v12103_v62 }
 0xa70   : > { %v11731_v42 = vpop.eup %11730 }
 0xa71   : > { %v4287_v53 = vsel %vm3598_vm3, %v11731_v42, 0.0 }
 0xa72   : > { %v11733_v43 = vpop.eup %11732  ;;  %4288 = vadd.xlane.f32.xlu0 %v4287_v53 }
 0xa73   : > { %v4290_v38 = vsel %vm3598_vm3, %v11733_v43, 0.0 }
 0xa76   : > { %4291 = vadd.xlane.f32.xlu0 %v4290_v38 }
 0xa8c   : > { %4300 = vrot.lane.b32.xlu0 %v13070_v13, %s12105_s23  ;;  %v4410_v13 = vpack.c.bf16 %v12971_v35, %v12971_v35  ;;  %v4407_v35 = vpack.c.bf16 %v12893_v21, %v12893_v21 }
 0xa8e   : > { %v4463_v60 = vsel %vm3505_vm1, %v4410_v13, 0 }
 0xaff   : > { %v4289_v44 = vpop.xlane.xlu0 %4288 }
 0xb00   : > { %11734 = vrcp.f32 %v4289_v44 }
 0xb03   : > { %v4292_v46 = vpop.xlane.xlu0 %4291 }
 0xb04   : > { %11736 = vrcp.f32 %v4292_v46 }
 0xb07   : > { %v4301_v48 = vpop.permute.xlu0 %4300 }
 0xb08   : > { %v4306_v49 = vsel %vm3626_vm2, %v4301_v48, 0 }
 0xb09   : > { %10266 = vmatpush3.bf16.msra.mxu0 %v4306_v49 }
 0xb0a   : > { %v11735_v51 = vpop.eup %11734  ;;  %10277 = vmatprep.subr.bf16.mxu0 %v12103_v62 }
 0xb0b   : > { %v4295_v39 = vmul.f32 %v11735_v51, %v11731_v42 }
 0xb0d   : > { %v4297_v47 = vpack.c.bf16 %v4295_v39, %v4295_v39 }
 0xb0e   : > { %v11737_v56 = vpop.eup %11736 }
 0xb0f   : > { %v4296_v52 = vmul.f32 %v11737_v56, %v11733_v43  ;;  %10268 = vmatmul.mubr.msk.bf16.vlgmr.msra.gmra.mrb[40].mxu0 %vm3598_vm3, %v4297_v47 }
 0xb10   : > { %10279 = vmatprep.mubr.msk.bf16.mxu0 %vm12104_vm0, %v12103_v62 }
 0xb11   : > { %v4298_v34 = vpack.c.bf16 %v4296_v52, %v4296_v52 }
 0xb12   : > { %10278 = vmatpush3.bf16.xpose.msra.mxu0 %v4417_v16 }
 0xb13   : > { %10274 = vmatmul.mubr.msk.bf16.vlgmr.msra.gmra.mrb[40].mxu1 %vm3598_vm3, %v4298_v34  ;;  %10289 = vmatprep.subr.bf16.mxu0 %v12103_v62 }
 0xb14   : > { %10284 = vmatpush3.bf16.xpose.msra.mxu1 %v4463_v60  ;;  %10285 = vmatprep.mubr.msk.bf16.mxu1 %vm12104_vm0, %v12103_v62 }
 0xb15   : > { %10295 = vmatprep.subr.bf16.mxu1 %v12103_v62 }
 0xb19   : > { %10280 = vmatmul.mubr.msk.bf16.vlgmr.msra.gmra.mrb[44].mxu0 %vm3505_vm1, %v4407_v35 }
 0xb1a   : > { %10290 = vmatpush3.bf16.msra.mxu0 %v4533_v5  ;;  %10291 = vmatprep.mubr.msk.bf16.mxu0 %vm12104_vm0, %v12103_v62 }
 0xb1b   : > { %10286 = vmatmul.mubr.msk.bf16.vlgmr.msra.gmra.mrb[44].mxu1 %vm3505_vm1, %v4408_v1  ;;  %10301 = vmatprep.subr.bf16.mxu0 %v12103_v62 }
 0xb1c   : > { %10296 = vmatpush3.bf16.msra.mxu1 %v4579_v59  ;;  %10297 = vmatprep.mubr.msk.bf16.mxu1 %vm12104_vm0, %v12103_v62 }
 0xb1d   : > { %10307 = vmatprep.subr.bf16.mxu1 %v12103_v62 }
 0xbe2   : > { %v13177_v21 = vpop.f32.mrb[40].mxu0 }
 0xbe3   : > { %v10269_v28 = vpop.f32.mrb[41].mxu0 }
 0xbe4   : > { %v4345_v0 = vpop.f32.mrb[42].mxu0 }
 0xbe5   : > { %v10270_v45 = vpop.f32.mrb[43].mxu0 }
 0xbe6   : > { %v13179_v10 = vpop.f32.mrb[40].mxu1 }
 0xbe7   : > { %v10275_v50 = vpop.f32.mrb[41].mxu1 }
 0xbe8   : > { %v4394_v9 = vpop.f32.mrb[42].mxu1 }
 0xbe9   : > { %v10276_v12 = vpop.f32.mrb[43].mxu1 }
 0xbec   : > { %v4453_v14 = vpop.f32.mrb[44].mxu0 }
 0xbed   : > { %v10281_v23 = vpop.f32.mrb[45].mxu0  ;;  %v4505_v17 = vsel %vm3598_vm3, %v4453_v14, -inf }
 0xbee   : > { %4506 = vmax.xlane.f32.xlu1 %v4505_v17  ;;  %v4456_v18 = vpop.f32.mrb[46].mxu0  ;;  %v4499_v19 = vpop.f32.mrb[44].mxu1 }
 0xbef   : > { %v10282_v20 = vpop.f32.mrb[47].mxu0  ;;  %v10287_v22 = vpop.f32.mrb[45].mxu1  ;;  %v4508_v24 = vsel %vm3598_vm3, %v4499_v19, -inf }
 0xbf0   : > { %4509 = vmax.xlane.f32.xlu0 %v4508_v24  ;;  %v4502_v25 = vpop.f32.mrb[46].mxu1 }
 0xbf1   : > { %v10288_v27 = vpop.f32.mrb[47].mxu1 }
 0xbff   : > { %4679 = vrot.lane.b32.xlu1 %v4410_v13, %s12105_s23 }
 0xc7b   : > { %v4507_v57 = vpop.xlane.xlu1 %4506 }
 0xc7c   : > { %v4511_v29 = vsub.f32 %v4453_v14, %v4507_v57 }
 0xc7d   : > { %v4510_v32 = vpop.xlane.xlu0 %4509 }
 0xc7e   : > { %v4513_v63 = vmul.f32 1.442695, %v4511_v29  ;;  %v4512_v36 = vsub.f32 %v4499_v19, %v4510_v32 }
 0xc7f   : > { %v4680_v53 = vpop.permute.xlu1 %4679 }
 0xc80   : > { %11738 = vpow2.f32 %v4513_v63  ;;  %v4515_v7 = vmul.f32 1.442695, %v4512_v36 }
 0xc82   : > { %11740 = vpow2.f32 %v4515_v7 }
 0xc8a   : > { %v11739_v15 = vpop.eup %11738 }
 0xc8b   : > { %v4517_v40 = vsel %vm3598_vm3, %v11739_v15, 0.0 }
 0xc8c   : > { %v11741_v41 = vpop.eup %11740  ;;  %4518 = vadd.xlane.f32.xlu0 %v4517_v40 }
 0xc8d   : > { %v4520_v42 = vsel %vm3598_vm3, %v11741_v41, 0.0 }
 0xc8e   : > { %4521 = vadd.xlane.f32.xlu1 %v4520_v42 }
 0xc9f   : > { %4624 = vrot.lane.b32.xlu1 %v4407_v35, %s12105_s23 }
 0xca2   : > { %4627 = vrot.lane.b32.xlu0 %v13138_v55, %s12105_s23  ;;  %v4685_v55 = vsel %vm3505_vm1, %v4680_v53, 0 }
 0xca3   : > { %4676 = vrot.lane.b32.xlu1 %v4408_v1, %s12105_s23 }
 0xd19   : > { %v4519_v43 = vpop.xlane.xlu0 %4518 }
 0xd1a   : > { %11742 = vrcp.f32 %v4519_v43 }
 0xd1b   : > { %v4522_v38 = vpop.xlane.xlu1 %4521 }
 0xd1c   : > { %11744 = vrcp.f32 %v4522_v38  ;;  %v13222_v38 = vpack.c.bf16 %v12967_v33, %v12967_v33  ;;  %v13238_v33 = vpack.c.bf16 %v13006_v61, %v13006_v61 }
 0xd1d   : > { %v4628_v49 = vpop.permute.xlu0 %4627 }
 0xd1e   : > { %v4633_v47 = vsel %vm3505_vm1, %v4628_v49, 0  ;;  %v4869_v49 = vsel %vm3505_vm1, %v13222_v38, 0 }
 0xd1f   : > { %v4625_v13 = vpop.permute.xlu1 %4624 }
 0xd23   : > { %v4677_v52 = vpop.permute.xlu1 %4676 }
 0xd24   : > { %v11743_v44 = vpop.eup %11742 }
 0xd25   : > { %v4525_v46 = vmul.f32 %v11743_v44, %v11739_v15 }
 0xd26   : > { %v11745_v48 = vpop.eup %11744 }
 0xd27   : > { %v4526_v51 = vmul.f32 %v11745_v48, %v11741_v41  ;;  %v4527_v39 = vpack.c.bf16 %v4525_v46, %v4525_v46 }
 0xd29   : > { %10292 = vmatmul.mubr.msk.bf16.vlgmr.msra.gmra.mrb[48].mxu0 %vm3598_vm3, %v4527_v39  ;;  %v4528_v56 = vpack.c.bf16 %v4526_v51, %v4526_v51 }
 0xd2a   : > { %10302 = vmatpush3.bf16.xpose.msra.mxu0 %v4633_v47  ;;  %10303 = vmatprep.mubr.msk.bf16.mxu0 %vm12104_vm0, %v12103_v62  ;;  %v13245_v47 = vpack.c.bf16 %v13010_v4, %v13010_v4 }
 0xd2b   : > { %10298 = vmatmul.mubr.msk.bf16.vlgmr.msra.gmra.mrb[48].mxu1 %vm3598_vm3, %v4528_v56  ;;  %10313 = vmatprep.subr.bf16.mxu0 %v12103_v62  ;;  %v4860_v56 = vpack.c.bf16 %v12901_v30, %v12901_v30 }
 0xd2c   : > { %10308 = vmatpush3.bf16.xpose.msra.mxu1 %v4685_v55  ;;  %10309 = vmatprep.mubr.msk.bf16.mxu1 %vm12104_vm0, %v12103_v62  ;;  %v4985_v55 = vsel %vm3626_vm2, %v13238_v33, 0  ;;  %v5031_v61 = vsel %vm3626_vm2, %v13245_v47, 0 }
 0xd2d   : > { %10319 = vmatprep.subr.bf16.mxu1 %v12103_v62 }
 0xd31   : > { %10304 = vmatmul.mubr.msk.bf16.vlgmr.msra.gmra.mrb[52].mxu0 %vm3505_vm1, %v4625_v13 }
 0xd32   : > { %10315 = vmatprep.mubr.msk.bf16.mxu0 %vm12104_vm0, %v12103_v62 }
 0xd33   : > { %10310 = vmatmul.mubr.msk.bf16.vlgmr.msra.gmra.mrb[52].mxu1 %vm3505_vm1, %v4677_v52 }
 0xd34   : > { %10321 = vmatprep.mubr.msk.bf16.mxu1 %vm12104_vm0, %v12103_v62 }
 0xdfc   : > { %v4569_v16 = vpop.f32.mrb[48].mxu0 }
 0xdfd   : > { %4621 = vst.msk [vmem:[#allocation3 + $0x10] sm:$0xff] %vm3505_vm1, %v4569_v16  ;;  %v10293_v34 = vpop.f32.mrb[49].mxu0 }
 0xdfe   : > { %v4572_v60 = vpop.f32.mrb[50].mxu0  ;;  %v4615_v35 = vpop.f32.mrb[48].mxu1 }
 0xdff   : > { %4622 = vst.msk [vmem:[#allocation3 + $0x30] sm:$0xff] %vm3505_vm1, %v4615_v35  ;;  %v10294_v1 = vpop.f32.mrb[51].mxu0  ;;  %v10299_v5 = vpop.f32.mrb[49].mxu1 }
 0xe00   : > { %v4618_v59 = vpop.f32.mrb[50].mxu1 }
 0xe01   : > { %v10300_v28 = vpop.f32.mrb[51].mxu1 }
 0xe04   : > { %v4669_v0 = vpop.f32.mrb[52].mxu0 }
 0xe05   : > { %v10305_v45 = vpop.f32.mrb[53].mxu0  ;;  %v4727_v50 = vsel %vm3598_vm3, %v4669_v0, -inf }
 0xe06   : > { %4728 = vmax.xlane.f32.xlu0 %v4727_v50  ;;  %v4672_v9 = vpop.f32.mrb[54].mxu0  ;;  %v4721_v12 = vpop.f32.mrb[52].mxu1 }
 0xe07   : > { %v10306_v14 = vpop.f32.mrb[55].mxu0  ;;  %v10311_v23 = vpop.f32.mrb[53].mxu1  ;;  %v4730_v17 = vsel %vm3598_vm3, %v4721_v12, -inf }
 0xe08   : > { %4731 = vmax.xlane.f32.xlu1 %v4730_v17  ;;  %v4724_v18 = vpop.f32.mrb[54].mxu1 }
 0xe09   : > { %v10312_v19 = vpop.f32.mrb[55].mxu1 }
 0xe19   : > { %4801 = vrot.lane.b32.xlu1 %v13161_v54, %s12105_s23 }
 0xe93   : > { %v4729_v20 = vpop.xlane.xlu0 %4728 }
 0xe94   : > { %v4733_v22 = vsub.f32 %v4669_v0, %v4729_v20 }
 0xe95   : > { %v4732_v24 = vpop.xlane.xlu1 %4731 }
 0xe96   : > { %v4735_v25 = vmul.f32 1.442695, %v4733_v22  ;;  %v4734_v27 = vsub.f32 %v4721_v12, %v4732_v24 }
 0xe98   : > { %11746 = vpow2.f32 %v4735_v25  ;;  %v4737_v57 = vmul.f32 1.442695, %v4734_v27 }
 0xe99   : > { %v4802_v29 = vpop.permute.xlu1 %4801 }
 0xe9a   : > { %11748 = vpow2.f32 %v4737_v57  ;;  %v4807_v32 = vsel %vm3626_vm2, %v4802_v29, 0 }
 0xe9b   : > { %10320 = vmatpush3.bf16.msra.mxu1 %v4807_v32 }
 0xe9c   : > { %10331 = vmatprep.subr.bf16.mxu1 %v12103_v62 }
 0xea2   : > { %v11747_v63 = vpop.eup %11746 }
 0xea3   : > { %v4739_v36 = vsel %vm3598_vm3, %v11747_v63, 0.0 }
 0xea4   : > { %v11749_v7 = vpop.eup %11748  ;;  %4740 = vadd.xlane.f32.xlu0 %v4739_v36 }
 0xea5   : > { %v4742_v54 = vsel %vm3598_vm3, %v11749_v7, 0.0 }
 0xea8   : > { %4743 = vadd.xlane.f32.xlu0 %v4742_v54 }
 0xebe   : > { %4752 = vrot.lane.b32.xlu0 %v13154_v31, %s12105_s23  ;;  %v4862_v31 = vpack.c.bf16 %v12973_v37, %v12973_v37  ;;  %v4859_v37 = vpack.c.bf16 %v12897_v26, %v12897_v26 }
 0xec0   : > { %v4915_v39 = vsel %vm3505_vm1, %v4862_v31, 0 }
 0xf31   : > { %v4741_v15 = vpop.xlane.xlu0 %4740 }
 0xf32   : > { %11750 = vrcp.f32 %v4741_v15 }
 0xf35   : > { %v4744_v40 = vpop.xlane.xlu0 %4743 }
 0xf36   : > { %11752 = vrcp.f32 %v4744_v40 }
 0xf39   : > { %v4753_v41 = vpop.permute.xlu0 %4752 }
 0xf3a   : > { %v4758_v42 = vsel %vm3626_vm2, %v4753_v41, 0 }
 0xf3b   : > { %10314 = vmatpush3.bf16.msra.mxu0 %v4758_v42 }
 0xf3c   : > { %v11751_v53 = vpop.eup %11750  ;;  %10325 = vmatprep.subr.bf16.mxu0 %v12103_v62 }
 0xf3d   : > { %v4747_v43 = vmul.f32 %v11751_v53, %v11747_v63 }
 0xf3f   : > { %v4749_v44 = vpack.c.bf16 %v4747_v43, %v4747_v43 }
 0xf40   : > { %v11753_v46 = vpop.eup %11752 }
 0xf41   : > { %v4748_v48 = vmul.f32 %v11753_v46, %v11749_v7  ;;  %10316 = vmatmul.mubr.msk.bf16.vlgmr.msra.gmra.mrb[56].mxu0 %vm3598_vm3, %v4749_v44 }
 0xf42   : > { %10327 = vmatprep.mubr.msk.bf16.mxu0 %vm12104_vm0, %v12103_v62 }
 0xf43   : > { %v4750_v51 = vpack.c.bf16 %v4748_v48, %v4748_v48 }
 0xf44   : > { %10326 = vmatpush3.bf16.xpose.msra.mxu0 %v4869_v49 }
 0xf45   : > { %10322 = vmatmul.mubr.msk.bf16.vlgmr.msra.gmra.mrb[56].mxu1 %vm3598_vm3, %v4750_v51  ;;  %10337 = vmatprep.subr.bf16.mxu0 %v12103_v62 }
 0xf46   : > { %10332 = vmatpush3.bf16.xpose.msra.mxu1 %v4915_v39  ;;  %10333 = vmatprep.mubr.msk.bf16.mxu1 %vm12104_vm0, %v12103_v62 }
 0xf47   : > { %10343 = vmatprep.subr.bf16.mxu1 %v12103_v62 }
 0xf4b   : > { %10328 = vmatmul.mubr.msk.bf16.vlgmr.msra.gmra.mrb[60].mxu0 %vm3505_vm1, %v4859_v37 }
 0xf4c   : > { %10338 = vmatpush3.bf16.msra.mxu0 %v4985_v55  ;;  %10339 = vmatprep.mubr.msk.bf16.mxu0 %vm12104_vm0, %v12103_v62 }
 0xf4d   : > { %10334 = vmatmul.mubr.msk.bf16.vlgmr.msra.gmra.mrb[60].mxu1 %vm3505_vm1, %v4860_v56  ;;  %10349 = vmatprep.subr.bf16.mxu0 %v12103_v62 }
 0xf4e   : > { %10344 = vmatpush3.bf16.msra.mxu1 %v5031_v61  ;;  %10345 = vmatprep.mubr.msk.bf16.mxu1 %vm12104_vm0, %v12103_v62 }
 0xf4f   : > { %10355 = vmatprep.subr.bf16.mxu1 %v12103_v62 }
0x1014   : > { %v13261_v26 = vpop.f32.mrb[56].mxu0 }
0x1015   : > { %v10317_v30 = vpop.f32.mrb[57].mxu0 }
0x1016   : > { %v4797_v4 = vpop.f32.mrb[58].mxu0 }
0x1017   : > { %v10318_v13 = vpop.f32.mrb[59].mxu0 }
0x1018   : > { %v13263_v52 = vpop.f32.mrb[56].mxu1 }
0x1019   : > { %v10323_v16 = vpop.f32.mrb[57].mxu1 }
0x101a   : > { %v4846_v34 = vpop.f32.mrb[58].mxu1 }
0x101b   : > { %v10324_v60 = vpop.f32.mrb[59].mxu1 }
0x101e   : > { %v4905_v35 = vpop.f32.mrb[60].mxu0 }
0x101f   : > { %v10329_v1 = vpop.f32.mrb[61].mxu0  ;;  %v4957_v5 = vsel %vm3598_vm3, %v4905_v35, -inf }
0x1020   : > { %4958 = vmax.xlane.f32.xlu1 %v4957_v5  ;;  %v4908_v59 = vpop.f32.mrb[62].mxu0  ;;  %v4951_v28 = vpop.f32.mrb[60].mxu1 }
0x1021   : > { %v10330_v0 = vpop.f32.mrb[63].mxu0  ;;  %v10335_v45 = vpop.f32.mrb[61].mxu1  ;;  %v4960_v50 = vsel %vm3598_vm3, %v4951_v28, -inf }
0x1022   : > { %4961 = vmax.xlane.f32.xlu0 %v4960_v50  ;;  %v4954_v9 = vpop.f32.mrb[62].mxu1 }
0x1023   : > { %v10336_v12 = vpop.f32.mrb[63].mxu1 }
0x1031   : > { %5131 = vrot.lane.b32.xlu1 %v4862_v31, %s12105_s23 }
0x10ad   : > { %v4959_v14 = vpop.xlane.xlu1 %4958 }
0x10ae   : > { %v4963_v23 = vsub.f32 %v4905_v35, %v4959_v14 }
0x10af   : > { %v4962_v17 = vpop.xlane.xlu0 %4961 }
0x10b0   : > { %v4965_v18 = vmul.f32 1.442695, %v4963_v23  ;;  %v4964_v19 = vsub.f32 %v4951_v28, %v4962_v17  ;;  %v11138_v23 = vld [vmem:[%s12461_s2 + $0xc] ss:$16 sps:$4 sm:$0xff]  }
0x10b1   : > { %v5132_v57 = vpop.permute.xlu1 %5131 }
0x10b2   : > { %11754 = vpow2.f32 %v4965_v18  ;;  %v4967_v20 = vmul.f32 1.442695, %v4964_v19  ;;  %v5137_v53 = vsel %vm3505_vm1, %v5132_v57, 0  ;;  %v11132_v19 = vld [vmem:[%s12461_s2 + $0x4] ss:$16 sps:$4 sm:$0xff]  }
0x10b4   : > { %11756 = vpow2.f32 %v4967_v20 }
0x10bc   : > { %v11755_v22 = vpop.eup %11754 }
0x10bd   : > { %v4969_v24 = vsel %vm3598_vm3, %v11755_v22, 0.0 }
0x10be   : > { %v11757_v25 = vpop.eup %11756  ;;  %4970 = vadd.xlane.f32.xlu0 %v4969_v24 }
0x10bf   : > { %v4972_v27 = vsel %vm3598_vm3, %v11757_v25, 0.0 }
0x10c0   : > { %4973 = vadd.xlane.f32.xlu1 %v4972_v27  ;;  %v11130_v27 = vld [vmem:[%s12461_s2] ss:$16 sps:$4 sm:$0xff]  }
0x10d1   : > { %5076 = vrot.lane.b32.xlu1 %v4859_v37, %s12105_s23 }
0x10d4   : > { %5079 = vrot.lane.b32.xlu0 %v13222_v38, %s12105_s23 }
0x10d5   : > { %5128 = vrot.lane.b32.xlu1 %v4860_v56, %s12105_s23 }
0x114b   : > { %v4971_v29 = vpop.xlane.xlu0 %4970 }
0x114c   : > { %11758 = vrcp.f32 %v4971_v29 }
0x114d   : > { %v4974_v32 = vpop.xlane.xlu1 %4973 }
0x114e   : > { %11760 = vrcp.f32 %v4974_v32  ;;  %v11135_v32 = vld [vmem:[%s12461_s2 + $0x24] ss:$16 sps:$4 sm:$0xff]  }
0x114f   : > { %v5080_v54 = vpop.permute.xlu0 %5079 }
0x1150   : > { %v5085_v41 = vsel %vm3505_vm1, %v5080_v54, 0  ;;  %v11133_v54 = vld [vmem:[%s12461_s2 + $0x20] ss:$16 sps:$4 sm:$0xff]  }
0x1151   : > { %v5077_v43 = vpop.permute.xlu1 %5076 }
0x1155   : > { %v5129_v38 = vpop.permute.xlu1 %5128 }
0x1156   : > { %v11759_v63 = vpop.eup %11758 }
0x1157   : > { %v4977_v36 = vmul.f32 %v11759_v63, %v11755_v22 }
0x1158   : > { %v11761_v7 = vpop.eup %11760 }
0x1159   : > { %v4978_v15 = vmul.f32 %v11761_v7, %v11757_v25  ;;  %v4979_v40 = vpack.c.bf16 %v4977_v36, %v4977_v36 }
0x115b   : > { %10340 = vmatmul.mubr.msk.bf16.vlgmr.msra.gmra.mrb[64].mxu0 %vm3598_vm3, %v4979_v40  ;;  %v4980_v42 = vpack.c.bf16 %v4978_v15, %v4978_v15  ;;  %v11136_v15 = vld [vmem:[%s12461_s2 + $0x8] ss:$16 sps:$4 sm:$0xff]  }
0x115c   : > { %10350 = vmatpush3.bf16.xpose.msra.mxu0 %v5085_v41  ;;  %10351 = vmatprep.mubr.msk.bf16.mxu0 %vm12104_vm0, %v12103_v62  ;;  %v11141_v41 = vld [vmem:[%s12461_s2 + $0x44] ss:$16 sps:$4 sm:$0xff]  }
0x115d   : > { %10346 = vmatmul.mubr.msk.bf16.vlgmr.msra.gmra.mrb[64].mxu1 %vm3598_vm3, %v4980_v42  ;;  %10361 = vmatprep.subr.bf16.mxu0 %v12103_v62  ;;  %v11144_v42 = vld [vmem:[%s12461_s2 + $0x2c] ss:$16 sps:$4 sm:$0xff]  }
0x115e   : > { %10356 = vmatpush3.bf16.xpose.msra.mxu1 %v5137_v53  ;;  %10357 = vmatprep.mubr.msk.bf16.mxu1 %vm12104_vm0, %v12103_v62  ;;  %v11139_v53 = vld [vmem:[%s12461_s2 + $0x40] ss:$16 sps:$4 sm:$0xff]  }
0x115f   : > { %10367 = vmatprep.subr.bf16.mxu1 %v12103_v62 }
0x1163   : > { %10352 = vmatmul.mubr.msk.bf16.vlgmr.msra.gmra.mrb[68].mxu0 %vm3505_vm1, %v5077_v43  ;;  %v11142_v43 = vld [vmem:[%s12461_s2 + $0x28] ss:$16 sps:$4 sm:$0xff]  }
0x1164   : > { %10363 = vmatprep.mubr.msk.bf16.mxu0 %vm12104_vm0, %v12103_v62 }
0x1165   : > { %10358 = vmatmul.mubr.msk.bf16.vlgmr.msra.gmra.mrb[68].mxu1 %vm3505_vm1, %v5129_v38  ;;  %v11147_v38 = vld [vmem:[%s12461_s2 + $0x64] ss:$16 sps:$4 sm:$0xff]  }
0x1166   : > { %10369 = vmatprep.mubr.msk.bf16.mxu1 %vm12104_vm0, %v12103_v62 }
0x122e   : > { %v5021_v44 = vpop.f32.mrb[64].mxu0 }
0x122f   : > { %5073 = vst.msk [vmem:[#allocation3 + $0x18] sm:$0xff] %vm3505_vm1, %v5021_v44  ;;  %v10341_v46 = vpop.f32.mrb[65].mxu0  ;;  %v11150_v44 = vld [vmem:[%s12461_s2 + $0x4c] ss:$16 sps:$4 sm:$0xff]  }
0x1230   : > { %v5024_v31 = vpop.f32.mrb[66].mxu0  ;;  %v5067_v48 = vpop.f32.mrb[64].mxu1  ;;  %v11145_v46 = vld [vmem:[%s12461_s2 + $0x60] ss:$16 sps:$4 sm:$0xff]  }
0x1231   : > { %5074 = vst.msk [vmem:[#allocation3 + $0x38] sm:$0xff] %vm3505_vm1, %v5067_v48  ;;  %v10342_v49 = vpop.f32.mrb[67].mxu0  ;;  %v10347_v51 = vpop.f32.mrb[65].mxu1  ;;  %v11148_v31 = vld [vmem:[%s12461_s2 + $0x48] ss:$16 sps:$4 sm:$0xff]  }
0x1232   : > { %v5070_v39 = vpop.f32.mrb[66].mxu1  ;;  %v11153_v48 = vld [vmem:[%s12461_s2 + $0x84] ss:$16 sps:$4 sm:$0xff]   ;;  %v11156_v49 = vld [vmem:[%s12461_s2 + $0x6c] ss:$16 sps:$4 sm:$0xff]  }
0x1233   : > { %v10348_v37 = vpop.f32.mrb[67].mxu1  ;;  %v11151_v51 = vld [vmem:[%s12461_s2 + $0x80] ss:$16 sps:$4 sm:$0xff]   ;;  %v11154_v39 = vld [vmem:[%s12461_s2 + $0x68] ss:$16 sps:$4 sm:$0xff]  }
0x1234   : > { %v11159_v37 = vld [vmem:[%s12461_s2 + $0xa4] ss:$16 sps:$4 sm:$0xff]  }
0x1236   : > { %v5121_v56 = vpop.f32.mrb[68].mxu0 }
0x1237   : > { %v10353_v55 = vpop.f32.mrb[69].mxu0  ;;  %v5179_v61 = vsel %vm3598_vm3, %v5121_v56, -inf }
0x1238   : > { %5180 = vmax.xlane.f32.xlu0 %v5179_v61  ;;  %v5124_v30 = vpop.f32.mrb[70].mxu0  ;;  %v5173_v4 = vpop.f32.mrb[68].mxu1  ;;  %v11157_v55 = vld [vmem:[%s12461_s2 + $0xa0] ss:$16 sps:$4 sm:$0xff]   ;;  %v11160_v61 = vld [vmem:[%s12461_s2 + $0x88] ss:$16 sps:$4 sm:$0xff]  }
0x1239   : > { %v10354_v62 = vpop.f32.mrb[71].mxu0  ;;  %v10359_v13 = vpop.f32.mrb[69].mxu1  ;;  %v5182_v16 = vsel %vm3598_vm3, %v5173_v4, -inf  ;;  %v11165_v30 = vld [vmem:[%s12461_s2 + $0xc4] ss:$16 sps:$4 sm:$0xff]  }
0x123a   : > { %5183 = vmax.xlane.f32.xlu1 %v5182_v16  ;;  %v5176_v34 = vpop.f32.mrb[70].mxu1  ;;  %v11163_v62 = vld [vmem:[%s12461_s2 + $0xc0] ss:$16 sps:$4 sm:$0xff]   ;;  %v11166_v13 = vld [vmem:[%s12461_s2 + $0xa8] ss:$16 sps:$4 sm:$0xff]  }
0x123b   : > { %v10360_v60 = vpop.f32.mrb[71].mxu1  ;;  %v11171_v16 = vld [vmem:[%s12461_s2 + $0xe4] ss:$16 sps:$4 sm:$0xff]   ;;  %v11174_v34 = vld [vmem:[%s12461_s2 + $0xcc] ss:$16 sps:$4 sm:$0xff]  }
0x123c   : > { %v11169_v60 = vld [vmem:[%s12461_s2 + $0xe0] ss:$16 sps:$4 sm:$0xff]  }
0x124b   : > { %5253 = vrot.lane.b32.xlu1 %v13245_v47, %s12105_s23 }
0x124f   : > { %4399 = vrot.lane.b32.xlu1 %v13177_v21, %s12105_s23 }
0x1253   : > { %4401 = vrot.lane.b32.xlu1 %v13179_v10, %s12105_s23 }
0x1257   : > { %3948 = vrot.lane.b32.xlu1 %v13095_v11, %s12105_s23 }
0x12c5   : > { %v5181_v35 = vpop.xlane.xlu0 %5180 }
0x12c6   : > { %v5185_v1 = vsub.f32 %v5121_v56, %v5181_v35  ;;  %v11162_v56 = vld [vmem:[%s12461_s2 + $0x8c] ss:$16 sps:$4 sm:$0xff]   ;;  %v11172_v35 = vld [vmem:[%s12461_s2 + $0xc8] ss:$16 sps:$4 sm:$0xff]  }
0x12c7   : > { %v5184_v5 = vpop.xlane.xlu1 %5183 }
0x12c8   : > { %v5187_v59 = vmul.f32 1.442695, %v5185_v1  ;;  %v5186_v28 = vsub.f32 %v5173_v4, %v5184_v5  ;;  %v11168_v4 = vld [vmem:[%s12461_s2 + $0xac] ss:$16 sps:$4 sm:$0xff]   ;;  %v11177_v1 = vld [vmem:[%s12461_s2 + $0x104] ss:$16 sps:$4 sm:$0xff]  }
0x12c9   : > { %v11180_v5 = vld [vmem:[%s12461_s2 + $0xec] ss:$16 sps:$4 sm:$0xff]  }
0x12ca   : > { %11762 = vpow2.f32 %v5187_v59  ;;  %v5189_v0 = vmul.f32 1.442695, %v5186_v28  ;;  %v11175_v59 = vld [vmem:[%s12461_s2 + $0x100] ss:$16 sps:$4 sm:$0xff]   ;;  %v11178_v28 = vld [vmem:[%s12461_s2 + $0xe8] ss:$16 sps:$4 sm:$0xff]  }
0x12cb   : > { %v5254_v45 = vpop.permute.xlu1 %5253 }
0x12cc   : > { %11764 = vpow2.f32 %v5189_v0  ;;  %v5259_v47 = vsel %vm3626_vm2, %v5254_v45, 0  ;;  %v11183_v0 = vld [vmem:[%s12461_s2 + $0x124] ss:$16 sps:$4 sm:$0xff]   ;;  %v11186_v45 = vld [vmem:[%s12461_s2 + $0x10c] ss:$16 sps:$4 sm:$0xff]  }
0x12cd   : > { %10368 = vmatpush3.bf16.msra.mxu1 %v5259_v47  ;;  %v11181_v47 = vld [vmem:[%s12461_s2 + $0x120] ss:$16 sps:$4 sm:$0xff]  }
0x12ce   : > { %6200 = vmatprep.subr.bf16.mxu1 %v11138_v23  ;;  %v11193_v23 = vld [vmem:[%s12461_s2 + $0x160] ss:$16 sps:$4 sm:$0xff]  }
0x12cf   : > { %v4400_v21 = vpop.permute.xlu1 %4399 }
0x12d0   : > { %4405 = vst.msk [vmem:[#allocation3 + $0x8] sm:$0xff] %vm3952_vm4, %v4400_v21  ;;  %v11184_v21 = vld [vmem:[%s12461_s2 + $0x108] ss:$16 sps:$4 sm:$0xff]  }
0x12d3   : > { %v4402_v10 = vpop.permute.xlu1 %4401 }
0x12d4   : > { %v11763_v50 = vpop.eup %11762  ;;  %4406 = vst.msk [vmem:[#allocation3 + $0x28] sm:$0xff] %vm3952_vm4, %v4402_v10  ;;  %v11189_v10 = vld [vmem:[%s12461_s2 + $0x144] ss:$16 sps:$4 sm:$0xff]  }
0x12d5   : > { %v5191_v11 = vsel %vm3598_vm3, %v11763_v50, 0.0 }
0x12d6   : > { %v11765_v9 = vpop.eup %11764  ;;  %5192 = vadd.xlane.f32.xlu0 %v5191_v11  ;;  %v11187_v11 = vld [vmem:[%s12461_s2 + $0x140] ss:$16 sps:$4 sm:$0xff]  }
0x12d7   : > { %v3949_v12 = vpop.permute.xlu1 %3948  ;;  %v5194_v14 = vsel %vm3598_vm3, %v11765_v9, 0.0  ;;  %v5312_v29 = vld [vmem:[#allocation3 + $0x8] sm:$0xff] }
0x12d8   : > { %3954 = vst.msk [vmem:[#allocation3 + $0x20] sm:$0xff] %vm3952_vm4, %v3949_v12  ;;  %v11195_v12 = vld [vmem:[%s12461_s2 + $0x164] ss:$16 sps:$4 sm:$0xff]  }
0x12da   : > { %5195 = vadd.xlane.f32.xlu0 %v5194_v14  ;;  %v11198_v14 = vld [vmem:[%s12461_s2 + $0x14c] ss:$16 sps:$4 sm:$0xff]  }
0x12f0   : > { %5204 = vrot.lane.b32.xlu0 %v13238_v33, %s12105_s23 }
0x12f4   : > { %3946 = vrot.lane.b32.xlu0 %v13093_v6, %s12105_s23  ;;  %v5316_v6 = vld [vmem:[#allocation3 + $0x28] sm:$0xff] }
0x12f5   : > { %v5320_v36 = vpack.c.bf16 %v5316_v6, %v5312_v29  ;;  %v11208_v6 = vld [vmem:[%s12461_s2 + $0x188] ss:$16 sps:$4 sm:$0xff]   ;;  %v11211_v29 = vld [vmem:[%s12461_s2 + $0x1c0] ss:$16 sps:$4 sm:$0xff]  }
0x1363   : > { %v5193_v17 = vpop.xlane.xlu0 %5192 }
0x1364   : > { %11766 = vrcp.f32 %v5193_v17  ;;  %v11196_v17 = vld [vmem:[%s12461_s2 + $0x148] ss:$16 sps:$4 sm:$0xff]  }
0x1367   : > { %v5196_v18 = vpop.xlane.xlu0 %5195 }
0x1368   : > { %11768 = vrcp.f32 %v5196_v18  ;;  %v11201_v18 = vld [vmem:[%s12461_s2 + $0x184] ss:$16 sps:$4 sm:$0xff]  }
0x136b   : > { %v5205_v20 = vpop.permute.xlu0 %5204 }
0x136c   : > { %v5210_v22 = vsel %vm3626_vm2, %v5205_v20, 0  ;;  %v11199_v20 = vld [vmem:[%s12461_s2 + $0x180] ss:$16 sps:$4 sm:$0xff]  }
0x136d   : > { %10362 = vmatpush3.bf16.msra.mxu0 %v5210_v22  ;;  %v11202_v22 = vld [vmem:[%s12461_s2 + $0x168] ss:$16 sps:$4 sm:$0xff]  }
0x136e   : > { %v11767_v24 = vpop.eup %11766  ;;  %6114 = vmatprep.subr.bf16.mxu0 %v11132_v19  ;;  %v11204_v19 = vld [vmem:[%s12461_s2 + $0x16c] ss:$16 sps:$4 sm:$0xff]  }
0x136f   : > { %v5199_v33 = vmul.f32 %v11767_v24, %v11763_v50  ;;  %v3947_v25 = vpop.permute.xlu0 %3946  ;;  %v11192_v50 = vld [vmem:[%s12461_s2 + $0x12c] ss:$16 sps:$4 sm:$0xff]   ;;  %v11207_v24 = vld [vmem:[%s12461_s2 + $0x1a4] ss:$16 sps:$4 sm:$0xff]  }
0x1370   : > { %3953 = vst.msk [vmem:[#allocation3] sm:$0xff] %vm3952_vm4, %v3947_v25  ;;  %v11205_v25 = vld [vmem:[%s12461_s2 + $0x1a0] ss:$16 sps:$4 sm:$0xff]  }
0x1371   : > { %v5201_v57 = vpack.c.bf16 %v5199_v33, %v5199_v33  ;;  %v11210_v33 = vld [vmem:[%s12461_s2 + $0x18c] ss:$16 sps:$4 sm:$0xff]  }
0x1372   : > { %v11769_v63 = vpop.eup %11768 }
0x1373   : > { %v5200_v7 = vmul.f32 %v11769_v63, %v11765_v9  ;;  %10364 = vmatmul.mubr.msk.bf16.vlgmr.msra.gmra.mrb[72].mxu0 %vm3598_vm3, %v5201_v57  ;;  %v11190_v9 = vld [vmem:[%s12461_s2 + $0x128] ss:$16 sps:$4 sm:$0xff]   ;;  %v11216_v57 = vld [vmem:[%s12461_s2 + $0x1ac] ss:$16 sps:$4 sm:$0xff]   ;;  %v11219_v63 = vld [vmem:[%s12461_s2 + $0x1e4] ss:$16 sps:$4 sm:$0xff]  }
0x1374   : > { %6115 = vmatpush1.bf16.msra.mxu0 %v11130_v27  ;;  %6146 = vmatprep.mubr.bf16.mxu0 %v5320_v36  ;;  %v11213_v27 = vld [vmem:[%s12461_s2 + $0x1c4] ss:$16 sps:$4 sm:$0xff]  }
0x1375   : > { %6116 = vmatprep.subr.bf16.mxu0 %v11135_v32  ;;  %v5202_v40 = vpack.c.bf16 %v5200_v7, %v5200_v7  ;;  %v11214_v32 = vld [vmem:[%s12461_s2 + $0x1a8] ss:$16 sps:$4 sm:$0xff]   ;;  %v11217_v7 = vld [vmem:[%s12461_s2 + $0x1e0] ss:$16 sps:$4 sm:$0xff]  }
0x1377   : > { %10370 = vmatmul.mubr.msk.bf16.vlgmr.msra.gmra.mrb[72].mxu1 %vm3598_vm3, %v5202_v40  ;;  %v5311_v40 = vld [vmem:[#allocation3] sm:$0xff] }
0x1378   : > { %6117 = vmatpush1.bf16.msra.mxu0 %v11133_v54  ;;  %6201 = vmatpush1.bf16.msra.mxu1 %v11136_v15  ;;  %v11220_v54 = vld [vmem:[%s12461_s2 + $0x1c8] ss:$16 sps:$4 sm:$0xff]   ;;  %v11225_v15 = vld [vmem:[%s12461_s2 + $0x1ec] ss:$16 sps:$4 sm:$0xff]  }
0x1379   : > { %6232 = vmatprep.mubr.bf16.mxu1 %v5320_v36  ;;  %6118 = vmatprep.subr.bf16.mxu0 %v11141_v41  ;;  %v11222_v36 = vld [vmem:[%s12461_s2 + $0x1cc] ss:$16 sps:$4 sm:$0xff]   ;;  %v5315_v41 = vld [vmem:[#allocation3 + $0x20] sm:$0xff] }
0x137a   : > { %6202 = vmatprep.subr.bf16.mxu1 %v11144_v42  ;;  %v11223_v42 = vld [vmem:[%s12461_s2 + $0x1e8] ss:$16 sps:$4 sm:$0xff]  }
0x137c   : > { %6119 = vmatpush1.bf16.msra.mxu0 %v11139_v53  ;;  %6203 = vmatpush1.bf16.msra.mxu1 %v11142_v43  ;;  %v5319_v53 = vpack.c.bf16 %v5315_v41, %v5311_v40  ;;  %v11226_v43 = vld [vmem:[%s12461_s2 + $0x200] ss:$16 sps:$4 sm:$0xff]   ;;  %v11307_v40 = vld [vmem:[%s12461_s2 + $0x3a8] ss:$16 sps:$4 sm:$0xff]   ;;  %v11309_v41 = vld [vmem:[%s12461_s2 + $0x3ac] ss:$16 sps:$4 sm:$0xff]  }
0x137d   : > { %6120 = vmatprep.subr.bf16.mxu0 %v11147_v38  ;;  %6204 = vmatprep.subr.bf16.mxu1 %v11150_v44  ;;  %v11228_v38 = vld [vmem:[%s12461_s2 + $0x204] ss:$16 sps:$4 sm:$0xff]   ;;  %v11229_v44 = vld [vmem:[%s12461_s2 + $0x208] ss:$16 sps:$4 sm:$0xff]  }
0x1380   : > { %6121 = vmatpush1.bf16.msra.mxu0 %v11145_v46  ;;  %6205 = vmatpush1.bf16.msra.mxu1 %v11148_v31  ;;  %v11231_v46 = vld [vmem:[%s12461_s2 + $0x20c] ss:$16 sps:$4 sm:$0xff]   ;;  %v11234_v31 = vld [vmem:[%s12461_s2 + $0x224] ss:$16 sps:$4 sm:$0xff]  }
0x1381   : > { %6122 = vmatprep.subr.bf16.mxu0 %v11153_v48  ;;  %6206 = vmatprep.subr.bf16.mxu1 %v11156_v49  ;;  %v11237_v48 = vld [vmem:[%s12461_s2 + $0x22c] ss:$16 sps:$4 sm:$0xff]   ;;  %v11232_v49 = vld [vmem:[%s12461_s2 + $0x220] ss:$16 sps:$4 sm:$0xff]  }
0x1384   : > { %6123 = vmatpush1.bf16.msra.mxu0 %v11151_v51  ;;  %6207 = vmatpush1.bf16.msra.mxu1 %v11154_v39  ;;  %v11235_v51 = vld [vmem:[%s12461_s2 + $0x228] ss:$16 sps:$4 sm:$0xff]   ;;  %v11240_v39 = vld [vmem:[%s12461_s2 + $0x244] ss:$16 sps:$4 sm:$0xff]  }
0x1385   : > { %6124 = vmatprep.subr.bf16.mxu0 %v11159_v37  ;;  %6208 = vmatprep.subr.bf16.mxu1 %v11162_v56  ;;  %v11243_v37 = vld [vmem:[%s12461_s2 + $0x24c] ss:$16 sps:$4 sm:$0xff]   ;;  %v11238_v56 = vld [vmem:[%s12461_s2 + $0x240] ss:$16 sps:$4 sm:$0xff]  }
0x1388   : > { %6125 = vmatpush1.bf16.msra.mxu0 %v11157_v55  ;;  %6209 = vmatpush1.bf16.msra.mxu1 %v11160_v61  ;;  %v11241_v55 = vld [vmem:[%s12461_s2 + $0x248] ss:$16 sps:$4 sm:$0xff]   ;;  %v11246_v61 = vld [vmem:[%s12461_s2 + $0x264] ss:$16 sps:$4 sm:$0xff]  }
0x1389   : > { %6126 = vmatprep.subr.bf16.mxu0 %v11165_v30  ;;  %6210 = vmatprep.subr.bf16.mxu1 %v11168_v4  ;;  %v11249_v30 = vld [vmem:[%s12461_s2 + $0x26c] ss:$16 sps:$4 sm:$0xff]   ;;  %v11244_v4 = vld [vmem:[%s12461_s2 + $0x260] ss:$16 sps:$4 sm:$0xff]  }
0x138c   : > { %6127 = vmatpush1.bf16.msra.mxu0 %v11163_v62  ;;  %6211 = vmatpush1.bf16.msra.mxu1 %v11166_v13  ;;  %v11247_v62 = vld [vmem:[%s12461_s2 + $0x268] ss:$16 sps:$4 sm:$0xff]   ;;  %v11252_v13 = vld [vmem:[%s12461_s2 + $0x284] ss:$16 sps:$4 sm:$0xff]  }
0x138d   : > { %6128 = vmatprep.subr.bf16.mxu0 %v11171_v16  ;;  %6212 = vmatprep.subr.bf16.mxu1 %v11174_v34  ;;  %v11255_v16 = vld [vmem:[%s12461_s2 + $0x28c] ss:$16 sps:$4 sm:$0xff]   ;;  %v11250_v34 = vld [vmem:[%s12461_s2 + $0x280] ss:$16 sps:$4 sm:$0xff]  }
0x1390   : > { %6129 = vmatpush1.bf16.msra.mxu0 %v11169_v60  ;;  %6213 = vmatpush1.bf16.msra.mxu1 %v11172_v35  ;;  %v11253_v60 = vld [vmem:[%s12461_s2 + $0x288] ss:$16 sps:$4 sm:$0xff]   ;;  %v11258_v35 = vld [vmem:[%s12461_s2 + $0x2a4] ss:$16 sps:$4 sm:$0xff]  }
0x1391   : > { %6130 = vmatprep.subr.bf16.mxu0 %v11177_v1  ;;  %6214 = vmatprep.subr.bf16.mxu1 %v11180_v5  ;;  %v11261_v1 = vld [vmem:[%s12461_s2 + $0x2ac] ss:$16 sps:$4 sm:$0xff]   ;;  %v11256_v5 = vld [vmem:[%s12461_s2 + $0x2a0] ss:$16 sps:$4 sm:$0xff]  }
0x1394   : > { %6131 = vmatpush1.bf16.msra.mxu0 %v11175_v59  ;;  %6215 = vmatpush1.bf16.msra.mxu1 %v11178_v28  ;;  %v11259_v59 = vld [vmem:[%s12461_s2 + $0x2a8] ss:$16 sps:$4 sm:$0xff]   ;;  %v11264_v28 = vld [vmem:[%s12461_s2 + $0x2c4] ss:$16 sps:$4 sm:$0xff]  }
0x1395   : > { %6132 = vmatprep.subr.bf16.mxu0 %v11183_v0  ;;  %6216 = vmatprep.subr.bf16.mxu1 %v11186_v45  ;;  %v11267_v0 = vld [vmem:[%s12461_s2 + $0x2cc] ss:$16 sps:$4 sm:$0xff]   ;;  %v11262_v45 = vld [vmem:[%s12461_s2 + $0x2c0] ss:$16 sps:$4 sm:$0xff]  }
0x1398   : > { %6133 = vmatpush1.bf16.msra.mxu0 %v11181_v47  ;;  %6217 = vmatpush1.bf16.msra.mxu1 %v11184_v21  ;;  %v11265_v47 = vld [vmem:[%s12461_s2 + $0x2c8] ss:$16 sps:$4 sm:$0xff]   ;;  %v11270_v21 = vld [vmem:[%s12461_s2 + $0x2e4] ss:$16 sps:$4 sm:$0xff]  }
0x1399   : > { %6134 = vmatprep.subr.bf16.mxu0 %v11189_v10  ;;  %6218 = vmatprep.subr.bf16.mxu1 %v11192_v50  ;;  %v11273_v10 = vld [vmem:[%s12461_s2 + $0x2ec] ss:$16 sps:$4 sm:$0xff]   ;;  %v11268_v50 = vld [vmem:[%s12461_s2 + $0x2e0] ss:$16 sps:$4 sm:$0xff]  }
0x139c   : > { %6135 = vmatpush1.bf16.msra.mxu0 %v11187_v11  ;;  %6219 = vmatpush1.bf16.msra.mxu1 %v11190_v9  ;;  %v11271_v11 = vld [vmem:[%s12461_s2 + $0x2e8] ss:$16 sps:$4 sm:$0xff]   ;;  %v11276_v9 = vld [vmem:[%s12461_s2 + $0x304] ss:$16 sps:$4 sm:$0xff]  }
0x139d   : > { %6136 = vmatprep.subr.bf16.mxu0 %v11195_v12  ;;  %6220 = vmatprep.subr.bf16.mxu1 %v11198_v14  ;;  %v11279_v12 = vld [vmem:[%s12461_s2 + $0x30c] ss:$16 sps:$4 sm:$0xff]   ;;  %v11274_v14 = vld [vmem:[%s12461_s2 + $0x300] ss:$16 sps:$4 sm:$0xff]  }
0x13a0   : > { %6137 = vmatpush1.bf16.msra.mxu0 %v11193_v23  ;;  %6221 = vmatpush1.bf16.msra.mxu1 %v11196_v17  ;;  %v11277_v23 = vld [vmem:[%s12461_s2 + $0x308] ss:$16 sps:$4 sm:$0xff]   ;;  %v11282_v17 = vld [vmem:[%s12461_s2 + $0x324] ss:$16 sps:$4 sm:$0xff]  }
0x13a1   : > { %6138 = vmatprep.subr.bf16.mxu0 %v11201_v18  ;;  %6222 = vmatprep.subr.bf16.mxu1 %v11204_v19  ;;  %v11285_v18 = vld [vmem:[%s12461_s2 + $0x32c] ss:$16 sps:$4 sm:$0xff]   ;;  %v11280_v19 = vld [vmem:[%s12461_s2 + $0x320] ss:$16 sps:$4 sm:$0xff]  }
0x13a4   : > { %6139 = vmatpush1.bf16.msra.mxu0 %v11199_v20  ;;  %6223 = vmatpush1.bf16.msra.mxu1 %v11202_v22  ;;  %v11283_v20 = vld [vmem:[%s12461_s2 + $0x328] ss:$16 sps:$4 sm:$0xff]   ;;  %v11288_v22 = vld [vmem:[%s12461_s2 + $0x344] ss:$16 sps:$4 sm:$0xff]  }
0x13a5   : > { %6140 = vmatprep.subr.bf16.mxu0 %v11207_v24  ;;  %6224 = vmatprep.subr.bf16.mxu1 %v11210_v33  ;;  %v11291_v24 = vld [vmem:[%s12461_s2 + $0x34c] ss:$16 sps:$4 sm:$0xff]   ;;  %v11286_v33 = vld [vmem:[%s12461_s2 + $0x340] ss:$16 sps:$4 sm:$0xff]  }
0x13a8   : > { %6141 = vmatpush1.bf16.msra.mxu0 %v11205_v25  ;;  %6225 = vmatpush1.bf16.msra.mxu1 %v11208_v6  ;;  %v11289_v25 = vld [vmem:[%s12461_s2 + $0x348] ss:$16 sps:$4 sm:$0xff]   ;;  %v11294_v6 = vld [vmem:[%s12461_s2 + $0x364] ss:$16 sps:$4 sm:$0xff]  }
0x13a9   : > { %6142 = vmatprep.subr.bf16.mxu0 %v11213_v27  ;;  %6226 = vmatprep.subr.bf16.mxu1 %v11216_v57  ;;  %v11297_v27 = vld [vmem:[%s12461_s2 + $0x36c] ss:$16 sps:$4 sm:$0xff]   ;;  %v11292_v57 = vld [vmem:[%s12461_s2 + $0x360] ss:$16 sps:$4 sm:$0xff]  }
0x13ac   : > { %6143 = vmatpush1.bf16.msra.mxu0 %v11211_v29  ;;  %6227 = vmatpush1.bf16.msra.mxu1 %v11214_v32  ;;  %v11295_v29 = vld [vmem:[%s12461_s2 + $0x368] ss:$16 sps:$4 sm:$0xff]   ;;  %v11298_v32 = vld [vmem:[%s12461_s2 + $0x380] ss:$16 sps:$4 sm:$0xff]  }
0x13ad   : > { %6144 = vmatprep.subr.bf16.mxu0 %v11219_v63  ;;  %6228 = vmatprep.subr.bf16.mxu1 %v11222_v36  ;;  %v11300_v63 = vld [vmem:[%s12461_s2 + $0x384] ss:$16 sps:$4 sm:$0xff]   ;;  %v11301_v36 = vld [vmem:[%s12461_s2 + $0x388] ss:$16 sps:$4 sm:$0xff]  }
0x13b0   : > { %6145 = vmatpush1.bf16.msra.mxu0 %v11217_v7  ;;  %6229 = vmatpush1.bf16.msra.mxu1 %v11220_v54  ;;  %v11303_v7 = vld [vmem:[%s12461_s2 + $0x38c] ss:$16 sps:$4 sm:$0xff]   ;;  %v11304_v54 = vld [vmem:[%s12461_s2 + $0x3a0] ss:$16 sps:$4 sm:$0xff]  }
0x13b1   : > { %6230 = vmatprep.subr.bf16.mxu1 %v11225_v15  ;;  %6157 = vmatprep.subr.bf16.mxu0 %v11228_v38  ;;  %v11306_v15 = vld [vmem:[%s12461_s2 + $0x3a4] ss:$16 sps:$4 sm:$0xff]   ;;  %v11315_v38 = vld [vmem:[%s12461_s2 + $0x3cc] ss:$16 sps:$4 sm:$0xff]  }
0x13b3   : > { %6147 = vmatmul.mubr.bf16.vlgmr.msra.gmra.mrb[76].mxu0 %v5319_v53 }
0x13b4   : > { %6231 = vmatpush1.bf16.msra.mxu1 %v11223_v42  ;;  %6158 = vmatpush1.bf16.msra.mxu0 %v11226_v43  ;;  %v11310_v42 = vld [vmem:[%s12461_s2 + $0x3c0] ss:$16 sps:$4 sm:$0xff]   ;;  %v11313_v43 = vld [vmem:[%s12461_s2 + $0x3c8] ss:$16 sps:$4 sm:$0xff]  }
0x13b5   : > { %6243 = vmatprep.subr.bf16.mxu1 %v11231_v46  ;;  %6159 = vmatprep.subr.bf16.mxu0 %v11234_v31  ;;  %v11316_v46 = vld [vmem:[%s12461_s2 + $0x3e0] ss:$16 sps:$4 sm:$0xff]  }
0x13b7   : > { %6233 = vmatmul.mubr.bf16.vlgmr.msra.gmra.mrb[76].mxu1 %v5319_v53  ;;  %v11312_v53 = vld [vmem:[%s12461_s2 + $0x3c4] ss:$16 sps:$4 sm:$0xff]  }
0x13b8   : > { %6244 = vmatpush1.bf16.msra.mxu1 %v11229_v44  ;;  %6160 = vmatpush1.bf16.msra.mxu0 %v11232_v49  ;;  %v11318_v44 = vld [vmem:[%s12461_s2 + $0x3e4] ss:$16 sps:$4 sm:$0xff]   ;;  %v11321_v49 = vld [vmem:[%s12461_s2 + $0x3ec] ss:$16 sps:$4 sm:$0xff]  }
0x13b9   : > { %6245 = vmatprep.subr.bf16.mxu1 %v11237_v48  ;;  %6161 = vmatprep.subr.bf16.mxu0 %v11240_v39  ;;  %v11319_v39 = vld [vmem:[%s12461_s2 + $0x3e8] ss:$16 sps:$4 sm:$0xff]  }
0x13bc   : > { %6246 = vmatpush1.bf16.msra.mxu1 %v11235_v51  ;;  %6162 = vmatpush1.bf16.msra.mxu0 %v11238_v56 }
0x13bd   : > { %6247 = vmatprep.subr.bf16.mxu1 %v11243_v37  ;;  %6163 = vmatprep.subr.bf16.mxu0 %v11246_v61 }
0x13c0   : > { %6248 = vmatpush1.bf16.msra.mxu1 %v11241_v55  ;;  %6164 = vmatpush1.bf16.msra.mxu0 %v11244_v4 }
0x13c1   : > { %6249 = vmatprep.subr.bf16.mxu1 %v11249_v30  ;;  %6165 = vmatprep.subr.bf16.mxu0 %v11252_v13 }
0x13c4   : > { %6250 = vmatpush1.bf16.msra.mxu1 %v11247_v62  ;;  %6166 = vmatpush1.bf16.msra.mxu0 %v11250_v34 }
0x13c5   : > { %6251 = vmatprep.subr.bf16.mxu1 %v11255_v16  ;;  %6167 = vmatprep.subr.bf16.mxu0 %v11258_v35 }
0x13c8   : > { %6252 = vmatpush1.bf16.msra.mxu1 %v11253_v60  ;;  %6168 = vmatpush1.bf16.msra.mxu0 %v11256_v5  ;;  %v9640_v5 = vld [vmem:[%s12480_s4 + $0x3] ss:$8 sm:$0xf] }
0x13c9   : > { %6253 = vmatprep.subr.bf16.mxu1 %v11261_v1  ;;  %6169 = vmatprep.subr.bf16.mxu0 %v11264_v28  ;;  %v5465_v28 = vrot.slane %v9640_v5, %v12870_v3 }
0x13cc   : > { %6254 = vmatpush1.bf16.msra.mxu1 %v11259_v59  ;;  %6170 = vmatpush1.bf16.msra.mxu0 %v11262_v45  ;;  %v5457_v59 = vrot.slane %v9640_v5, %v12943_v2 }
0x13cd   : > { %6255 = vmatprep.subr.bf16.mxu1 %v11267_v0  ;;  %6171 = vmatprep.subr.bf16.mxu0 %v11270_v21  ;;  %v5461_v0 = vrot.slane %v9640_v5, %v12857_v58  ;;  %v5469_v21 = vrot.slane %v9640_v5, %v12879_v8  ;;  %v11351_v5 = vld [vmem:[%s12463_s11 + $0x8c] ss:$16 sps:$4 sm:$0xff]  }
0x13d0   : > { %6256 = vmatpush1.bf16.msra.mxu1 %v11265_v47  ;;  %6172 = vmatpush1.bf16.msra.mxu0 %v11268_v50 }
0x13d1   : > { %6257 = vmatprep.subr.bf16.mxu1 %v11273_v10  ;;  %6173 = vmatprep.subr.bf16.mxu0 %v11276_v9 }
0x13d4   : > { %6258 = vmatpush1.bf16.msra.mxu1 %v11271_v11  ;;  %6174 = vmatpush1.bf16.msra.mxu0 %v11274_v14 }
0x13d5   : > { %6259 = vmatprep.subr.bf16.mxu1 %v11279_v12  ;;  %6175 = vmatprep.subr.bf16.mxu0 %v11282_v17  ;;  %v11778_v17 = vld [vmem:[#allocation2] sm:$0xff] }
0x13d8   : > { %6260 = vmatpush1.bf16.msra.mxu1 %v11277_v23  ;;  %6176 = vmatpush1.bf16.msra.mxu0 %v11280_v19 }
0x13d9   : > { %6261 = vmatprep.subr.bf16.mxu1 %v11285_v18  ;;  %6177 = vmatprep.subr.bf16.mxu0 %v11288_v22 }
0x13dc   : > { %6262 = vmatpush1.bf16.msra.mxu1 %v11283_v20  ;;  %6178 = vmatpush1.bf16.msra.mxu0 %v11286_v33 }
0x13dd   : > { %6263 = vmatprep.subr.bf16.mxu1 %v11291_v24  ;;  %6179 = vmatprep.subr.bf16.mxu0 %v11294_v6  ;;  %v11779_v24 = vld [vmem:[#allocation2 + $0x8] sm:$0xff] }
0x13e0   : > { %6264 = vmatpush1.bf16.msra.mxu1 %v11289_v25  ;;  %6180 = vmatpush1.bf16.msra.mxu0 %v11292_v57  ;;  %v11780_v57 = vld [vmem:[#allocation2 + $0x20] sm:$0xff] }
0x13e1   : > { %6265 = vmatprep.subr.bf16.mxu1 %v11297_v27  ;;  %6181 = vmatprep.subr.bf16.mxu0 %v11300_v63 }
0x13e4   : > { %6266 = vmatpush1.bf16.msra.mxu1 %v11295_v29  ;;  %6182 = vmatpush1.bf16.msra.mxu0 %v11298_v32  ;;  %v11781_v32 = vld [vmem:[#allocation2 + $0x10] sm:$0xff] }
0x13e5   : > { %6267 = vmatprep.subr.bf16.mxu1 %v11303_v7  ;;  %6183 = vmatprep.subr.bf16.mxu0 %v11306_v15  ;;  %v11782_v7 = vld [vmem:[#allocation2 + $0x28] sm:$0xff] }
0x13e8   : > { %6268 = vmatpush1.bf16.msra.mxu1 %v11301_v36  ;;  %6184 = vmatpush1.bf16.msra.mxu0 %v11304_v54 }
0x13e9   : > { %6269 = vmatprep.subr.bf16.mxu1 %v11309_v41  ;;  %6185 = vmatprep.subr.bf16.mxu0 %v11312_v53 }
0x13ec   : > { %6270 = vmatpush1.bf16.msra.mxu1 %v11307_v40  ;;  %6186 = vmatpush1.bf16.msra.mxu0 %v11310_v42  ;;  %v11783_v40 = vld [vmem:[#allocation2 + $0x18] sm:$0xff]  ;;  %v11784_v42 = vld [vmem:[#allocation2 + $0x30] sm:$0xff] }
0x13ed   : > { %6271 = vmatprep.subr.bf16.mxu1 %v11315_v38  ;;  %6187 = vmatprep.subr.bf16.mxu0 %v11318_v44  ;;  %v11785_v44 = vld [vmem:[#allocation2 + $0x38] sm:$0xff] }
0x13f0   : > { %6272 = vmatpush1.bf16.msra.mxu1 %v11313_v43  ;;  %6188 = vmatpush1.bf16.msra.mxu0 %v11316_v46 }
0x13f1   : > { %6273 = vmatprep.subr.bf16.mxu1 %v11321_v49 }
0x13f4   : > { %6274 = vmatpush1.bf16.msra.mxu1 %v11319_v39  ;;  %v11324_v39 = vld [vmem:[%s12463_s11 + $0x4] ss:$16 sps:$4 sm:$0xff]  }
0x13f5   : > { %7204 = vmatprep.subr.bf16.mxu0 %v11324_v39 }
0x1446   : > { %v5246_v31 = vpop.f32.mrb[72].mxu0 }
0x1447   : > { %5303 = vrot.lane.b32.xlu0 %v5246_v31, %s12105_s23  ;;  %v10365_v48 = vpop.f32.mrb[73].mxu0 }
0x1448   : > { %v5249_v51 = vpop.f32.mrb[74].mxu0 }
0x1449   : > { %v10366_v37 = vpop.f32.mrb[75].mxu0  ;;  %v11322_v51 = vld [vmem:[%s12463_s11] ss:$16 sps:$4 sm:$0xff]  }
0x144a   : > { %v5295_v56 = vpop.f32.mrb[72].mxu1  ;;  %v11325_v37 = vld [vmem:[%s12463_s11 + $0x8] ss:$16 sps:$4 sm:$0xff]  }
0x144b   : > { %4851 = vrot.lane.b32.xlu0 %v13261_v26, %s12105_s23  ;;  %5305 = vrot.lane.b32.xlu1 %v5295_v56, %s12105_s23  ;;  %v10371_v55 = vpop.f32.mrb[73].mxu1  ;;  %v11327_v56 = vld [vmem:[%s12463_s11 + $0xc] ss:$16 sps:$4 sm:$0xff]  }
0x144c   : > { %v5298_v61 = vpop.f32.mrb[74].mxu1  ;;  %v11330_v55 = vld [vmem:[%s12463_s11 + $0x24] ss:$16 sps:$4 sm:$0xff]   ;;  %7290 = vmatprep.subr.bf16.mxu1 %v11327_v56 }
0x144d   : > { %v10372_v30 = vpop.f32.mrb[75].mxu1  ;;  %v11333_v61 = vld [vmem:[%s12463_s11 + $0x2c] ss:$16 sps:$4 sm:$0xff]  }
0x144e   : > { %v11328_v30 = vld [vmem:[%s12463_s11 + $0x20] ss:$16 sps:$4 sm:$0xff]  }
0x144f   : > { %4853 = vrot.lane.b32.xlu1 %v13263_v52, %s12105_s23 }
0x14b9   : > { %v5304_v4 = vpop.permute.xlu0 %5303 }
0x14ba   : > { %5309 = vst.msk [vmem:[#allocation3 + $0x18] sm:$0xff] %vm3952_vm4, %v5304_v4  ;;  %v11331_v4 = vld [vmem:[%s12463_s11 + $0x28] ss:$16 sps:$4 sm:$0xff]  }
0x14bd   : > { %v4852_v62 = vpop.permute.xlu0 %4851  ;;  %v5306_v13 = vpop.permute.xlu1 %5305 }
0x14be   : > { %4857 = vst.msk [vmem:[#allocation3 + $0x10] sm:$0xff] %vm3952_vm4, %v4852_v62  ;;  %5310 = vst.msk [vmem:[#allocation3 + $0x38] sm:$0xff] %vm3952_vm4, %v5306_v13  ;;  %v11336_v62 = vld [vmem:[%s12463_s11 + $0x44] ss:$16 sps:$4 sm:$0xff]   ;;  %v11339_v13 = vld [vmem:[%s12463_s11 + $0x4c] ss:$16 sps:$4 sm:$0xff]  }
0x14c1   : > { %v4854_v16 = vpop.permute.xlu1 %4853  ;;  %v5314_v26 = vld [vmem:[#allocation3 + $0x18] sm:$0xff] }
0x14c2   : > { %4858 = vst.msk [vmem:[#allocation3 + $0x30] sm:$0xff] %vm3952_vm4, %v4854_v16  ;;  %v11334_v16 = vld [vmem:[%s12463_s11 + $0x40] ss:$16 sps:$4 sm:$0xff]  }
0x14c5   : > { %v5318_v34 = vld [vmem:[#allocation3 + $0x38] sm:$0xff]  ;;  %v5313_v35 = vld [vmem:[#allocation3 + $0x10] sm:$0xff] }
0x14c6   : > { %v5322_v60 = vpack.c.bf16 %v5318_v34, %v5314_v26  ;;  %v11337_v26 = vld [vmem:[%s12463_s11 + $0x48] ss:$16 sps:$4 sm:$0xff]   ;;  %v11342_v34 = vld [vmem:[%s12463_s11 + $0x64] ss:$16 sps:$4 sm:$0xff]  }
0x14c8   : > { %6189 = vmatprep.mubr.bf16.mxu0 %v5322_v60  ;;  %6275 = vmatprep.mubr.bf16.mxu1 %v5322_v60  ;;  %v11345_v60 = vld [vmem:[%s12463_s11 + $0x6c] ss:$16 sps:$4 sm:$0xff]  }
0x14c9   : > { %v5317_v52 = vld [vmem:[#allocation3 + $0x30] sm:$0xff] }
0x14ca   : > { %v5321_v1 = vpack.c.bf16 %v5317_v52, %v5313_v35  ;;  %v11340_v35 = vld [vmem:[%s12463_s11 + $0x60] ss:$16 sps:$4 sm:$0xff]   ;;  %v11343_v52 = vld [vmem:[%s12463_s11 + $0x68] ss:$16 sps:$4 sm:$0xff]  }
0x14cc   : > { %6190 = vmatmul.mubr.bf16.vlgmr.msra.gmra.mrb[76].mxu0 %v5321_v1  ;;  %6276 = vmatmul.mubr.bf16.vlgmr.msra.gmra.mrb[76].mxu1 %v5321_v1  ;;  %v11348_v1 = vld [vmem:[%s12463_s11 + $0x84] ss:$16 sps:$4 sm:$0xff]  }
0x14cd   : > { %7205 = vmatpush1.bf16.msra.mxu0 %v11322_v51  ;;  %7291 = vmatpush1.bf16.msra.mxu1 %v11325_v37 }
0x14ce   : > { %7206 = vmatprep.subr.bf16.mxu0 %v11330_v55  ;;  %7292 = vmatprep.subr.bf16.mxu1 %v11333_v61 }
0x14d1   : > { %7207 = vmatpush1.bf16.msra.mxu0 %v11328_v30  ;;  %7293 = vmatpush1.bf16.msra.mxu1 %v11331_v4  ;;  %v11384_v4 = vld [vmem:[%s12463_s11 + $0x144] ss:$16 sps:$4 sm:$0xff]  }
0x14d2   : > { %7208 = vmatprep.subr.bf16.mxu0 %v11336_v62  ;;  %7294 = vmatprep.subr.bf16.mxu1 %v11339_v13  ;;  %v11382_v62 = vld [vmem:[%s12463_s11 + $0x140] ss:$16 sps:$4 sm:$0xff]   ;;  %v11385_v13 = vld [vmem:[%s12463_s11 + $0x148] ss:$16 sps:$4 sm:$0xff]  }
0x14d5   : > { %7209 = vmatpush1.bf16.msra.mxu0 %v11334_v16  ;;  %7295 = vmatpush1.bf16.msra.mxu1 %v11337_v26  ;;  %v11390_v16 = vld [vmem:[%s12463_s11 + $0x164] ss:$16 sps:$4 sm:$0xff]   ;;  %v11393_v26 = vld [vmem:[%s12463_s11 + $0x16c] ss:$16 sps:$4 sm:$0xff]  }
0x14d6   : > { %7210 = vmatprep.subr.bf16.mxu0 %v11342_v34  ;;  %7296 = vmatprep.subr.bf16.mxu1 %v11345_v60  ;;  %v11388_v34 = vld [vmem:[%s12463_s11 + $0x160] ss:$16 sps:$4 sm:$0xff]   ;;  %v11391_v60 = vld [vmem:[%s12463_s11 + $0x168] ss:$16 sps:$4 sm:$0xff]  }
0x14d9   : > { %7211 = vmatpush1.bf16.msra.mxu0 %v11340_v35  ;;  %7297 = vmatpush1.bf16.msra.mxu1 %v11343_v52  ;;  %v11396_v35 = vld [vmem:[%s12463_s11 + $0x184] ss:$16 sps:$4 sm:$0xff]   ;;  %v11394_v52 = vld [vmem:[%s12463_s11 + $0x180] ss:$16 sps:$4 sm:$0xff]  }
0x14da   : > { %7212 = vmatprep.subr.bf16.mxu0 %v11348_v1  ;;  %7298 = vmatprep.subr.bf16.mxu1 %v11351_v5  ;;  %v11397_v1 = vld [vmem:[%s12463_s11 + $0x188] ss:$16 sps:$4 sm:$0xff]   ;;  %v11399_v5 = vld [vmem:[%s12463_s11 + $0x18c] ss:$16 sps:$4 sm:$0xff]  }
0x159f   : > { %v6191_v45 = vpop.f32.mrb[76].mxu0  ;;  %v6277_v47 = vpop.f32.mrb[76].mxu1 }
0x15a0   : > { %v10373_v10 = vadd.f32 %v6191_v45, %v5457_v59  ;;  %v6193_v50 = vpop.f32.mrb[77].mxu0  ;;  %v6279_v11 = vpop.f32.mrb[77].mxu1  ;;  %v10377_v9 = vadd.f32 %v6277_v47, %v5465_v28  ;;  %v11357_v45 = vld [vmem:[%s12463_s11 + $0xac] ss:$16 sps:$4 sm:$0xff]   ;;  %v11352_v47 = vld [vmem:[%s12463_s11 + $0xa0] ss:$16 sps:$4 sm:$0xff]  }
0x15a1   : > { %v10374_v12 = vadd.f32 %v6193_v50, %v5461_v0  ;;  %v6195_v14 = vpop.f32.mrb[78].mxu0  ;;  %v6281_v23 = vpop.f32.mrb[78].mxu1  ;;  %v10378_v25 = vadd.f32 %v6279_v11, %v5469_v21  ;;  %v11363_v50 = vld [vmem:[%s12463_s11 + $0xcc] ss:$16 sps:$4 sm:$0xff]   ;;  %v11358_v11 = vld [vmem:[%s12463_s11 + $0xc0] ss:$16 sps:$4 sm:$0xff]  }
0x15a2   : > { %v13459_v18 = vadd.f32 %v11778_v17, %v10373_v10  ;;  %v10375_v19 = vadd.f32 %v6195_v14, %v5457_v59  ;;  %v6197_v20 = vpop.f32.mrb[79].mxu0  ;;  %v6283_v22 = vpop.f32.mrb[79].mxu1  ;;  %v10379_v6 = vadd.f32 %v6281_v23, %v5465_v28  ;;  %v13465_v63 = vadd.f32 %v11781_v32, %v10377_v9  ;;  %v11346_v59 = vld [vmem:[%s12463_s11 + $0x80] ss:$16 sps:$4 sm:$0xff]   ;;  %v11349_v28 = vld [vmem:[%s12463_s11 + $0x88] ss:$16 sps:$4 sm:$0xff]  }
0x15a3   : > { %v13461_v33 = vadd.f32 %v11779_v24, %v10374_v12  ;;  %v10376_v27 = vadd.f32 %v6197_v20, %v5461_v0  ;;  %v10380_v15 = vadd.f32 %v6283_v22, %v5469_v21  ;;  %v13471_v41 = vadd.f32 %v11783_v40, %v10378_v25  ;;  %v11354_v0 = vld [vmem:[%s12463_s11 + $0xa4] ss:$16 sps:$4 sm:$0xff]   ;;  %7213 = vmatpush1.bf16.msra.mxu0 %v11346_v59  ;;  %v11355_v21 = vld [vmem:[%s12463_s11 + $0xa8] ss:$16 sps:$4 sm:$0xff]   ;;  %v11369_v14 = vld [vmem:[%s12463_s11 + $0xec] ss:$16 sps:$4 sm:$0xff]  }
0x15a4   : > { %v13463_v29 = vadd.f32 %v11780_v57, %v10375_v19  ;;  %v13473_v53 = vadd.f32 %v11784_v42, %v10379_v6  ;;  %7299 = vmatpush1.bf16.msra.mxu1 %v11349_v28  ;;  %7214 = vmatprep.subr.bf16.mxu0 %v11354_v0  ;;  %v11360_v10 = vld [vmem:[%s12463_s11 + $0xc4] ss:$16 sps:$4 sm:$0xff]   ;;  %v11361_v9 = vld [vmem:[%s12463_s11 + $0xc8] ss:$16 sps:$4 sm:$0xff]   ;;  %v11364_v23 = vld [vmem:[%s12463_s11 + $0xe0] ss:$16 sps:$4 sm:$0xff]  }
0x15a5   : > { %v6298_v36 = vadd.f32 %v13461_v33, %v13459_v18  ;;  %v13469_v54 = vadd.f32 %v11782_v7, %v10376_v27  ;;  %v13478_v46 = vadd.f32 %v11785_v44, %v10380_v15  ;;  %7300 = vmatprep.subr.bf16.mxu1 %v11357_v45  ;;  %v11366_v12 = vld [vmem:[%s12463_s11 + $0xe4] ss:$16 sps:$4 sm:$0xff]   ;;  %v11367_v17 = vld [vmem:[%s12463_s11 + $0xe8] ss:$16 sps:$4 sm:$0xff]   ;;  %v11375_v20 = vld [vmem:[%s12463_s11 + $0x10c] ss:$16 sps:$4 sm:$0xff]  }
0x15a6   : > { %v11372_v19 = vld [vmem:[%s12463_s11 + $0x104] ss:$16 sps:$4 sm:$0xff]   ;;  %v11370_v22 = vld [vmem:[%s12463_s11 + $0x100] ss:$16 sps:$4 sm:$0xff]   ;;  %v11373_v24 = vld [vmem:[%s12463_s11 + $0x108] ss:$16 sps:$4 sm:$0xff]  }
0x15a7   : > { %v6303_v43 = vadd.f32 %v13469_v54, %v13463_v29  ;;  %v6299_v38 = vadd.f32 %v6298_v36, %v13465_v63  ;;  %7215 = vmatpush1.bf16.msra.mxu0 %v11352_v47  ;;  %v11378_v25 = vld [vmem:[%s12463_s11 + $0x124] ss:$16 sps:$4 sm:$0xff]   ;;  %v11381_v6 = vld [vmem:[%s12463_s11 + $0x12c] ss:$16 sps:$4 sm:$0xff]   ;;  %v11376_v27 = vld [vmem:[%s12463_s11 + $0x120] ss:$16 sps:$4 sm:$0xff]  }
0x15a8   : > { %7301 = vmatpush1.bf16.msra.mxu1 %v11355_v21  ;;  %7216 = vmatprep.subr.bf16.mxu0 %v11360_v10  ;;  %v11379_v57 = vld [vmem:[%s12463_s11 + $0x128] ss:$16 sps:$4 sm:$0xff]   ;;  %v11402_v59 = vld [vmem:[%s12463_s11 + $0x1a4] ss:$16 sps:$4 sm:$0xff]   ;;  %v11405_v28 = vld [vmem:[%s12463_s11 + $0x1ac] ss:$16 sps:$4 sm:$0xff]  }
0x15a9   : > { %v6300_v31 = vadd.f32 %v6299_v38, %v13471_v41  ;;  %v6304_v48 = vadd.f32 %v6303_v43, %v13473_v53  ;;  %7302 = vmatprep.subr.bf16.mxu1 %v11363_v50  ;;  %v11400_v0 = vld [vmem:[%s12463_s11 + $0x1a0] ss:$16 sps:$4 sm:$0xff]   ;;  %v11403_v45 = vld [vmem:[%s12463_s11 + $0x1a8] ss:$16 sps:$4 sm:$0xff]   ;;  %v11408_v47 = vld [vmem:[%s12463_s11 + $0x1c4] ss:$16 sps:$4 sm:$0xff]  }
0x15aa   : > { %v11411_v21 = vld [vmem:[%s12463_s11 + $0x1cc] ss:$16 sps:$4 sm:$0xff]   ;;  %v11406_v10 = vld [vmem:[%s12463_s11 + $0x1c0] ss:$16 sps:$4 sm:$0xff]   ;;  %v11409_v50 = vld [vmem:[%s12463_s11 + $0x1c8] ss:$16 sps:$4 sm:$0xff]  }
0x15ab   : > { %6301 = vadd.xlane.f32.xlu0 %v6300_v31  ;;  %v6305_v49 = vadd.f32 %v6304_v48, %v13478_v46  ;;  %7217 = vmatpush1.bf16.msra.mxu0 %v11358_v11  ;;  %v11414_v11 = vld [vmem:[%s12463_s11 + $0x1e4] ss:$16 sps:$4 sm:$0xff]  }
0x15ac   : > { %7303 = vmatpush1.bf16.msra.mxu1 %v11361_v9  ;;  %7218 = vmatprep.subr.bf16.mxu0 %v11366_v12  ;;  %v11417_v9 = vld [vmem:[%s12463_s11 + $0x1ec] ss:$16 sps:$4 sm:$0xff]   ;;  %v11412_v12 = vld [vmem:[%s12463_s11 + $0x1e0] ss:$16 sps:$4 sm:$0xff]  }
0x15ad   : > { %6306 = vadd.xlane.f32.xlu1 %v6305_v49  ;;  %7304 = vmatprep.subr.bf16.mxu1 %v11369_v14  ;;  %v11415_v14 = vld [vmem:[%s12463_s11 + $0x1e8] ss:$16 sps:$4 sm:$0xff]  }
0x15af   : > { %7219 = vmatpush1.bf16.msra.mxu0 %v11364_v23  ;;  %v11420_v23 = vld [vmem:[%s12463_s11 + $0x204] ss:$16 sps:$4 sm:$0xff]  }
0x15b0   : > { %7305 = vmatpush1.bf16.msra.mxu1 %v11367_v17  ;;  %7220 = vmatprep.subr.bf16.mxu0 %v11372_v19  ;;  %v11423_v17 = vld [vmem:[%s12463_s11 + $0x20c] ss:$16 sps:$4 sm:$0xff]  }
0x15b1   : > { %7306 = vmatprep.subr.bf16.mxu1 %v11375_v20 }
0x15b3   : > { %7221 = vmatpush1.bf16.msra.mxu0 %v11370_v22 }
0x15b4   : > { %7307 = vmatpush1.bf16.msra.mxu1 %v11373_v24  ;;  %7222 = vmatprep.subr.bf16.mxu0 %v11378_v25 }
0x15b5   : > { %7308 = vmatprep.subr.bf16.mxu1 %v11381_v6 }
0x15b7   : > { %7223 = vmatpush1.bf16.msra.mxu0 %v11376_v27  ;;  %v9769_v27 = vld [vmem:[%s12480_s4 + $0x6] ss:$8 sm:$0xf] }
0x15b8   : > { %7309 = vmatpush1.bf16.msra.mxu1 %v11379_v57  ;;  %7224 = vmatprep.subr.bf16.mxu0 %v11384_v4  ;;  %v9770_v57 = vld [vmem:[%s12480_s4 + $0x7] ss:$8 sm:$0xf] }
0x15bb   : > { %7225 = vmatpush1.bf16.msra.mxu0 %v11382_v62 }
0x15bc   : > { %7226 = vmatprep.subr.bf16.mxu0 %v11390_v16 }
0x15bf   : > { %7227 = vmatpush1.bf16.msra.mxu0 %v11388_v34 }
0x15c0   : > { %7228 = vmatprep.subr.bf16.mxu0 %v11396_v35  ;;  %v11418_v35 = vld [vmem:[%s12463_s11 + $0x200] ss:$16 sps:$4 sm:$0xff]  }
0x15c3   : > { %7229 = vmatpush1.bf16.msra.mxu0 %v11394_v52  ;;  %v11421_v52 = vld [vmem:[%s12463_s11 + $0x208] ss:$16 sps:$4 sm:$0xff]  }
0x15c4   : > { %7230 = vmatprep.subr.bf16.mxu0 %v11402_v59  ;;  %v11426_v59 = vld [vmem:[%s12463_s11 + $0x224] ss:$16 sps:$4 sm:$0xff]  }
0x15c7   : > { %7231 = vmatpush1.bf16.msra.mxu0 %v11400_v0 }
0x15c8   : > { %7232 = vmatprep.subr.bf16.mxu0 %v11408_v47  ;;  %v11427_v47 = vld [vmem:[%s12463_s11 + $0x228] ss:$16 sps:$4 sm:$0xff]  }
0x15cb   : > { %7233 = vmatpush1.bf16.msra.mxu0 %v11406_v10  ;;  %v11435_v10 = vld [vmem:[%s12463_s11 + $0x24c] ss:$16 sps:$4 sm:$0xff]  }
0x15cc   : > { %7234 = vmatprep.subr.bf16.mxu0 %v11414_v11  ;;  %v11433_v11 = vld [vmem:[%s12463_s11 + $0x248] ss:$16 sps:$4 sm:$0xff]  }
0x15cf   : > { %7235 = vmatpush1.bf16.msra.mxu0 %v11412_v12  ;;  %v11441_v12 = vld [vmem:[%s12463_s11 + $0x26c] ss:$16 sps:$4 sm:$0xff]  }
0x15d0   : > { %7247 = vmatprep.subr.bf16.mxu0 %v11420_v23  ;;  %v11439_v23 = vld [vmem:[%s12463_s11 + $0x268] ss:$16 sps:$4 sm:$0xff]  }
0x1638   : > { %v6302_v32 = vpop.xlane.xlu0 %6301 }
0x1639   : > { %v6309_v36 = vmul.f32 0.001953125, %v6302_v32  ;;  %v6363_v32 = vrot.slane %v9769_v27, %v12870_v3 }
0x163a   : > { %v6307_v7 = vpop.xlane.xlu1 %6306 }
0x163b   : > { %v13524_v15 = vsub.f32 %v13459_v18, %v6309_v36  ;;  %v13527_v40 = vsub.f32 %v13461_v33, %v6309_v36  ;;  %v6310_v42 = vmul.f32 0.001953125, %v6307_v7  ;;  %v13530_v43 = vsub.f32 %v13465_v63, %v6309_v36 }
0x163c   : > { %v13533_v38 = vsub.f32 %v13471_v41, %v6309_v36  ;;  %v6359_v7 = vrot.slane %v9769_v27, %v12857_v58 }
0x163d   : > { %v13536_v44 = vsub.f32 %v13463_v29, %v6310_v42  ;;  %v13539_v31 = vsub.f32 %v13469_v54, %v6310_v42  ;;  %v6319_v18 = vmul.f32 %v13524_v15, %v13524_v15  ;;  %v6320_v33 = vmul.f32 %v13527_v40, %v13527_v40 }
0x163e   : > { %v13546_v48 = vsub.f32 %v13473_v53, %v6310_v42  ;;  %v6321_v63 = vmul.f32 %v13530_v43, %v13530_v43  ;;  %v6322_v49 = vmul.f32 %v13533_v38, %v13533_v38  ;;  %v13557_v53 = vsub.f32 %v13478_v46, %v6310_v42  ;;  %v11387_v46 = vld [vmem:[%s12463_s11 + $0x14c] ss:$16 sps:$4 sm:$0xff]  }
0x163f   : > { %v6327_v41 = vadd.f32 %v6320_v33, %v6319_v18  ;;  %v6323_v29 = vmul.f32 %v13536_v44, %v13536_v44  ;;  %v6324_v54 = vmul.f32 %v13539_v31, %v13539_v31  ;;  %7310 = vmatprep.subr.bf16.mxu1 %v11387_v46  ;;  %v6355_v33 = vrot.slane %v9769_v27, %v12943_v2 }
0x1640   : > { %v6325_v39 = vmul.f32 %v13546_v48, %v13546_v48  ;;  %v6326_v61 = vmul.f32 %v13557_v53, %v13557_v53  ;;  %7311 = vmatpush1.bf16.msra.mxu1 %v11385_v13  ;;  %v6396_v13 = vrot.slane %v9770_v57, %v12879_v8 }
0x1641   : > { %v6328_v51 = vadd.f32 %v6327_v41, %v6321_v63  ;;  %v6332_v37 = vadd.f32 %v6324_v54, %v6323_v29  ;;  %7312 = vmatprep.subr.bf16.mxu1 %v11393_v26  ;;  %v6392_v41 = vrot.slane %v9770_v57, %v12870_v3 }
0x1643   : > { %v6329_v56 = vadd.f32 %v6328_v51, %v6322_v49  ;;  %v6333_v55 = vadd.f32 %v6332_v37, %v6325_v39  ;;  %v6388_v49 = vrot.slane %v9770_v57, %v12857_v58  ;;  %v6384_v51 = vrot.slane %v9770_v57, %v12943_v2  ;;  %v11456_v57 = vld [vmem:[%s12463_s11 + $0x2c4] ss:$16 sps:$4 sm:$0xff]  }
0x1644   : > { %7313 = vmatpush1.bf16.msra.mxu1 %v11391_v60  ;;  %v6367_v37 = vrot.slane %v9769_v27, %v12879_v8  ;;  %v11451_v27 = vld [vmem:[%s12463_s11 + $0x2a8] ss:$16 sps:$4 sm:$0xff]  }
0x1645   : > { %6330 = vadd.xlane.f32.xlu0 %v6329_v56  ;;  %v6334_v30 = vadd.f32 %v6333_v55, %v6326_v61  ;;  %7314 = vmatprep.subr.bf16.mxu1 %v11399_v5 }
0x1648   : > { %7315 = vmatpush1.bf16.msra.mxu1 %v11397_v1 }
0x1649   : > { %6335 = vadd.xlane.f32.xlu0 %v6334_v30  ;;  %7316 = vmatprep.subr.bf16.mxu1 %v11405_v28  ;;  %v11429_v28 = vld [vmem:[%s12463_s11 + $0x22c] ss:$16 sps:$4 sm:$0xff]  }
0x164c   : > { %7317 = vmatpush1.bf16.msra.mxu1 %v11403_v45  ;;  %v11424_v45 = vld [vmem:[%s12463_s11 + $0x220] ss:$16 sps:$4 sm:$0xff]  }
0x164d   : > { %7318 = vmatprep.subr.bf16.mxu1 %v11411_v21  ;;  %v11432_v21 = vld [vmem:[%s12463_s11 + $0x244] ss:$16 sps:$4 sm:$0xff]  }
0x1650   : > { %7319 = vmatpush1.bf16.msra.mxu1 %v11409_v50  ;;  %v11430_v50 = vld [vmem:[%s12463_s11 + $0x240] ss:$16 sps:$4 sm:$0xff]  }
0x1651   : > { %7320 = vmatprep.subr.bf16.mxu1 %v11417_v9  ;;  %v11438_v9 = vld [vmem:[%s12463_s11 + $0x264] ss:$16 sps:$4 sm:$0xff]  }
0x1654   : > { %7321 = vmatpush1.bf16.msra.mxu1 %v11415_v14  ;;  %v11436_v14 = vld [vmem:[%s12463_s11 + $0x260] ss:$16 sps:$4 sm:$0xff]  }
0x1655   : > { %7333 = vmatprep.subr.bf16.mxu1 %v11423_v17  ;;  %v11444_v17 = vld [vmem:[%s12463_s11 + $0x284] ss:$16 sps:$4 sm:$0xff]  }
0x16d2   : > { %v6331_v19 = vpop.xlane.xlu0 %6330 }
0x16d3   : > { %v6337_v20 = vmul.f32 0.001953125, %v6331_v19  ;;  %v11447_v19 = vld [vmem:[%s12463_s11 + $0x28c] ss:$16 sps:$4 sm:$0xff]  }
0x16d5   : > { %v6339_v22 = vadd.f32 1e-05, %v6337_v20  ;;  %v11442_v20 = vld [vmem:[%s12463_s11 + $0x280] ss:$16 sps:$4 sm:$0xff]  }
0x16d6   : > { %v6336_v24 = vpop.xlane.xlu0 %6335 }
0x16d7   : > { %11770 = vrsqrt.f32 %v6339_v22  ;;  %v6338_v25 = vmul.f32 0.001953125, %v6336_v24  ;;  %v11445_v22 = vld [vmem:[%s12463_s11 + $0x288] ss:$16 sps:$4 sm:$0xff]   ;;  %v11450_v24 = vld [vmem:[%s12463_s11 + $0x2a4] ss:$16 sps:$4 sm:$0xff]  }
0x16d9   : > { %v6340_v6 = vadd.f32 1e-05, %v6338_v25  ;;  %v11453_v25 = vld [vmem:[%s12463_s11 + $0x2ac] ss:$16 sps:$4 sm:$0xff]  }
0x16db   : > { %11772 = vrsqrt.f32 %v6340_v6  ;;  %v11448_v6 = vld [vmem:[%s12463_s11 + $0x2a0] ss:$16 sps:$4 sm:$0xff]  }
0x16e1   : > { %v11771_v36 = vpop.eup %11770 }
0x16e2   : > { %v6344_v42 = vmul.f32 %v11771_v36, %v13527_v40  ;;  %v6343_v18 = vmul.f32 %v11771_v36, %v13524_v15  ;;  %v6345_v63 = vmul.f32 %v11771_v36, %v13530_v43  ;;  %v6346_v39 = vmul.f32 %v11771_v36, %v13533_v38  ;;  %v11454_v36 = vld [vmem:[%s12463_s11 + $0x2c0] ss:$16 sps:$4 sm:$0xff]  }
0x16e4   : > { %v6374_v29 = vmul.f32 %v6363_v32, %v6345_v63  ;;  %v6373_v56 = vmul.f32 %v6359_v7, %v6344_v42  ;;  %v6372_v55 = vmul.f32 %v6355_v33, %v6343_v18  ;;  %v6375_v62 = vmul.f32 %v6367_v37, %v6346_v39  ;;  %v11462_v42 = vld [vmem:[%s12463_s11 + $0x2e4] ss:$16 sps:$4 sm:$0xff]   ;;  %v11465_v18 = vld [vmem:[%s12463_s11 + $0x2ec] ss:$16 sps:$4 sm:$0xff]   ;;  %v11463_v63 = vld [vmem:[%s12463_s11 + $0x2e8] ss:$16 sps:$4 sm:$0xff]  }
0x16e5   : > { %v11773_v54 = vpop.eup %11772  ;;  %v11477_v39 = vld [vmem:[%s12463_s11 + $0x32c] ss:$16 sps:$4 sm:$0xff]  }
0x16e6   : > { %v6348_v40 = vmul.f32 %v11773_v54, %v13539_v31  ;;  %v6347_v15 = vmul.f32 %v11773_v54, %v13536_v44  ;;  %v6350_v43 = vmul.f32 %v11773_v54, %v13557_v53  ;;  %v6349_v61 = vmul.f32 %v11773_v54, %v13546_v48  ;;  %v11466_v54 = vld [vmem:[%s12463_s11 + $0x300] ss:$16 sps:$4 sm:$0xff]  }
0x16e7   : > { %v13606_v30 = vadd.f32 %v6392_v41, %v6374_v29  ;;  %v13609_v16 = vadd.f32 %v6388_v49, %v6373_v56  ;;  %v13613_v53 = vadd.f32 %v6384_v51, %v6372_v55  ;;  %v13627_v5 = vadd.f32 %v6396_v13, %v6375_v62  ;;  %v11471_v29 = vld [vmem:[%s12463_s11 + $0x30c] ss:$16 sps:$4 sm:$0xff]   ;;  %v11480_v56 = vld [vmem:[%s12463_s11 + $0x344] ss:$16 sps:$4 sm:$0xff]   ;;  %v11478_v55 = vld [vmem:[%s12463_s11 + $0x340] ss:$16 sps:$4 sm:$0xff]  }
0x16e8   : > { %v6377_v4 = vmul.f32 %v6359_v7, %v6348_v40  ;;  %v6376_v46 = vmul.f32 %v6355_v33, %v6347_v15  ;;  %v6379_v38 = vmul.f32 %v6367_v37, %v6350_v43  ;;  %v6378_v31 = vmul.f32 %v6363_v32, %v6349_v61  ;;  %v11459_v32 = vld [vmem:[%s12463_s11 + $0x2cc] ss:$16 sps:$4 sm:$0xff]   ;;  %v11457_v7 = vld [vmem:[%s12463_s11 + $0x2c8] ss:$16 sps:$4 sm:$0xff]   ;;  %v11460_v33 = vld [vmem:[%s12463_s11 + $0x2e0] ss:$16 sps:$4 sm:$0xff]  }
0x16e9   : > { %v11472_v37 = vld [vmem:[%s12463_s11 + $0x320] ss:$16 sps:$4 sm:$0xff]   ;;  %v11475_v40 = vld [vmem:[%s12463_s11 + $0x328] ss:$16 sps:$4 sm:$0xff]   ;;  %v11483_v15 = vld [vmem:[%s12463_s11 + $0x34c] ss:$16 sps:$4 sm:$0xff]  }
0x16ea   : > { %v13611_v44 = vadd.f32 %v6388_v49, %v6377_v4  ;;  %v13615_v26 = vadd.f32 %v6384_v51, %v6376_v46  ;;  %v13617_v48 = vadd.f32 %v6396_v13, %v6379_v38  ;;  %v13619_v34 = vadd.f32 %v6392_v41, %v6378_v31  ;;  %v11468_v41 = vld [vmem:[%s12463_s11 + $0x304] ss:$16 sps:$4 sm:$0xff]   ;;  %v11469_v49 = vld [vmem:[%s12463_s11 + $0x308] ss:$16 sps:$4 sm:$0xff]   ;;  %v11489_v4 = vld [vmem:[%s12463_s11 + $0x36c] ss:$16 sps:$4 sm:$0xff]  }
0x16eb   : > { %v11474_v51 = vld [vmem:[%s12463_s11 + $0x324] ss:$16 sps:$4 sm:$0xff]   ;;  %v11481_v43 = vld [vmem:[%s12463_s11 + $0x348] ss:$16 sps:$4 sm:$0xff]   ;;  %v11484_v46 = vld [vmem:[%s12463_s11 + $0x360] ss:$16 sps:$4 sm:$0xff]  }
0x16ec   : > { %v6410_v60 = vpack.c.bf16 %v13611_v44, %v13609_v16  ;;  %v6409_v1 = vpack.c.bf16 %v13615_v26, %v13613_v53  ;;  %v6412_v0 = vpack.c.bf16 %v13617_v48, %v13627_v5  ;;  %v11486_v61 = vld [vmem:[%s12463_s11 + $0x364] ss:$16 sps:$4 sm:$0xff]   ;;  %v11487_v62 = vld [vmem:[%s12463_s11 + $0x368] ss:$16 sps:$4 sm:$0xff]   ;;  %v11495_v13 = vld [vmem:[%s12463_s11 + $0x38c] ss:$16 sps:$4 sm:$0xff]  }
0x16ed   : > { %v11492_v38 = vld [vmem:[%s12463_s11 + $0x384] ss:$16 sps:$4 sm:$0xff]   ;;  %v11490_v31 = vld [vmem:[%s12463_s11 + $0x380] ss:$16 sps:$4 sm:$0xff]  }
0x16ee   : > { %7236 = vmatprep.mubr.bf16.mxu0 %v6410_v60  ;;  %7322 = vmatprep.mubr.bf16.mxu1 %v6410_v60  ;;  %v11493_v60 = vld [vmem:[%s12463_s11 + $0x388] ss:$16 sps:$4 sm:$0xff]  }
0x16ef   : > { %7237 = vmatmul.mubr.bf16.vlgmr.msra.gmra.mrb[80].mxu0 %v6409_v1  ;;  %7323 = vmatmul.mubr.bf16.vlgmr.msra.gmra.mrb[80].mxu1 %v6409_v1  ;;  %v11496_v1 = vld [vmem:[%s12463_s11 + $0x3a0] ss:$16 sps:$4 sm:$0xff]  }
0x16f0   : > { %7248 = vmatpush1.bf16.msra.mxu0 %v11418_v35  ;;  %7334 = vmatpush1.bf16.msra.mxu1 %v11421_v52  ;;  %v11498_v35 = vld [vmem:[%s12463_s11 + $0x3a4] ss:$16 sps:$4 sm:$0xff]   ;;  %v11501_v52 = vld [vmem:[%s12463_s11 + $0x3ac] ss:$16 sps:$4 sm:$0xff]  }
0x16f1   : > { %7279 = vmatprep.mubr.bf16.mxu0 %v6412_v0  ;;  %7365 = vmatprep.mubr.bf16.mxu1 %v6412_v0  ;;  %v11507_v0 = vld [vmem:[%s12463_s11 + $0x3cc] ss:$16 sps:$4 sm:$0xff]  }
0x16f2   : > { %7249 = vmatprep.subr.bf16.mxu0 %v11426_v59  ;;  %7335 = vmatprep.subr.bf16.mxu1 %v11429_v28  ;;  %v11499_v59 = vld [vmem:[%s12463_s11 + $0x3a8] ss:$16 sps:$4 sm:$0xff]   ;;  %v11504_v28 = vld [vmem:[%s12463_s11 + $0x3c4] ss:$16 sps:$4 sm:$0xff]  }
0x16f4   : > { %7250 = vmatpush1.bf16.msra.mxu0 %v11424_v45  ;;  %7336 = vmatpush1.bf16.msra.mxu1 %v11427_v47  ;;  %v11502_v45 = vld [vmem:[%s12463_s11 + $0x3c0] ss:$16 sps:$4 sm:$0xff]   ;;  %v11505_v47 = vld [vmem:[%s12463_s11 + $0x3c8] ss:$16 sps:$4 sm:$0xff]  }
0x16f5   : > { %7251 = vmatprep.subr.bf16.mxu0 %v11432_v21  ;;  %7337 = vmatprep.subr.bf16.mxu1 %v11435_v10  ;;  %v11510_v21 = vld [vmem:[%s12463_s11 + $0x3e4] ss:$16 sps:$4 sm:$0xff]   ;;  %v11513_v10 = vld [vmem:[%s12463_s11 + $0x3ec] ss:$16 sps:$4 sm:$0xff]  }
0x16f8   : > { %7252 = vmatpush1.bf16.msra.mxu0 %v11430_v50  ;;  %7338 = vmatpush1.bf16.msra.mxu1 %v11433_v11  ;;  %v11508_v50 = vld [vmem:[%s12463_s11 + $0x3e0] ss:$16 sps:$4 sm:$0xff]   ;;  %v11511_v11 = vld [vmem:[%s12463_s11 + $0x3e8] ss:$16 sps:$4 sm:$0xff]  }
0x16f9   : > { %7253 = vmatprep.subr.bf16.mxu0 %v11438_v9  ;;  %7339 = vmatprep.subr.bf16.mxu1 %v11441_v12  ;;  %v11516_v9 = vld [vmem:[%s12469_s6 + $0x4] ss:$16 sps:$4 sm:$0xff]   ;;  %v11519_v12 = vld [vmem:[%s12469_s6 + $0xc] ss:$16 sps:$4 sm:$0xff]  }
0x16fc   : > { %7254 = vmatpush1.bf16.msra.mxu0 %v11436_v14  ;;  %7340 = vmatpush1.bf16.msra.mxu1 %v11439_v23  ;;  %v11514_v14 = vld [vmem:[%s12469_s6] ss:$16 sps:$4 sm:$0xff]   ;;  %v11517_v23 = vld [vmem:[%s12469_s6 + $0x8] ss:$16 sps:$4 sm:$0xff]  }
0x16fd   : > { %7255 = vmatprep.subr.bf16.mxu0 %v11444_v17  ;;  %7341 = vmatprep.subr.bf16.mxu1 %v11447_v19  ;;  %v6411_v17 = vpack.c.bf16 %v13619_v34, %v13606_v30  ;;  %v11522_v19 = vld [vmem:[%s12469_s6 + $0x24] ss:$16 sps:$4 sm:$0xff]  }
0x1700   : > { %7256 = vmatpush1.bf16.msra.mxu0 %v11442_v20  ;;  %7342 = vmatpush1.bf16.msra.mxu1 %v11445_v22  ;;  %v11525_v20 = vld [vmem:[%s12469_s6 + $0x2c] ss:$16 sps:$4 sm:$0xff]   ;;  %v11520_v22 = vld [vmem:[%s12469_s6 + $0x20] ss:$16 sps:$4 sm:$0xff]  }
0x1701   : > { %7257 = vmatprep.subr.bf16.mxu0 %v11450_v24  ;;  %7343 = vmatprep.subr.bf16.mxu1 %v11453_v25  ;;  %v11523_v24 = vld [vmem:[%s12469_s6 + $0x28] ss:$16 sps:$4 sm:$0xff]   ;;  %v11528_v25 = vld [vmem:[%s12469_s6 + $0x44] ss:$16 sps:$4 sm:$0xff]  }
0x1704   : > { %7258 = vmatpush1.bf16.msra.mxu0 %v11448_v6  ;;  %7344 = vmatpush1.bf16.msra.mxu1 %v11451_v27  ;;  %v11531_v6 = vld [vmem:[%s12469_s6 + $0x4c] ss:$16 sps:$4 sm:$0xff]   ;;  %v11526_v27 = vld [vmem:[%s12469_s6 + $0x40] ss:$16 sps:$4 sm:$0xff]  }
0x1705   : > { %7259 = vmatprep.subr.bf16.mxu0 %v11456_v57  ;;  %7345 = vmatprep.subr.bf16.mxu1 %v11459_v32  ;;  %v11529_v57 = vld [vmem:[%s12469_s6 + $0x48] ss:$16 sps:$4 sm:$0xff]   ;;  %v11534_v32 = vld [vmem:[%s12469_s6 + $0x64] ss:$16 sps:$4 sm:$0xff]  }
0x1708   : > { %7260 = vmatpush1.bf16.msra.mxu0 %v11454_v36  ;;  %7346 = vmatpush1.bf16.msra.mxu1 %v11457_v7  ;;  %v11537_v36 = vld [vmem:[%s12469_s6 + $0x6c] ss:$16 sps:$4 sm:$0xff]   ;;  %v11532_v7 = vld [vmem:[%s12469_s6 + $0x60] ss:$16 sps:$4 sm:$0xff]  }
0x1709   : > { %7261 = vmatprep.subr.bf16.mxu0 %v11462_v42  ;;  %7347 = vmatprep.subr.bf16.mxu1 %v11465_v18  ;;  %v11535_v42 = vld [vmem:[%s12469_s6 + $0x68] ss:$16 sps:$4 sm:$0xff]   ;;  %v11540_v18 = vld [vmem:[%s12469_s6 + $0x84] ss:$16 sps:$4 sm:$0xff]  }
0x170c   : > { %7262 = vmatpush1.bf16.msra.mxu0 %v11460_v33  ;;  %7348 = vmatpush1.bf16.msra.mxu1 %v11463_v63  ;;  %v11543_v33 = vld [vmem:[%s12469_s6 + $0x8c] ss:$16 sps:$4 sm:$0xff]   ;;  %v11538_v63 = vld [vmem:[%s12469_s6 + $0x80] ss:$16 sps:$4 sm:$0xff]  }
0x170d   : > { %7263 = vmatprep.subr.bf16.mxu0 %v11468_v41  ;;  %7349 = vmatprep.subr.bf16.mxu1 %v11471_v29  ;;  %v11541_v41 = vld [vmem:[%s12469_s6 + $0x88] ss:$16 sps:$4 sm:$0xff]   ;;  %v11546_v29 = vld [vmem:[%s12469_s6 + $0xa4] ss:$16 sps:$4 sm:$0xff]  }
0x1710   : > { %7264 = vmatpush1.bf16.msra.mxu0 %v11466_v54  ;;  %7350 = vmatpush1.bf16.msra.mxu1 %v11469_v49  ;;  %v11549_v54 = vld [vmem:[%s12469_s6 + $0xac] ss:$16 sps:$4 sm:$0xff]   ;;  %v11544_v49 = vld [vmem:[%s12469_s6 + $0xa0] ss:$16 sps:$4 sm:$0xff]  }
0x1711   : > { %7265 = vmatprep.subr.bf16.mxu0 %v11474_v51  ;;  %7351 = vmatprep.subr.bf16.mxu1 %v11477_v39  ;;  %v11547_v51 = vld [vmem:[%s12469_s6 + $0xa8] ss:$16 sps:$4 sm:$0xff]   ;;  %v11552_v39 = vld [vmem:[%s12469_s6 + $0xc4] ss:$16 sps:$4 sm:$0xff]  }
0x1714   : > { %7266 = vmatpush1.bf16.msra.mxu0 %v11472_v37  ;;  %7352 = vmatpush1.bf16.msra.mxu1 %v11475_v40  ;;  %v11555_v37 = vld [vmem:[%s12469_s6 + $0xcc] ss:$16 sps:$4 sm:$0xff]   ;;  %v11550_v40 = vld [vmem:[%s12469_s6 + $0xc0] ss:$16 sps:$4 sm:$0xff]  }
0x1715   : > { %7267 = vmatprep.subr.bf16.mxu0 %v11480_v56  ;;  %7353 = vmatprep.subr.bf16.mxu1 %v11483_v15  ;;  %v11553_v56 = vld [vmem:[%s12469_s6 + $0xc8] ss:$16 sps:$4 sm:$0xff]   ;;  %v11558_v15 = vld [vmem:[%s12469_s6 + $0xe4] ss:$16 sps:$4 sm:$0xff]  }
0x1718   : > { %7268 = vmatpush1.bf16.msra.mxu0 %v11478_v55  ;;  %7354 = vmatpush1.bf16.msra.mxu1 %v11481_v43  ;;  %v11561_v55 = vld [vmem:[%s12469_s6 + $0xec] ss:$16 sps:$4 sm:$0xff]   ;;  %v11556_v43 = vld [vmem:[%s12469_s6 + $0xe0] ss:$16 sps:$4 sm:$0xff]  }
0x1719   : > { %7269 = vmatprep.subr.bf16.mxu0 %v11486_v61  ;;  %7355 = vmatprep.subr.bf16.mxu1 %v11489_v4  ;;  %v11559_v61 = vld [vmem:[%s12469_s6 + $0xe8] ss:$16 sps:$4 sm:$0xff]   ;;  %v11564_v4 = vld [vmem:[%s12469_s6 + $0x104] ss:$16 sps:$4 sm:$0xff]  }
0x171c   : > { %7270 = vmatpush1.bf16.msra.mxu0 %v11484_v46  ;;  %7356 = vmatpush1.bf16.msra.mxu1 %v11487_v62  ;;  %v11567_v46 = vld [vmem:[%s12469_s6 + $0x10c] ss:$16 sps:$4 sm:$0xff]   ;;  %v11562_v62 = vld [vmem:[%s12469_s6 + $0x100] ss:$16 sps:$4 sm:$0xff]  }
0x171d   : > { %7271 = vmatprep.subr.bf16.mxu0 %v11492_v38  ;;  %7357 = vmatprep.subr.bf16.mxu1 %v11495_v13  ;;  %v11565_v38 = vld [vmem:[%s12469_s6 + $0x108] ss:$16 sps:$4 sm:$0xff]   ;;  %v11570_v13 = vld [vmem:[%s12469_s6 + $0x124] ss:$16 sps:$4 sm:$0xff]  }
0x1720   : > { %7272 = vmatpush1.bf16.msra.mxu0 %v11490_v31  ;;  %7358 = vmatpush1.bf16.msra.mxu1 %v11493_v60  ;;  %v11573_v31 = vld [vmem:[%s12469_s6 + $0x12c] ss:$16 sps:$4 sm:$0xff]   ;;  %v11568_v60 = vld [vmem:[%s12469_s6 + $0x120] ss:$16 sps:$4 sm:$0xff]  }
0x1721   : > { %7273 = vmatprep.subr.bf16.mxu0 %v11498_v35  ;;  %7359 = vmatprep.subr.bf16.mxu1 %v11501_v52  ;;  %v11571_v35 = vld [vmem:[%s12469_s6 + $0x128] ss:$16 sps:$4 sm:$0xff]   ;;  %v11576_v52 = vld [vmem:[%s12469_s6 + $0x144] ss:$16 sps:$4 sm:$0xff]  }
0x1724   : > { %7274 = vmatpush1.bf16.msra.mxu0 %v11496_v1  ;;  %7360 = vmatpush1.bf16.msra.mxu1 %v11499_v59  ;;  %v11579_v1 = vld [vmem:[%s12469_s6 + $0x14c] ss:$16 sps:$4 sm:$0xff]   ;;  %v11574_v59 = vld [vmem:[%s12469_s6 + $0x140] ss:$16 sps:$4 sm:$0xff]  }
0x1725   : > { %7275 = vmatprep.subr.bf16.mxu0 %v11504_v28  ;;  %7361 = vmatprep.subr.bf16.mxu1 %v11507_v0  ;;  %v11577_v28 = vld [vmem:[%s12469_s6 + $0x148] ss:$16 sps:$4 sm:$0xff]   ;;  %v11582_v0 = vld [vmem:[%s12469_s6 + $0x164] ss:$16 sps:$4 sm:$0xff]  }
0x1728   : > { %7276 = vmatpush1.bf16.msra.mxu0 %v11502_v45  ;;  %7362 = vmatpush1.bf16.msra.mxu1 %v11505_v47  ;;  %v11585_v45 = vld [vmem:[%s12469_s6 + $0x16c] ss:$16 sps:$4 sm:$0xff]   ;;  %v11580_v47 = vld [vmem:[%s12469_s6 + $0x160] ss:$16 sps:$4 sm:$0xff]  }
0x1729   : > { %7277 = vmatprep.subr.bf16.mxu0 %v11510_v21  ;;  %7363 = vmatprep.subr.bf16.mxu1 %v11513_v10  ;;  %v11583_v21 = vld [vmem:[%s12469_s6 + $0x168] ss:$16 sps:$4 sm:$0xff]   ;;  %v11588_v10 = vld [vmem:[%s12469_s6 + $0x184] ss:$16 sps:$4 sm:$0xff]  }
0x172c   : > { %7278 = vmatpush1.bf16.msra.mxu0 %v11508_v50  ;;  %7364 = vmatpush1.bf16.msra.mxu1 %v11511_v11  ;;  %v11591_v50 = vld [vmem:[%s12469_s6 + $0x18c] ss:$16 sps:$4 sm:$0xff]   ;;  %v11586_v11 = vld [vmem:[%s12469_s6 + $0x180] ss:$16 sps:$4 sm:$0xff]  }
0x172d   : > { %8179 = vmatprep.subr.bf16.mxu0 %v11516_v9  ;;  %8265 = vmatprep.subr.bf16.mxu1 %v11519_v12  ;;  %v11589_v9 = vld [vmem:[%s12469_s6 + $0x188] ss:$16 sps:$4 sm:$0xff]   ;;  %v11594_v12 = vld [vmem:[%s12469_s6 + $0x1a4] ss:$16 sps:$4 sm:$0xff]  }
0x172f   : > { %7280 = vmatmul.mubr.bf16.vlgmr.msra.gmra.mrb[80].mxu0 %v6411_v17  ;;  %7366 = vmatmul.mubr.bf16.vlgmr.msra.gmra.mrb[80].mxu1 %v6411_v17  ;;  %v11595_v17 = vld [vmem:[%s12469_s6 + $0x1a8] ss:$16 sps:$4 sm:$0xff]  }
0x1730   : > { %8180 = vmatpush1.bf16.msra.mxu0 %v11514_v14  ;;  %8266 = vmatpush1.bf16.msra.mxu1 %v11517_v23  ;;  %v11597_v14 = vld [vmem:[%s12469_s6 + $0x1ac] ss:$16 sps:$4 sm:$0xff]   ;;  %v11592_v23 = vld [vmem:[%s12469_s6 + $0x1a0] ss:$16 sps:$4 sm:$0xff]  }
0x1731   : > { %8181 = vmatprep.subr.bf16.mxu0 %v11522_v19  ;;  %8267 = vmatprep.subr.bf16.mxu1 %v11525_v20  ;;  %v11600_v19 = vld [vmem:[%s12469_s6 + $0x1c4] ss:$16 sps:$4 sm:$0xff]   ;;  %v11603_v20 = vld [vmem:[%s12469_s6 + $0x1cc] ss:$16 sps:$4 sm:$0xff]  }
0x1734   : > { %8182 = vmatpush1.bf16.msra.mxu0 %v11520_v22  ;;  %8268 = vmatpush1.bf16.msra.mxu1 %v11523_v24  ;;  %v11598_v22 = vld [vmem:[%s12469_s6 + $0x1c0] ss:$16 sps:$4 sm:$0xff]   ;;  %v11601_v24 = vld [vmem:[%s12469_s6 + $0x1c8] ss:$16 sps:$4 sm:$0xff]  }
0x1735   : > { %8183 = vmatprep.subr.bf16.mxu0 %v11528_v25  ;;  %8269 = vmatprep.subr.bf16.mxu1 %v11531_v6  ;;  %v11606_v25 = vld [vmem:[%s12469_s6 + $0x1e4] ss:$16 sps:$4 sm:$0xff]   ;;  %v11609_v6 = vld [vmem:[%s12469_s6 + $0x1ec] ss:$16 sps:$4 sm:$0xff]  }
0x1738   : > { %8184 = vmatpush1.bf16.msra.mxu0 %v11526_v27  ;;  %8270 = vmatpush1.bf16.msra.mxu1 %v11529_v57  ;;  %v11604_v27 = vld [vmem:[%s12469_s6 + $0x1e0] ss:$16 sps:$4 sm:$0xff]   ;;  %v11607_v57 = vld [vmem:[%s12469_s6 + $0x1e8] ss:$16 sps:$4 sm:$0xff]  }
0x1739   : > { %8185 = vmatprep.subr.bf16.mxu0 %v11534_v32  ;;  %8271 = vmatprep.subr.bf16.mxu1 %v11537_v36  ;;  %v11612_v32 = vld [vmem:[%s12469_s6 + $0x204] ss:$16 sps:$4 sm:$0xff]   ;;  %v11615_v36 = vld [vmem:[%s12469_s6 + $0x20c] ss:$16 sps:$4 sm:$0xff]  }
0x173c   : > { %8186 = vmatpush1.bf16.msra.mxu0 %v11532_v7  ;;  %8272 = vmatpush1.bf16.msra.mxu1 %v11535_v42  ;;  %v9771_v7 = vld [vmem:[%s12480_s4 + $0x4] ss:$8 sm:$0xf] }
0x173d   : > { %8187 = vmatprep.subr.bf16.mxu0 %v11540_v18  ;;  %8273 = vmatprep.subr.bf16.mxu1 %v11543_v33  ;;  %v6547_v42 = vrot.slane %v9771_v7, %v12943_v2  ;;  %v6555_v18 = vrot.slane %v9771_v7, %v12870_v3  ;;  %v6551_v33 = vrot.slane %v9771_v7, %v12857_v58 }
0x1740   : > { %8188 = vmatpush1.bf16.msra.mxu0 %v11538_v63  ;;  %8274 = vmatpush1.bf16.msra.mxu1 %v11541_v41  ;;  %v6559_v63 = vrot.slane %v9771_v7, %v12879_v8  ;;  %v11645_v7 = vld [vmem:[%s12469_s6 + $0x2ac] ss:$16 sps:$4 sm:$0xff]  }
0x1741   : > { %8189 = vmatprep.subr.bf16.mxu0 %v11546_v29  ;;  %8275 = vmatprep.subr.bf16.mxu1 %v11549_v54 }
0x1744   : > { %8190 = vmatpush1.bf16.msra.mxu0 %v11544_v49  ;;  %8276 = vmatpush1.bf16.msra.mxu1 %v11547_v51 }
0x1745   : > { %8191 = vmatprep.subr.bf16.mxu0 %v11552_v39  ;;  %8277 = vmatprep.subr.bf16.mxu1 %v11555_v37 }
0x1748   : > { %8192 = vmatpush1.bf16.msra.mxu0 %v11550_v40  ;;  %8278 = vmatpush1.bf16.msra.mxu1 %v11553_v56 }
0x1749   : > { %8193 = vmatprep.subr.bf16.mxu0 %v11558_v15  ;;  %8279 = vmatprep.subr.bf16.mxu1 %v11561_v55 }
0x174c   : > { %8194 = vmatpush1.bf16.msra.mxu0 %v11556_v43  ;;  %8280 = vmatpush1.bf16.msra.mxu1 %v11559_v61 }
0x174d   : > { %8195 = vmatprep.subr.bf16.mxu0 %v11564_v4  ;;  %8281 = vmatprep.subr.bf16.mxu1 %v11567_v46 }
0x1750   : > { %8196 = vmatpush1.bf16.msra.mxu0 %v11562_v62  ;;  %8282 = vmatpush1.bf16.msra.mxu1 %v11565_v38 }
0x1751   : > { %8197 = vmatprep.subr.bf16.mxu0 %v11570_v13  ;;  %8283 = vmatprep.subr.bf16.mxu1 %v11573_v31 }
0x1754   : > { %8198 = vmatpush1.bf16.msra.mxu0 %v11568_v60  ;;  %8284 = vmatpush1.bf16.msra.mxu1 %v11571_v35 }
0x1755   : > { %8199 = vmatprep.subr.bf16.mxu0 %v11576_v52  ;;  %8285 = vmatprep.subr.bf16.mxu1 %v11579_v1 }
0x1758   : > { %8200 = vmatpush1.bf16.msra.mxu0 %v11574_v59  ;;  %8286 = vmatpush1.bf16.msra.mxu1 %v11577_v28 }
0x1759   : > { %8201 = vmatprep.subr.bf16.mxu0 %v11582_v0  ;;  %8287 = vmatprep.subr.bf16.mxu1 %v11585_v45 }
0x175c   : > { %8202 = vmatpush1.bf16.msra.mxu0 %v11580_v47  ;;  %8288 = vmatpush1.bf16.msra.mxu1 %v11583_v21  ;;  %v11610_v21 = vld [vmem:[%s12469_s6 + $0x200] ss:$16 sps:$4 sm:$0xff]  }
0x175d   : > { %8203 = vmatprep.subr.bf16.mxu0 %v11588_v10  ;;  %8289 = vmatprep.subr.bf16.mxu1 %v11591_v50  ;;  %v11613_v10 = vld [vmem:[%s12469_s6 + $0x208] ss:$16 sps:$4 sm:$0xff]   ;;  %v11618_v50 = vld [vmem:[%s12469_s6 + $0x224] ss:$16 sps:$4 sm:$0xff]  }
0x1760   : > { %8204 = vmatpush1.bf16.msra.mxu0 %v11586_v11  ;;  %8290 = vmatpush1.bf16.msra.mxu1 %v11589_v9  ;;  %v11621_v11 = vld [vmem:[%s12469_s6 + $0x22c] ss:$16 sps:$4 sm:$0xff]   ;;  %v11616_v9 = vld [vmem:[%s12469_s6 + $0x220] ss:$16 sps:$4 sm:$0xff]  }
0x1761   : > { %8205 = vmatprep.subr.bf16.mxu0 %v11594_v12  ;;  %8291 = vmatprep.subr.bf16.mxu1 %v11597_v14  ;;  %v11619_v12 = vld [vmem:[%s12469_s6 + $0x228] ss:$16 sps:$4 sm:$0xff]   ;;  %v11624_v14 = vld [vmem:[%s12469_s6 + $0x244] ss:$16 sps:$4 sm:$0xff]  }
0x1764   : > { %8206 = vmatpush1.bf16.msra.mxu0 %v11592_v23  ;;  %8292 = vmatpush1.bf16.msra.mxu1 %v11595_v17  ;;  %v11627_v23 = vld [vmem:[%s12469_s6 + $0x24c] ss:$16 sps:$4 sm:$0xff]   ;;  %v11622_v17 = vld [vmem:[%s12469_s6 + $0x240] ss:$16 sps:$4 sm:$0xff]  }
0x1765   : > { %8207 = vmatprep.subr.bf16.mxu0 %v11600_v19  ;;  %8293 = vmatprep.subr.bf16.mxu1 %v11603_v20  ;;  %v11625_v19 = vld [vmem:[%s12469_s6 + $0x248] ss:$16 sps:$4 sm:$0xff]   ;;  %v11630_v20 = vld [vmem:[%s12469_s6 + $0x264] ss:$16 sps:$4 sm:$0xff]  }
0x1768   : > { %8208 = vmatpush1.bf16.msra.mxu0 %v11598_v22  ;;  %8294 = vmatpush1.bf16.msra.mxu1 %v11601_v24  ;;  %v11633_v22 = vld [vmem:[%s12469_s6 + $0x26c] ss:$16 sps:$4 sm:$0xff]   ;;  %v11628_v24 = vld [vmem:[%s12469_s6 + $0x260] ss:$16 sps:$4 sm:$0xff]  }
0x1769   : > { %8209 = vmatprep.subr.bf16.mxu0 %v11606_v25  ;;  %8295 = vmatprep.subr.bf16.mxu1 %v11609_v6  ;;  %v11631_v25 = vld [vmem:[%s12469_s6 + $0x268] ss:$16 sps:$4 sm:$0xff]   ;;  %v11636_v6 = vld [vmem:[%s12469_s6 + $0x284] ss:$16 sps:$4 sm:$0xff]  }
0x176c   : > { %8210 = vmatpush1.bf16.msra.mxu0 %v11604_v27  ;;  %8296 = vmatpush1.bf16.msra.mxu1 %v11607_v57  ;;  %v11639_v27 = vld [vmem:[%s12469_s6 + $0x28c] ss:$16 sps:$4 sm:$0xff]   ;;  %v11634_v57 = vld [vmem:[%s12469_s6 + $0x280] ss:$16 sps:$4 sm:$0xff]  }
0x176d   : > { %8222 = vmatprep.subr.bf16.mxu0 %v11612_v32  ;;  %8308 = vmatprep.subr.bf16.mxu1 %v11615_v36  ;;  %v11637_v32 = vld [vmem:[%s12469_s6 + $0x288] ss:$16 sps:$4 sm:$0xff]   ;;  %v11642_v36 = vld [vmem:[%s12469_s6 + $0x2a4] ss:$16 sps:$4 sm:$0xff]  }
0x1802   : > { %v7281_v41 = vpop.f32.mrb[80].mxu0  ;;  %v7367_v29 = vpop.f32.mrb[80].mxu1 }
0x1803   : > { %v10381_v54 = vadd.f32 %v7281_v41, %v6547_v42  ;;  %v10385_v49 = vadd.f32 %v7367_v29, %v6555_v18  ;;  %v7283_v51 = vpop.f32.mrb[81].mxu0  ;;  %v7369_v39 = vpop.f32.mrb[81].mxu1  ;;  %v11646_v41 = vld [vmem:[%s12469_s6 + $0x2c0] ss:$16 sps:$4 sm:$0xff]   ;;  %v11649_v29 = vld [vmem:[%s12469_s6 + $0x2c8] ss:$16 sps:$4 sm:$0xff]  }
0x1804   : > { %v10382_v37 = vadd.f32 %v7283_v51, %v6551_v33  ;;  %v10386_v40 = vadd.f32 %v7369_v39, %v6559_v63  ;;  %v7285_v56 = vpop.f32.mrb[82].mxu0  ;;  %v7371_v15 = vpop.f32.mrb[82].mxu1  ;;  %v11652_v51 = vld [vmem:[%s12469_s6 + $0x2e0] ss:$16 sps:$4 sm:$0xff]   ;;  %v11655_v39 = vld [vmem:[%s12469_s6 + $0x2e8] ss:$16 sps:$4 sm:$0xff]  }
0x1805   : > { %v10383_v55 = vadd.f32 %v7285_v56, %v6547_v42  ;;  %v10387_v43 = vadd.f32 %v7371_v15, %v6555_v18  ;;  %v7287_v61 = vpop.f32.mrb[83].mxu0  ;;  %v7373_v4 = vpop.f32.mrb[83].mxu1  ;;  %v7376_v38 = vmax.f32 %v10381_v54, 0.0  ;;  %v7378_v13 = vmax.f32 %v10385_v49, 0.0  ;;  %v11640_v42 = vld [vmem:[%s12469_s6 + $0x2a0] ss:$16 sps:$4 sm:$0xff]  }
0x1806   : > { %v10384_v46 = vadd.f32 %v7287_v61, %v6551_v33  ;;  %v10388_v62 = vadd.f32 %v7373_v4, %v6559_v63  ;;  %v7377_v35 = vmax.f32 %v10382_v37, 0.0  ;;  %v7379_v52 = vmax.f32 %v10386_v40, 0.0  ;;  %v11643_v18 = vld [vmem:[%s12469_s6 + $0x2a8] ss:$16 sps:$4 sm:$0xff]   ;;  %v11648_v33 = vld [vmem:[%s12469_s6 + $0x2c4] ss:$16 sps:$4 sm:$0xff]  }
0x1807   : > { %v7380_v31 = vmax.f32 %v10383_v55, 0.0  ;;  %v7382_v60 = vmax.f32 %v10387_v43, 0.0  ;;  %v11651_v63 = vld [vmem:[%s12469_s6 + $0x2cc] ss:$16 sps:$4 sm:$0xff]   ;;  %v11654_v54 = vld [vmem:[%s12469_s6 + $0x2e4] ss:$16 sps:$4 sm:$0xff]  }
0x1808   : > { %v7381_v1 = vmax.f32 %v10384_v46, 0.0  ;;  %v7383_v59 = vmax.f32 %v10388_v62, 0.0  ;;  %v11657_v49 = vld [vmem:[%s12469_s6 + $0x2ec] ss:$16 sps:$4 sm:$0xff]   ;;  %v11660_v37 = vld [vmem:[%s12469_s6 + $0x304] ss:$16 sps:$4 sm:$0xff]  }
0x1809   : > { %v7384_v28 = vpack.c.bf16 %v7380_v31, %v7376_v38  ;;  %v13764_v0 = vpack.c.bf16 %v7382_v60, %v7378_v13  ;;  %v11663_v40 = vld [vmem:[%s12469_s6 + $0x30c] ss:$16 sps:$4 sm:$0xff]   ;;  %v11658_v56 = vld [vmem:[%s12469_s6 + $0x300] ss:$16 sps:$4 sm:$0xff]   ;;  %v11661_v15 = vld [vmem:[%s12469_s6 + $0x308] ss:$16 sps:$4 sm:$0xff]  }
0x180a   : > { %v7385_v45 = vpack.c.bf16 %v7381_v1, %v7377_v35  ;;  %v7387_v47 = vpack.c.bf16 %v7383_v59, %v7379_v52  ;;  %v11666_v55 = vld [vmem:[%s12469_s6 + $0x324] ss:$16 sps:$4 sm:$0xff]   ;;  %v11669_v43 = vld [vmem:[%s12469_s6 + $0x32c] ss:$16 sps:$4 sm:$0xff]   ;;  %v11664_v61 = vld [vmem:[%s12469_s6 + $0x320] ss:$16 sps:$4 sm:$0xff]  }
0x180b   : > { %v11667_v4 = vld [vmem:[%s12469_s6 + $0x328] ss:$16 sps:$4 sm:$0xff]   ;;  %v11672_v46 = vld [vmem:[%s12469_s6 + $0x344] ss:$16 sps:$4 sm:$0xff]   ;;  %v11675_v62 = vld [vmem:[%s12469_s6 + $0x34c] ss:$16 sps:$4 sm:$0xff]  }
0x180c   : > { %8211 = vmatprep.mubr.bf16.mxu0 %v7385_v45  ;;  %8297 = vmatprep.mubr.bf16.mxu1 %v7385_v45  ;;  %v11670_v38 = vld [vmem:[%s12469_s6 + $0x340] ss:$16 sps:$4 sm:$0xff]   ;;  %v11673_v13 = vld [vmem:[%s12469_s6 + $0x348] ss:$16 sps:$4 sm:$0xff]   ;;  %v11678_v31 = vld [vmem:[%s12469_s6 + $0x364] ss:$16 sps:$4 sm:$0xff]  }
0x180d   : > { %8212 = vmatmul.mubr.bf16.vlgmr.msra.gmra.mrb[84].mxu0 %v7384_v28  ;;  %8298 = vmatmul.mubr.bf16.vlgmr.msra.gmra.mrb[84].mxu1 %v7384_v28  ;;  %v11681_v60 = vld [vmem:[%s12469_s6 + $0x36c] ss:$16 sps:$4 sm:$0xff]   ;;  %v11676_v35 = vld [vmem:[%s12469_s6 + $0x360] ss:$16 sps:$4 sm:$0xff]   ;;  %v11679_v52 = vld [vmem:[%s12469_s6 + $0x368] ss:$16 sps:$4 sm:$0xff]  }
0x180e   : > { %8223 = vmatpush1.bf16.msra.mxu0 %v11610_v21  ;;  %8309 = vmatpush1.bf16.msra.mxu1 %v11613_v10  ;;  %v11684_v1 = vld [vmem:[%s12469_s6 + $0x384] ss:$16 sps:$4 sm:$0xff]   ;;  %v11687_v59 = vld [vmem:[%s12469_s6 + $0x38c] ss:$16 sps:$4 sm:$0xff]   ;;  %v11682_v28 = vld [vmem:[%s12469_s6 + $0x380] ss:$16 sps:$4 sm:$0xff]  }
0x180f   : > { %8254 = vmatprep.mubr.bf16.mxu0 %v7387_v47  ;;  %8340 = vmatprep.mubr.bf16.mxu1 %v7387_v47  ;;  %v11685_v45 = vld [vmem:[%s12469_s6 + $0x388] ss:$16 sps:$4 sm:$0xff]   ;;  %v11690_v47 = vld [vmem:[%s12469_s6 + $0x3a4] ss:$16 sps:$4 sm:$0xff]   ;;  %v11693_v21 = vld [vmem:[%s12469_s6 + $0x3ac] ss:$16 sps:$4 sm:$0xff]  }
0x1810   : > { %8224 = vmatprep.subr.bf16.mxu0 %v11618_v50  ;;  %8310 = vmatprep.subr.bf16.mxu1 %v11621_v11  ;;  %v11688_v10 = vld [vmem:[%s12469_s6 + $0x3a0] ss:$16 sps:$4 sm:$0xff]   ;;  %v11691_v50 = vld [vmem:[%s12469_s6 + $0x3a8] ss:$16 sps:$4 sm:$0xff]   ;;  %v11696_v11 = vld [vmem:[%s12469_s6 + $0x3c4] ss:$16 sps:$4 sm:$0xff]  }
0x1812   : > { %8225 = vmatpush1.bf16.msra.mxu0 %v11616_v9  ;;  %8311 = vmatpush1.bf16.msra.mxu1 %v11619_v12  ;;  %v11699_v9 = vld [vmem:[%s12469_s6 + $0x3cc] ss:$16 sps:$4 sm:$0xff]   ;;  %v11694_v12 = vld [vmem:[%s12469_s6 + $0x3c0] ss:$16 sps:$4 sm:$0xff]  }
0x1813   : > { %8226 = vmatprep.subr.bf16.mxu0 %v11624_v14  ;;  %8312 = vmatprep.subr.bf16.mxu1 %v11627_v23  ;;  %v11697_v14 = vld [vmem:[%s12469_s6 + $0x3c8] ss:$16 sps:$4 sm:$0xff]   ;;  %v11702_v23 = vld [vmem:[%s12469_s6 + $0x3e4] ss:$16 sps:$4 sm:$0xff]  }
0x1816   : > { %8227 = vmatpush1.bf16.msra.mxu0 %v11622_v17  ;;  %8313 = vmatpush1.bf16.msra.mxu1 %v11625_v19  ;;  %v11705_v17 = vld [vmem:[%s12469_s6 + $0x3ec] ss:$16 sps:$4 sm:$0xff]   ;;  %v11700_v19 = vld [vmem:[%s12469_s6 + $0x3e0] ss:$16 sps:$4 sm:$0xff]  }
0x1817   : > { %8228 = vmatprep.subr.bf16.mxu0 %v11630_v20  ;;  %8314 = vmatprep.subr.bf16.mxu1 %v11633_v22  ;;  %v11703_v20 = vld [vmem:[%s12469_s6 + $0x3e8] ss:$16 sps:$4 sm:$0xff]   ;;  %v9900_v22 = vld [vmem:[%s12480_s4 + $0x5] ss:$8 sm:$0xf] }
0x181a   : > { %8229 = vmatpush1.bf16.msra.mxu0 %v11628_v24  ;;  %8315 = vmatpush1.bf16.msra.mxu1 %v11631_v25  ;;  %v7522_v24 = vrot.slane %v9900_v22, %v12943_v2  ;;  %v7530_v25 = vrot.slane %v9900_v22, %v12870_v3 }
0x181b   : > { %8230 = vmatprep.subr.bf16.mxu0 %v11636_v6  ;;  %8316 = vmatprep.subr.bf16.mxu1 %v11639_v27  ;;  %v7526_v6 = vrot.slane %v9900_v22, %v12857_v58 }
0x181e   : > { %8231 = vmatpush1.bf16.msra.mxu0 %v11634_v57  ;;  %8317 = vmatpush1.bf16.msra.mxu1 %v11637_v32  ;;  %v7534_v32 = vrot.slane %v9900_v22, %v12879_v8 }
0x181f   : > { %8232 = vmatprep.subr.bf16.mxu0 %v11642_v36  ;;  %8318 = vmatprep.subr.bf16.mxu1 %v11645_v7 }
0x1822   : > { %8233 = vmatpush1.bf16.msra.mxu0 %v11640_v42  ;;  %8319 = vmatpush1.bf16.msra.mxu1 %v11643_v18 }
0x1823   : > { %8234 = vmatprep.subr.bf16.mxu0 %v11648_v33  ;;  %8320 = vmatprep.subr.bf16.mxu1 %v11651_v63 }
0x1826   : > { %8235 = vmatpush1.bf16.msra.mxu0 %v11646_v41  ;;  %8321 = vmatpush1.bf16.msra.mxu1 %v11649_v29 }
0x1827   : > { %8236 = vmatprep.subr.bf16.mxu0 %v11654_v54  ;;  %8322 = vmatprep.subr.bf16.mxu1 %v11657_v49 }
0x182a   : > { %8237 = vmatpush1.bf16.msra.mxu0 %v11652_v51  ;;  %8323 = vmatpush1.bf16.msra.mxu1 %v11655_v39 }
0x182b   : > { %8238 = vmatprep.subr.bf16.mxu0 %v11660_v37  ;;  %8324 = vmatprep.subr.bf16.mxu1 %v11663_v40 }
0x182e   : > { %8239 = vmatpush1.bf16.msra.mxu0 %v11658_v56  ;;  %8325 = vmatpush1.bf16.msra.mxu1 %v11661_v15 }
0x182f   : > { %8240 = vmatprep.subr.bf16.mxu0 %v11666_v55  ;;  %8326 = vmatprep.subr.bf16.mxu1 %v11669_v43 }
0x1832   : > { %8241 = vmatpush1.bf16.msra.mxu0 %v11664_v61  ;;  %8327 = vmatpush1.bf16.msra.mxu1 %v11667_v4 }
0x1833   : > { %8242 = vmatprep.subr.bf16.mxu0 %v11672_v46  ;;  %8328 = vmatprep.subr.bf16.mxu1 %v11675_v62 }
0x1836   : > { %8243 = vmatpush1.bf16.msra.mxu0 %v11670_v38  ;;  %8329 = vmatpush1.bf16.msra.mxu1 %v11673_v13 }
0x1837   : > { %8244 = vmatprep.subr.bf16.mxu0 %v11678_v31  ;;  %8330 = vmatprep.subr.bf16.mxu1 %v11681_v60 }
0x183a   : > { %8245 = vmatpush1.bf16.msra.mxu0 %v11676_v35  ;;  %8331 = vmatpush1.bf16.msra.mxu1 %v11679_v52 }
0x183b   : > { %8246 = vmatprep.subr.bf16.mxu0 %v11684_v1  ;;  %8332 = vmatprep.subr.bf16.mxu1 %v11687_v59 }
0x183e   : > { %8247 = vmatpush1.bf16.msra.mxu0 %v11682_v28  ;;  %8333 = vmatpush1.bf16.msra.mxu1 %v11685_v45 }
0x183f   : > { %8248 = vmatprep.subr.bf16.mxu0 %v11690_v47  ;;  %8334 = vmatprep.subr.bf16.mxu1 %v11693_v21 }
0x1842   : > { %8249 = vmatpush1.bf16.msra.mxu0 %v11688_v10  ;;  %8335 = vmatpush1.bf16.msra.mxu1 %v11691_v50 }
0x1843   : > { %8250 = vmatprep.subr.bf16.mxu0 %v11696_v11  ;;  %8336 = vmatprep.subr.bf16.mxu1 %v11699_v9 }
0x1846   : > { %8251 = vmatpush1.bf16.msra.mxu0 %v11694_v12  ;;  %8337 = vmatpush1.bf16.msra.mxu1 %v11697_v14 }
0x1847   : > { %8252 = vmatprep.subr.bf16.mxu0 %v11702_v23  ;;  %8338 = vmatprep.subr.bf16.mxu1 %v11705_v17 }
0x184a   : > { %8253 = vmatpush1.bf16.msra.mxu0 %v11700_v19  ;;  %8339 = vmatpush1.bf16.msra.mxu1 %v11703_v20 }
0x184d   : > { %8255 = vmatmul.mubr.bf16.vlgmr.msra.gmra.mrb[84].mxu0 %v13764_v0  ;;  %8341 = vmatmul.mubr.bf16.vlgmr.msra.gmra.mrb[84].mxu1 %v13764_v0 }
0x1920   : > { %v8256_v27 = vpop.f32.mrb[84].mxu0  ;;  %v8342_v57 = vpop.f32.mrb[84].mxu1 }
0x1921   : > { %v10389_v36 = vadd.f32 %v8256_v27, %v7522_v24  ;;  %v8258_v7 = vpop.f32.mrb[85].mxu0  ;;  %v8344_v42 = vpop.f32.mrb[85].mxu1  ;;  %v10393_v18 = vadd.f32 %v8342_v57, %v7530_v25 }
0x1922   : > { %v10390_v33 = vadd.f32 %v8258_v7, %v7526_v6  ;;  %v8260_v63 = vpop.f32.mrb[86].mxu0  ;;  %v8346_v41 = vpop.f32.mrb[86].mxu1  ;;  %v10394_v39 = vadd.f32 %v8344_v42, %v7534_v32  ;;  %v10030_v7 = vld [vmem:[%s12480_s4 + $0x21] ss:$8 sm:$0xf] }
0x1923   : > { %v8351_v0 = vadd.f32 %v10389_v36, %v13613_v53  ;;  %v10391_v29 = vadd.f32 %v8260_v63, %v7522_v24  ;;  %v8262_v54 = vpop.f32.mrb[87].mxu0  ;;  %v8348_v49 = vpop.f32.mrb[87].mxu1  ;;  %v10395_v37 = vadd.f32 %v8346_v41, %v7530_v25  ;;  %v8353_v15 = vadd.f32 %v10393_v18, %v13606_v30  ;;  %v10029_v36 = vld [vmem:[%s12480_s4 + $0x20] ss:$8 sm:$0xf] }
0x1924   : > { %v8352_v51 = vadd.f32 %v10390_v33, %v13609_v16  ;;  %v10392_v40 = vadd.f32 %v8262_v54, %v7526_v6  ;;  %v10396_v61 = vadd.f32 %v8348_v49, %v7534_v32  ;;  %v8354_v4 = vadd.f32 %v10394_v39, %v13627_v5 }
0x1925   : > { %v8355_v56 = vadd.f32 %v10391_v29, %v13615_v26  ;;  %v8357_v53 = vadd.f32 %v10395_v37, %v13619_v34  ;;  %v8419_v42 = vrot.slane %v10029_v36, %v12943_v2  ;;  %v8423_v18 = vrot.slane %v10029_v36, %v12857_v58 }
0x1926   : > { %v8363_v55 = vadd.f32 %v8352_v51, %v8351_v0  ;;  %v8356_v43 = vadd.f32 %v10392_v40, %v13611_v44  ;;  %v8358_v38 = vadd.f32 %v10396_v61, %v13617_v48  ;;  %v8427_v33 = vrot.slane %v10029_v36, %v12870_v3 }
0x1927   : > { %v8431_v63 = vrot.slane %v10029_v36, %v12879_v8  ;;  %v8452_v29 = vrot.slane %v10030_v7, %v12857_v58  ;;  %v8456_v54 = vrot.slane %v10030_v7, %v12870_v3  ;;  %v8460_v49 = vrot.slane %v10030_v7, %v12879_v8  ;;  %v11808_v36 = vld [vmem:[%s14095_s26 + $0xe8] sm:$0xff] (!%p10031_p0)  }
0x1928   : > { %v8368_v46 = vadd.f32 %v8356_v43, %v8355_v56  ;;  %v8364_v62 = vadd.f32 %v8363_v55, %v8353_v15 }
0x192a   : > { %v8365_v16 = vadd.f32 %v8364_v62, %v8354_v4  ;;  %v8369_v13 = vadd.f32 %v8368_v46, %v8357_v53 }
0x192c   : > { %8366 = vadd.xlane.f32.xlu0 %v8365_v16  ;;  %v8370_v31 = vadd.f32 %v8369_v13, %v8358_v38 }
0x192e   : > { %8371 = vadd.xlane.f32.xlu1 %v8370_v31 }
0x19b9   : > { %v8367_v26 = vpop.xlane.xlu0 %8366 }
0x19ba   : > { %v8373_v60 = vmul.f32 0.001953125, %v8367_v26 }
0x19bb   : > { %v8372_v30 = vpop.xlane.xlu1 %8371 }
0x19bc   : > { %v8375_v35 = vsub.f32 %v8351_v0, %v8373_v60  ;;  %v8376_v52 = vsub.f32 %v8352_v51, %v8373_v60  ;;  %v8374_v44 = vmul.f32 0.001953125, %v8372_v30  ;;  %v8377_v1 = vsub.f32 %v8353_v15, %v8373_v60 }
0x19bd   : > { %v8378_v59 = vsub.f32 %v8354_v4, %v8373_v60  ;;  %v8448_v0 = vrot.slane %v10030_v7, %v12943_v2  ;;  %v11809_v7 = vld [vmem:[%s14095_s26 + $0x28] sm:$0xff] (!%p10031_p0)  }
0x19be   : > { %v8379_v5 = vsub.f32 %v8355_v56, %v8374_v44  ;;  %v8380_v28 = vsub.f32 %v8356_v43, %v8374_v44  ;;  %v8383_v34 = vmul.f32 %v8375_v35, %v8375_v35  ;;  %v8384_v45 = vmul.f32 %v8376_v52, %v8376_v52 }
0x19bf   : > { %v8385_v47 = vmul.f32 %v8377_v1, %v8377_v1  ;;  %v8381_v21 = vsub.f32 %v8357_v53, %v8374_v44  ;;  %v8382_v10 = vsub.f32 %v8358_v38, %v8374_v44  ;;  %v8386_v9 = vmul.f32 %v8378_v59, %v8378_v59 }
0x19c0   : > { %v8391_v48 = vadd.f32 %v8384_v45, %v8383_v34  ;;  %v8387_v50 = vmul.f32 %v8379_v5, %v8379_v5  ;;  %v8388_v11 = vmul.f32 %v8380_v28, %v8380_v28  ;;  %v8547_v34 = vld [vmem:[%s14094_s18 + $0x8] sm:$0xff] (!%p10031_p0)  ;;  %v11787_v45 = vld [vmem:[%s14095_s26 + $0x40] sm:$0xff] (!%p10031_p0)  }
0x19c1   : > { %v8389_v14 = vmul.f32 %v8381_v21, %v8381_v21  ;;  %v8390_v19 = vmul.f32 %v8382_v10, %v8382_v10  ;;  %10137 = vmatprep.subr.bf16.mxu0 (!%p10031_p0), %v11787_v45 }
0x19c2   : > { %v8392_v12 = vadd.f32 %v8391_v48, %v8385_v47  ;;  %v8396_v23 = vadd.f32 %v8388_v11, %v8387_v50  ;;  %v11788_v47 = vld [vmem:[%s14095_s26 + $0xc0] sm:$0xff] (!%p10031_p0)   ;;  %v11792_v50 = vld [vmem:[%s14095_s26 + $0xc8] sm:$0xff] (!%p10031_p0)  }
0x19c3   : > { %10159 = vmatprep.subr.bf16.mxu1 (!%p10031_p0), %v11788_v47  ;;  %v11790_v48 = vld [vmem:[%s14095_s26 + $0x80] sm:$0xff] (!%p10031_p0)   ;;  %v11793_v11 = vld [vmem:[%s14095_s26 + $0x8] sm:$0xff] (!%p10031_p0)  }
0x19c4   : > { %v8393_v17 = vadd.f32 %v8392_v12, %v8386_v9  ;;  %v8397_v20 = vadd.f32 %v8396_v23, %v8389_v14  ;;  %10160 = vmatpush3.bf16.msra.mxu1 (!%p10031_p0), %v11790_v48  ;;  %v11794_v9 = vld [vmem:[%s14095_s26 + $0x88] sm:$0xff] (!%p10031_p0)   ;;  %v11795_v12 = vld [vmem:[%s14095_s26 + $0x50] sm:$0xff] (!%p10031_p0)  }
0x19c5   : > { %10161 = vmatprep.subr.bf16.mxu1 (!%p10031_p0), %v11792_v50  ;;  %v11796_v14 = vld [vmem:[%s14095_s26 + $0xd0] sm:$0xff] (!%p10031_p0)  }
0x19c6   : > { %8394 = vadd.xlane.f32.xlu0 %v8393_v17  ;;  %v8398_v22 = vadd.f32 %v8397_v20, %v8390_v19  ;;  %v11797_v23 = vld [vmem:[%s14095_s26 + $0x10] sm:$0xff] (!%p10031_p0)   ;;  %v11799_v19 = vld [vmem:[%s14095_s26 + $0x58] sm:$0xff] (!%p10031_p0)  }
0x19c7   : > { %v11798_v17 = vld [vmem:[%s14095_s26 + $0x90] sm:$0xff] (!%p10031_p0)   ;;  %v11800_v20 = vld [vmem:[%s14095_s26 + $0xd8] sm:$0xff] (!%p10031_p0)  }
0x19c8   : > { %8399 = vadd.xlane.f32.xlu1 %v8398_v22  ;;  %10162 = vmatpush3.bf16.msra.mxu1 (!%p10031_p0), %v11794_v9  ;;  %v11801_v22 = vld [vmem:[%s14095_s26 + $0x18] sm:$0xff] (!%p10031_p0)  }
0x19c9   : > { %10163 = vmatprep.subr.bf16.mxu1 (!%p10031_p0), %v11796_v14 }
0x19cc   : > { %10164 = vmatpush3.bf16.msra.mxu1 (!%p10031_p0), %v11798_v17 }
0x19cd   : > { %10165 = vmatprep.subr.bf16.mxu1 (!%p10031_p0), %v11800_v20 }
0x1a53   : > { %v8395_v24 = vpop.xlane.xlu0 %8394 }
0x1a54   : > { %v8401_v25 = vmul.f32 0.001953125, %v8395_v24  ;;  %v11802_v24 = vld [vmem:[%s14095_s26 + $0x98] sm:$0xff] (!%p10031_p0)  }
0x1a55   : > { %v8400_v6 = vpop.xlane.xlu1 %8399  ;;  %10166 = vmatpush3.bf16.msra.mxu1 (!%p10031_p0), %v11802_v24 }
0x1a56   : > { %v8403_v27 = vadd.f32 1e-05, %v8401_v25  ;;  %v8402_v57 = vmul.f32 0.001953125, %v8400_v6  ;;  %v11803_v25 = vld [vmem:[%s14095_s26 + $0x60] sm:$0xff] (!%p10031_p0)  }
0x1a57   : > { %v11804_v6 = vld [vmem:[%s14095_s26 + $0xe0] sm:$0xff] (!%p10031_p0)  }
0x1a58   : > { %11774 = vrsqrt.f32 %v8403_v27  ;;  %v8404_v32 = vadd.f32 1e-05, %v8402_v57  ;;  %v11805_v27 = vld [vmem:[%s14095_s26 + $0x20] sm:$0xff] (!%p10031_p0)   ;;  %10167 = vmatprep.subr.bf16.mxu1 (!%p10031_p0), %v11804_v6 }
0x1a59   : > { %v11806_v57 = vld [vmem:[%s14095_s26 + $0xa0] sm:$0xff] (!%p10031_p0)  }
0x1a5a   : > { %11776 = vrsqrt.f32 %v8404_v32  ;;  %v11807_v32 = vld [vmem:[%s14095_s26 + $0x68] sm:$0xff] (!%p10031_p0)   ;;  %10168 = vmatpush3.bf16.msra.mxu1 (!%p10031_p0), %v11806_v57 }
0x1a5b   : > { %10169 = vmatprep.subr.bf16.mxu1 (!%p10031_p0), %v11808_v36 }
0x1a62   : > { %v11775_v41 = vpop.eup %11774 }
0x1a63   : > { %v8407_v51 = vmul.f32 %v11775_v41, %v8375_v35  ;;  %v8408_v39 = vmul.f32 %v11775_v41, %v8376_v52  ;;  %v8409_v37 = vmul.f32 %v11775_v41, %v8377_v1  ;;  %v8410_v40 = vmul.f32 %v11775_v41, %v8378_v59  ;;  %v11814_v41 = vld [vmem:[%s14095_s26 + $0xb0] sm:$0xff] (!%p10031_p0)  }
0x1a64   : > { %v11777_v56 = vpop.eup %11776 }
0x1a65   : > { %v8436_v15 = vmul.f32 %v8419_v42, %v8407_v51  ;;  %v8437_v55 = vmul.f32 %v8423_v18, %v8408_v39  ;;  %v8438_v43 = vmul.f32 %v8427_v33, %v8409_v37  ;;  %v8439_v61 = vmul.f32 %v8431_v63, %v8410_v40  ;;  %v8485_v51 = vld [vmem:[#allocation13] ss:$4 sm:$0xf] (!%p10031_p0) }
0x1a66   : > { %v8411_v4 = vmul.f32 %v11777_v56, %v8379_v5  ;;  %v8412_v53 = vmul.f32 %v11777_v56, %v8380_v28  ;;  %v8413_v46 = vmul.f32 %v11777_v56, %v8381_v21  ;;  %v8414_v62 = vmul.f32 %v11777_v56, %v8382_v10  ;;  %v8546_v5 = vld [vmem:[%s14094_s18] sm:$0xff] (!%p10031_p0)  ;;  %v11791_v10 = vld [vmem:[%s14095_s26 + $0x48] sm:$0xff] (!%p10031_p0)  }
0x1a67   : > { %v13853_v38 = vadd.f32 %v8448_v0, %v8436_v15  ;;  %v13855_v16 = vadd.f32 %v8452_v29, %v8437_v55  ;;  %v13857_v13 = vadd.f32 %v8456_v54, %v8438_v43  ;;  %v13859_v31 = vadd.f32 %v8460_v49, %v8439_v61  ;;  %8484 = sbr.rel (%p10031_p0) target bundleno = 7454 (0x1d1e), region = 88  ;;  %v11789_v21 = vld [vmem:[%s14095_s26] sm:$0xff] (!%p10031_p0)  }
0x1a68   : > { %v8440_v26 = vmul.f32 %v8419_v42, %v8411_v4  ;;  %v8441_v60 = vmul.f32 %v8423_v18, %v8412_v53  ;;  %v8442_v30 = vmul.f32 %v8427_v33, %v8413_v46  ;;  %v8443_v35 = vmul.f32 %v8431_v63, %v8414_v62  ;;  %10138 = vmatpush3.bf16.msra.mxu0 (!%p10031_p0), %v11789_v21  ;;  %v11810_v42 = vld [vmem:[%s14095_s26 + $0xa8] sm:$0xff] (!%p10031_p0)   ;;  %v11811_v18 = vld [vmem:[%s14095_s26 + $0x70] sm:$0xff] (!%p10031_p0)  }
0x1a69   : > { %8473 = vst [vmem:[#allocation2] sm:$0xff] %v13853_v38  ;;  %8474 = vst [vmem:[#allocation2 + $0x8] sm:$0xff] %v13855_v16  ;;  %v12106_v28 = vmov (!%p10031_p0), 0   ;;  %10139 = vmatprep.subr.bf16.mxu0 (!%p10031_p0), %v11791_v10  ;;  %10170 = vmatpush3.bf16.msra.mxu1 (!%p10031_p0), %v11810_v42  ;;  %v11812_v33 = vld [vmem:[%s14095_s26 + $0xf0] sm:$0xff] (!%p10031_p0)   ;;  %v8490_v39 = vrot.slane (!%p10031_p0), %v8485_v51, %v12943_v2  ;;  %v8494_v37 = vrot.slane (!%p10031_p0), %v8485_v51, %v12857_v58 }
0x1a6a   : > { %8475 = vst [vmem:[#allocation2 + $0x10] sm:$0xff] %v13857_v13  ;;  %8476 = vst [vmem:[#allocation2 + $0x18] sm:$0xff] %v13859_v31  ;;  %v13865_v52 = vadd.f32 %v8448_v0, %v8440_v26  ;;  %v13867_v44 = vadd.f32 %v8452_v29, %v8441_v60  ;;  %v13869_v1 = vadd.f32 %v8456_v54, %v8442_v30  ;;  %11786 = vset.pattern.permute.xlu0 (!%p10031_p0), %v12106_v28  ;;  %v11813_v63 = vld [vmem:[%s14095_s26 + $0x30] sm:$0xff] (!%p10031_p0)   ;;  %v11815_v0 = vld [vmem:[%s14095_s26 + $0x78] sm:$0xff] (!%p10031_p0)  }
0x1a6b   : > { %v13871_v59 = vadd.f32 %v8460_v49, %v8443_v35  ;;  %8550 = vperm.xlu0 (!%p10031_p0), %11786, %v8546_v5   ;;  %10171 = vmatprep.subr.bf16.mxu1 (!%p10031_p0), %v11812_v33  ;;  %v11816_v29 = vld [vmem:[%s14095_s26 + $0xf8] sm:$0xff] (!%p10031_p0)   ;;  %v8498_v40 = vrot.slane (!%p10031_p0), %v8485_v51, %v12870_v3  ;;  %v8502_v56 = vrot.slane (!%p10031_p0), %v8485_v51, %v12879_v8  ;;  %v8516_v15 = vld [vmem:[#allocation13 + $0x1] ss:$4 sm:$0xf] (!%p10031_p0) }
0x1a6c   : > { %8477 = vst [vmem:[#allocation2 + $0x20] sm:$0xff] %v13865_v52  ;;  %8478 = vst [vmem:[#allocation2 + $0x28] sm:$0xff] %v13867_v44  ;;  %10140 = vmatpush3.bf16.msra.mxu0 (!%p10031_p0), %v11793_v11  ;;  %v11817_v54 = vld [vmem:[%s14095_s26 + $0x38] sm:$0xff] (!%p10031_p0)   ;;  %v8507_v55 = vmul.f32 (!%p10031_p0), %v8490_v39, %v13853_v38  ;;  %v8521_v43 = vrot.slane (!%p10031_p0), %v8516_v15, %v12943_v2  ;;  %v8525_v61 = vrot.slane (!%p10031_p0), %v8516_v15, %v12857_v58 }
0x1a6d   : > { %8479 = vst [vmem:[#allocation2 + $0x30] sm:$0xff] %v13869_v1  ;;  %8480 = vst [vmem:[#allocation2 + $0x38] sm:$0xff] %v13871_v59  ;;  %10141 = vmatprep.subr.bf16.mxu0 (!%p10031_p0), %v11795_v12  ;;  %10172 = vmatpush3.bf16.msra.mxu1 (!%p10031_p0), %v11814_v41  ;;  %v11818_v49 = vld [vmem:[%s14095_s26 + $0xb8] sm:$0xff] (!%p10031_p0)   ;;  %v8529_v4 = vrot.slane (!%p10031_p0), %v8516_v15, %v12870_v3  ;;  %v8508_v53 = vmul.f32 (!%p10031_p0), %v8494_v37, %v13855_v16 }
0x1a6e   : > { %10173 = vmatprep.subr.bf16.mxu1 %v11816_v29  ;;  %v8509_v46 = vmul.f32 %v8498_v40, %v13857_v13  ;;  %v8510_v62 = vmul.f32 %v8502_v56, %v13859_v31  ;;  %v8533_v26 = vrot.slane %v8516_v15, %v12879_v8  ;;  %v8538_v60 = vadd.f32 %v8521_v43, %v8507_v55 }
0x1a6f   : > { %8555 = vperm.xlu0 %11786, %v8547_v34   ;;  %v8539_v30 = vadd.f32 %v8525_v61, %v8508_v53  ;;  %v8511_v38 = vmul.f32 %v8490_v39, %v13865_v52  ;;  %v8512_v2 = vmul.f32 %v8494_v37, %v13867_v44  ;;  %v8513_v58 = vmul.f32 %v8498_v40, %v13869_v1 }
0x1a70   : > { %10142 = vmatpush3.bf16.msra.mxu0 %v11797_v23  ;;  %v8540_v35 = vadd.f32 %v8529_v4, %v8509_v46  ;;  %v8541_v5 = vadd.f32 %v8533_v26, %v8510_v62  ;;  %v8514_v3 = vmul.f32 %v8502_v56, %v13871_v59 }
0x1a71   : > { %10143 = vmatprep.subr.bf16.mxu0 %v11799_v19  ;;  %10174 = vmatpush3.bf16.msra.mxu1 %v11818_v49  ;;  %v8542_v31 = vadd.f32 %v8521_v43, %v8511_v38  ;;  %v8543_v47 = vadd.f32 %v8525_v61, %v8512_v2  ;;  %v8544_v8 = vadd.f32 %v8529_v4, %v8513_v58 }
0x1a72   : > { %v8545_v21 = vadd.f32 %v8533_v26, %v8514_v3 }
0x1a74   : > { %10144 = vmatpush3.bf16.msra.mxu0 %v11801_v22 }
0x1a75   : > { %10145 = vmatprep.subr.bf16.mxu0 %v11803_v25 }
0x1a78   : > { %10146 = vmatpush3.bf16.msra.mxu0 %v11805_v27 }
0x1a79   : > { %10147 = vmatprep.subr.bf16.mxu0 %v11807_v32 }
0x1a7c   : > { %10148 = vmatpush3.bf16.msra.mxu0 %v11809_v7 }
0x1a7d   : > { %10149 = vmatprep.subr.bf16.mxu0 %v11811_v18 }
0x1a80   : > { %10150 = vmatpush3.bf16.msra.mxu0 %v11813_v63 }
0x1a81   : > { %10151 = vmatprep.subr.bf16.mxu0 %v11815_v0 }
0x1a84   : > { %10152 = vmatpush3.bf16.msra.mxu0 %v11817_v54 }
0x1aea   : > { %v8551_v28 = vpop.permute.xlu0 %8550 }
0x1aeb   : > { %v8558_v16 = vmul.f32 %v8551_v28, %v8538_v60  ;;  %v8559_v34 = vmul.f32 %v8551_v28, %v8539_v30  ;;  %v8560_v13 = vmul.f32 %v8551_v28, %v8540_v35  ;;  %v8561_v45 = vmul.f32 %v8551_v28, %v8541_v5 }
0x1aed   : > { %v8566_v48 = vrot.slane %v8558_v16, 4  ;;  %v8572_v10 = vrot.slane %v8559_v34, 4  ;;  %v8578_v50 = vrot.slane %v8560_v13, 4  ;;  %v8584_v11 = vrot.slane %v8561_v45, 4 }
0x1aee   : > { %v8556_v52 = vpop.permute.xlu0 %8555 }
0x1aef   : > { %v8567_v9 = vadd.f32 %v8566_v48, %v8558_v16  ;;  %v8573_v44 = vadd.f32 %v8572_v10, %v8559_v34  ;;  %v8579_v12 = vadd.f32 %v8578_v50, %v8560_v13  ;;  %v8585_v1 = vadd.f32 %v8584_v11, %v8561_v45 }
0x1af0   : > { %v8562_v14 = vmul.f32 %v8556_v52, %v8542_v31  ;;  %v8563_v59 = vmul.f32 %v8556_v52, %v8543_v47  ;;  %v8564_v23 = vmul.f32 %v8556_v52, %v8544_v8  ;;  %v8565_v17 = vmul.f32 %v8556_v52, %v8545_v21 }
0x1af1   : > { %v8568_v19 = vrot.slane %v8567_v9, 2  ;;  %v8574_v20 = vrot.slane %v8573_v44, 2  ;;  %v8580_v22 = vrot.slane %v8579_v12, 2  ;;  %v8586_v24 = vrot.slane %v8585_v1, 2 }
0x1af2   : > { %v8590_v25 = vrot.slane %v8562_v14, 4  ;;  %v8596_v6 = vrot.slane %v8563_v59, 4  ;;  %v8602_v27 = vrot.slane %v8564_v23, 4  ;;  %v8608_v57 = vrot.slane %v8565_v17, 4 }
0x1af3   : > { %v8569_v32 = vadd.f32 %v8568_v19, %v8567_v9  ;;  %v8581_v36 = vadd.f32 %v8580_v22, %v8579_v12  ;;  %v8575_v7 = vadd.f32 %v8574_v20, %v8573_v44  ;;  %v8587_v42 = vadd.f32 %v8586_v24, %v8585_v1 }
0x1af4   : > { %v8591_v18 = vadd.f32 %v8590_v25, %v8562_v14  ;;  %v8597_v33 = vadd.f32 %v8596_v6, %v8563_v59  ;;  %v8603_v63 = vadd.f32 %v8602_v27, %v8564_v23  ;;  %v8609_v41 = vadd.f32 %v8608_v57, %v8565_v17 }
0x1af5   : > { %v8570_v0 = vrot.slane %v8569_v32, 1  ;;  %v8582_v29 = vrot.slane %v8581_v36, 1  ;;  %v8576_v54 = vrot.slane %v8575_v7, 1  ;;  %v8588_v49 = vrot.slane %v8587_v42, 1 }
0x1af6   : > { %v8592_v51 = vrot.slane %v8591_v18, 2  ;;  %v8598_v39 = vrot.slane %v8597_v33, 2  ;;  %v8604_v37 = vrot.slane %v8603_v63, 2  ;;  %v8610_v40 = vrot.slane %v8609_v41, 2 }
0x1af7   : > { %v8577_v56 = vadd.f32 %v8576_v54, %v8575_v7  ;;  %v8589_v15 = vadd.f32 %v8588_v49, %v8587_v42  ;;  %v8571_v55 = vadd.f32 %v8570_v0, %v8569_v32  ;;  %v8583_v43 = vadd.f32 %v8582_v29, %v8581_v36  ;;  %v10032_v7 = vld [vmem:[#allocation13 + $0x2] ss:$0 sm:$0xff] }
0x1af8   : > { %v8593_v61 = vadd.f32 %v8592_v51, %v8591_v18  ;;  %v8599_v4 = vadd.f32 %v8598_v39, %v8597_v33  ;;  %v8605_v53 = vadd.f32 %v8604_v37, %v8603_v63  ;;  %v8611_v46 = vadd.f32 %v8610_v40, %v8609_v41 }
0x1af9   : > { %v8615_v62 = vmul.f32 0.125, %v8577_v56  ;;  %v8617_v26 = vmul.f32 0.125, %v8589_v15  ;;  %v8614_v60 = vmul.f32 0.125, %v8571_v55  ;;  %v8616_v30 = vmul.f32 0.125, %v8583_v43 }
0x1afa   : > { %v8594_v35 = vrot.slane %v8593_v61, 1  ;;  %v8606_v5 = vrot.slane %v8605_v53, 1  ;;  %v8600_v38 = vrot.slane %v8599_v4, 1  ;;  %v8612_v2 = vrot.slane %v8611_v46, 1 }
0x1afb   : > { %v8623_v34 = vpack.c.bf16 %v8615_v62, %v8615_v62  ;;  %v8625_v13 = vpack.c.bf16 %v8617_v26, %v8617_v26  ;;  %v8622_v45 = vpack.c.bf16 %v8614_v60, %v8614_v60  ;;  %v8624_v31 = vpack.c.bf16 %v8616_v30, %v8616_v30 }
0x1afc   : > { %v8595_v58 = vadd.f32 %v8594_v35, %v8593_v61  ;;  %v8607_v3 = vadd.f32 %v8606_v5, %v8605_v53  ;;  %v8601_v28 = vadd.f32 %v8600_v38, %v8599_v4  ;;  %v8613_v16 = vadd.f32 %v8612_v2, %v8611_v46 }
0x1afd   : > { %v8708_v9 = vunpack.c.l.b16 %v8623_v34  ;;  %v8710_v44 = vunpack.c.l.b16 %v8625_v13  ;;  %v8707_v12 = vunpack.c.l.b16 %v8622_v45  ;;  %v8709_v1 = vunpack.c.l.b16 %v8624_v31 }
0x1afe   : > { %v8619_v47 = vmul.f32 0.125, %v8601_v28  ;;  %v8621_v8 = vmul.f32 0.125, %v8613_v16  ;;  %v8618_v21 = vmul.f32 0.125, %v8595_v58  ;;  %v8620_v48 = vmul.f32 0.125, %v8607_v3 }
0x1b00   : > { %v8627_v10 = vpack.c.bf16 %v8619_v47, %v8619_v47  ;;  %v8629_v50 = vpack.c.bf16 %v8621_v8, %v8621_v8  ;;  %v8626_v11 = vpack.c.bf16 %v8618_v21, %v8618_v21  ;;  %v8628_v52 = vpack.c.bf16 %v8620_v48, %v8620_v48 }
0x1b02   : > { %v8712_v14 = vunpack.c.l.b16 %v8627_v10  ;;  %v8714_v59 = vunpack.c.l.b16 %v8629_v50  ;;  %v8711_v23 = vunpack.c.l.b16 %v8626_v11  ;;  %v8713_v17 = vunpack.c.l.b16 %v8628_v52 }
0x1b04   : > { %v8717_v19 = vsel %vm8715_vm5, %v8712_v14, %v8708_v9  ;;  %v8719_v20 = vsel %vm8715_vm5, %v8714_v59, %v8710_v44  ;;  %v8716_v22 = vsel %vm8715_vm5, %v8711_v23, %v8707_v12  ;;  %v8718_v24 = vsel %vm8715_vm5, %v8713_v17, %v8709_v1 }
0x1b05   : > { %v8721_v25 = vpack.c.b16 %v8717_v19, %v8717_v19  ;;  %v8723_v6 = vpack.c.b16 %v8719_v20, %v8719_v20  ;;  %v8720_v27 = vpack.c.b16 %v8716_v22, %v8716_v22  ;;  %v8722_v57 = vpack.c.b16 %v8718_v24, %v8718_v24 }
0x1b07   : > { %8952 = vmatprep.mubr.bf16.mxu0 %v8721_v25  ;;  %8992 = vmatprep.mubr.bf16.mxu1 %v8723_v6 }
0x1b08   : > { %8953 = vmatmul.mubr.bf16.vlgmr.msra.gmra.mrb[0].mxu0 %v8720_v27  ;;  %8993 = vmatmul.mubr.bf16.vlgmr.msra.gmra.mrb[0].mxu1 %v8722_v57 }
0x1bdb   : > { %v10153_v32 = vpop.f32.mrb[0].mxu0  ;;  %v10175_v36 = vpop.f32.mrb[0].mxu1 }
0x1bdc   : > { %v10154_v42 = vpop.f32.mrb[1].mxu0  ;;  %v10176_v18 = vpop.f32.mrb[1].mxu1 }
0x1bdd   : > { %v10155_v33 = vadd.f32 %v10154_v42, %v10153_v32  ;;  %v10177_v63 = vadd.f32 %v10176_v18, %v10175_v36  ;;  %v10156_v41 = vpop.f32.mrb[2].mxu0  ;;  %v10178_v0 = vpop.f32.mrb[2].mxu1 }
0x1bde   : > { %v10157_v29 = vpop.f32.mrb[3].mxu0  ;;  %v10179_v54 = vpop.f32.mrb[3].mxu1 }
0x1bdf   : > { %v8955_v49 = vadd.f32 %v10155_v33, %v10032_v7 }
0x1be1   : > { %v8995_v51 = vadd.f32 %v10177_v63, %v8955_v49 }
0x1be3   : > { %v9001_v39 = vsel %vm9000_vm6, %v8995_v51, -inf }
0x1be4   : > { %9002 = vmax.xlane.f32.xlu1 %v9001_v39 }
0x1c71   : > { %v9003_v37 = vpop.xlane.xlu1 %9002 }
0x1c72   : > { %v9004_v40 = vsub.f32 %v8995_v51, %v9003_v37 }
0x1c74   : > { %v9005_v56 = vmul.f32 1.442695, %v9004_v40 }
0x1c76   : > { %11819 = vpow2.f32 %v9005_v56 }
0x1c80   : > { %v11820_v15 = vpop.eup %11819 }
0x1c81   : > { %v9007_v55 = vsel %vm9000_vm6, %v11820_v15, 0.0 }
0x1c82   : > { %9008 = vadd.xlane.f32.xlu1 %v9007_v55 }
0x1d0f   : > { %v9009_v43 = vpop.xlane.xlu1 %9008 }
0x1d10   : > { %11821 = vrcp.f32 %v9009_v43 }
0x1d1a   : > { %v11822_v61 = vpop.eup %11821 }
0x1d1b   : > { %v9011_v4 = vmul.f32 %v11822_v61, %v11820_v15 }
0x1d1d   : > { %9012 = vst.msk [vmem:[#allocation15] sm:$0x3] %vm9000_vm6, %v9011_v4 }
0x1d1e PF: > { %p10493_p4 = scmp.eq.s32.totalorder %s12295_s20, 2  ;;  %s12107_s23 = smov [#allocation15]  }
0x1d1f   : > { %s9022_s29 = sshll.u32 %s12107_s23, 4  ;;  %s9023_s29 = int_to_ptr.vmem [resolvable:$true] %s9022_s29 }
0x1d20   : > { %s11999_s22 = scalar_lea.vmem %s9023_s29, 32  ;;  %p12006_p1 = scmp.lt.s32.totalorder %s9023_s29, %s9023_s29 }
0x1d21   : > { %p12000_p2 = scmp.ne.s32.totalorder %s9023_s29, %s11999_s22  ;;  %p12007_p8 = scmp.lt.s32.totalorder %s11999_s22, %s11999_s22 }
0x1d23   : > { %p12001_p5 = pnand %p12000_p2, %p10493_p4  ;;  %p12008_p11 = por %p12007_p8, %p12006_p1 }
0x1d25   : > { %p12002_p10 = pneg %p12001_p5 }
0x1d27   : > { %p12009_p12 = pnand %p12008_p11, %p12002_p10 }
0x1d29   : > { %12012 = shalt.err (!%p12009_p12)
}
0x1d2a   : > { %s14096_s25 = sld [smem:[#allocation31_spill]] }
0x1d30   : > { %s12013_s13 = scalar_lea.hbm %s14096_s25, 32 }
0x1d31   : > { %p12014_p3 = scmp.ne.s32.totalorder %s14096_s25, %s12013_s13  ;;  %p12019_p13 = scmp.lt.u32.totalorder %s12013_s13, %s14096_s25 }
0x1d33   : > { %p12015_p6 = pnand %p12014_p3, %p10493_p4 }
0x1d35   : > { %p12016_p7 = pneg %p12015_p6 }
0x1d37   : > { %p12021_p9 = pnand %p12019_p13, %p12016_p7 }
0x1d39   : > { %12024 = shalt.err (!%p12021_p9)
}
0x1d3a   : > { %10465 = dma.vmem_to_hbm [thread:$0]  (%p10493_p4), %s9023_s29, 32, %s14096_s25, [#allocation6]  }
0x1d3b   : > { %12066 = dma.done.wait (%p10493_p4), [#allocation6], 32  }
0x1d3c   : > { %12068 = vsyncadd (%p10493_p4), [#allocation6], 4294967264 }
0x1d3d PF: > { %s14097_s2 = sld [smem:[#allocation23_spill]]  ;;  %s14098_s9 = sld [smem:[#allocation21_spill]] }
0x1d3e   : > { %s14099_s11 = sld [smem:[#allocation25_spill]]  ;;  %s14100_s12 = sld [smem:[#allocation22_spill]] }
0x1d3f   : > { %s14101_s13 = sld [smem:[#allocation24_spill]]  ;;  %s14102_s30 = smov %s12075_s10 }
0x1d43   : > { %s28_s14 = sadd.s32 1, %s14097_s2   ;;  %s14103_s10 = smov %s14098_s9 }
0x1d44   : > { %p25_p0 = scmp.ge.s32.totalorder %s28_s14, 5  }
0x1d46   :  { %27 = sbr.rel (!%p25_p0) target bundleno = 16 (0x10), region = 163 }
0x1d4d   :  { %9035 = vsyncpa [#allocation5], 1 }
0x1d4e   :  { %9037 = vsyncpa [#allocation5 + $0x1], 1 }
0x1d4f   :  { %9038 = vsyncpa [#allocation8], 1 }
0x1d50   :  { %9040 = vsyncpa [#allocation8 + $0x1], 1 }
0x1d51   :  { %9041 = vsyncpa [#allocation11], 1 }
0x1d52   :  { %9043 = vsyncpa [#allocation11 + $0x1], 1 }
0x1d53   :  { %9044 = vsyncpa [#allocation14], 1 }
0x1d54   :  { %9045 = vsyncpa [#allocation6], 1 }
0x1d55   :  { %9047 = vsyncpa [#allocation6 + $0x1], 1 }

</bundles_post_ra>
